<compile_context>
chip_gen: v7x
topology: tpu7x:2x2x1
jax: 0.10.0
libtpu: 0.0.40
codegen_flags: <defaults>
</compile_context>

<pallas_src>
import jax
import jax.numpy as jnp
from jax.experimental import pallas as pl
from jax.experimental.pallas import tpu as pltpu


# ----------------------------------------------------------------------------
# helpers
# ----------------------------------------------------------------------------
def _round_up(x, m):
    return (x + m - 1) // m * m


def _cdiv(a, b):
    return -(-a // b)


def _vmem_limit_bytes():
    """Generation-aware scoped-VMEM limit (~64-96MiB on 128MiB parts, <=48MiB on v7x)."""
    try:
        cap = pltpu.get_tpu_info().vmem_capacity_bytes
        return int(min(cap * 3 // 4, 96 * 1024 * 1024))
    except Exception:
        return 48 * 1024 * 1024


def _pick_dt(D, HW, target=256, cap=4096):
    """Smallest divisor of D whose depth block yields >= target matmul rows (<= cap)."""
    best = 1
    for d in range(1, D + 1):
        if D % d:
            continue
        if d * HW <= cap:
            best = d
        if d * HW >= target:
            break
    return best


def _pick_tc(M):
    """LSTM chunk length: a bounded divisor of the conv block row count (never M itself)."""
    for cand in (128, 64, 32, 16, 8):
        if M % cand == 0:
            return cand
    return 8  # unreachable when H*W % 8 == 0 (asserted in the wrapper)


# ----------------------------------------------------------------------------
# Kernel 1: fused Conv3d + (folded) LSTM input-gate projection.
#   grid = (B, n_dblocks). The full halo-padded slab of one batch element stays
#   resident in VMEM across the depth axis (index_map ignores d -> single DMA).
#   Each step builds a (Dt*H*W, Kp) bf16 patch matrix directly in (M, K) layout
#   (channels-last input => no transpose) and does one MXU matmul -> gate
#   pre-activations for Dt depth slices.
# ----------------------------------------------------------------------------
def _conv_gates_kernel(x_ref, w_ref, b_ref, gx_ref):
    # x_ref : (D+2, H+2, W+2, Cin) bf16 (batch squeezed, resident across d)
    # w_ref : (Kp, 4Hp) bf16, b_ref: (1, 4Hp) f32
    # gx_ref: (M=Dt*H*W, 4Hp) bf16
    _, hp2, wp2, cin = x_ref.shape
    H, W = hp2 - 2, wp2 - 2
    M = gx_ref.shape[0]
    Dt = M // (H * W)
    Kp = w_ref.shape[0]
    base = pl.program_id(1) * Dt

    pieces = []
    for kd in range(3):
        for kh in range(3):
            for kw in range(3):
                p = x_ref[pl.ds(base + kd, Dt), kh:kh + H, kw:kw + W, :]  # (Dt,H,W,Cin)
                pieces.append(p.reshape(M, cin))
    k27 = 27 * cin
    if Kp > k27:                                   # zero-pad K up to 128 (MXU-friendly)
        pieces.append(jnp.zeros((M, Kp - k27), jnp.bfloat16))
    patches = jnp.concatenate(pieces, axis=1)      # (M, Kp) bf16, columns (kd,kh,kw,cin)

    gx = jnp.dot(patches, w_ref[...], preferred_element_type=jnp.float32) + b_ref[...]
    gx_ref[...] = gx.astype(gx_ref.dtype)


def conv_gates(xb, w_gates, b_gates, Dt, n_dblocks):
    """xb: (B, D+2, H+2, W+2, Cin) bf16 halo-padded channels-last input.
    Returns gx: (B, n_dblocks*Dt*H*W, 4Hp) bf16 gate pre-activations (input side)."""
    B, Dp2, Hp2, Wp2, Cin = xb.shape
    H, W = Hp2 - 2, Wp2 - 2
    M = Dt * H * W
    Kp, fourHp = w_gates.shape
    return pl.pallas_call(
        _conv_gates_kernel,
        out_shape=jax.ShapeDtypeStruct((B, n_dblocks * M, fourHp), jnp.bfloat16),
        grid=(B, n_dblocks),
        in_specs=[
            # full per-batch slab; index_map ignores d -> DMA'd once per batch element
            pl.BlockSpec((None, Dp2, Hp2, Wp2, Cin), lambda b, d: (b, 0, 0, 0, 0)),
            pl.BlockSpec((Kp, fourHp), lambda b, d: (0, 0)),
            pl.BlockSpec((1, fourHp), lambda b, d: (0, 0)),
        ],
        out_specs=pl.BlockSpec((None, M, fourHp), lambda b, d: (b, d, 0)),
        compiler_params=pltpu.CompilerParams(
            dimension_semantics=("parallel", "arbitrary"),
            vmem_limit_bytes=_vmem_limit_bytes()),
    )(xb, w_gates, b_gates)


# ----------------------------------------------------------------------------
# Kernel 2: LSTM recurrence (chunked over time) with the output projection +
#   log_softmax FUSED into the per-chunk epilogue (hs never leaves VMEM).
#   grid = (G batch groups [parallel], n_chunks [arbitrary]); h/c carried in
#   VMEM scratch across chunks; gates packed (i, f, o, g) -> one sigmoid + one tanh.
# ----------------------------------------------------------------------------
def _lstm_proj_kernel(gx_ref, whh_ref, wout_ref, bout_ref, out_ref,
                      h_scr, c_scr, hs_scr):
    @pl.when(pl.program_id(1) == 0)
    def _():
        h_scr[...] = jnp.zeros_like(h_scr)
        c_scr[...] = jnp.zeros_like(c_scr)

    Bg, Tc, fourHp = gx_ref.shape
    Hp = fourHp // 4
    Vp = out_ref.shape[-1]
    whh = whh_ref[...]                                         # (Hp, 4Hp) bf16

    def step(i, carry):
        h, c = carry
        g = gx_ref[:, i, :].astype(jnp.float32) + jnp.dot(
            h.astype(jnp.bfloat16), whh, preferred_element_type=jnp.float32)
        sg = jax.nn.sigmoid(g[:, :3 * Hp])                     # gates packed (i, f, o, g)
        i_g = sg[:, 0 * Hp:1 * Hp]
        f_g = sg[:, 1 * Hp:2 * Hp]
        o_g = sg[:, 2 * Hp:3 * Hp]
        g_g = jnp.tanh(g[:, 3 * Hp:])
        c = f_g * c + i_g * g_g
        h = o_g * jnp.tanh(c)
        hs_scr[:, i, :] = h.astype(jnp.bfloat16)
        return h, c

    h, c = jax.lax.fori_loop(0, Tc, step, (h_scr[...], c_scr[...]), unroll=8)
    h_scr[...] = h
    c_scr[...] = c

    # fused projection + log_softmax epilogue for this chunk (M = Bg*Tc rows)
    # TODO(synk): for a large vocab, tile over Vp with an online logsumexp (v7x VMEM).
    hs = hs_scr[...].reshape(Bg * Tc, Hp)
    logits = jnp.dot(hs, wout_ref[...],
                     preferred_element_type=jnp.float32) + bout_ref[...]
    m = jnp.max(logits, axis=-1, keepdims=True)
    z = logits - m
    lse = jnp.log(jnp.sum(jnp.exp(z), axis=-1, keepdims=True))
    out_ref[...] = (z - lse).reshape(Bg, Tc, Vp)


def lstm_proj(gx, w_hh, w_out, b_out, Tc, n_chunks, G):
    """gx: (B, T_gx, 4Hp) bf16 -> log-probs (B, n_chunks*Tc, Vp) f32."""
    B, _, fourHp = gx.shape
    Hp = fourHp // 4
    Vp = w_out.shape[1]
    Bg = B // G
    T_out = n_chunks * Tc
    return pl.pallas_call(
        _lstm_proj_kernel,
        out_shape=jax.ShapeDtypeStruct((B, T_out, Vp), jnp.float32),
        grid=(G, n_chunks),
        in_specs=[
            pl.BlockSpec((Bg, Tc, fourHp), lambda g, t: (g, t, 0)),
            pl.BlockSpec((Hp, fourHp), lambda g, t: (0, 0)),
            pl.BlockSpec((Hp, Vp), lambda g, t: (0, 0)),
            pl.BlockSpec((1, Vp), lambda g, t: (0, 0)),
        ],
        out_specs=pl.BlockSpec((Bg, Tc, Vp), lambda g, t: (g, t, 0)),
        scratch_shapes=[pltpu.VMEM((Bg, Hp), jnp.float32),
                        pltpu.VMEM((Bg, Hp), jnp.float32),
                        pltpu.VMEM((Bg, Tc, Hp), jnp.bfloat16)],
        compiler_params=pltpu.CompilerParams(
            dimension_semantics=("parallel", "arbitrary"),
            vmem_limit_bytes=_vmem_limit_bytes()),
    )(gx, w_hh, w_out, b_out)


# ----------------------------------------------------------------------------
# Parameters: PyTorch-layout weights + one-time fold / reorder / pad / cast.
# ----------------------------------------------------------------------------
def init_params(key, cin, cout, hid, vocab, k=3):
    ks = jax.random.split(key, 8)
    s = 0.1
    return {
        "conv_w": s * jax.random.normal(ks[0], (cout, cin, k, k, k), jnp.float32),
        "conv_b": s * jax.random.normal(ks[1], (cout,), jnp.float32),
        "w_ih": s * jax.random.normal(ks[2], (4 * hid, cout), jnp.float32),
        "w_hh": s * jax.random.normal(ks[3], (4 * hid, hid), jnp.float32),
        "b_ih": s * jax.random.normal(ks[4], (4 * hid,), jnp.float32),
        "b_hh": s * jax.random.normal(ks[5], (4 * hid,), jnp.float32),
        "w_out": s * jax.random.normal(ks[6], (vocab, hid), jnp.float32),
        "b_out": s * jax.random.normal(ks[7], (vocab,), jnp.float32),
    }


def prepare_params(params):
    """Fold conv->LSTM-input matmuls, reorder gates to (i,f,o,g), lane-pad, cast bf16."""
    conv_w = params["conv_w"]                             # (Cout, Cin, 3,3,3)
    Cout, Cin = conv_w.shape[:2]
    Hh = params["w_hh"].shape[1]                          # hidden size
    V = params["w_out"].shape[0]                          # vocab size
    Hp = _round_up(Hh, 128)
    Vp = _round_up(V, 128)
    K27 = 27 * Cin
    Kp = _round_up(K27, 128)

    # Patch columns are ordered (kd, kh, kw, cin) in the conv kernel.
    conv_w_kc = conv_w.transpose(2, 3, 4, 1, 0).reshape(K27, Cout)
    w_comb = conv_w_kc @ params["w_ih"].T                 # (K27, 4H) exact fold, gates [i f g o]
    b_comb = params["conv_b"] @ params["w_ih"].T + params["b_ih"] + params["b_hh"]
    whhT = params["w_hh"].T                               # (H, 4H), gates [i f g o]

    # Repack gate lanes as (i, f, o, g), each lane-padded to Hp; K zero-padded to Kp.
    order = (0, 1, 3, 2)                                  # new position -> PyTorch gate idx
    w_gates = jnp.zeros((Kp, 4 * Hp), jnp.float32)
    b_gates = jnp.zeros((4 * Hp,), jnp.float32)
    w_hh_p = jnp.zeros((Hp, 4 * Hp), jnp.float32)
    for new_g, old_g in enumerate(order):
        dst = slice(new_g * Hp, new_g * Hp + Hh)
        src = slice(old_g * Hh, (old_g + 1) * Hh)
        w_gates = w_gates.at[:K27, dst].set(w_comb[:, src])
        b_gates = b_gates.at[dst].set(b_comb[src])
        w_hh_p = w_hh_p.at[:Hh, dst].set(whhT[:, src])

    w_out_p = jnp.zeros((Hp, Vp), jnp.float32).at[:Hh, :V].set(params["w_out"].T)
    # padded vocab lanes get a huge negative bias (kept in f32!) so they vanish in log_softmax
    b_out_p = jnp.full((Vp,), -1e30, jnp.float32).at[:V].set(params["b_out"])

    return {
        "w_gates": w_gates.astype(jnp.bfloat16),
        "b_gates": b_gates.reshape(1, 4 * Hp),            # f32
        "w_hh": w_hh_p.astype(jnp.bfloat16),
        "w_out": w_out_p.astype(jnp.bfloat16),
        "b_out": b_out_p.reshape(1, Vp),                   # f32
        "Hp": Hp, "Vp": Vp, "V": V,
    }


# ----------------------------------------------------------------------------
# Forward pass (matches VideoProcessingModel.forward semantics)
# ----------------------------------------------------------------------------
def video_processing_forward(prep, x, target_length):
    B, Cin, D, H, W = x.shape
    HW = H * W
    S = D * HW
    L = int(target_length)
    assert 0 < L <= S, "target_length must be in (0, D*H*W]"
    assert HW % 8 == 0, "H*W must be a multiple of 8 for the depth-block tiling"

    V = prep["V"]

    # bf16 + spatial halo pad (padding=1) + channels-last: (B, D+2, H+2, W+2, Cin).
    # One cheap relayout of the (small) raw input removes every in-kernel transpose.
    xb = jnp.pad(x.astype(jnp.bfloat16),
                 ((0, 0), (0, 0), (1, 1), (1, 1), (1, 1)))
    xb = xb.transpose(0, 2, 3, 4, 1)

    # Conv depth block (>=256 matmul rows where possible); only the depth blocks whose
    # timesteps are actually used (t < target_length) are ever produced.
    Dt = _pick_dt(D, HW)
    M_conv = Dt * HW
    n_dblocks = _cdiv(L, M_conv)
    gx = conv_gates(xb, prep["w_gates"], prep["b_gates"], Dt, n_dblocks)  # (B, T_gx, 4Hp)

    # Chunked LSTM + fused projection/log_softmax; only ceil(L/Tc) chunks are run
    # (causal recurrence => identical to running the full sequence and truncating).
    Tc = _pick_tc(M_conv)                      # divides M_conv => chunks never exceed T_gx
    n_chunks = _cdiv(L, Tc)
    G = 2 if (B % 2 == 0 and B >= 2) else 1    # batch groups -> v7x megacore parallelism
    logp = lstm_proj(gx, prep["w_hh"], prep["w_out"], prep["b_out"],
                     Tc, n_chunks, G)          # (B, n_chunks*Tc, Vp) f32

    return logp[:, :L, :V]


# ----------------------------------------------------------------------------
# Pure-JAX f32 reference (same stand-in semantics) for a numerical self-check.
# ----------------------------------------------------------------------------
def reference_forward(params, x, L):
    feats = jax.lax.conv_general_dilated(
        x, params["conv_w"], window_strides=(1, 1, 1),
        padding=((1, 1), (1, 1), (1, 1)),
        dimension_numbers=("NCDHW", "OIDHW", "NCDHW"))
    feats = feats + params["conv_b"][None, :, None, None, None]
    B, C, D, H, W = feats.shape
    seq = feats.reshape(B, C, D * H * W).transpose(0, 2, 1)     # (B, S, C)
    Hh = params["w_hh"].shape[1]

    def step(carry, xt):
        h, c = carry
        g = xt @ params["w_ih"].T + h @ params["w_hh"].T + params["b_ih"] + params["b_hh"]
        i = jax.nn.sigmoid(g[:, :Hh])
        f = jax.nn.sigmoid(g[:, Hh:2 * Hh])
        gg = jnp.tanh(g[:, 2 * Hh:3 * Hh])
        o = jax.nn.sigmoid(g[:, 3 * Hh:])
        c = f * c + i * gg
        h = o * jnp.tanh(c)
        return (h, c), h

    h0 = jnp.zeros((B, Hh), jnp.float32)
    _, hs = jax.lax.scan(step, (h0, jnp.zeros_like(h0)), seq.transpose(1, 0, 2))
    hs = hs.transpose(1, 0, 2)[:, :L]                            # (B, L, H)
    logits = hs @ params["w_out"].T + params["b_out"]
    return jax.nn.log_softmax(logits, axis=-1)


# ----------------------------------------------------------------------------
if __name__ == "__main__":
    key = jax.random.PRNGKey(0)
    k_x, k_p = jax.random.split(key)

    B, Cin, D, H, W = 2, 3, 4, 8, 8          # seq S = D*H*W = 256
    COUT, HID, VOCAB = 16, 32, 28
    TARGET_LEN = 192                          # < S: exercises early truncation

    x = jax.random.normal(k_x, (B, Cin, D, H, W), jnp.float32)
    params = init_params(k_p, Cin, COUT, HID, VOCAB)
    prep = prepare_params(params)

    out = video_processing_forward(prep, x, TARGET_LEN)
    jax.block_until_ready(out)

    assert out.shape == (B, TARGET_LEN, VOCAB), out.shape
    assert bool(jnp.all(jnp.isfinite(out))), "non-finite output"
    # log_softmax rows must (approximately) normalize to 1
    row_sums = jnp.sum(jnp.exp(out), axis=-1)
    assert bool(jnp.all(jnp.abs(row_sums - 1.0) < 1e-3)), "log_softmax not normalized"
    # numerical check against the f32 reference (bf16 storage/operands => loose tol)
    ref = reference_forward(params, x, TARGET_LEN)
    max_diff = float(jnp.max(jnp.abs(out - ref)))
    assert max_diff < 0.1, f"mismatch vs reference: max|diff|={max_diff}"
    print("KERNEL_OK")
</pallas_src>

<mosaic_0001>
module attributes {stable_mosaic.version = 11 : i64} {
  func.func @_conv_gates_kernel(%arg0: i32, %arg1: i32, %arg2: memref<1x6x10x10x3xbf16, #tpu.memory_space<vmem>>, %arg3: memref<128x512xbf16, #tpu.memory_space<vmem>>, %arg4: memref<1x512xf32, #tpu.memory_space<vmem>>, %arg5: memref<1x256x512xbf16, #tpu.memory_space<vmem>>) attributes {dimension_semantics = [#tpu.dimension_semantics<parallel>, #tpu.dimension_semantics<arbitrary>], iteration_bounds = array<i64: 2, 1>, scalar_prefetch = 0 : i64, scratch_operands = 0 : i64, tpu.core_type = #tpu.core_type<tc>, window_params = [{transform_indices = @transform_0, window_bounds = array<i64: 1, 6, 10, 10, 3>}, {pipeline_mode = #tpu.pipeline_mode<synchronous>, transform_indices = @transform_1, window_bounds = array<i64: 128, 512>}, {pipeline_mode = #tpu.pipeline_mode<synchronous>, transform_indices = @transform_2, window_bounds = array<i64: 1, 512>}, {transform_indices = @transform_3, window_bounds = array<i64: 1, 256, 512>}]} {
    %c4_i32 = arith.constant 4 : i32
    %0 = arith.muli %arg1, %c4_i32 : i32
    %c0_i32 = arith.constant 0 : i32
    %1 = arith.addi %0, %c0_i32 : i32
    %c0 = arith.constant 0 : index
    %2 = arith.index_cast %1 : i32 to index
    %c0_0 = arith.constant 0 : index
    %c0_1 = arith.constant 0 : index
    %c0_2 = arith.constant 0 : index
    %3 = vector.load %arg2[%c0, %2, %c0_0, %c0_1, %c0_2] : memref<1x6x10x10x3xbf16, #tpu.memory_space<vmem>>, vector<1x4x8x8x3xbf16>
    %4 = vector.shape_cast %3 : vector<1x4x8x8x3xbf16> to vector<4x8x8x3xbf16>
    %5 = vector.shape_cast %4 : vector<4x8x8x3xbf16> to vector<256x3xbf16>
    %c0_i32_3 = arith.constant 0 : i32
    %6 = arith.addi %0, %c0_i32_3 : i32
    %c0_4 = arith.constant 0 : index
    %7 = arith.index_cast %6 : i32 to index
    %c0_5 = arith.constant 0 : index
    %c1 = arith.constant 1 : index
    %c0_6 = arith.constant 0 : index
    %8 = vector.load %arg2[%c0_4, %7, %c0_5, %c1, %c0_6] : memref<1x6x10x10x3xbf16, #tpu.memory_space<vmem>>, vector<1x4x8x8x3xbf16>
    %9 = vector.shape_cast %8 : vector<1x4x8x8x3xbf16> to vector<4x8x8x3xbf16>
    %10 = vector.shape_cast %9 : vector<4x8x8x3xbf16> to vector<256x3xbf16>
    %c0_i32_7 = arith.constant 0 : i32
    %11 = arith.addi %0, %c0_i32_7 : i32
    %c0_8 = arith.constant 0 : index
    %12 = arith.index_cast %11 : i32 to index
    %c0_9 = arith.constant 0 : index
    %c2 = arith.constant 2 : index
    %c0_10 = arith.constant 0 : index
    %13 = vector.load %arg2[%c0_8, %12, %c0_9, %c2, %c0_10] : memref<1x6x10x10x3xbf16, #tpu.memory_space<vmem>>, vector<1x4x8x8x3xbf16>
    %14 = vector.shape_cast %13 : vector<1x4x8x8x3xbf16> to vector<4x8x8x3xbf16>
    %15 = vector.shape_cast %14 : vector<4x8x8x3xbf16> to vector<256x3xbf16>
    %c0_i32_11 = arith.constant 0 : i32
    %16 = arith.addi %0, %c0_i32_11 : i32
    %c0_12 = arith.constant 0 : index
    %17 = arith.index_cast %16 : i32 to index
    %c1_13 = arith.constant 1 : index
    %c0_14 = arith.constant 0 : index
    %c0_15 = arith.constant 0 : index
    %18 = vector.load %arg2[%c0_12, %17, %c1_13, %c0_14, %c0_15] : memref<1x6x10x10x3xbf16, #tpu.memory_space<vmem>>, vector<1x4x8x8x3xbf16>
    %19 = vector.shape_cast %18 : vector<1x4x8x8x3xbf16> to vector<4x8x8x3xbf16>
    %20 = vector.shape_cast %19 : vector<4x8x8x3xbf16> to vector<256x3xbf16>
    %c0_i32_16 = arith.constant 0 : i32
    %21 = arith.addi %0, %c0_i32_16 : i32
    %c0_17 = arith.constant 0 : index
    %22 = arith.index_cast %21 : i32 to index
    %c1_18 = arith.constant 1 : index
    %c1_19 = arith.constant 1 : index
    %c0_20 = arith.constant 0 : index
    %23 = vector.load %arg2[%c0_17, %22, %c1_18, %c1_19, %c0_20] : memref<1x6x10x10x3xbf16, #tpu.memory_space<vmem>>, vector<1x4x8x8x3xbf16>
    %24 = vector.shape_cast %23 : vector<1x4x8x8x3xbf16> to vector<4x8x8x3xbf16>
    %25 = vector.shape_cast %24 : vector<4x8x8x3xbf16> to vector<256x3xbf16>
    %c0_i32_21 = arith.constant 0 : i32
    %26 = arith.addi %0, %c0_i32_21 : i32
    %c0_22 = arith.constant 0 : index
    %27 = arith.index_cast %26 : i32 to index
    %c1_23 = arith.constant 1 : index
    %c2_24 = arith.constant 2 : index
    %c0_25 = arith.constant 0 : index
    %28 = vector.load %arg2[%c0_22, %27, %c1_23, %c2_24, %c0_25] : memref<1x6x10x10x3xbf16, #tpu.memory_space<vmem>>, vector<1x4x8x8x3xbf16>
    %29 = vector.shape_cast %28 : vector<1x4x8x8x3xbf16> to vector<4x8x8x3xbf16>
    %30 = vector.shape_cast %29 : vector<4x8x8x3xbf16> to vector<256x3xbf16>
    %c0_i32_26 = arith.constant 0 : i32
    %31 = arith.addi %0, %c0_i32_26 : i32
    %c0_27 = arith.constant 0 : index
    %32 = arith.index_cast %31 : i32 to index
    %c2_28 = arith.constant 2 : index
    %c0_29 = arith.constant 0 : index
    %c0_30 = arith.constant 0 : index
    %33 = vector.load %arg2[%c0_27, %32, %c2_28, %c0_29, %c0_30] : memref<1x6x10x10x3xbf16, #tpu.memory_space<vmem>>, vector<1x4x8x8x3xbf16>
    %34 = vector.shape_cast %33 : vector<1x4x8x8x3xbf16> to vector<4x8x8x3xbf16>
    %35 = vector.shape_cast %34 : vector<4x8x8x3xbf16> to vector<256x3xbf16>
    %c0_i32_31 = arith.constant 0 : i32
    %36 = arith.addi %0, %c0_i32_31 : i32
    %c0_32 = arith.constant 0 : index
    %37 = arith.index_cast %36 : i32 to index
    %c2_33 = arith.constant 2 : index
    %c1_34 = arith.constant 1 : index
    %c0_35 = arith.constant 0 : index
    %38 = vector.load %arg2[%c0_32, %37, %c2_33, %c1_34, %c0_35] : memref<1x6x10x10x3xbf16, #tpu.memory_space<vmem>>, vector<1x4x8x8x3xbf16>
    %39 = vector.shape_cast %38 : vector<1x4x8x8x3xbf16> to vector<4x8x8x3xbf16>
    %40 = vector.shape_cast %39 : vector<4x8x8x3xbf16> to vector<256x3xbf16>
    %c0_i32_36 = arith.constant 0 : i32
    %41 = arith.addi %0, %c0_i32_36 : i32
    %c0_37 = arith.constant 0 : index
    %42 = arith.index_cast %41 : i32 to index
    %c2_38 = arith.constant 2 : index
    %c2_39 = arith.constant 2 : index
    %c0_40 = arith.constant 0 : index
    %43 = vector.load %arg2[%c0_37, %42, %c2_38, %c2_39, %c0_40] : memref<1x6x10x10x3xbf16, #tpu.memory_space<vmem>>, vector<1x4x8x8x3xbf16>
    %44 = vector.shape_cast %43 : vector<1x4x8x8x3xbf16> to vector<4x8x8x3xbf16>
    %45 = vector.shape_cast %44 : vector<4x8x8x3xbf16> to vector<256x3xbf16>
    %c1_i32 = arith.constant 1 : i32
    %46 = arith.addi %0, %c1_i32 : i32
    %c0_41 = arith.constant 0 : index
    %47 = arith.index_cast %46 : i32 to index
    %c0_42 = arith.constant 0 : index
    %c0_43 = arith.constant 0 : index
    %c0_44 = arith.constant 0 : index
    %48 = vector.load %arg2[%c0_41, %47, %c0_42, %c0_43, %c0_44] : memref<1x6x10x10x3xbf16, #tpu.memory_space<vmem>>, vector<1x4x8x8x3xbf16>
    %49 = vector.shape_cast %48 : vector<1x4x8x8x3xbf16> to vector<4x8x8x3xbf16>
    %50 = vector.shape_cast %49 : vector<4x8x8x3xbf16> to vector<256x3xbf16>
    %c1_i32_45 = arith.constant 1 : i32
    %51 = arith.addi %0, %c1_i32_45 : i32
    %c0_46 = arith.constant 0 : index
    %52 = arith.index_cast %51 : i32 to index
    %c0_47 = arith.constant 0 : index
    %c1_48 = arith.constant 1 : index
    %c0_49 = arith.constant 0 : index
    %53 = vector.load %arg2[%c0_46, %52, %c0_47, %c1_48, %c0_49] : memref<1x6x10x10x3xbf16, #tpu.memory_space<vmem>>, vector<1x4x8x8x3xbf16>
    %54 = vector.shape_cast %53 : vector<1x4x8x8x3xbf16> to vector<4x8x8x3xbf16>
    %55 = vector.shape_cast %54 : vector<4x8x8x3xbf16> to vector<256x3xbf16>
    %c1_i32_50 = arith.constant 1 : i32
    %56 = arith.addi %0, %c1_i32_50 : i32
    %c0_51 = arith.constant 0 : index
    %57 = arith.index_cast %56 : i32 to index
    %c0_52 = arith.constant 0 : index
    %c2_53 = arith.constant 2 : index
    %c0_54 = arith.constant 0 : index
    %58 = vector.load %arg2[%c0_51, %57, %c0_52, %c2_53, %c0_54] : memref<1x6x10x10x3xbf16, #tpu.memory_space<vmem>>, vector<1x4x8x8x3xbf16>
    %59 = vector.shape_cast %58 : vector<1x4x8x8x3xbf16> to vector<4x8x8x3xbf16>
    %60 = vector.shape_cast %59 : vector<4x8x8x3xbf16> to vector<256x3xbf16>
    %c1_i32_55 = arith.constant 1 : i32
    %61 = arith.addi %0, %c1_i32_55 : i32
    %c0_56 = arith.constant 0 : index
    %62 = arith.index_cast %61 : i32 to index
    %c1_57 = arith.constant 1 : index
    %c0_58 = arith.constant 0 : index
    %c0_59 = arith.constant 0 : index
    %63 = vector.load %arg2[%c0_56, %62, %c1_57, %c0_58, %c0_59] : memref<1x6x10x10x3xbf16, #tpu.memory_space<vmem>>, vector<1x4x8x8x3xbf16>
    %64 = vector.shape_cast %63 : vector<1x4x8x8x3xbf16> to vector<4x8x8x3xbf16>
    %65 = vector.shape_cast %64 : vector<4x8x8x3xbf16> to vector<256x3xbf16>
    %c1_i32_60 = arith.constant 1 : i32
    %66 = arith.addi %0, %c1_i32_60 : i32
    %c0_61 = arith.constant 0 : index
    %67 = arith.index_cast %66 : i32 to index
    %c1_62 = arith.constant 1 : index
    %c1_63 = arith.constant 1 : index
    %c0_64 = arith.constant 0 : index
    %68 = vector.load %arg2[%c0_61, %67, %c1_62, %c1_63, %c0_64] : memref<1x6x10x10x3xbf16, #tpu.memory_space<vmem>>, vector<1x4x8x8x3xbf16>
    %69 = vector.shape_cast %68 : vector<1x4x8x8x3xbf16> to vector<4x8x8x3xbf16>
    %70 = vector.shape_cast %69 : vector<4x8x8x3xbf16> to vector<256x3xbf16>
    %c1_i32_65 = arith.constant 1 : i32
    %71 = arith.addi %0, %c1_i32_65 : i32
    %c0_66 = arith.constant 0 : index
    %72 = arith.index_cast %71 : i32 to index
    %c1_67 = arith.constant 1 : index
    %c2_68 = arith.constant 2 : index
    %c0_69 = arith.constant 0 : index
    %73 = vector.load %arg2[%c0_66, %72, %c1_67, %c2_68, %c0_69] : memref<1x6x10x10x3xbf16, #tpu.memory_space<vmem>>, vector<1x4x8x8x3xbf16>
    %74 = vector.shape_cast %73 : vector<1x4x8x8x3xbf16> to vector<4x8x8x3xbf16>
    %75 = vector.shape_cast %74 : vector<4x8x8x3xbf16> to vector<256x3xbf16>
    %c1_i32_70 = arith.constant 1 : i32
    %76 = arith.addi %0, %c1_i32_70 : i32
    %c0_71 = arith.constant 0 : index
    %77 = arith.index_cast %76 : i32 to index
    %c2_72 = arith.constant 2 : index
    %c0_73 = arith.constant 0 : index
    %c0_74 = arith.constant 0 : index
    %78 = vector.load %arg2[%c0_71, %77, %c2_72, %c0_73, %c0_74] : memref<1x6x10x10x3xbf16, #tpu.memory_space<vmem>>, vector<1x4x8x8x3xbf16>
    %79 = vector.shape_cast %78 : vector<1x4x8x8x3xbf16> to vector<4x8x8x3xbf16>
    %80 = vector.shape_cast %79 : vector<4x8x8x3xbf16> to vector<256x3xbf16>
    %c1_i32_75 = arith.constant 1 : i32
    %81 = arith.addi %0, %c1_i32_75 : i32
    %c0_76 = arith.constant 0 : index
    %82 = arith.index_cast %81 : i32 to index
    %c2_77 = arith.constant 2 : index
    %c1_78 = arith.constant 1 : index
    %c0_79 = arith.constant 0 : index
    %83 = vector.load %arg2[%c0_76, %82, %c2_77, %c1_78, %c0_79] : memref<1x6x10x10x3xbf16, #tpu.memory_space<vmem>>, vector<1x4x8x8x3xbf16>
    %84 = vector.shape_cast %83 : vector<1x4x8x8x3xbf16> to vector<4x8x8x3xbf16>
    %85 = vector.shape_cast %84 : vector<4x8x8x3xbf16> to vector<256x3xbf16>
    %c1_i32_80 = arith.constant 1 : i32
    %86 = arith.addi %0, %c1_i32_80 : i32
    %c0_81 = arith.constant 0 : index
    %87 = arith.index_cast %86 : i32 to index
    %c2_82 = arith.constant 2 : index
    %c2_83 = arith.constant 2 : index
    %c0_84 = arith.constant 0 : index
    %88 = vector.load %arg2[%c0_81, %87, %c2_82, %c2_83, %c0_84] : memref<1x6x10x10x3xbf16, #tpu.memory_space<vmem>>, vector<1x4x8x8x3xbf16>
    %89 = vector.shape_cast %88 : vector<1x4x8x8x3xbf16> to vector<4x8x8x3xbf16>
    %90 = vector.shape_cast %89 : vector<4x8x8x3xbf16> to vector<256x3xbf16>
    %c2_i32 = arith.constant 2 : i32
    %91 = arith.addi %0, %c2_i32 : i32
    %c0_85 = arith.constant 0 : index
    %92 = arith.index_cast %91 : i32 to index
    %c0_86 = arith.constant 0 : index
    %c0_87 = arith.constant 0 : index
    %c0_88 = arith.constant 0 : index
    %93 = vector.load %arg2[%c0_85, %92, %c0_86, %c0_87, %c0_88] : memref<1x6x10x10x3xbf16, #tpu.memory_space<vmem>>, vector<1x4x8x8x3xbf16>
    %94 = vector.shape_cast %93 : vector<1x4x8x8x3xbf16> to vector<4x8x8x3xbf16>
    %95 = vector.shape_cast %94 : vector<4x8x8x3xbf16> to vector<256x3xbf16>
    %c2_i32_89 = arith.constant 2 : i32
    %96 = arith.addi %0, %c2_i32_89 : i32
    %c0_90 = arith.constant 0 : index
    %97 = arith.index_cast %96 : i32 to index
    %c0_91 = arith.constant 0 : index
    %c1_92 = arith.constant 1 : index
    %c0_93 = arith.constant 0 : index
    %98 = vector.load %arg2[%c0_90, %97, %c0_91, %c1_92, %c0_93] : memref<1x6x10x10x3xbf16, #tpu.memory_space<vmem>>, vector<1x4x8x8x3xbf16>
    %99 = vector.shape_cast %98 : vector<1x4x8x8x3xbf16> to vector<4x8x8x3xbf16>
    %100 = vector.shape_cast %99 : vector<4x8x8x3xbf16> to vector<256x3xbf16>
    %c2_i32_94 = arith.constant 2 : i32
    %101 = arith.addi %0, %c2_i32_94 : i32
    %c0_95 = arith.constant 0 : index
    %102 = arith.index_cast %101 : i32 to index
    %c0_96 = arith.constant 0 : index
    %c2_97 = arith.constant 2 : index
    %c0_98 = arith.constant 0 : index
    %103 = vector.load %arg2[%c0_95, %102, %c0_96, %c2_97, %c0_98] : memref<1x6x10x10x3xbf16, #tpu.memory_space<vmem>>, vector<1x4x8x8x3xbf16>
    %104 = vector.shape_cast %103 : vector<1x4x8x8x3xbf16> to vector<4x8x8x3xbf16>
    %105 = vector.shape_cast %104 : vector<4x8x8x3xbf16> to vector<256x3xbf16>
    %c2_i32_99 = arith.constant 2 : i32
    %106 = arith.addi %0, %c2_i32_99 : i32
    %c0_100 = arith.constant 0 : index
    %107 = arith.index_cast %106 : i32 to index
    %c1_101 = arith.constant 1 : index
    %c0_102 = arith.constant 0 : index
    %c0_103 = arith.constant 0 : index
    %108 = vector.load %arg2[%c0_100, %107, %c1_101, %c0_102, %c0_103] : memref<1x6x10x10x3xbf16, #tpu.memory_space<vmem>>, vector<1x4x8x8x3xbf16>
    %109 = vector.shape_cast %108 : vector<1x4x8x8x3xbf16> to vector<4x8x8x3xbf16>
    %110 = vector.shape_cast %109 : vector<4x8x8x3xbf16> to vector<256x3xbf16>
    %c2_i32_104 = arith.constant 2 : i32
    %111 = arith.addi %0, %c2_i32_104 : i32
    %c0_105 = arith.constant 0 : index
    %112 = arith.index_cast %111 : i32 to index
    %c1_106 = arith.constant 1 : index
    %c1_107 = arith.constant 1 : index
    %c0_108 = arith.constant 0 : index
    %113 = vector.load %arg2[%c0_105, %112, %c1_106, %c1_107, %c0_108] : memref<1x6x10x10x3xbf16, #tpu.memory_space<vmem>>, vector<1x4x8x8x3xbf16>
    %114 = vector.shape_cast %113 : vector<1x4x8x8x3xbf16> to vector<4x8x8x3xbf16>
    %115 = vector.shape_cast %114 : vector<4x8x8x3xbf16> to vector<256x3xbf16>
    %c2_i32_109 = arith.constant 2 : i32
    %116 = arith.addi %0, %c2_i32_109 : i32
    %c0_110 = arith.constant 0 : index
    %117 = arith.index_cast %116 : i32 to index
    %c1_111 = arith.constant 1 : index
    %c2_112 = arith.constant 2 : index
    %c0_113 = arith.constant 0 : index
    %118 = vector.load %arg2[%c0_110, %117, %c1_111, %c2_112, %c0_113] : memref<1x6x10x10x3xbf16, #tpu.memory_space<vmem>>, vector<1x4x8x8x3xbf16>
    %119 = vector.shape_cast %118 : vector<1x4x8x8x3xbf16> to vector<4x8x8x3xbf16>
    %120 = vector.shape_cast %119 : vector<4x8x8x3xbf16> to vector<256x3xbf16>
    %c2_i32_114 = arith.constant 2 : i32
    %121 = arith.addi %0, %c2_i32_114 : i32
    %c0_115 = arith.constant 0 : index
    %122 = arith.index_cast %121 : i32 to index
    %c2_116 = arith.constant 2 : index
    %c0_117 = arith.constant 0 : index
    %c0_118 = arith.constant 0 : index
    %123 = vector.load %arg2[%c0_115, %122, %c2_116, %c0_117, %c0_118] : memref<1x6x10x10x3xbf16, #tpu.memory_space<vmem>>, vector<1x4x8x8x3xbf16>
    %124 = vector.shape_cast %123 : vector<1x4x8x8x3xbf16> to vector<4x8x8x3xbf16>
    %125 = vector.shape_cast %124 : vector<4x8x8x3xbf16> to vector<256x3xbf16>
    %c2_i32_119 = arith.constant 2 : i32
    %126 = arith.addi %0, %c2_i32_119 : i32
    %c0_120 = arith.constant 0 : index
    %127 = arith.index_cast %126 : i32 to index
    %c2_121 = arith.constant 2 : index
    %c1_122 = arith.constant 1 : index
    %c0_123 = arith.constant 0 : index
    %128 = vector.load %arg2[%c0_120, %127, %c2_121, %c1_122, %c0_123] : memref<1x6x10x10x3xbf16, #tpu.memory_space<vmem>>, vector<1x4x8x8x3xbf16>
    %129 = vector.shape_cast %128 : vector<1x4x8x8x3xbf16> to vector<4x8x8x3xbf16>
    %130 = vector.shape_cast %129 : vector<4x8x8x3xbf16> to vector<256x3xbf16>
    %c2_i32_124 = arith.constant 2 : i32
    %131 = arith.addi %0, %c2_i32_124 : i32
    %c0_125 = arith.constant 0 : index
    %132 = arith.index_cast %131 : i32 to index
    %c2_126 = arith.constant 2 : index
    %c2_127 = arith.constant 2 : index
    %c0_128 = arith.constant 0 : index
    %133 = vector.load %arg2[%c0_125, %132, %c2_126, %c2_127, %c0_128] : memref<1x6x10x10x3xbf16, #tpu.memory_space<vmem>>, vector<1x4x8x8x3xbf16>
    %134 = vector.shape_cast %133 : vector<1x4x8x8x3xbf16> to vector<4x8x8x3xbf16>
    %135 = vector.shape_cast %134 : vector<4x8x8x3xbf16> to vector<256x3xbf16>
    %cst = arith.constant 0.000000e+00 : bf16
    %136 = vector.broadcast %cst : bf16 to vector<256x47xbf16>
    %137 = tpu.concatenate %5, %10, %15, %20, %25, %30, %35, %40, %45, %50, %55, %60, %65, %70, %75, %80 in 1 : vector<256x3xbf16>, vector<256x3xbf16>, vector<256x3xbf16>, vector<256x3xbf16>, vector<256x3xbf16>, vector<256x3xbf16>, vector<256x3xbf16>, vector<256x3xbf16>, vector<256x3xbf16>, vector<256x3xbf16>, vector<256x3xbf16>, vector<256x3xbf16>, vector<256x3xbf16>, vector<256x3xbf16>, vector<256x3xbf16>, vector<256x3xbf16> -> vector<256x48xbf16>
    %138 = tpu.concatenate %85, %90, %95, %100, %105, %110, %115, %120, %125, %130, %135, %136 in 1 : vector<256x3xbf16>, vector<256x3xbf16>, vector<256x3xbf16>, vector<256x3xbf16>, vector<256x3xbf16>, vector<256x3xbf16>, vector<256x3xbf16>, vector<256x3xbf16>, vector<256x3xbf16>, vector<256x3xbf16>, vector<256x3xbf16>, vector<256x47xbf16> -> vector<256x80xbf16>
    %139 = tpu.concatenate %137, %138 in 1 : vector<256x48xbf16>, vector<256x80xbf16> -> vector<256x128xbf16>
    %c0_129 = arith.constant 0 : index
    %c0_130 = arith.constant 0 : index
    %140 = vector.load %arg3[%c0_129, %c0_130] : memref<128x512xbf16, #tpu.memory_space<vmem>>, vector<128x512xbf16>
    %cst_131 = arith.constant dense<0.000000e+00> : vector<256x512xf32>
    %141 = tpu.matmul %139, %140, %cst_131 {dimension_numbers = #tpu.dot_dimension_numbers<[1], [0], [0], [1], [0, 0, 1, 1], [], []>} : vector<256x128xbf16>, vector<128x512xbf16>, vector<256x512xf32> -> vector<256x512xf32>
    %c0_132 = arith.constant 0 : index
    %c0_133 = arith.constant 0 : index
    %142 = vector.load %arg4[%c0_132, %c0_133] : memref<1x512xf32, #tpu.memory_space<vmem>>, vector<1x512xf32>
    %143 = vector.broadcast %142 : vector<1x512xf32> to vector<256x512xf32>
    %144 = arith.addf %141, %143 : vector<256x512xf32>
    %145 = arith.truncf %144 : vector<256x512xf32> to vector<256x512xbf16>
    %c0_134 = arith.constant 0 : index
    %c0_135 = arith.constant 0 : index
    %c0_136 = arith.constant 0 : index
    %146 = vector.load %arg5[%c0_134, %c0_135, %c0_136] : memref<1x256x512xbf16, #tpu.memory_space<vmem>>, vector<1x256x512xbf16>
    %147 = vector.shape_cast %146 : vector<1x256x512xbf16> to vector<256x512xbf16>
    %148 = vector.shape_cast %145 : vector<256x512xbf16> to vector<1x256x512xbf16>
    tpu.vector_store %arg5[%c0_134, %c0_135, %c0_136], %148 {strides = array<i32>} : memref<1x256x512xbf16, #tpu.memory_space<vmem>>, vector<1x256x512xbf16>,
    return
  }
  func.func @transform_0(%arg0: i32, %arg1: i32) -> (i32, i32, i32, i32, i32) {
    %c0_i32 = arith.constant 0 : i32
    %c0_i32_0 = arith.constant 0 : i32
    %c0_i32_1 = arith.constant 0 : i32
    %c0_i32_2 = arith.constant 0 : i32
    %c0_i32_3 = arith.constant 0 : i32
    return %arg0, %c0_i32, %c0_i32_0, %c0_i32_1, %c0_i32_2 : i32, i32, i32, i32, i32
  }
  func.func @transform_1(%arg0: i32, %arg1: i32) -> (i32, i32) {
    %c0_i32 = arith.constant 0 : i32
    %c0_i32_0 = arith.constant 0 : i32
    %c0_i32_1 = arith.constant 0 : i32
    return %c0_i32, %c0_i32_0 : i32, i32
  }
  func.func @transform_2(%arg0: i32, %arg1: i32) -> (i32, i32) {
    %c0_i32 = arith.constant 0 : i32
    %c0_i32_0 = arith.constant 0 : i32
    %c0_i32_1 = arith.constant 0 : i32
    return %c0_i32, %c0_i32_0 : i32, i32
  }
  func.func @transform_3(%arg0: i32, %arg1: i32) -> (i32, i32, i32) {
    %c0_i32 = arith.constant 0 : i32
    %c0_i32_0 = arith.constant 0 : i32
    return %arg0, %arg1, %c0_i32 : i32, i32, i32
  }
}

</mosaic_0001>

<bundles_post_ra>
// kernel: tpu_custom_call.1
= control target key start
LH: loop header
LB: loop body
LE: loop exit
PB: predicated region body
PF: predicated region fallthrough
CT: control target
= control target key end

     0   :  { %8 = vsyncpa [#allocation3], 0  ;;  %s20175_s0 = inlined_call_operand.vmem [shape: bf16[2,6,10,10,3], index: 0, kind: input, shape index: {}]   ;;  %s20176_s1 = inlined_call_operand.vmem [shape: bf16[128,512], index: 1, kind: input, shape index: {}]   ;;  %s20177_s2 = inlined_call_operand.vmem [shape: f32[1,512], index: 2, kind: input, shape index: {}]   ;;  %s20178_s3 = inlined_call_operand.hbm [shape: bf16[2,256,512], index: 3, kind: output, shape index: {}]  }
   0x1   :  { %10 = vsyncpa [#allocation3 + $0x1], 0  ;;  %s13500_s12 = smov 0   ;;  %s13502_s13 = smov 0  }
   0x2   :  { %s13504_s14 = smov 0   ;;  %s13506_s15 = smov 0  }
   0x3   :  { %s13508_s16 = smov 0   ;;  %s13510_s17 = smov 0  }
   0x4 LB: > { %s11366_s18 = sadd.s32 4294967295, %s13458_s17   ;;  %s11367_s19 = sadd.s32 4294967294, %s13458_s17   ;;  %s13458_s17 = sphi %s13510_s17, %s16_s17   ;;  %s13454_s16 = sphi %s13508_s16, %s20666_s16   ;;  %s13450_s15 = sphi %s13506_s15, %s20665_s15   ;;  %s13446_s14 = sphi %s13504_s14, %s20664_s14   ;;  %s13442_s13 = sphi %s13502_s13, %s20663_s13   ;;  %s13438_s12 = sphi %s13500_s12, %s20662_s12  }
   0x5   : > { %s28_s20 = sadd.s32 1, %s13454_s16  ;;  %s105_s21 = sadd.s32 1, %s13446_s14 }
   0x6   : > { %p30_p0 = scmp.ge.s32.totalorder %s28_s20, 2  ;;  %p115_p1 = scmp.ne.s32.totalorder %s13446_s14, %s13442_s13 }
   0x7   : > { %p116_p2 = scmp.eq.s32.totalorder %s11366_s18, 1  ;;  %p121_p3 = scmp.ne.s32.totalorder %s13442_s13, %s13438_s12 }
   0x8   : > { %s20668_s20 = smov (%p30_p0, %s28_s20), 0  ;;  %p122_p5 = scmp.eq.s32.totalorder %s11367_s19, 1 }
   0x9   : > { %p13540_p4 = por %p116_p2, %p115_p1  ;;  %s100_s23 = ssub.s32 %s13454_s16, %s20668_s20 }
   0xa   : > { %p11370_p6 = scmp.ge.s32.totalorder %s13458_s17, 1  ;;  %p103_p7 = scmp.eq.s32.totalorder %s100_s23, 0 }
   0xb   : > { %p13547_p8 = por %p122_p5, %p121_p3  ;;  %p154_p9 = scmp.lt.s32.totalorder %s13458_s17, 3 }
   0xc   : > { %s13553_s25 = scalar_select %p103_p7, %s13446_s14, %s105_s21  }
   0xd   : > { %p155_p10 = pnand %p11370_p6, %p154_p9 }
   0xf   : > { %158 = sbr.rel (%p155_p10) target bundleno = 1485 (0x5cd), region = 32 }
  0x16   : > { %p178_p11 = scmp.lt.s32.totalorder %s13450_s15, 1  ;;  %vm253_vm0 = vsmask.f32 3328  ;;  %vm254_vm1 = vsmask.f32 7440  ;;  %v20208_v27 = vmov 0 }
  0x17   : > { %vm13584_vm2 = vmor %vm253_vm0, %vm254_vm1  ;;  %s13460_s4 = smov 3   ;;  %vm800_vm3 = vcmask 1042432   ;;  %vm801_vm4 = vcmask 1046532   ;;  %s13461_s5 = smov 6   ;;  %vm8285_vm6 = vcmask 23552   ;;  %vm8334_vm7 = vcmask 48128  }
  0x18   : > { %s179_s26 = scalar_select %p178_p11, %s13450_s15, 1  ;;  %v20209_v27 = vsel %vm13584_vm2, 4294967295, %v20208_v27  ;;  %vm13804_vm5 = vmor %vm800_vm3, %vm801_vm4  ;;  %vm8367_vm8 = vcmask 72704   ;;  %vm8400_vm9 = vcmask 97280   ;;  %vm20204_vm10 = vcmask 121856  }
  0x19   : > { %20210 = vst [vmem:[#allocation5_spill] sm:$0xff] %v20209_v27  ;;  %s13462_s6 = smov 9   ;;  %s13463_s7 = smov 12   ;;  %vm8466_vm11 = vcmask 146432   ;;  %vm20205_vm12 = vcmask 171008   ;;  %vm8532_vm13 = vcmask 195584  }
  0x1a   : > { %s13027_s27 = smul.u32 480, %s179_s26  ;;  %s20194_s8 = smov 15   ;;  %vm8565_vm14 = vcmask 220160   ;;  %vm8598_vm15 = vcmask 244736   ;;  %vm20203_vm0 = vcmask 269312   ;;  %vm20202_vm1 = vcmask 293888  }
  0x1b   : > { %s20200_s9 = smov 18   ;;  %s13466_s10 = smov 21   ;;  %vm8697_vm3 = vcmask 318464   ;;  %vm8730_vm4 = vcmask 343040  }
  0x1c   : > { %s13560_s30 = scalar_lea.vmem %s20175_s0, %s13027_s27  ;;  %s13467_s11 = smov 24  }
  0x1d   : > { %v193_v0 = vld [vmem:[%s13560_s30 + $0x20] sm:$0xf]  ;;  %v194_v1 = vld [vmem:[%s13560_s30 + $0x28] sm:$0xf]  ;;  %v13565_v2 = vld [vmem:[%s13560_s30 + $0x24] sm:$0x1] }
  0x1e   : > { %v13568_v3 = vld [vmem:[%s13560_s30 + $0x2c] sm:$0x1]  ;;  %v313_v4 = vshrl.u32 %v193_v0, 16  ;;  %v316_v5 = vshll.u32 %v193_v0, 16  ;;  %v322_v6 = vshll.u32 %v13565_v2, 16  ;;  %v327_v7 = vshrl.u32 %v194_v1, 16 }
  0x1f   : > { %v330_v8 = vshll.u32 %v194_v1, 16  ;;  %v336_v9 = vshll.u32 %v13568_v3, 16  ;;  %v189_v10 = vld [vmem:[%s13560_s30] sm:$0xf]  ;;  %v190_v11 = vld [vmem:[%s13560_s30 + $0x8] sm:$0xf] }
  0x20   : > { %v315_v12 = vrot.slane %v313_v4, 4  ;;  %v318_v13 = vrot.slane %v316_v5, 5  ;;  %v324_v14 = vrot.slane %v322_v6, 5  ;;  %v329_v15 = vrot.slane %v327_v7, 4  ;;  %v13575_v16 = vld [vmem:[%s13560_s30 + $0x4] sm:$0x1] }
  0x21   : > { %v332_v17 = vrot.slane %v330_v8, 5  ;;  %v338_v18 = vrot.slane %v336_v9, 5  ;;  %v13578_v19 = vld [vmem:[%s13560_s30 + $0xc] sm:$0x1]  ;;  %v257_v20 = vshrl.u32 %v189_v10, 16  ;;  %v260_v21 = vshll.u32 %v189_v10, 16 }
  0x22   : > { %v319_v22 = vor.u32 %v318_v13, %v315_v12  ;;  %v266_v23 = vshll.u32 %v13575_v16, 16  ;;  %v271_v24 = vshrl.u32 %v190_v11, 16  ;;  %v274_v25 = vshll.u32 %v190_v11, 16  ;;  %v195_v26 = vld [vmem:[%s13560_s30 + $0x30] sm:$0xf]  ;;  %s13468_s18 = smov 27  }
  0x23   : > { %v333_v28 = vor.u32 %v332_v17, %v329_v15  ;;  %v259_v29 = vrot.slane %v257_v20, 4  ;;  %v262_v30 = vrot.slane %v260_v21, 5  ;;  %v280_v31 = vshll.u32 %v13578_v19, 16  ;;  %v196_v32 = vld [vmem:[%s13560_s30 + $0x38] sm:$0xf]  ;;  %s13469_s19 = smov 30  }
  0x24   : > { %v320_v33 = vrot.slane %v319_v22, 4  ;;  %v268_v34 = vrot.slane %v266_v23, 5  ;;  %v273_v35 = vrot.slane %v271_v24, 4  ;;  %v276_v36 = vrot.slane %v274_v25, 5  ;;  %v13591_v37 = vld [vmem:[%s13560_s30 + $0x34] sm:$0x1] }
  0x25   : > { %v334_v38 = vrot.slane %v333_v28, 4  ;;  %v263_v39 = vor.u32 %v262_v30, %v259_v29  ;;  %v282_v40 = vrot.slane %v280_v31, 5  ;;  %v341_v41 = vshrl.u32 %v195_v26, 16  ;;  %v13596_v44 = vld [vmem:[%s13560_s30 + $0x3c] sm:$0x1]  ;;  %s13470_s21 = smov 33  }
  0x26   : > { %v325_v42 = vsel %vm13584_vm2, %v320_v33, %v324_v14  ;;  %v277_v43 = vor.u32 %v276_v36, %v273_v35  ;;  %v344_v45 = vshll.u32 %v195_v26, 16  ;;  %v350_v46 = vshll.u32 %v13591_v37, 16  ;;  %v191_v51 = vld [vmem:[%s13560_s30 + $0x10] sm:$0xf]  ;;  %v13603_v56 = vld [vmem:[%s13560_s30 + $0x14] sm:$0x1] }
  0x27   : > { %v339_v47 = vsel %vm13584_vm2, %v334_v38, %v338_v18  ;;  %v264_v48 = vrot.slane %v263_v39, 4  ;;  %v343_v49 = vrot.slane %v341_v41, 4  ;;  %v355_v50 = vshrl.u32 %v196_v32, 16  ;;  %v192_v61 = vld [vmem:[%s13560_s30 + $0x18] sm:$0xf]  ;;  %s20192_s23 = smov 36  }
  0x28   : > { %v12447_v52 = vcombine.low %v325_v42, %v339_v47  ;;  %v278_v53 = vrot.slane %v277_v43, 4  ;;  %v346_v54 = vrot.slane %v344_v45, 5  ;;  %v352_v55 = vrot.slane %v350_v46, 5  ;;  %v13613_v0 = vld [vmem:[%s13560_s30 + $0x1c] sm:$0x1]  ;;  %s13473_s26 = smov 42  }
  0x29   : > { %v269_v57 = vsel %vm13584_vm2, %v264_v48, %v268_v34  ;;  %v357_v58 = vrot.slane %v355_v50, 4  ;;  %v358_v59 = vshll.u32 %v196_v32, 16  ;;  %v364_v60 = vshll.u32 %v13596_v44, 16  ;;  %v199_v9 = vld [vmem:[%s13560_s30 + $0x60] sm:$0xf]  ;;  %s20196_s27 = smov 45  }
  0x2a   : > { %6977 = vrot.lane.b32.xlu1 %v12447_v52, %s13460_s4  ;;  %v283_v62 = vsel %vm13584_vm2, %v278_v53, %v282_v40  ;;  %v347_v63 = vor.u32 %v346_v54, %v343_v49  ;;  %v285_v1 = vshrl.u32 %v191_v51, 16  ;;  %v288_v4 = vshll.u32 %v191_v51, 16  ;;  %v200_v14 = vld [vmem:[%s13560_s30 + $0x68] sm:$0xf]  ;;  %v13621_v21 = vld [vmem:[%s13560_s30 + $0x64] sm:$0x1] }
  0x2b   : > { %v12445_v5 = vcombine.low %v269_v57, %v283_v62  ;;  %v360_v6 = vrot.slane %v358_v59, 5  ;;  %v366_v7 = vrot.slane %v364_v60, 5  ;;  %v294_v8 = vshll.u32 %v13603_v56, 16  ;;  %v13626_v30 = vld [vmem:[%s13560_s30 + $0x6c] sm:$0x1]  ;;  %s20198_s29 = smov 48  }
  0x2c   : > { %v348_v10 = vrot.slane %v347_v63, 4  ;;  %v287_v11 = vrot.slane %v285_v1, 4  ;;  %v290_v12 = vrot.slane %v288_v4, 5  ;;  %v299_v13 = vshrl.u32 %v192_v61, 16  ;;  %v197_v36 = vld [vmem:[%s13560_s30 + $0x50] sm:$0xf] }
  0x2d   : > { %6973 = vrot.lane.b32.xlu0 %v12445_v5, %s13460_s4  ;;  %v361_v15 = vor.u32 %v360_v6, %v357_v58  ;;  %v296_v17 = vrot.slane %v294_v8, 5  ;;  %v302_v18 = vshll.u32 %v192_v61, 16  ;;  %v308_v20 = vshll.u32 %v13613_v0, 16  ;;  %v198_v42 = vld [vmem:[%s13560_s30 + $0x58] sm:$0xf]  ;;  %s20530_s28 = smov 36  }
  0x2e   : > { %v353_v22 = vsel %vm13584_vm2, %v348_v10, %v352_v55  ;;  %v291_v23 = vor.u32 %v290_v12, %v287_v11  ;;  %v301_v24 = vrot.slane %v299_v13, 4  ;;  %v397_v25 = vshrl.u32 %v199_v9, 16  ;;  %v13634_v43 = vld [vmem:[%s13560_s30 + $0x54] sm:$0x1]  ;;  %v13641_v53 = vld [vmem:[%s13560_s30 + $0x5c] sm:$0x1] }
  0x2f   : > { %v362_v26 = vrot.slane %v361_v15, 4  ;;  %v304_v28 = vrot.slane %v302_v18, 5  ;;  %v310_v29 = vrot.slane %v308_v20, 5  ;;  %v400_v31 = vshll.u32 %v199_v9, 16  ;;  %v203_v63 = vld [vmem:[%s13560_s30 + $0x80] sm:$0xf] }
  0x30   : > { %v292_v32 = vrot.slane %v291_v23, 4  ;;  %v399_v33 = vrot.slane %v397_v25, 4  ;;  %v406_v34 = vshll.u32 %v13621_v21, 16  ;;  %v411_v35 = vshrl.u32 %v200_v14, 16  ;;  %v204_v1 = vld [vmem:[%s13560_s30 + $0x88] sm:$0xf] }
  0x31   : > { %v367_v38 = vsel %vm13584_vm2, %v362_v26, %v366_v7  ;;  %v305_v39 = vor.u32 %v304_v28, %v301_v24  ;;  %v402_v40 = vrot.slane %v400_v31, 5  ;;  %v414_v41 = vshll.u32 %v200_v14, 16  ;;  %v13649_v8 = vld [vmem:[%s13560_s30 + $0x84] sm:$0x1]  ;;  %v13656_v15 = vld [vmem:[%s13560_s30 + $0x8c] sm:$0x1] }
  0x32   : > { %v12448_v45 = vcombine.low %v353_v22, %v367_v38  ;;  %v297_v46 = vsel %vm13584_vm2, %v292_v32, %v296_v17  ;;  %v408_v47 = vrot.slane %v406_v34, 5  ;;  %v413_v48 = vrot.slane %v411_v35, 4  ;;  %v201_v25 = vld [vmem:[%s13560_s30 + $0x70] sm:$0xf]  ;;  %v13663_v32 = vld [vmem:[%s13560_s30 + $0x74] sm:$0x1] }
  0x33   : > { %v306_v49 = vrot.slane %v305_v39, 4  ;;  %v403_v50 = vor.u32 %v402_v40, %v399_v33  ;;  %v416_v51 = vrot.slane %v414_v41, 5  ;;  %v420_v52 = vshll.u32 %v13626_v30, 16  ;;  %v202_v38 = vld [vmem:[%s13560_s30 + $0x78] sm:$0xf] }
  0x34   : > { %6979 = vrot.lane.b32.xlu1 %v12448_v45, %s13460_s4  ;;  %v369_v54 = vshrl.u32 %v197_v36, 16  ;;  %v372_v55 = vshll.u32 %v197_v36, 16  ;;  %v378_v57 = vshll.u32 %v13634_v43, 16  ;;  %v383_v58 = vshrl.u32 %v198_v42, 16  ;;  %v11730_v27 = vld [vmem:[%s13560_s30 + $0x78] sm:$0xe] }
  0x35   : > { %v311_v59 = vsel %vm13584_vm2, %v306_v49, %v310_v29  ;;  %v404_v60 = vrot.slane %v403_v50, 4  ;;  %v417_v61 = vor.u32 %v416_v51, %v413_v48  ;;  %v422_v62 = vrot.slane %v420_v52, 5 }
  0x36   : > { %v12446_v4 = vcombine.low %v297_v46, %v311_v59  ;;  %v371_v5 = vrot.slane %v369_v54, 4  ;;  %v374_v6 = vrot.slane %v372_v55, 5  ;;  %v380_v7 = vrot.slane %v378_v57, 5  ;;  %v207_v55 = vld [vmem:[%s13560_s30 + $0xb0] sm:$0xf] }
  0x37   : > { %v409_v9 = vsel %vm13584_vm2, %v404_v60, %v408_v47  ;;  %v418_v10 = vrot.slane %v417_v61, 4  ;;  %v385_v11 = vrot.slane %v383_v58, 4  ;;  %v386_v12 = vshll.u32 %v198_v42, 16  ;;  %v13671_v47 = vld [vmem:[%s13560_s30 + $0x7c] sm:$0x1] }
  0x38   : > { %6975 = vrot.lane.b32.xlu0 %v12446_v4, %s13460_s4  ;;  %v375_v13 = vor.u32 %v374_v6, %v371_v5  ;;  %v392_v14 = vshll.u32 %v13641_v53, 16  ;;  %v453_v17 = vshrl.u32 %v203_v63, 16  ;;  %v456_v18 = vshll.u32 %v203_v63, 16  ;;  %v13678_v61 = vld [vmem:[%s13560_s30 + $0xb4] sm:$0x1] }
  0x39   : > { %v423_v20 = vsel %vm13584_vm2, %v418_v10, %v422_v62  ;;  %v388_v22 = vrot.slane %v386_v12, 5  ;;  %v462_v23 = vshll.u32 %v13649_v8, 16  ;;  %v467_v24 = vshrl.u32 %v204_v1, 16  ;;  %v208_v5 = vld [vmem:[%s13560_s30 + $0xb8] sm:$0xf] }
  0x3a   : > { %v12450_v26 = vcombine.low %v409_v9, %v423_v20  ;;  %v376_v28 = vrot.slane %v375_v13, 4  ;;  %v394_v29 = vrot.slane %v392_v14, 5  ;;  %v455_v31 = vrot.slane %v453_v17, 4  ;;  %v13686_v13 = vld [vmem:[%s13560_s30 + $0xbc] sm:$0x1] }
  0x3b   : > { %v389_v33 = vor.u32 %v388_v22, %v385_v11  ;;  %v458_v34 = vrot.slane %v456_v18, 5  ;;  %v464_v35 = vrot.slane %v462_v23, 5  ;;  %v469_v36 = vrot.slane %v467_v24, 4  ;;  %v205_v24 = vld [vmem:[%s13560_s30 + $0xa0] sm:$0xf] }
  0x3c   : > { %6983 = vrot.lane.b32.xlu1 %v12450_v26, %s13460_s4  ;;  %v381_v39 = vsel %vm13584_vm2, %v376_v28, %v380_v7  ;;  %v470_v40 = vshll.u32 %v204_v1, 16  ;;  %v476_v41 = vshll.u32 %v13656_v15, 16  ;;  %v425_v42 = vshrl.u32 %v201_v25, 16 }
  0x3d   : > { %v390_v45 = vrot.slane %v389_v33, 4  ;;  %v459_v46 = vor.u32 %v458_v34, %v455_v31  ;;  %v428_v48 = vshll.u32 %v201_v25, 16  ;;  %v434_v49 = vshll.u32 %v13663_v32, 16  ;;  %v206_v31 = vld [vmem:[%s13560_s30 + $0xa8] sm:$0xf] }
  0x3e   : > { %v472_v50 = vrot.slane %v470_v40, 5  ;;  %v478_v51 = vrot.slane %v476_v41, 5  ;;  %v427_v52 = vrot.slane %v425_v42, 4  ;;  %v439_v54 = vshrl.u32 %v202_v38, 16  ;;  %v13694_v33 = vld [vmem:[%s13560_s30 + $0xa4] sm:$0x1] }
  0x3f   : > { %v395_v57 = vsel %vm13584_vm2, %v390_v45, %v394_v29  ;;  %v460_v58 = vrot.slane %v459_v46, 4  ;;  %v430_v59 = vrot.slane %v428_v48, 5  ;;  %v436_v60 = vrot.slane %v434_v49, 5  ;;  %v13701_v46 = vld [vmem:[%s13560_s30 + $0xac] sm:$0x1] }
  0x40   : > { %v12449_v62 = vcombine.low %v381_v39, %v395_v57  ;;  %v473_v63 = vor.u32 %v472_v50, %v469_v36  ;;  %v441_v1 = vrot.slane %v439_v54, 4  ;;  %v442_v4 = vshll.u32 %v202_v38, 16  ;;  %v211_v57 = vld [vmem:[%s13560_s30 + $0xd0] sm:$0xf] }
  0x41   : > { %v465_v6 = vsel %vm13584_vm2, %v460_v58, %v464_v35  ;;  %v431_v7 = vor.u32 %v430_v59, %v427_v52  ;;  %v448_v9 = vshll.u32 %v13671_v47, 16  ;;  %v509_v10 = vshrl.u32 %v207_v55, 16 }
  0x42   : > { %6981 = vrot.lane.b32.xlu0 %v12449_v62, %s13460_s4  ;;  %v474_v11 = vrot.slane %v473_v63, 4  ;;  %v444_v12 = vrot.slane %v442_v4, 5  ;;  %v512_v14 = vshll.u32 %v207_v55, 16  ;;  %v518_v17 = vshll.u32 %v13678_v61, 16  ;;  %v212_v63 = vld [vmem:[%s13560_s30 + $0xd8] sm:$0xf] }
  0x43   : > { %v432_v18 = vrot.slane %v431_v7, 4  ;;  %v450_v20 = vrot.slane %v448_v9, 5  ;;  %v511_v22 = vrot.slane %v509_v10, 4  ;;  %v523_v23 = vshrl.u32 %v208_v5, 16 }
  0x44   : > { %v479_v25 = vsel %vm13584_vm2, %v474_v11, %v478_v51  ;;  %v445_v26 = vor.u32 %v444_v12, %v441_v1  ;;  %v514_v28 = vrot.slane %v512_v14, 5  ;;  %v520_v29 = vrot.slane %v518_v17, 5  ;;  %v13709_v1 = vld [vmem:[%s13560_s30 + $0xd4] sm:$0x1]  ;;  %v13716_v11 = vld [vmem:[%s13560_s30 + $0xdc] sm:$0x1] }
  0x45   : > { %v12452_v34 = vcombine.low %v465_v6, %v479_v25  ;;  %v437_v35 = vsel %vm13584_vm2, %v432_v18, %v436_v60  ;;  %v525_v36 = vrot.slane %v523_v23, 4  ;;  %v526_v38 = vshll.u32 %v208_v5, 16  ;;  %v209_v23 = vld [vmem:[%s13560_s30 + $0xc0] sm:$0xf] }
  0x46   : > { %v446_v39 = vrot.slane %v445_v26, 4  ;;  %v515_v40 = vor.u32 %v514_v28, %v511_v22  ;;  %v532_v41 = vshll.u32 %v13686_v13, 16  ;;  %v481_v42 = vshrl.u32 %v205_v24, 16 }
  0x47   : > { %6987 = vrot.lane.b32.xlu1 %v12452_v34, %s13460_s4  ;;  %v528_v45 = vrot.slane %v526_v38, 5  ;;  %v484_v48 = vshll.u32 %v205_v24, 16  ;;  %v490_v49 = vshll.u32 %v13694_v33, 16  ;;  %v495_v50 = vshrl.u32 %v206_v31, 16  ;;  %v210_v38 = vld [vmem:[%s13560_s30 + $0xc8] sm:$0xf] }
  0x48   : > { %v451_v51 = vsel %vm13584_vm2, %v446_v39, %v450_v20  ;;  %v516_v52 = vrot.slane %v515_v40, 4  ;;  %v534_v54 = vrot.slane %v532_v41, 5  ;;  %v483_v55 = vrot.slane %v481_v42, 4 }
  0x49   : > { %v12451_v58 = vcombine.low %v437_v35, %v451_v51  ;;  %v529_v59 = vor.u32 %v528_v45, %v525_v36  ;;  %v486_v60 = vrot.slane %v484_v48, 5  ;;  %v492_v62 = vrot.slane %v490_v49, 5  ;;  %v13730_v45 = vld [vmem:[%s13560_s30 + $0xcc] sm:$0x1] }
  0x4a   : > { %v521_v4 = vsel %vm13584_vm2, %v516_v52, %v520_v29  ;;  %v497_v5 = vrot.slane %v495_v50, 4  ;;  %v498_v6 = vshll.u32 %v206_v31, 16  ;;  %v504_v7 = vshll.u32 %v13701_v46, 16  ;;  %v13723_v29 = vld [vmem:[%s13560_s30 + $0xc4] sm:$0x1] }
  0x4b   : > { %6985 = vrot.lane.b32.xlu0 %v12451_v58, %s13460_s4  ;;  %v530_v9 = vrot.slane %v529_v59, 4  ;;  %v487_v10 = vor.u32 %v486_v60, %v483_v55  ;;  %v565_v12 = vshrl.u32 %v211_v57, 16  ;;  %v568_v14 = vshll.u32 %v211_v57, 16  ;;  %v215_v52 = vld [vmem:[%s13560_s30 + $0x100] sm:$0xf] }
  0x4c   : > { %v500_v17 = vrot.slane %v498_v6, 5  ;;  %v506_v18 = vrot.slane %v504_v7, 5  ;;  %v574_v20 = vshll.u32 %v13709_v1, 16  ;;  %v579_v22 = vshrl.u32 %v212_v63, 16  ;;  %v216_v59 = vld [vmem:[%s13560_s30 + $0x108] sm:$0xf] }
  0x4d   : > { %v535_v24 = vsel %vm13584_vm2, %v530_v9, %v534_v54  ;;  %v488_v25 = vrot.slane %v487_v10, 4  ;;  %v567_v26 = vrot.slane %v565_v12, 4  ;;  %v570_v28 = vrot.slane %v568_v14, 5 }
  0x4e   : > { %v12454_v31 = vcombine.low %v521_v4, %v535_v24  ;;  %v501_v34 = vor.u32 %v500_v17, %v497_v5  ;;  %v576_v35 = vrot.slane %v574_v20, 5  ;;  %v581_v36 = vrot.slane %v579_v22, 4  ;;  %v13739_v5 = vld [vmem:[%s13560_s30 + $0x104] sm:$0x1]  ;;  %v13745_v20 = vld [vmem:[%s13560_s30 + $0x10c] sm:$0x1] }
  0x4f   : > { %v493_v39 = vsel %vm13584_vm2, %v488_v25, %v492_v62  ;;  %v571_v40 = vor.u32 %v570_v28, %v567_v26  ;;  %v582_v41 = vshll.u32 %v212_v63, 16  ;;  %v588_v42 = vshll.u32 %v13716_v11, 16  ;;  %v213_v26 = vld [vmem:[%s13560_s30 + $0xf0] sm:$0xf] }
  0x50   : > { %6991 = vrot.lane.b32.xlu1 %v12454_v31, %s13460_s4  ;;  %v502_v48 = vrot.slane %v501_v34, 4  ;;  %v537_v49 = vshrl.u32 %v209_v23, 16  ;;  %v540_v50 = vshll.u32 %v209_v23, 16  ;;  %v546_v51 = vshll.u32 %v13723_v29, 16 }
  0x51   : > { %v572_v54 = vrot.slane %v571_v40, 4  ;;  %v584_v55 = vrot.slane %v582_v41, 5  ;;  %v590_v57 = vrot.slane %v588_v42, 5  ;;  %v551_v58 = vshrl.u32 %v210_v38, 16  ;;  %v13754_v42 = vld [vmem:[%s13560_s30 + $0xf4] sm:$0x1] }
  0x52   : > { %v507_v60 = vsel %vm13584_vm2, %v502_v48, %v506_v18  ;;  %v539_v62 = vrot.slane %v537_v49, 4  ;;  %v542_v63 = vrot.slane %v540_v50, 5  ;;  %v548_v4 = vrot.slane %v546_v51, 5 }
  0x53   : > { %v12453_v6 = vcombine.low %v493_v39, %v507_v60  ;;  %v577_v7 = vsel %vm13584_vm2, %v572_v54, %v576_v35  ;;  %v585_v9 = vor.u32 %v584_v55, %v581_v36  ;;  %v553_v10 = vrot.slane %v551_v58, 4  ;;  %v214_v36 = vld [vmem:[%s13560_s30 + $0xf8] sm:$0xf] }
  0x54   : > { %v543_v12 = vor.u32 %v542_v63, %v539_v62  ;;  %v554_v14 = vshll.u32 %v210_v38, 16  ;;  %v560_v17 = vshll.u32 %v13730_v45, 16  ;;  %v621_v18 = vshrl.u32 %v215_v52, 16  ;;  %v13761_v62 = vld [vmem:[%s13560_s30 + $0xfc] sm:$0x1] }
  0x55   : > { %6989 = vrot.lane.b32.xlu0 %v12453_v6, %s13460_s4  ;;  %v586_v22 = vrot.slane %v585_v9, 4  ;;  %v624_v23 = vshll.u32 %v215_v52, 16  ;;  %v630_v24 = vshll.u32 %v13739_v5, 16  ;;  %v635_v25 = vshrl.u32 %v216_v59, 16 }
  0x56   : > { %v544_v28 = vrot.slane %v543_v12, 4  ;;  %v556_v31 = vrot.slane %v554_v14, 5  ;;  %v562_v34 = vrot.slane %v560_v17, 5  ;;  %v623_v35 = vrot.slane %v621_v18, 4 }
  0x57   : > { %v591_v38 = vsel %vm13584_vm2, %v586_v22, %v590_v57  ;;  %v626_v39 = vrot.slane %v624_v23, 5  ;;  %v632_v40 = vrot.slane %v630_v24, 5  ;;  %v637_v41 = vrot.slane %v635_v25, 4  ;;  %v220_v22 = vld [vmem:[%s13560_s30 + $0x128] sm:$0xf] }
  0x58   : > { %v12456_v48 = vcombine.low %v577_v7, %v591_v38  ;;  %v549_v49 = vsel %vm13584_vm2, %v544_v28, %v548_v4  ;;  %v557_v50 = vor.u32 %v556_v31, %v553_v10  ;;  %v638_v51 = vshll.u32 %v216_v59, 16  ;;  %v219_v10 = vld [vmem:[%s13560_s30 + $0x120] sm:$0xf]  ;;  %v13769_v23 = vld [vmem:[%s13560_s30 + $0x124] sm:$0x1] }
  0x59   : > { %v627_v52 = vor.u32 %v626_v39, %v623_v35  ;;  %v644_v54 = vshll.u32 %v13745_v20, 16  ;;  %v593_v55 = vshrl.u32 %v213_v26, 16  ;;  %v596_v58 = vshll.u32 %v213_v26, 16 }
  0x5a   : > { %6995 = vrot.lane.b32.xlu1 %v12456_v48, %s13460_s4  ;;  %v558_v57 = vrot.slane %v557_v50, 4  ;;  %v640_v60 = vrot.slane %v638_v51, 5  ;;  %v602_v63 = vshll.u32 %v13754_v42, 16  ;;  %v607_v6 = vshrl.u32 %v214_v36, 16  ;;  %v217_v51 = vld [vmem:[%s13560_s30 + $0x110] sm:$0xf] }
  0x5b   : > { %v628_v4 = vrot.slane %v627_v52, 4  ;;  %v646_v7 = vrot.slane %v644_v54, 5  ;;  %v595_v9 = vrot.slane %v593_v55, 4  ;;  %v598_v59 = vrot.slane %v596_v58, 5  ;;  %v13783_v55 = vld [vmem:[%s13560_s30 + $0x114] sm:$0x1] }
  0x5c   : > { %v563_v12 = vsel %vm13584_vm2, %v558_v57, %v562_v34  ;;  %v641_v14 = vor.u32 %v640_v60, %v637_v41  ;;  %v604_v17 = vrot.slane %v602_v63, 5  ;;  %v609_v18 = vrot.slane %v607_v6, 4  ;;  %v13775_v34 = vld [vmem:[%s13560_s30 + $0x12c] sm:$0x1]  ;;  %v218_v6 = vld [vmem:[%s13560_s30 + $0x118] sm:$0xf] }
  0x5d   : > { %v12455_v24 = vcombine.low %v549_v49, %v563_v12  ;;  %v633_v25 = vsel %vm13584_vm2, %v628_v4, %v632_v40  ;;  %v599_v26 = vor.u32 %v598_v59, %v595_v9  ;;  %v610_v28 = vshll.u32 %v214_v36, 16  ;;  %v13791_v12 = vld [vmem:[%s13560_s30 + $0x11c] sm:$0x1] }
  0x5e   : > { %v642_v31 = vrot.slane %v641_v14, 4  ;;  %v616_v35 = vshll.u32 %v13761_v62, 16  ;;  %v677_v38 = vshrl.u32 %v219_v10, 16  ;;  %v680_v39 = vshll.u32 %v219_v10, 16 }
  0x5f   : > { %6993 = vrot.lane.b32.xlu0 %v12455_v24, %s13460_s4  ;;  %v600_v41 = vrot.slane %v599_v26, 4  ;;  %v612_v48 = vrot.slane %v610_v28, 5  ;;  %v686_v49 = vshll.u32 %v13769_v23, 16  ;;  %v691_v50 = vshrl.u32 %v220_v22, 16 }
  0x60   : > { %v647_v36 = vsel %vm13584_vm2, %v642_v31, %v646_v7  ;;  %v618_v40 = vrot.slane %v616_v35, 5  ;;  %v679_v52 = vrot.slane %v677_v38, 4  ;;  %v682_v54 = vrot.slane %v680_v39, 5  ;;  %v706_v31 = vld [vmem:[%s13560_s30 + $0x10] sm:$0xe] }
  0x61   : > { %v12458_v58 = vcombine.low %v633_v25, %v647_v36  ;;  %v605_v57 = vsel %vm13584_vm2, %v600_v41, %v604_v17  ;;  %v613_v60 = vor.u32 %v612_v48, %v609_v18  ;;  %v688_v63 = vrot.slane %v686_v49, 5  ;;  %v707_v41 = vld [vmem:[%s13560_s30 + $0x18] sm:$0xe]  ;;  %v704_v36 = vld [vmem:[%s13560_s30] sm:$0xe] }
  0x62   : > { %v683_v4 = vor.u32 %v682_v54, %v679_v52  ;;  %v693_v9 = vrot.slane %v691_v50, 4  ;;  %v694_v59 = vshll.u32 %v220_v22, 16  ;;  %v700_v10 = vshll.u32 %v13775_v34, 16 }
  0x63   : > { %6999 = vrot.lane.b32.xlu1 %v12458_v58, %s13460_s4  ;;  %v614_v7 = vrot.slane %v613_v60, 4  ;;  %v649_v14 = vshrl.u32 %v217_v51, 16  ;;  %v652_v24 = vshll.u32 %v217_v51, 16  ;;  %v658_v17 = vshll.u32 %v13783_v55, 16 }
  0x64   : > { %v684_v18 = vrot.slane %v683_v4, 4  ;;  %v696_v25 = vrot.slane %v694_v59, 5  ;;  %v702_v26 = vrot.slane %v700_v10, 5  ;;  %v663_v28 = vshrl.u32 %v218_v6, 16 }
  0x65   : > { %v619_v22 = vsel %vm13584_vm2, %v614_v7, %v618_v40  ;;  %v651_v35 = vrot.slane %v649_v14, 4  ;;  %v654_v38 = vrot.slane %v652_v24, 5  ;;  %v660_v39 = vrot.slane %v658_v17, 5  ;;  %v710_v24 = vld [vmem:[%s13560_s30 + $0x30] sm:$0xe] }
  0x66   : > { %v12457_v48 = vcombine.low %v605_v57, %v619_v22  ;;  %v689_v49 = vsel %vm13584_vm2, %v684_v18, %v688_v63  ;;  %v697_v50 = vor.u32 %v696_v25, %v693_v9  ;;  %v665_v51 = vrot.slane %v663_v28, 4 }
  0x67   : > { %v655_v52 = vor.u32 %v654_v38, %v651_v35  ;;  %v666_v54 = vshll.u32 %v218_v6, 16  ;;  %v672_v58 = vshll.u32 %v13791_v12, 16  ;;  %v20211_v40 = vmov 0  ;;  %v705_v6 = vld [vmem:[%s13560_s30 + $0x8] sm:$0xe] }
  0x68   : > { %v20212_v40 = vsel %vm13804_vm5, 4294967295, %v20211_v40  ;;  %v11375_v60 = vrot.slane %v706_v31, 9  ;;  %6997 = vrot.lane.b32.xlu0 %v12457_v48, %s13460_s4  ;;  %v698_v57 = vrot.slane %v697_v50, 4  ;;  %v813_v63 = vrot.slane %v13603_v56, 5  ;;  %v708_v38 = vld [vmem:[%s13560_s30 + $0x20] sm:$0xe] }
  0x69   : > { %20213 = vst [vmem:[#allocation6_spill] sm:$0xff] %v20212_v40  ;;  %v11376_v4 = vrot.slane %v707_v41, 9  ;;  %v817_v9 = vrot.slane %v13613_v0, 5  ;;  %v656_v59 = vrot.slane %v655_v52, 4  ;;  %v668_v10 = vrot.slane %v666_v54, 5 }
  0x6a   : > { %v674_v7 = vrot.slane %v672_v58, 5  ;;  %v11373_v14 = vrot.slane %v704_v36, 9  ;;  %v703_v17 = vsel %vm13584_vm2, %v698_v57, %v702_v26  ;;  %v814_v18 = vsel %vm13804_vm5, %v11375_v60, %v813_v63  ;;  %v711_v0 = vld [vmem:[%s13560_s30 + $0x38] sm:$0xe]  ;;  %v709_v41 = vld [vmem:[%s13560_s30 + $0x28] sm:$0xe] }
  0x6b   : > { %v818_v56 = vsel %vm13804_vm5, %v11376_v4, %v817_v9  ;;  %v805_v25 = vrot.slane %v13575_v16, 5  ;;  %v12460_v28 = vcombine.low %v689_v49, %v703_v17  ;;  %v661_v31 = vsel %vm13584_vm2, %v656_v59, %v660_v39  ;;  %v714_v52 = vld [vmem:[%s13560_s30 + $0x60] sm:$0xe]  ;;  %v715_v57 = vld [vmem:[%s13560_s30 + $0x68] sm:$0xe] }
  0x6c   : > { %v669_v22 = vor.u32 %v668_v10, %v665_v51  ;;  %v12462_v35 = vcombine.low %v814_v18, %v818_v56  ;;  %v11374_v48 = vrot.slane %v705_v6, 9  ;;  %v809_v50 = vrot.slane %v13578_v19, 5  ;;  %v712_v9 = vld [vmem:[%s13560_s30 + $0x50] sm:$0xe]  ;;  %v713_v6 = vld [vmem:[%s13560_s30 + $0x58] sm:$0xe] }
  0x6d   : > { %v806_v26 = vsel %vm13804_vm5, %v11373_v14, %v805_v25  ;;  %v11379_v36 = vrot.slane %v710_v24, 9  ;;  %7003 = vrot.lane.b32.xlu1 %v12460_v28, %s13460_s4  ;;  %v829_v49 = vrot.slane %v13591_v37, 5  ;;  %v11380_v39 = vrot.slane %v711_v0, 9  ;;  %v718_v24 = vld [vmem:[%s13560_s30 + $0x80] sm:$0xe] }
  0x6e   : > { %v670_v16 = vrot.slane %v669_v22, 4  ;;  %v833_v51 = vrot.slane %v13596_v44, 5  ;;  %v810_v54 = vsel %vm13804_vm5, %v11374_v48, %v809_v50  ;;  %v11377_v58 = vrot.slane %v708_v38, 9  ;;  %v719_v25 = vld [vmem:[%s13560_s30 + $0x88] sm:$0xe] }
  0x6f   : > { %v821_v60 = vrot.slane %v13565_v2, 5  ;;  %v11378_v19 = vrot.slane %v709_v41, 9  ;;  %v12461_v4 = vcombine.low %v806_v26, %v810_v54  ;;  %v830_v37 = vsel %vm13804_vm5, %v11379_v36, %v829_v49  ;;  %v716_v22 = vld [vmem:[%s13560_s30 + $0x70] sm:$0xe]  ;;  %v717_v38 = vld [vmem:[%s13560_s30 + $0x78] sm:$0xe] }
  0x70   : > { %v675_v63 = vsel %vm13584_vm2, %v670_v16, %v674_v7  ;;  %v834_v44 = vsel %vm13804_vm5, %v11380_v39, %v833_v51  ;;  %v825_v14 = vrot.slane %v13568_v3, 5  ;;  %v11383_v7 = vrot.slane %v714_v52, 9  ;;  %v722_v36 = vld [vmem:[%s13560_s30 + $0xb0] sm:$0xe]  ;;  %v723_v51 = vld [vmem:[%s13560_s30 + $0xb8] sm:$0xe] }
  0x71   : > { %v12459_v59 = vcombine.low %v661_v31, %v675_v63  ;;  %v12464_v10 = vcombine.low %v830_v37, %v834_v44  ;;  %v822_v2 = vsel %vm13804_vm5, %v11377_v58, %v821_v60  ;;  %7055 = vrot.lane.b32.xlu1 %v12462_v35, %s13461_s5  ;;  %v845_v17 = vrot.slane %v13621_v21, 5  ;;  %v720_v58 = vld [vmem:[%s13560_s30 + $0xa0] sm:$0xe]  ;;  %v721_v44 = vld [vmem:[%s13560_s30 + $0xa8] sm:$0xe] }
  0x72   : > { %v11384_v18 = vrot.slane %v715_v57, 9  ;;  %v849_v56 = vrot.slane %v13626_v30, 5  ;;  %v826_v0 = vsel %vm13804_vm5, %v11378_v19, %v825_v14  ;;  %v11381_v28 = vrot.slane %v712_v9, 9  ;;  %v726_v9 = vld [vmem:[%s13560_s30 + $0xd0] sm:$0xe] }
  0x73   : > { %7001 = vrot.lane.b32.xlu0 %v12459_v59, %s13460_s4  ;;  %v837_v3 = vrot.slane %v13634_v43, 5  ;;  %v11382_v31 = vrot.slane %v713_v6, 9  ;;  %v846_v35 = vsel %vm13804_vm5, %v11383_v7, %v845_v17  ;;  %v841_v30 = vrot.slane %v13641_v53, 5  ;;  %v725_v7 = vld [vmem:[%s13560_s30 + $0xc8] sm:$0xe] }
  0x74   : > { %v850_v21 = vsel %vm13804_vm5, %v11384_v18, %v849_v56  ;;  %v12463_v41 = vcombine.low %v822_v2, %v826_v0  ;;  %v11387_v48 = vrot.slane %v718_v24, 9  ;;  %v861_v50 = vrot.slane %v13649_v8, 5  ;;  %v724_v2 = vld [vmem:[%s13560_s30 + $0xc0] sm:$0xe]  ;;  %v11429_v40 = vld [vmem:[%s13560_s30 + $0xf8] sm:$0xf] }
  0x75   : > { %v12466_v26 = vcombine.low %v846_v35, %v850_v21  ;;  %7059 = vrot.lane.b32.xlu1 %v12464_v10, %s13461_s5  ;;  %v838_v43 = vsel %vm13804_vm5, %v11381_v28, %v837_v3  ;;  %v11388_v16 = vrot.slane %v719_v25, 9  ;;  %v865_v49 = vrot.slane %v13656_v15, 5  ;;  %v727_v10 = vld [vmem:[%s13560_s30 + $0xd8] sm:$0xe]  ;;  %v730_v0 = vld [vmem:[%s13560_s30 + $0x100] sm:$0xe] }
  0x76   : > { %v11385_v39 = vrot.slane %v716_v22, 9  ;;  %v842_v53 = vsel %vm13804_vm5, %v11382_v31, %v841_v30  ;;  %v862_v8 = vsel %vm13804_vm5, %v11387_v48, %v861_v50  ;;  %v853_v52 = vrot.slane %v13663_v32, 5  ;;  %v731_v22 = vld [vmem:[%s13560_s30 + $0x108] sm:$0xe]  ;;  %v728_v30 = vld [vmem:[%s13560_s30 + $0xf0] sm:$0xe] }
  0x77   : > { %7053 = vrot.lane.b32.xlu0 %v12461_v4, %s13461_s5  ;;  %v11386_v54 = vrot.slane %v717_v38, 9  ;;  %v866_v15 = vsel %vm13804_vm5, %v11388_v16, %v865_v49  ;;  %v857_v60 = vrot.slane %v13671_v47, 5  ;;  %v11391_v19 = vrot.slane %v722_v36, 9  ;;  %v729_v48 = vld [vmem:[%s13560_s30 + $0xf8] sm:$0xe] }
  0x78   : > { %v877_v57 = vrot.slane %v13678_v61, 5  ;;  %v12468_v63 = vcombine.low %v862_v8, %v866_v15  ;;  %v854_v4 = vsel %vm13804_vm5, %v11385_v39, %v853_v52  ;;  %v11392_v37 = vrot.slane %v723_v51, 9  ;;  %v734_v16 = vld [vmem:[%s13560_s30 + $0x120] sm:$0xe]  ;;  %v735_v51 = vld [vmem:[%s13560_s30 + $0x128] sm:$0xe] }
  0x79   : > { %v881_v32 = vrot.slane %v13686_v13, 5  ;;  %7063 = vrot.lane.b32.xlu1 %v12466_v26, %s13461_s5  ;;  %v858_v6 = vsel %vm13804_vm5, %v11386_v54, %v857_v60  ;;  %v11389_v61 = vrot.slane %v720_v58, 9  ;;  %v869_v59 = vrot.slane %v13694_v33, 5  ;;  %v733_v60 = vld [vmem:[%s13560_s30 + $0x118] sm:$0xe] }
  0x7a   : > { %v878_v47 = vsel %vm13804_vm5, %v11391_v19, %v877_v57  ;;  %v12465_v13 = vcombine.low %v838_v43, %v842_v53  ;;  %v12467_v14 = vcombine.low %v854_v4, %v858_v6  ;;  %v11390_v17 = vrot.slane %v721_v44, 9 }
  0x7b   : > { %7057 = vrot.lane.b32.xlu0 %v12463_v41, %s13461_s5  ;;  %v882_v24 = vsel %vm13804_vm5, %v11392_v37, %v881_v32  ;;  %v873_v18 = vrot.slane %v13701_v46, 5  ;;  %v11395_v56 = vrot.slane %v726_v9, 9  ;;  %v893_v25 = vrot.slane %v13709_v1, 5 }
  0x7c   : > { %v12470_v33 = vcombine.low %v878_v47, %v882_v24  ;;  %v11396_v28 = vrot.slane %v727_v10, 9  ;;  %v897_v3 = vrot.slane %v13716_v11, 5  ;;  %v11393_v31 = vrot.slane %v724_v2, 9  ;;  %v11408_v10 = vld [vmem:[%s13560_s30 + $0x20] sm:$0xf] }
  0x7d   : > { %7067 = vrot.lane.b32.xlu1 %v12468_v63, %s13461_s5  ;;  %v870_v35 = vsel %vm13804_vm5, %v11389_v61, %v869_v59  ;;  %v894_v46 = vsel %vm13804_vm5, %v11395_v56, %v893_v25  ;;  %v885_v21 = vrot.slane %v13723_v29, 5  ;;  %v11394_v1 = vrot.slane %v725_v7, 9  ;;  %v13957_v7 = vld [vmem:[%s13560_s30 + $0x8] sm:$0xf] }
  0x7e   : > { %v898_v11 = vsel %vm13804_vm5, %v11396_v28, %v897_v3  ;;  %v889_v38 = vrot.slane %v13730_v45, 5  ;;  %v11399_v41 = vrot.slane %v730_v0, 9  ;;  %v909_v26 = vrot.slane %v13739_v5, 5 }
  0x7f   : > { %7061 = vrot.lane.b32.xlu0 %v12465_v13, %s13461_s5  ;;  %v874_v50 = vsel %vm13804_vm5, %v11390_v17, %v873_v18  ;;  %v12472_v36 = vcombine.low %v894_v46, %v898_v11  ;;  %v11400_v43 = vrot.slane %v731_v22, 9  ;;  %v913_v29 = vrot.slane %v13745_v20, 5  ;;  %v13960_v17 = vld [vmem:[%s13560_s30 + $0x10] sm:$0xf]  ;;  %v11412_v22 = vld [vmem:[%s13560_s30 + $0x40] sm:$0xf] }
  0x80   : > { %v886_v49 = vsel %vm13804_vm5, %v11393_v31, %v885_v21  ;;  %v890_v45 = vsel %vm13804_vm5, %v11394_v1, %v889_v38  ;;  %v11397_v39 = vrot.slane %v728_v30, 9  ;;  %v901_v5 = vrot.slane %v13754_v42, 5  ;;  %v732_v42 = vld [vmem:[%s13560_s30 + $0x110] sm:$0xe]  ;;  %v13976_v11 = vld [vmem:[%s13560_s30 + $0x28] sm:$0xf] }
  0x81   : > { %7071 = vrot.lane.b32.xlu1 %v12470_v33, %s13461_s5  ;;  %v910_v53 = vsel %vm13804_vm5, %v11399_v41, %v909_v26  ;;  %v914_v20 = vsel %vm13804_vm5, %v11400_v43, %v913_v29  ;;  %v11398_v8 = vrot.slane %v729_v48, 9  ;;  %v905_v52 = vrot.slane %v13761_v62, 5  ;;  %v11411_v33 = vld [vmem:[%s13560_s30 + $0x38] sm:$0xf]  ;;  %v13984_v48 = vld [vmem:[%s13560_s30 + $0x30] sm:$0xf] }
  0x82   : > { %v12469_v54 = vcombine.low %v870_v35, %v874_v50  ;;  %v11403_v58 = vrot.slane %v734_v16, 9  ;;  %v925_v15 = vrot.slane %v13769_v23, 5  ;;  %v11404_v19 = vrot.slane %v735_v51, 9  ;;  %v11415_v51 = vld [vmem:[%s13560_s30 + $0x68] sm:$0xf] }
  0x83   : > { %7065 = vrot.lane.b32.xlu0 %v12467_v14, %s13461_s5  ;;  %v929_v57 = vrot.slane %v13775_v34, 5  ;;  %v12471_v63 = vcombine.low %v886_v49, %v890_v45  ;;  %v12474_v4 = vcombine.low %v910_v53, %v914_v20  ;;  %v902_v37 = vsel %vm13804_vm5, %v11397_v39, %v901_v5  ;;  %v11407_v34 = vld [vmem:[%s13560_s30 + $0x18] sm:$0xf] }
  0x84   : > { %v906_v62 = vsel %vm13804_vm5, %v11398_v8, %v905_v52  ;;  %v11401_v32 = vrot.slane %v732_v42, 9  ;;  %v917_v44 = vrot.slane %v13783_v55, 5  ;;  %v11402_v23 = vrot.slane %v733_v60, 9  ;;  %v11416_v52 = vld [vmem:[%s13560_s30 + $0x70] sm:$0xf] }
  0x85   : > { %7075 = vrot.lane.b32.xlu1 %v12472_v36, %s13461_s5  ;;  %v921_v9 = vrot.slane %v13791_v12, 5  ;;  %v926_v6 = vsel %vm13804_vm5, %v11403_v58, %v925_v15  ;;  %v930_v47 = vsel %vm13804_vm5, %v11404_v19, %v929_v57  ;;  %v1027_v61 = vshrl.u32 %v11407_v34, 16  ;;  %v14015_v19 = vld [vmem:[%s13560_s30 + $0x58] sm:$0xf] }
  0x86   : > { %v1030_v59 = vshll.u32 %v11407_v34, 16  ;;  %v12473_v2 = vcombine.low %v902_v37, %v906_v62  ;;  %v1041_v55 = vshrl.u32 %v11408_v10, 16  ;;  %v12476_v12 = vcombine.low %v926_v6, %v930_v47  ;;  %v11414_v62 = vld [vmem:[%s13560_s30 + $0x60] sm:$0xf] }
  0x87   : > { %7069 = vrot.lane.b32.xlu0 %v12469_v54, %s13461_s5  ;;  %v918_v13 = vsel %vm13804_vm5, %v11401_v32, %v917_v44  ;;  %v922_v14 = vsel %vm13804_vm5, %v11402_v23, %v921_v9  ;;  %v1044_v24 = vshll.u32 %v11408_v10, 16  ;;  %v13963_v18 = vrot.slane %v1027_v61, 4  ;;  %v11420_v61 = vld [vmem:[%s13560_s30 + $0x90] sm:$0xf] }
  0x88   : > { %v13965_v56 = vrot.slane %v1030_v59, 5  ;;  %v999_v25 = vshrl.u32 %v13957_v7, 16  ;;  %v1002_v0 = vshll.u32 %v13957_v7, 16  ;;  %v12478_v28 = vcombine.low %v11407_v34, %v11408_v10  ;;  %v11419_v34 = vld [vmem:[%s13560_s30 + $0x88] sm:$0xf] }
  0x89   : > { %7079 = vrot.lane.b32.xlu1 %v12474_v4, %s13461_s5  ;;  %v1013_v3 = vshrl.u32 %v13960_v17, 16  ;;  %v1016_v31 = vshll.u32 %v13960_v17, 16  ;;  %v1083_v35 = vshrl.u32 %v11411_v33, 16  ;;  %v12475_v46 = vcombine.low %v918_v13, %v922_v14  ;;  %v14035_v14 = vld [vmem:[%s13560_s30 + $0x78] sm:$0xf] }
  0x8a   : > { %v13973_v21 = vrot.slane %v1041_v55, 4  ;;  %v1086_v1 = vshll.u32 %v11411_v33, 16  ;;  %v1097_v30 = vshrl.u32 %v11412_v22, 16  ;;  %v13979_v38 = vrot.slane %v1044_v24, 5 }
  0x8b   : > { %7073 = vrot.lane.b32.xlu0 %v12471_v63, %s13461_s5  ;;  %v12477_v41 = vcombine.low %v13957_v7, %v13960_v17  ;;  %v1100_v26 = vshll.u32 %v11412_v22, 16  ;;  %v1055_v50 = vshrl.u32 %v13976_v11, 16  ;;  %v13988_v36 = vrot.slane %v999_v25, 4 }
  0x8c   : > { %v13990_v43 = vrot.slane %v1002_v0, 5  ;;  %v1058_v29 = vshll.u32 %v13976_v11, 16  ;;  %v1069_v16 = vshrl.u32 %v13984_v48, 16  ;;  %v13994_v49 = vrot.slane %v1013_v3, 4  ;;  %v11418_v3 = vld [vmem:[%s13560_s30 + $0x80] sm:$0xf] }
  0x8d   : > { %7083 = vrot.lane.b32.xlu1 %v12476_v12, %s13461_s5  ;;  %v13996_v45 = vrot.slane %v1016_v31, 5  ;;  %v13998_v39 = vrot.slane %v1083_v35, 4  ;;  %v1072_v5 = vshll.u32 %v13984_v48, 16  ;;  %v14002_v53 = vrot.slane %v1086_v1, 5 }
  0x8e   : > { %v14004_v20 = vrot.slane %v1097_v30, 4  ;;  %v12480_v8 = vcombine.low %v11411_v33, %v11412_v22  ;;  %v1139_v54 = vshrl.u32 %v11415_v51, 16  ;;  %v14008_v58 = vrot.slane %v1100_v26, 5  ;;  %v11423_v30 = vld [vmem:[%s13560_s30 + $0xb8] sm:$0xf] }
  0x8f   : > { %7077 = vrot.lane.b32.xlu0 %v12473_v2, %s13461_s5  ;;  %v14010_v15 = vrot.slane %v1055_v50, 4  ;;  %v12479_v42 = vcombine.low %v13976_v11, %v13984_v48  ;;  %v1142_v60 = vshll.u32 %v11415_v51, 16  ;;  %v14018_v57 = vrot.slane %v1058_v29, 5  ;;  %v11424_v50 = vld [vmem:[%s13560_s30 + $0xc0] sm:$0xf] }
  0x90   : > { %v14020_v63 = vrot.slane %v1069_v16, 4  ;;  %v1153_v4 = vshrl.u32 %v11416_v52, 16  ;;  %v1156_v37 = vshll.u32 %v11416_v52, 16  ;;  %v14023_v32 = vrot.slane %v1072_v5, 5 }
  0x91   : > { %7167 = vrot.lane.b32.xlu1 %v12478_v28, %s13462_s6  ;;  %v1111_v44 = vshrl.u32 %v14015_v19, 16  ;;  %v1114_v23 = vshll.u32 %v14015_v19, 16  ;;  %v1125_v9 = vshrl.u32 %v11414_v62, 16  ;;  %v14028_v6 = vrot.slane %v1139_v54, 4 }
  0x92   : > { %v1128_v47 = vshll.u32 %v11414_v62, 16  ;;  %v1195_v59 = vshrl.u32 %v11419_v34, 16  ;;  %v1198_v10 = vshll.u32 %v11419_v34, 16  ;;  %v14032_v2 = vrot.slane %v1142_v60, 5 }
  0x93   : > { %7081 = vrot.lane.b32.xlu0 %v12475_v46, %s13461_s5  ;;  %v12482_v55 = vcombine.low %v11415_v51, %v11416_v52  ;;  %v1209_v12 = vshrl.u32 %v11420_v61, 16  ;;  %v1212_v13 = vshll.u32 %v11420_v61, 16  ;;  %v14038_v24 = vrot.slane %v1153_v4, 4 }
  0x94   : > { %v14040_v7 = vrot.slane %v1156_v37, 5  ;;  %v12481_v17 = vcombine.low %v14015_v19, %v11414_v62  ;;  %v1167_v25 = vshrl.u32 %v14035_v14, 16  ;;  %v14044_v0 = vrot.slane %v1111_v44, 4  ;;  %v11422_v19 = vld [vmem:[%s13560_s30 + $0xb0] sm:$0xf] }
  0x95   : > { %7171 = vrot.lane.b32.xlu1 %v12480_v8, %s13462_s6  ;;  %v14046_v33 = vrot.slane %v1114_v23, 5  ;;  %v14048_v28 = vrot.slane %v1125_v9, 4  ;;  %v1170_v31 = vshll.u32 %v14035_v14, 16  ;;  %v14052_v22 = vrot.slane %v1128_v47, 5  ;;  %v11421_v8 = vld [vmem:[%s13560_s30 + $0xa8] sm:$0xf] }
  0x96   : > { %v14054_v35 = vrot.slane %v1195_v59, 4  ;;  %v14056_v46 = vrot.slane %v1198_v10, 5  ;;  %v1181_v1 = vshrl.u32 %v11418_v3, 16  ;;  %v14060_v11 = vrot.slane %v1209_v12, 4  ;;  %v11427_v23 = vld [vmem:[%s13560_s30 + $0xd8] sm:$0xf] }
  0x97   : > { %7165 = vrot.lane.b32.xlu0 %v12477_v41, %s13462_s6  ;;  %v14062_v41 = vrot.slane %v1212_v13, 5  ;;  %v12484_v26 = vcombine.low %v11419_v34, %v11420_v61  ;;  %v1184_v48 = vshll.u32 %v11418_v3, 16  ;;  %v14066_v29 = vrot.slane %v1167_v25, 4  ;;  %v11428_v47 = vld [vmem:[%s13560_s30 + $0xe0] sm:$0xf] }
  0x98   : > { %v1251_v16 = vshrl.u32 %v11423_v30, 16  ;;  %v1254_v5 = vshll.u32 %v11423_v30, 16  ;;  %v1265_v51 = vshrl.u32 %v11424_v50, 16  ;;  %v14069_v52 = vrot.slane %v1170_v31, 5 }
  0x99   : > { %7175 = vrot.lane.b32.xlu1 %v12482_v55, %s13462_s6  ;;  %v12483_v54 = vcombine.low %v14035_v14, %v11418_v3  ;;  %v1268_v60 = vshll.u32 %v11424_v50, 16  ;;  %v1223_v4 = vshrl.u32 %v11421_v8, 16  ;;  %v14073_v37 = vrot.slane %v1181_v1, 4  ;;  %v11425_v14 = vld [vmem:[%s13560_s30 + $0xc8] sm:$0xf] }
  0x9a   : > { %v1226_v62 = vshll.u32 %v11421_v8, 16  ;;  %v1237_v44 = vshrl.u32 %v11422_v19, 16  ;;  %v14077_v9 = vrot.slane %v1184_v48, 5  ;;  %v12486_v34 = vcombine.low %v11423_v30, %v11424_v50  ;;  %v11426_v30 = vld [vmem:[%s13560_s30 + $0xd0] sm:$0xf] }
  0x9b   : > { %7169 = vrot.lane.b32.xlu0 %v12479_v42, %s13462_s6  ;;  %v1240_v42 = vshll.u32 %v11422_v19, 16  ;;  %v1307_v61 = vshrl.u32 %v11427_v23, 16  ;;  %v1310_v59 = vshll.u32 %v11427_v23, 16  ;;  %v14081_v10 = vrot.slane %v1251_v16, 4  ;;  %v11431_v16 = vld [vmem:[%s13560_s30 + $0x108] sm:$0xf] }
  0x9c   : > { %v14083_v55 = vrot.slane %v1254_v5, 5  ;;  %v14085_v12 = vrot.slane %v1265_v51, 4  ;;  %v1321_v13 = vshrl.u32 %v11428_v47, 16  ;;  %v14088_v25 = vrot.slane %v1268_v60, 5 }
  0x9d   : > { %7179 = vrot.lane.b32.xlu1 %v12484_v26, %s13462_s6  ;;  %v14090_v3 = vrot.slane %v1223_v4, 4  ;;  %v12485_v31 = vcombine.low %v11421_v8, %v11422_v19  ;;  %v1324_v1 = vshll.u32 %v11428_v47, 16  ;;  %v14093_v26 = vrot.slane %v1226_v62, 5  ;;  %v11432_v19 = vld [vmem:[%s13560_s30 + $0x110] sm:$0xf] }
  0x9e   : > { %v14097_v48 = vrot.slane %v1240_v42, 5  ;;  %v1279_v50 = vshrl.u32 %v11425_v14, 16  ;;  %v14101_v5 = vrot.slane %v1307_v61, 4  ;;  %v14103_v51 = vrot.slane %v1310_v59, 5  ;;  %v11430_v59 = vld [vmem:[%s13560_s30 + $0x100] sm:$0xf] }
  0x9f   : > { %7173 = vrot.lane.b32.xlu0 %v12481_v17, %s13462_s6  ;;  %20214 = vst [vmem:[#allocation7_spill] sm:$0xff] %v14090_v3  ;;  %20215 = vst [vmem:[#allocation8_spill] sm:$0xff] %v14093_v26  ;;  %v14095_v17 = vrot.slane %v1237_v44, 4  ;;  %v12488_v60 = vcombine.low %v11427_v23, %v11428_v47  ;;  %v1282_v8 = vshll.u32 %v11425_v14, 16  ;;  %v14107_v4 = vrot.slane %v1321_v13, 4 }
  0xa0   : > { %20217 = vst [vmem:[#allocation10_spill] sm:$0xff] %v14097_v48  ;;  %20218 = vst [vmem:[#allocation11_spill] sm:$0xff] %v14101_v5  ;;  %v1293_v62 = vshrl.u32 %v11426_v30, 16  ;;  %v1296_v44 = vshll.u32 %v11426_v30, 16  ;;  %v1363_v42 = vshrl.u32 %v11431_v16, 16  ;;  %v14110_v48 = vrot.slane %v1324_v1, 5 }
  0xa1   : > { %20216 = vst [vmem:[#allocation9_spill] sm:$0xff] %v14095_v17  ;;  %7183 = vrot.lane.b32.xlu1 %v12486_v34, %s13462_s6  ;;  %20219 = vst [vmem:[#allocation12_spill] sm:$0xff] %v14103_v51  ;;  %v1366_v34 = vshll.u32 %v11431_v16, 16  ;;  %v1377_v61 = vshrl.u32 %v11432_v19, 16  ;;  %v1380_v5 = vshll.u32 %v11432_v19, 16  ;;  %v14113_v51 = vrot.slane %v1279_v50, 4 }
  0xa2   : > { %20220 = vst [vmem:[#allocation13_spill] sm:$0xff] %v14107_v4  ;;  %20221 = vst [vmem:[#allocation14_spill] sm:$0xff] %v14110_v48  ;;  %v1335_v23 = vshrl.u32 %v11429_v40, 16  ;;  %v1349_v47 = vshrl.u32 %v11430_v59, 16  ;;  %v14116_v13 = vrot.slane %v1282_v8, 5  ;;  %v12487_v4 = vcombine.low %v11425_v14, %v11426_v30 }
  0xa3   : > { %7177 = vrot.lane.b32.xlu0 %v12483_v54, %s13462_s6  ;;  %20222 = vst [vmem:[#allocation15_spill] sm:$0xff] %v14113_v51  ;;  %v1338_v54 = vshll.u32 %v11429_v40, 16  ;;  %v12490_v17 = vcombine.low %v11431_v16, %v11432_v19  ;;  %v1352_v1 = vshll.u32 %v11430_v59, 16  ;;  %v14119_v48 = vld [vmem:[%s13560_s30 + $0x128] sm:$0xf]  ;;  %v14125_v50 = vrot.slane %v1293_v62, 4 }
  0xa4   : > { %v14122_v26 = vld [vmem:[%s13560_s30 + $0x130] sm:$0xf]  ;;  %v14127_v51 = vrot.slane %v1296_v44, 5  ;;  %v14129_v3 = vrot.slane %v1363_v42, 4  ;;  %v14133_v8 = vld [vmem:[%s13560_s30 + $0x118] sm:$0xf] }
  0xa5   : > { %7187 = vrot.lane.b32.xlu1 %v12488_v60, %s13462_s6  ;;  %20223 = vst [vmem:[#allocation16_spill] sm:$0xff] %v14125_v50  ;;  %v1419_v60 = vshrl.u32 %v14119_v48, 16  ;;  %v14136_v14 = vld [vmem:[%s13560_s30 + $0x120] sm:$0xf]  ;;  %v14138_v30 = vrot.slane %v1366_v34, 5  ;;  %v14140_v16 = vrot.slane %v1377_v61, 4  ;;  %v1033_v61 = vor.u32 %v13965_v56, %v13963_v18 }
  0xa6   : > { %20224 = vst [vmem:[#allocation17_spill] sm:$0xff] %v14127_v51  ;;  %20225 = vst [vmem:[#allocation18_spill] sm:$0xff] %v14129_v3  ;;  %v14142_v19 = vrot.slane %v1380_v5, 5  ;;  %v14145_v62 = vld [vmem:[%s13560_s30 + $0x1c] sm:$0x1]  ;;  %v14147_v44 = vrot.slane %v1335_v23, 4  ;;  %v12492_v5 = vcombine.low %v14119_v48, %v14122_v26 }
  0xa7   : > { %7181 = vrot.lane.b32.xlu0 %v12485_v31, %s13462_s6  ;;  %v12489_v31 = vcombine.low %v11429_v40, %v11430_v59  ;;  %20226 = vst [vmem:[#allocation19_spill] sm:$0xff] %v14145_v62  ;;  %v14149_v42 = vrot.slane %v1338_v54, 5  ;;  %v14151_v3 = vrot.slane %v1349_v47, 4  ;;  %v14155_v50 = vld [vmem:[%s13560_s30 + $0x24] sm:$0x1]  ;;  %v14158_v34 = vrot.slane %v1352_v1, 5 }
  0xa8   : > { %20227 = vst [vmem:[#allocation20_spill] sm:$0xff] %v14155_v50  ;;  %v14166_v59 = vld [vmem:[%s13560_s30 + $0xc] sm:$0x1]  ;;  %v14169_v23 = vrot.slane %v1419_v60, 4  ;;  %v1047_v47 = vor.u32 %v13979_v38, %v13973_v21  ;;  %v14176_v1 = vld [vmem:[%s13560_s30 + $0x14] sm:$0x1]  ;;  %v12491_v40 = vcombine.low %v14133_v8, %v14136_v14  ;;  %v1019_v21 = vor.u32 %v13996_v45, %v13994_v49 }
  0xa9   : > { %7191 = vrot.lane.b32.xlu1 %v12490_v17, %s13462_s6  ;;  %v1036_v17 = vshll.u32 %v14145_v62, 16  ;;  %v1034_v18 = vrot.slane %v1033_v61, 4  ;;  %v1050_v56 = vshll.u32 %v14155_v50, 16  ;;  %v14184_v60 = vld [vmem:[%s13560_s30 + $0x3c] sm:$0x1]  ;;  %v1008_v62 = vshll.u32 %v14166_v59, 16 }
  0xaa   : > { %20228 = vst [vmem:[#allocation21_spill] sm:$0xff] %v14169_v23  ;;  %20229 = vst [vmem:[#allocation22_spill] sm:$0xff] %v14184_v60  ;;  %v1048_v51 = vrot.slane %v1047_v47, 4  ;;  %v1022_v61 = vshll.u32 %v14176_v1, 16  ;;  %v14192_v50 = vld [vmem:[%s13560_s30 + $0x44] sm:$0x1] }
  0xab   : > { %7185 = vrot.lane.b32.xlu0 %v12487_v4, %s13462_s6  ;;  %v1005_v4 = vor.u32 %v13990_v43, %v13988_v36  ;;  %v1038_v54 = vrot.slane %v1036_v17, 5  ;;  %v1052_v38 = vrot.slane %v1050_v56, 5  ;;  %v1089_v36 = vor.u32 %v14002_v53, %v13998_v39  ;;  %v14201_v45 = vld [vmem:[%s13560_s30 + $0x2c] sm:$0x1] }
  0xac   : > { %v1010_v17 = vrot.slane %v1008_v62, 5  ;;  %v1020_v47 = vrot.slane %v1019_v21, 4  ;;  %v1092_v49 = vshll.u32 %v14184_v60, 16  ;;  %v1024_v56 = vrot.slane %v1022_v61, 5 }
  0xad   : > { %7195 = vrot.lane.b32.xlu1 %v12492_v5, %s13462_s6  ;;  %v1006_v23 = vrot.slane %v1005_v4, 4  ;;  %v1039_v43 = vsel %vm13584_vm2, %v1034_v18, %v1038_v54  ;;  %v1053_v5 = vsel %vm13584_vm2, %v1048_v51, %v1052_v38  ;;  %v1090_v4 = vrot.slane %v1089_v36, 4  ;;  %v14211_v18 = vld [vmem:[%s13560_s30 + $0x34] sm:$0x1] }
  0xae   : > { %v1103_v39 = vor.u32 %v14008_v58, %v14004_v20  ;;  %v12494_v53 = vcombine.low %v1039_v43, %v1053_v5  ;;  %v1094_v54 = vrot.slane %v1092_v49, 5  ;;  %v1106_v62 = vshll.u32 %v14192_v50, 16  ;;  %v14219_v20 = vld [vmem:[%s13560_s30 + $0x6c] sm:$0x1] }
  0xaf   : > { %7189 = vrot.lane.b32.xlu0 %v12489_v31, %s13462_s6  ;;  %v1011_v31 = vsel %vm13584_vm2, %v1006_v23, %v1010_v17  ;;  %v1025_v21 = vsel %vm13584_vm2, %v1020_v47, %v1024_v56  ;;  %v1061_v51 = vor.u32 %v14018_v57, %v14010_v15  ;;  %v1064_v38 = vshll.u32 %v14201_v45, 16  ;;  %v14229_v17 = vld [vmem:[%s13560_s30 + $0x74] sm:$0x1] }
  0xb0   : > { %v1104_v60 = vrot.slane %v1103_v39, 4  ;;  %v12493_v58 = vcombine.low %v1011_v31, %v1025_v21  ;;  %v1095_v23 = vsel %vm13584_vm2, %v1090_v4, %v1094_v54  ;;  %v1108_v61 = vrot.slane %v1106_v62, 5  ;;  %v14239_v4 = vld [vmem:[%s13560_s30 + $0x5c] sm:$0x1] }
  0xb1   : > { %7247 = vrot.lane.b32.xlu1 %v12494_v53, %s13463_s7  ;;  %v1075_v36 = vor.u32 %v14023_v32, %v14020_v63  ;;  %v1062_v15 = vrot.slane %v1061_v51, 4  ;;  %v1066_v57 = vrot.slane %v1064_v38, 5  ;;  %v1078_v43 = vshll.u32 %v14211_v18, 16  ;;  %v14242_v63 = vld [vmem:[%s13560_s30 + $0x64] sm:$0x1]  ;;  %v14246_v53 = vpop.permute.xlu1 %6977 }
  0xb2   : > { %v1109_v47 = vsel %vm13584_vm2, %v1104_v60, %v1108_v61  ;;  %v1148_v5 = vshll.u32 %v14219_v20, 16  ;;  %v1159_v56 = vor.u32 %v14040_v7, %v14038_v24  ;;  %v1162_v24 = vshll.u32 %v14229_v17, 16  ;;  %v14260_v38 = vld [vmem:[%s13560_s30 + $0x8c] sm:$0x1] }
  0xb3   : > { %7193 = vrot.lane.b32.xlu0 %v12491_v40, %s13462_s6  ;;  %v1145_v40 = vor.u32 %v14032_v2, %v14028_v6  ;;  %v1076_v49 = vrot.slane %v1075_v36, 4  ;;  %v12496_v32 = vcombine.low %v1095_v23, %v1109_v47  ;;  %v1067_v39 = vsel %vm13584_vm2, %v1062_v15, %v1066_v57 }
  0xb4   : > { %v1080_v6 = vrot.slane %v1078_v43, 5  ;;  %v1150_v60 = vrot.slane %v1148_v5, 5  ;;  %v1160_v31 = vrot.slane %v1159_v56, 4  ;;  %v1117_v7 = vor.u32 %v14046_v33, %v14044_v0  ;;  %v14280_v5 = vld [vmem:[%s13560_s30 + $0x84] sm:$0x1]  ;;  %v14282_v56 = vpop.permute.xlu0 %6973 }
  0xb5   : > { %v1146_v2 = vrot.slane %v1145_v40, 4  ;;  %7251 = vrot.lane.b32.xlu1 %v12496_v32, %s13463_s7  ;;  %v1120_v62 = vshll.u32 %v14239_v4, 16  ;;  %v1131_v21 = vor.u32 %v14052_v22, %v14048_v28  ;;  %v1134_v51 = vshll.u32 %v14242_v63, 16  ;;  %20230 = vst [vmem:[#allocation23_spill] sm:$0xff] %v14282_v56 }
  0xb6   : > { %v1081_v54 = vsel %vm13584_vm2, %v1076_v49, %v1080_v6  ;;  %v1164_v33 = vrot.slane %v1162_v24, 5  ;;  %v1118_v61 = vrot.slane %v1117_v7, 4  ;;  %v1201_v28 = vor.u32 %v14056_v46, %v14054_v35  ;;  %v14277_v49 = vld [vmem:[%s13560_s30 + $0x7c] sm:$0x1] }
  0xb7   : > { %7245 = vrot.lane.b32.xlu0 %v12493_v58, %s13463_s7  ;;  %v14263_v58 = vld [vmem:[%s13560_s30 + $0x94] sm:$0x1]  ;;  %v12495_v23 = vcombine.low %v1067_v39, %v1081_v54  ;;  %v1151_v0 = vsel %vm13584_vm2, %v1146_v2, %v1150_v60  ;;  %v1122_v36 = vrot.slane %v1120_v62, 5  ;;  %v1132_v15 = vrot.slane %v1131_v21, 4  ;;  %v14289_v6 = vld [vmem:[%s13560_s30 + $0xbc] sm:$0x1] }
  0xb8   : > { %v1136_v57 = vrot.slane %v1134_v51, 5  ;;  %v1165_v22 = vsel %vm13584_vm2, %v1160_v31, %v1164_v33  ;;  %v1204_v43 = vshll.u32 %v14260_v38, 16  ;;  %v1215_v40 = vor.u32 %v14062_v41, %v14060_v11  ;;  %v14291_v11 = vpop.permute.xlu1 %6979 }
  0xb9   : > { %v1218_v47 = vshll.u32 %v14263_v58, 16  ;;  %v12498_v32 = vcombine.low %v1151_v0, %v1165_v22  ;;  %v1123_v35 = vsel %vm13584_vm2, %v1118_v61, %v1122_v36  ;;  %v1202_v39 = vrot.slane %v1201_v28, 4  ;;  %20231 = vst [vmem:[#allocation24_spill] sm:$0xff] %v14291_v11  ;;  %v14312_v0 = vld [vmem:[%s13560_s30 + $0xac] sm:$0x1]  ;;  %v14316_v22 = vpop.permute.xlu0 %6975 }
  0xba   : > { %v1137_v46 = vsel %vm13584_vm2, %v1132_v15, %v1136_v57  ;;  %v1206_v2 = vrot.slane %v1204_v43, 5  ;;  %v1216_v60 = vrot.slane %v1215_v40, 4  ;;  %v1173_v24 = vor.u32 %v14069_v52, %v14066_v29  ;;  %20232 = vst [vmem:[#allocation25_spill] sm:$0xff] %v14316_v22  ;;  %v14323_v43 = vld [vmem:[%s13560_s30 + $0xb4] sm:$0x1] }
  0xbb   : > { %7249 = vrot.lane.b32.xlu0 %v12495_v23, %s13463_s7  ;;  %v12497_v41 = vcombine.low %v1123_v35, %v1137_v46  ;;  %v1220_v31 = vrot.slane %v1218_v47, 5  ;;  %7255 = vrot.lane.b32.xlu1 %v12498_v32, %s13463_s7  ;;  %v1176_v7 = vshll.u32 %v14277_v49, 16  ;;  %v1187_v54 = vor.u32 %v14077_v9, %v14073_v37  ;;  %v14306_v23 = vld [vmem:[%s13560_s30 + $0xc4] sm:$0x1]  ;;  %v20233_v40 = vld [vmem:[#allocation7_spill] sm:$0xff]  ;;  %v20234_v47 = vld [vmem:[#allocation8_spill] sm:$0xff] }
  0xbc   : > { %v1190_v62 = vshll.u32 %v14280_v5, 16  ;;  %v1207_v21 = vsel %vm13584_vm2, %v1202_v39, %v1206_v2  ;;  %v1257_v29 = vor.u32 %v14083_v55, %v14081_v10  ;;  %v1260_v52 = vshll.u32 %v14289_v6, 16  ;;  %v14328_v46 = vpop.permute.xlu1 %6983  ;;  %v20237_v2 = vld [vmem:[#allocation10_spill] sm:$0xff]  ;;  %v15090_v11 = vld [vmem:[%s13560_s30 + $0xd4] sm:$0x1] }
  0xbd   : > { %v1221_v51 = vsel %vm13584_vm2, %v1216_v60, %v1220_v31  ;;  %v1174_v9 = vrot.slane %v1173_v24, 4  ;;  %v1178_v33 = vrot.slane %v1176_v7, 5  ;;  %v1188_v61 = vrot.slane %v1187_v54, 4  ;;  %20235 = vst [vmem:[#allocation7_spill] sm:$0xff] %v14328_v46  ;;  %v11564_v46 = vld [vmem:[%s13560_s30 + $0x138] sm:$0xf] }
  0xbe   : > { %v12500_v37 = vcombine.low %v1207_v21, %v1221_v51  ;;  %v1192_v36 = vrot.slane %v1190_v62, 5  ;;  %v1258_v15 = vrot.slane %v1257_v29, 4  ;;  %v1262_v57 = vrot.slane %v1260_v52, 5  ;;  %v14337_v62 = vld [vmem:[%s13560_s30 + $0xdc] sm:$0x1] }
  0xbf   : > { %7253 = vrot.lane.b32.xlu0 %v12497_v41, %s13463_s7  ;;  %v1271_v28 = vor.u32 %v14088_v25, %v14085_v12  ;;  %v1179_v10 = vsel %vm13584_vm2, %v1174_v9, %v1178_v33  ;;  %v1274_v55 = vshll.u32 %v14306_v23, 16  ;;  %v1229_v32 = vor.u32 %v20234_v47, %v20233_v40  ;;  %v20236_v41 = vld [vmem:[#allocation9_spill] sm:$0xff] }
  0xc0   : > { %7259 = vrot.lane.b32.xlu1 %v12500_v37, %s13463_s7  ;;  %v1232_v35 = vshll.u32 %v14312_v0, 16  ;;  %v1193_v12 = vsel %vm13584_vm2, %v1188_v61, %v1192_v36  ;;  %v1263_v25 = vsel %vm13584_vm2, %v1258_v15, %v1262_v57  ;;  %v1243_v60 = vor.u32 %v20237_v2, %v20236_v41  ;;  %v14346_v9 = vld [vmem:[%s13560_s30 + $0xe4] sm:$0x1]  ;;  %v20241_v57 = vld [vmem:[#allocation11_spill] sm:$0xff] }
  0xc1   : > { %v1272_v39 = vrot.slane %v1271_v28, 4  ;;  %v12499_v31 = vcombine.low %v1179_v10, %v1193_v12  ;;  %v1276_v24 = vrot.slane %v1274_v55, 5  ;;  %v1230_v7 = vrot.slane %v1229_v32, 4  ;;  %v20242_v28 = vld [vmem:[#allocation12_spill] sm:$0xff]  ;;  %v14362_v55 = vld [vmem:[%s13560_s30 + $0xcc] sm:$0x1] }
  0xc2   : > { %v1234_v54 = vrot.slane %v1232_v35, 5  ;;  %v20238_v21 = vshll.u32 %v14119_v48, 16  ;;  %v1391_v29 = vshrl.u32 %v14133_v8, 16  ;;  %v1244_v52 = vrot.slane %v1243_v60, 4  ;;  %v20244_v2 = vld [vmem:[#allocation13_spill] sm:$0xff]  ;;  %v20245_v60 = vld [vmem:[#allocation14_spill] sm:$0xff] }
  0xc3   : > { %v1246_v37 = vshll.u32 %v14323_v43, 16  ;;  %v20239_v33 = vshrl.u32 %v14122_v26, 16  ;;  %v20240_v36 = vshll.u32 %v14122_v26, 16  ;;  %7257 = vrot.lane.b32.xlu0 %v12499_v31, %s13463_s7  ;;  %v1277_v48 = vsel %vm13584_vm2, %v1272_v39, %v1276_v24  ;;  %v14367_v26 = vpop.permute.xlu0 %6981  ;;  %v14374_v24 = vld [vmem:[%s13560_s30 + $0xd4] sm:$0x1] }
  0xc4   : > { %v14341_v51 = vrot.slane %v20238_v21, 5  ;;  %v1313_v10 = vor.u32 %v20242_v28, %v20241_v57  ;;  %v12502_v40 = vcombine.low %v1263_v25, %v1277_v48  ;;  %v1235_v47 = vsel %vm13584_vm2, %v1230_v7, %v1234_v54  ;;  %20243 = vst [vmem:[#allocation8_spill] sm:$0xff] %v14367_v26  ;;  %v14376_v25 = vpop.permute.xlu1 %6987  ;;  %v20247_v21 = vld [vmem:[#allocation15_spill] sm:$0xff]  ;;  %v20248_v57 = vld [vmem:[#allocation16_spill] sm:$0xff]  ;;  %v20249_v28 = vld [vmem:[#allocation17_spill] sm:$0xff] }
  0xc5   : > { %v14350_v61 = vrot.slane %v20239_v33, 4  ;;  %v14354_v15 = vrot.slane %v20240_v36, 5  ;;  %v1248_v32 = vrot.slane %v1246_v37, 5  ;;  %v1316_v35 = vshll.u32 %v14337_v62, 16  ;;  %20246 = vst [vmem:[#allocation9_spill] sm:$0xff] %v14376_v25 }
  0xc6   : > { %v1394_v12 = vshll.u32 %v14133_v8, 16  ;;  %v1314_v41 = vrot.slane %v1313_v10, 4  ;;  %v1327_v39 = vor.u32 %v20245_v60, %v20244_v2  ;;  %v1330_v31 = vshll.u32 %v14346_v9, 16  ;;  %7263 = vrot.lane.b32.xlu1 %v12502_v40, %s13463_s7  ;;  %v11563_v26 = vld [vmem:[%s13560_s30 + $0x130] sm:$0xf] }
  0xc7   : > { %v1249_v7 = vsel %vm13584_vm2, %v1244_v52, %v1248_v32  ;;  %v1318_v54 = vrot.slane %v1316_v35, 5  ;;  %v1285_v8 = vor.u32 %v14116_v13, %v20247_v21  ;;  %v1288_v37 = vshll.u32 %v14362_v55, 16  ;;  %v14390_v32 = vld [vmem:[%s13560_s30 + $0x10c] sm:$0x1] }
  0xc8   : > { %v12501_v33 = vcombine.low %v1235_v47, %v1249_v7  ;;  %v1328_v36 = vrot.slane %v1327_v39, 4  ;;  %v1332_v48 = vrot.slane %v1330_v31, 5  ;;  %v1299_v10 = vor.u32 %v20249_v28, %v20248_v57  ;;  %v14399_v31 = vld [vmem:[%s13560_s30 + $0x114] sm:$0x1]  ;;  %v20250_v21 = vld [vmem:[#allocation18_spill] sm:$0xff] }
  0xc9   : > { %v1319_v40 = vsel %vm13584_vm2, %v1314_v41, %v1318_v54  ;;  %v1286_v2 = vrot.slane %v1285_v8, 4  ;;  %v1290_v60 = vrot.slane %v1288_v37, 5  ;;  %v1302_v52 = vshll.u32 %v14374_v24, 16  ;;  %v14406_v8 = vld [vmem:[%s13560_s30 + $0xfc] sm:$0x1]  ;;  %v14408_v37 = vpop.permute.xlu0 %6985 }
  0xca   : > { %v14392_v13 = vrot.slane %v1391_v29, 4  ;;  %v1405_v47 = vshrl.u32 %v14136_v14, 16  ;;  %7261 = vrot.lane.b32.xlu0 %v12501_v33, %s13463_s7  ;;  %v1333_v35 = vsel %vm13584_vm2, %v1328_v36, %v1332_v48  ;;  %v1300_v39 = vrot.slane %v1299_v10, 4  ;;  %20251 = vst [vmem:[#allocation10_spill] sm:$0xff] %v14408_v37  ;;  %v14415_v28 = vld [vmem:[%s13560_s30 + $0x104] sm:$0x1]  ;;  %v14417_v10 = vpop.permute.xlu1 %6991 }
  0xcb   : > { %v12504_v41 = vcombine.low %v1319_v40, %v1333_v35  ;;  %v1291_v7 = vsel %vm13584_vm2, %v1286_v2, %v1290_v60  ;;  %v1304_v54 = vrot.slane %v1302_v52, 5  ;;  %v1369_v29 = vor.u32 %v14138_v30, %v20250_v21  ;;  %20252 = vst [vmem:[#allocation11_spill] sm:$0xff] %v14417_v10  ;;  %v11551_v10 = vld [vmem:[%s13560_s30 + $0xc0] sm:$0xf] }
  0xcc   : > { %v1396_v57 = vrot.slane %v1394_v12, 5  ;;  %v1408_v33 = vshll.u32 %v14136_v14, 16  ;;  %v1372_v36 = vshll.u32 %v14390_v32, 16  ;;  %v1383_v48 = vor.u32 %v14142_v19, %v14140_v16 }
  0xcd   : > { %7267 = vrot.lane.b32.xlu1 %v12504_v41, %s13463_s7  ;;  %v1305_v30 = vsel %vm13584_vm2, %v1300_v39, %v1304_v54  ;;  %v1370_v40 = vrot.slane %v1369_v29, 4  ;;  %v1386_v12 = vshll.u32 %v14399_v31, 16  ;;  %v1341_v14 = vor.u32 %v14149_v42, %v14147_v44 }
  0xce   : > { %v12503_v2 = vcombine.low %v1291_v7, %v1305_v30  ;;  %v1374_v60 = vrot.slane %v1372_v36, 5  ;;  %v1384_v16 = vrot.slane %v1383_v48, 4  ;;  %v1344_v19 = vshll.u32 %v14406_v8, 16  ;;  %v14433_v7 = vld [vmem:[%s13560_s30 + $0x12c] sm:$0x1] }
  0xcf   : > { %v1388_v52 = vrot.slane %v1386_v12, 5  ;;  %v1342_v35 = vrot.slane %v1341_v14, 4  ;;  %v1355_v41 = vor.u32 %v14158_v34, %v14151_v3  ;;  %v1358_v39 = vshll.u32 %v14415_v28, 16  ;;  %v14438_v30 = vld [vmem:[%s13560_s30 + $0x134] sm:$0x1]  ;;  %v20253_v3 = vld [vmem:[#allocation21_spill] sm:$0xff] }
  0xd0   : > { %v1407_v54 = vrot.slane %v1405_v47, 4  ;;  %v1410_v21 = vrot.slane %v1408_v33, 5  ;;  %7265 = vrot.lane.b32.xlu0 %v12503_v2, %s13463_s7  ;;  %v1375_v44 = vsel %vm13584_vm2, %v1370_v40, %v1374_v60  ;;  %v1346_v42 = vrot.slane %v1344_v19, 5  ;;  %v14443_v47 = vld [vmem:[%s13560_s30 + $0x11c] sm:$0x1]  ;;  %v14445_v33 = vpop.permute.xlu0 %6989  ;;  %v14452_v2 = vpop.permute.xlu1 %6995 }
  0xd1   : > { %v1389_v29 = vsel %vm13584_vm2, %v1384_v16, %v1388_v52  ;;  %v1356_v36 = vrot.slane %v1355_v41, 4  ;;  %v1360_v48 = vrot.slane %v1358_v39, 5  ;;  %v1425_v34 = vor.u32 %v14341_v51, %v20253_v3  ;;  %20254 = vst [vmem:[#allocation12_spill] sm:$0xff] %v14445_v33  ;;  %v14450_v14 = vld [vmem:[%s13560_s30 + $0x124] sm:$0x1]  ;;  %20255 = vst [vmem:[#allocation13_spill] sm:$0xff] %v14452_v2 }
  0xd2   : > { %v12506_v12 = vcombine.low %v1375_v44, %v1389_v29  ;;  %v1347_v40 = vsel %vm13584_vm2, %v1342_v35, %v1346_v42  ;;  %v1428_v19 = vshll.u32 %v14433_v7, 16  ;;  %v1439_v51 = vor.u32 %v14354_v15, %v14350_v61  ;;  %v20259_v2 = vld [vmem:[#allocation20_spill] sm:$0xff] }
  0xd3   : > { %v1361_v60 = vsel %vm13584_vm2, %v1356_v36, %v1360_v48  ;;  %v1426_v16 = vrot.slane %v1425_v34, 4  ;;  %v1442_v35 = vshll.u32 %v14438_v30, 16  ;;  %v1397_v41 = vor.u32 %v1396_v57, %v14392_v13  ;;  %v11471_v48 = vld [vmem:[%s13560_s30 + $0x18] sm:$0xe]  ;;  %v11472_v57 = vld [vmem:[%s13560_s30 + $0x20] sm:$0xe] }
  0xd4   : > { %7271 = vrot.lane.b32.xlu1 %v12506_v12, %s13463_s7  ;;  %v12505_v52 = vcombine.low %v1347_v40, %v1361_v60  ;;  %v1400_v39 = vshll.u32 %v14443_v47, 16  ;;  %v1430_v44 = vrot.slane %v1428_v19, 5  ;;  %v1440_v42 = vrot.slane %v1439_v51, 4  ;;  %v11469_v40 = vld [vmem:[%s13560_s30 + $0x8] sm:$0xe]  ;;  %v14470_v60 = vpop.permute.xlu0 %6993 }
  0xd5   : > { %v1411_v29 = vor.u32 %v1410_v21, %v1407_v54  ;;  %v1414_v36 = vshll.u32 %v14450_v14, 16  ;;  %v1444_v61 = vrot.slane %v1442_v35, 5  ;;  %v1398_v15 = vrot.slane %v1397_v41, 4  ;;  %20256 = vst [vmem:[#allocation14_spill] sm:$0xff] %v14470_v60  ;;  %v11470_v51 = vld [vmem:[%s13560_s30 + $0x10] sm:$0xe] }
  0xd6   : > { %7269 = vrot.lane.b32.xlu0 %v12505_v52, %s13463_s7  ;;  %v1402_v3 = vrot.slane %v1400_v39, 5  ;;  %v1431_v34 = vsel %vm13584_vm2, %v1426_v16, %v1430_v44  ;;  %v11503_v19 = vrot.slane %v11471_v48, 9  ;;  %v14477_v52 = vpop.permute.xlu1 %6999  ;;  %v20258_v41 = vld [vmem:[#allocation19_spill] sm:$0xff]  ;;  %v11475_v44 = vld [vmem:[%s13560_s30 + $0x38] sm:$0xe] }
  0xd7   : > { %v1412_v12 = vrot.slane %v1411_v29, 4  ;;  %v1416_v13 = vrot.slane %v1414_v36, 5  ;;  %v1445_v54 = vsel %vm13584_vm2, %v1440_v42, %v1444_v61  ;;  %20257 = vst [vmem:[#allocation15_spill] sm:$0xff] %v14477_v52  ;;  %v1552_v39 = vrot.slane %v20258_v41, 5 }
  0xd8   : > { %v1403_v21 = vsel %vm13584_vm2, %v1398_v15, %v1402_v3  ;;  %v12508_v35 = vcombine.low %v1431_v34, %v1445_v54  ;;  %v11504_v36 = vrot.slane %v11472_v57, 9  ;;  %v1556_v42 = vrot.slane %v20259_v2, 5  ;;  %v11473_v54 = vld [vmem:[%s13560_s30 + $0x28] sm:$0xe] }
  0xd9   : > { %v1417_v16 = vsel %vm13584_vm2, %v1412_v12, %v1416_v13  ;;  %v11501_v61 = vrot.slane %v11469_v40, 9  ;;  %v1553_v15 = vsel %vm13804_vm5, %v11503_v19, %v1552_v39  ;;  %v1544_v3 = vrot.slane %v14166_v59, 5  ;;  %v11476_v13 = vld [vmem:[%s13560_s30 + $0x40] sm:$0xe]  ;;  %v20261_v59 = vld [vmem:[#allocation22_spill] sm:$0xff] }
  0xda   : > { %v12507_v29 = vcombine.low %v1403_v21, %v1417_v16  ;;  %7275 = vrot.lane.b32.xlu1 %v12508_v35, %s13463_s7  ;;  %v11502_v34 = vrot.slane %v11470_v51, 9  ;;  %v1548_v12 = vrot.slane %v14176_v1, 5  ;;  %v1557_v57 = vsel %vm13804_vm5, %v11504_v36, %v1556_v42  ;;  %v11474_v51 = vld [vmem:[%s13560_s30 + $0x30] sm:$0xe]  ;;  %v14500_v1 = vpop.permute.xlu0 %6997  ;;  %v11479_v39 = vld [vmem:[%s13560_s30 + $0x68] sm:$0xe] }
  0xdb   : > { %v11507_v2 = vrot.slane %v11475_v44, 9  ;;  %v12510_v40 = vcombine.low %v1553_v15, %v1557_v57  ;;  %v1545_v21 = vsel %vm13804_vm5, %v11501_v61, %v1544_v3  ;;  %v1568_v35 = vrot.slane %v20261_v59, 5  ;;  %20262 = vst [vmem:[#allocation16_spill] sm:$0xff] %v14500_v1 }
  0xdc   : > { %7273 = vrot.lane.b32.xlu0 %v12507_v29, %s13463_s7  ;;  %v1549_v19 = vsel %vm13804_vm5, %v11502_v34, %v1548_v12  ;;  %v11508_v41 = vrot.slane %v11476_v13, 9  ;;  %v1572_v36 = vrot.slane %v14192_v50, 5  ;;  %v11505_v42 = vrot.slane %v11473_v54, 9  ;;  %v11480_v34 = vld [vmem:[%s13560_s30 + $0x70] sm:$0xe] }
  0xdd   : > { %v12509_v16 = vcombine.low %v1545_v21, %v1549_v19  ;;  %v1569_v44 = vsel %vm13804_vm5, %v11507_v2, %v1568_v35  ;;  %v1560_v61 = vrot.slane %v14201_v45, 5  ;;  %v11506_v15 = vrot.slane %v11474_v51, 9  ;;  %v11478_v50 = vld [vmem:[%s13560_s30 + $0x60] sm:$0xe]  ;;  %v11483_v21 = vld [vmem:[%s13560_s30 + $0x88] sm:$0xe] }
  0xde   : > { %7327 = vrot.lane.b32.xlu1 %v12510_v40, %s20194_s8  ;;  %v1564_v3 = vrot.slane %v14211_v18, 5  ;;  %v1573_v12 = vsel %vm13804_vm5, %v11508_v41, %v1572_v36  ;;  %v11511_v57 = vrot.slane %v11479_v39, 9  ;;  %v1584_v2 = vrot.slane %v14219_v20, 5  ;;  %v11477_v40 = vld [vmem:[%s13560_s30 + $0x58] sm:$0xe] }
  0xdf   : > { %v14503_v29 = vpop.permute.xlu1 %7003  ;;  %v1561_v13 = vsel %vm13804_vm5, %v11505_v42, %v1560_v61  ;;  %v12512_v54 = vcombine.low %v1569_v44, %v1573_v12  ;;  %v11512_v35 = vrot.slane %v11480_v34, 9  ;;  %v1588_v51 = vrot.slane %v14229_v17, 5  ;;  %v11484_v36 = vld [vmem:[%s13560_s30 + $0x90] sm:$0xe]  ;;  %v11481_v17 = vld [vmem:[%s13560_s30 + $0x78] sm:$0xe] }
  0xe0   : > { %20263 = vst [vmem:[#allocation17_spill] sm:$0xff] %v14503_v29  ;;  %7325 = vrot.lane.b32.xlu0 %v12509_v16, %s20194_s8  ;;  %v1565_v45 = vsel %vm13804_vm5, %v11506_v15, %v1564_v3  ;;  %v1585_v59 = vsel %vm13804_vm5, %v11511_v57, %v1584_v2  ;;  %v11509_v16 = vrot.slane %v11477_v40, 9  ;;  %v1576_v41 = vrot.slane %v14239_v4, 5  ;;  %v11482_v12 = vld [vmem:[%s13560_s30 + $0x80] sm:$0xe] }
  0xe1   : > { %v12511_v19 = vcombine.low %v1561_v13, %v1565_v45  ;;  %v11510_v39 = vrot.slane %v11478_v50, 9  ;;  %v1580_v44 = vrot.slane %v14242_v63, 5  ;;  %v1589_v42 = vsel %vm13804_vm5, %v11512_v35, %v1588_v51  ;;  %v11487_v2 = vld [vmem:[%s13560_s30 + $0xb8] sm:$0xe] }
  0xe2   : > { %7331 = vrot.lane.b32.xlu1 %v12512_v54, %s20194_s8  ;;  %v11515_v61 = vrot.slane %v11483_v21, 9  ;;  %v12514_v15 = vcombine.low %v1585_v59, %v1589_v42  ;;  %v1577_v3 = vsel %vm13804_vm5, %v11509_v16, %v1576_v41  ;;  %v1600_v4 = vrot.slane %v14260_v38, 5  ;;  %v11488_v59 = vld [vmem:[%s13560_s30 + $0xc0] sm:$0xe] }
  0xe3   : > { %v14523_v18 = vpop.permute.xlu1 %7055  ;;  %v1581_v34 = vsel %vm13804_vm5, %v11510_v39, %v1580_v44  ;;  %v11516_v57 = vrot.slane %v11484_v36, 9  ;;  %v1604_v54 = vrot.slane %v14263_v58, 5  ;;  %v11513_v45 = vrot.slane %v11481_v17, 9  ;;  %v11485_v58 = vld [vmem:[%s13560_s30 + $0xa8] sm:$0xe] }
  0xe4   : > { %20264 = vst [vmem:[#allocation18_spill] sm:$0xff] %v14523_v18  ;;  %7329 = vrot.lane.b32.xlu0 %v12511_v19, %s20194_s8  ;;  %v12513_v13 = vcombine.low %v1577_v3, %v1581_v34  ;;  %v1601_v50 = vsel %vm13804_vm5, %v11515_v61, %v1600_v4  ;;  %v1592_v38 = vrot.slane %v14277_v49, 5  ;;  %v11514_v21 = vrot.slane %v11482_v12, 9  ;;  %v11486_v39 = vld [vmem:[%s13560_s30 + $0xb0] sm:$0xe] }
  0xe5   : > { %v14528_v20 = vpop.permute.xlu0 %7001  ;;  %v1596_v19 = vrot.slane %v14280_v5, 5  ;;  %v1605_v35 = vsel %vm13804_vm5, %v11516_v57, %v1604_v54  ;;  %v11519_v16 = vrot.slane %v11487_v2, 9  ;;  %v1616_v41 = vrot.slane %v14289_v6, 5  ;;  %v11491_v5 = vld [vmem:[%s13560_s30 + $0xd8] sm:$0xe] }
  0xe6   : > { %20265 = vst [vmem:[#allocation21_spill] sm:$0xff] %v14528_v20  ;;  %7335 = vrot.lane.b32.xlu1 %v12514_v15, %s20194_s8  ;;  %v1593_v51 = vsel %vm13804_vm5, %v11513_v45, %v1592_v38  ;;  %v12516_v49 = vcombine.low %v1601_v50, %v1605_v35  ;;  %v11520_v15 = vrot.slane %v11488_v59, 9  ;;  %v1620_v6 = vrot.slane %v14306_v23, 5  ;;  %v11489_v23 = vld [vmem:[%s13560_s30 + $0xc8] sm:$0xe] }
  0xe7   : > { %v14544_v63 = vpop.permute.xlu1 %7059  ;;  %v1597_v36 = vsel %vm13804_vm5, %v11514_v21, %v1596_v19  ;;  %v1617_v17 = vsel %vm13804_vm5, %v11519_v16, %v1616_v41  ;;  %v11517_v3 = vrot.slane %v11485_v58, 9  ;;  %v1608_v34 = vrot.slane %v14312_v0, 5  ;;  %v11490_v54 = vld [vmem:[%s13560_s30 + $0xd0] sm:$0xe]  ;;  %v11495_v21 = vld [vmem:[%s13560_s30 + $0x108] sm:$0xe] }
  0xe8   : > { %20266 = vst [vmem:[#allocation19_spill] sm:$0xff] %v14544_v63  ;;  %7333 = vrot.lane.b32.xlu0 %v12513_v13, %s20194_s8  ;;  %v12515_v61 = vcombine.low %v1593_v51, %v1597_v36  ;;  %v11518_v4 = vrot.slane %v11486_v39, 9  ;;  %v1612_v12 = vrot.slane %v14323_v43, 5  ;;  %v11492_v13 = vld [vmem:[%s13560_s30 + $0xe0] sm:$0xe]  ;;  %v1621_v57 = vsel %vm13804_vm5, %v11520_v15, %v1620_v6 }
  0xe9   : > { %v14547_v40 = vpop.permute.xlu0 %7053  ;;  %v11523_v2 = vrot.slane %v11491_v5, 9  ;;  %v1632_v50 = vrot.slane %v14337_v62, 5  ;;  %v12518_v38 = vcombine.low %v1617_v17, %v1621_v57  ;;  %v1609_v0 = vsel %vm13804_vm5, %v11517_v3, %v1608_v34  ;;  %v11496_v51 = vld [vmem:[%s13560_s30 + $0x110] sm:$0xe]  ;;  %v11558_v63 = vld [vmem:[%s13560_s30 + $0x108] sm:$0xf] }
  0xea   : > { %20267 = vst [vmem:[#allocation20_spill] sm:$0xff] %v14547_v40  ;;  %7339 = vrot.lane.b32.xlu1 %v12516_v49, %s20194_s8  ;;  %v1613_v43 = vsel %vm13804_vm5, %v11518_v4, %v1612_v12  ;;  %v11524_v35 = vrot.slane %v11492_v13, 9  ;;  %v1636_v16 = vrot.slane %v14346_v9, 5  ;;  %v11521_v41 = vrot.slane %v11489_v23, 9  ;;  %v11493_v49 = vld [vmem:[%s13560_s30 + $0xf8] sm:$0xe] }
  0xeb   : > { %v14564_v44 = vpop.permute.xlu1 %7063  ;;  %v12517_v59 = vcombine.low %v1609_v0, %v1613_v43  ;;  %v1633_v62 = vsel %vm13804_vm5, %v11523_v2, %v1632_v50  ;;  %v1624_v58 = vrot.slane %v14362_v55, 5  ;;  %v11522_v39 = vrot.slane %v11490_v54, 9  ;;  %v11499_v13 = vld [vmem:[%s13560_s30 + $0x128] sm:$0xe]  ;;  %v11497_v54 = vld [vmem:[%s13560_s30 + $0x118] sm:$0xe] }
  0xec   : > { %20268 = vst [vmem:[#allocation22_spill] sm:$0xff] %v14564_v44  ;;  %7337 = vrot.lane.b32.xlu0 %v12515_v61, %s20194_s8  ;;  %v1628_v36 = vrot.slane %v14374_v24, 5  ;;  %v11527_v5 = vrot.slane %v11495_v21, 9  ;;  %v11494_v61 = vld [vmem:[%s13560_s30 + $0x100] sm:$0xe]  ;;  %v1637_v15 = vsel %vm13804_vm5, %v11524_v35, %v1636_v16  ;;  %v1648_v55 = vrot.slane %v14390_v32, 5 }
  0xed   : > { %v14569_v42 = vpop.permute.xlu0 %7057  ;;  %v1625_v9 = vsel %vm13804_vm5, %v11521_v41, %v1624_v58  ;;  %v11528_v6 = vrot.slane %v11496_v51, 9  ;;  %v12520_v34 = vcombine.low %v1633_v62, %v1637_v15  ;;  %v1652_v4 = vrot.slane %v14399_v31, 5  ;;  %v11500_v32 = vld [vmem:[%s13560_s30 + $0x130] sm:$0xe]  ;;  %v11498_v43 = vld [vmem:[%s13560_s30 + $0x120] sm:$0xe] }
  0xee   : > { %20269 = vst [vmem:[#allocation26_spill] sm:$0xff] %v14569_v42  ;;  %7343 = vrot.lane.b32.xlu1 %v12518_v38, %s20194_s8  ;;  %v1629_v24 = vsel %vm13804_vm5, %v11522_v39, %v1628_v36  ;;  %v11525_v12 = vrot.slane %v11493_v49, 9  ;;  %v1649_v2 = vsel %vm13804_vm5, %v11527_v5, %v1648_v55  ;;  %v1640_v50 = vrot.slane %v14406_v8, 5 }
  0xef   : > { %v14584_v45 = vpop.permute.xlu1 %7067  ;;  %v12519_v57 = vcombine.low %v1625_v9, %v1629_v24  ;;  %v11526_v23 = vrot.slane %v11494_v61, 9  ;;  %v1653_v38 = vsel %vm13804_vm5, %v11528_v6, %v1652_v4  ;;  %v1644_v0 = vrot.slane %v14415_v28, 5  ;;  %v14651_v9 = vld [vmem:[%s13560_s30 + $0x28] sm:$0xf]  ;;  %v14658_v6 = vld [vmem:[%s13560_s30 + $0x10] sm:$0xf] }
  0xf0   : > { %20270 = vst [vmem:[#allocation27_spill] sm:$0xff] %v14584_v45  ;;  %7341 = vrot.lane.b32.xlu0 %v12517_v59, %s20194_s8  ;;  %v12522_v21 = vcombine.low %v1649_v2, %v1653_v38  ;;  %v1641_v59 = vsel %vm13804_vm5, %v11525_v12, %v1640_v50  ;;  %v11531_v8 = vrot.slane %v11499_v13, 9  ;;  %v1664_v62 = vrot.slane %v14433_v7, 5  ;;  %v11540_v2 = vld [vmem:[%s13560_s30 + $0x48] sm:$0xf] }
  0xf1   : > { %v14591_v19 = vpop.permute.xlu0 %7061  ;;  %v1645_v51 = vsel %vm13804_vm5, %v11526_v23, %v1644_v0  ;;  %v11532_v28 = vrot.slane %v11500_v32, 9  ;;  %v1668_v16 = vrot.slane %v14438_v30, 5  ;;  %v11529_v41 = vrot.slane %v11497_v54, 9  ;;  %v11537_v23 = vld [vmem:[%s13560_s30 + $0x30] sm:$0xf] }
  0xf2   : > { %20271 = vst [vmem:[#allocation28_spill] sm:$0xff] %v14591_v19  ;;  %7347 = vrot.lane.b32.xlu1 %v12520_v34, %s20194_s8  ;;  %v12521_v58 = vcombine.low %v1641_v59, %v1645_v51  ;;  %v1665_v39 = vsel %vm13804_vm5, %v11531_v8, %v1664_v62  ;;  %v1656_v49 = vrot.slane %v14443_v47, 5  ;;  %v11530_v7 = vrot.slane %v11498_v43, 9  ;;  %v11535_v47 = vld [vmem:[%s13560_s30 + $0x20] sm:$0xf] }
  0xf3   : > { %v14603_v17 = vpop.permute.xlu1 %7071  ;;  %v1669_v36 = vsel %vm13804_vm5, %v11532_v28, %v1668_v16  ;;  %v1660_v5 = vrot.slane %v14450_v14, 5  ;;  %v14661_v34 = vld [vmem:[%s13560_s30 + $0x18] sm:$0xf]  ;;  %v12526_v4 = vcombine.low %v11535_v47, %v14651_v9  ;;  %v1836_v8 = vshrl.u32 %v11540_v2, 16  ;;  %v14683_v51 = vld [vmem:[%s13560_s30 + $0x70] sm:$0xf] }
  0xf4   : > { %20272 = vst [vmem:[#allocation29_spill] sm:$0xff] %v14603_v17  ;;  %7345 = vrot.lane.b32.xlu0 %v12519_v57, %s20194_s8  ;;  %v12524_v30 = vcombine.low %v1665_v39, %v1669_v36  ;;  %v1657_v15 = vsel %vm13804_vm5, %v11529_v41, %v1656_v49  ;;  %v12525_v13 = vcombine.low %v14658_v6, %v14661_v34  ;;  %v11539_v57 = vld [vmem:[%s13560_s30 + $0x40] sm:$0xf]  ;;  %v11538_v32 = vld [vmem:[%s13560_s30 + $0x38] sm:$0xf]  ;;  %v1839_v62 = vshll.u32 %v11540_v2, 16 }
  0xf5   : > { %v14610_v3 = vpop.permute.xlu0 %7065  ;;  %v1661_v14 = vsel %vm13804_vm5, %v11530_v7, %v1660_v5  ;;  %v12528_v54 = vcombine.low %v11539_v57, %v11540_v2  ;;  %v1822_v0 = vshrl.u32 %v11539_v57, 16  ;;  %v1825_v43 = vshll.u32 %v11539_v57, 16  ;;  %v14767_v45 = vld [vmem:[%s13560_s30 + $0xc8] sm:$0xf] }
  0xf6   : > { %20273 = vst [vmem:[#allocation30_spill] sm:$0xff] %v14610_v3  ;;  %7351 = vrot.lane.b32.xlu1 %v12522_v21, %s20194_s8  ;;  %v12523_v24 = vcombine.low %v1657_v15, %v1661_v14  ;;  %v12527_v59 = vcombine.low %v11537_v23, %v11538_v32  ;;  %v1766_v28 = vshrl.u32 %v11535_v47, 16  ;;  %v1794_v16 = vshrl.u32 %v11537_v23, 16 }
  0xf7   : > { %v14626_v31 = vpop.permute.xlu1 %7075  ;;  %v1797_v41 = vshll.u32 %v11537_v23, 16  ;;  %v1769_v49 = vshll.u32 %v11535_v47, 16  ;;  %v1780_v7 = vshrl.u32 %v14651_v9, 16  ;;  %v1824_v36 = vrot.slane %v1822_v0, 4  ;;  %v14703_v47 = vld [vmem:[%s13560_s30 + $0x68] sm:$0xf] }
  0xf8   : > { %20274 = vst [vmem:[#allocation31_spill] sm:$0xff] %v14626_v31  ;;  %7349 = vrot.lane.b32.xlu0 %v12521_v58, %s20194_s8  ;;  %v14687_v58 = vld [vmem:[%s13560_s30 + $0x78] sm:$0xf]  ;;  %v1827_v5 = vrot.slane %v1825_v43, 5  ;;  %v1783_v14 = vshll.u32 %v14651_v9, 16  ;;  %v1755_v57 = vshll.u32 %v14661_v34, 16 }
  0xf9   : > { %v14632_v35 = vpop.permute.xlu0 %7069  ;;  %v14706_v2 = vrot.slane %v1836_v8, 4  ;;  %v14708_v23 = vrot.slane %v1839_v62, 5  ;;  %v14712_v9 = vrot.slane %v1794_v16, 4  ;;  %v14714_v0 = vrot.slane %v1797_v41, 5  ;;  %v11547_v8 = vld [vmem:[%s13560_s30 + $0x90] sm:$0xf] }
  0xfa   : > { %20275 = vst [vmem:[#allocation32_spill] sm:$0xff] %v14632_v35  ;;  %7355 = vrot.lane.b32.xlu1 %v12524_v30, %s20194_s8  ;;  %v14694_v30 = vld [vmem:[%s13560_s30 + $0x60] sm:$0xf]  ;;  %v1811_v43 = vshll.u32 %v11538_v32, 16  ;;  %v1828_v29 = vor.u32 %v1827_v5, %v1824_v36  ;;  %v14726_v16 = vrot.slane %v1769_v49, 5  ;;  %v14728_v41 = vrot.slane %v1780_v7, 4 }
  0xfb   : > { %v14644_v61 = vpop.permute.xlu1 %7079  ;;  %v1842_v20 = vor.u32 %v14708_v23, %v14706_v2  ;;  %v1800_v49 = vor.u32 %v14714_v0, %v14712_v9  ;;  %v11546_v2 = vld [vmem:[%s13560_s30 + $0x88] sm:$0xf]  ;;  %v1895_v9 = vshll.u32 %v14687_v58, 16  ;;  %v1850_v0 = vshrl.u32 %v14694_v30, 16 }
  0xfc   : > { %20276 = vst [vmem:[#allocation33_spill] sm:$0xff] %v14644_v61  ;;  %7353 = vrot.lane.b32.xlu0 %v12523_v24, %s20194_s8  ;;  %v1738_v24 = vshrl.u32 %v14658_v6, 16  ;;  %v11545_v61 = vld [vmem:[%s13560_s30 + $0x80] sm:$0xf]  ;;  %v2088_v18 = vshrl.u32 %v11558_v63, 16  ;;  %v2091_v37 = vshll.u32 %v11558_v63, 16 }
  0xfd   : > { %v14653_v55 = vpop.permute.xlu0 %7073  ;;  %v12531_v17 = vcombine.low %v11545_v61, %v11546_v2  ;;  %v1906_v33 = vshrl.u32 %v11545_v61, 16  ;;  %v1852_v25 = vrot.slane %v1850_v0, 4 }
  0xfe   : > { %20277 = vst [vmem:[#allocation34_spill] sm:$0xff] %v14653_v55  ;;  %7439 = vrot.lane.b32.xlu1 %v12526_v4, %s20200_s9  ;;  %v1741_v4 = vshll.u32 %v14658_v6, 16  ;;  %v1808_v6 = vshrl.u32 %v11538_v32, 16  ;;  %v14732_v32 = vrot.slane %v1738_v24, 4  ;;  %v1878_v24 = vshrl.u32 %v14683_v51, 16 }
  0xff   : > { %v14665_v12 = vpop.permute.xlu1 %7083  ;;  %v1908_v0 = vrot.slane %v1906_v33, 4 }
 0x100   : > { %20278 = vst [vmem:[#allocation35_spill] sm:$0xff] %v14665_v12  ;;  %7437 = vrot.lane.b32.xlu0 %v12525_v13, %s20200_s9  ;;  %v1752_v13 = vshrl.u32 %v14661_v34, 16  ;;  %v14718_v12 = vrot.slane %v1766_v28, 4  ;;  %v12529_v34 = vcombine.low %v14694_v30, %v14703_v47  ;;  %v11548_v28 = vld [vmem:[%s13560_s30 + $0x98] sm:$0xf]  ;;  %v14735_v36 = vrot.slane %v1741_v4, 5 }
 0x101   : > { %v14672_v50 = vpop.permute.xlu0 %7077  ;;  %v1810_v7 = vrot.slane %v1808_v6, 4  ;;  %v14750_v4 = vrot.slane %v1828_v29, 4  ;;  %v1853_v6 = vshll.u32 %v14694_v30, 16  ;;  %v1867_v29 = vshll.u32 %v14703_v47, 16 }
 0x102   : > { %20279 = vst [vmem:[#allocation36_spill] sm:$0xff] %v14672_v50  ;;  %7443 = vrot.lane.b32.xlu1 %v12528_v54, %s20200_s9  ;;  %v12530_v54 = vcombine.low %v14683_v51, %v14687_v58  ;;  %v14737_v5 = vrot.slane %v1752_v13, 4  ;;  %v1881_v13 = vshll.u32 %v14683_v51, 16  ;;  %v12532_v50 = vcombine.low %v11547_v8, %v11548_v28 }
 0x103   : > { %v14677_v38 = vpop.permute.xlu1 %7167  ;;  %v1937_v51 = vshll.u32 %v11547_v8, 16  ;;  %v1948_v1 = vshrl.u32 %v11548_v28, 16  ;;  %v1880_v55 = vrot.slane %v1878_v24, 4  ;;  %v1951_v60 = vshll.u32 %v11548_v28, 16 }
 0x104   : > { %20280 = vst [vmem:[#allocation37_spill] sm:$0xff] %v14677_v38  ;;  %7441 = vrot.lane.b32.xlu0 %v12527_v59, %s20200_s9  ;;  %v1883_v35 = vrot.slane %v1881_v13, 5  ;;  %v1869_v28 = vrot.slane %v1867_v29, 5  ;;  %v14781_v29 = vrot.slane %v1842_v20, 4  ;;  %v11555_v20 = vld [vmem:[%s13560_s30 + $0xe0] sm:$0xf] }
 0x105   : > { %v14680_v21 = vpop.permute.xlu0 %7081  ;;  %v1939_v24 = vrot.slane %v1937_v51, 5  ;;  %v1953_v13 = vrot.slane %v1951_v60, 5 }
 0x106   : > { %20281 = vst [vmem:[#allocation38_spill] sm:$0xff] %v14680_v21  ;;  %7447 = vrot.lane.b32.xlu1 %v12530_v54, %s20200_s9  ;;  %v14730_v21 = vrot.slane %v1783_v14, 5  ;;  %v14739_v54 = vrot.slane %v1755_v57, 5  ;;  %v1813_v14 = vrot.slane %v1811_v43, 5  ;;  %v1892_v57 = vshrl.u32 %v14687_v58, 16 }
 0x107   : > { %v14689_v39 = vpop.permute.xlu1 %7171  ;;  %v1864_v43 = vshrl.u32 %v14703_v47, 16 }
 0x108   : > { %20282 = vst [vmem:[#allocation39_spill] sm:$0xff] %v14689_v39  ;;  %7445 = vrot.lane.b32.xlu0 %v12529_v34, %s20200_s9  ;;  %v1934_v34 = vshrl.u32 %v11547_v8, 16  ;;  %v1814_v31 = vor.u32 %v1813_v14, %v1810_v7  ;;  %v1894_v30 = vrot.slane %v1892_v57, 4  ;;  %v1897_v8 = vrot.slane %v1895_v9, 5 }
 0x109   : > { %v14696_v15 = vpop.permute.xlu0 %7165  ;;  %v1866_v7 = vrot.slane %v1864_v43, 4  ;;  %v1920_v57 = vshrl.u32 %v11546_v2, 16  ;;  %v1884_v9 = vor.u32 %v1883_v35, %v1880_v55  ;;  %v1990_v43 = vshrl.u32 %v11551_v10, 16 }
 0x10a   : > { %20283 = vst [vmem:[#allocation40_spill] sm:$0xff] %v14696_v15  ;;  %7451 = vrot.lane.b32.xlu1 %v12532_v50, %s20200_s9  ;;  %v1855_v50 = vrot.slane %v1853_v6, 5  ;;  %v1936_v14 = vrot.slane %v1934_v34, 4  ;;  %v14785_v60 = vrot.slane %v1814_v31, 4  ;;  %v1898_v34 = vor.u32 %v1897_v8, %v1894_v30 }
 0x10b   : > { %v14716_v59 = vpop.permute.xlu1 %7175  ;;  %v14789_v55 = vrot.slane %v1920_v57, 4  ;;  %v14797_v31 = vrot.slane %v1884_v9, 4 }
 0x10c   : > { %20284 = vst [vmem:[#allocation41_spill] sm:$0xff] %v14716_v59  ;;  %7449 = vrot.lane.b32.xlu0 %v12531_v17, %s20200_s9  ;;  %v1923_v59 = vshll.u32 %v11546_v2, 16  ;;  %v1993_v2 = vshll.u32 %v11551_v10, 16  ;;  %v1856_v51 = vor.u32 %v1855_v50, %v1852_v25  ;;  %v2004_v25 = vshrl.u32 %v14767_v45, 16 }
 0x10d   : > { %v14724_v62 = vpop.permute.xlu0 %7169 }
 0x10e   : > { %20285 = vst [vmem:[#allocation42_spill] sm:$0xff] %v14724_v62  ;;  %v14775_v62 = vld [vmem:[%s13560_s30 + $0xb8] sm:$0xf]  ;;  %v14805_v30 = vrot.slane %v1993_v2, 5 }
 0x10f   : > { %v14748_v52 = vpop.permute.xlu1 %7179  ;;  %v1979_v2 = vshll.u32 %v14775_v62, 16 }
 0x110   : > { %20286 = vst [vmem:[#allocation43_spill] sm:$0xff] %v14748_v52  ;;  %v1909_v52 = vshll.u32 %v11545_v61, 16  ;;  %v12534_v61 = vcombine.low %v11551_v10, %v14767_v45 }
 0x111   : > { %v14755_v23 = vpop.permute.xlu0 %7173 }
 0x112   : > { %20287 = vst [vmem:[#allocation44_spill] sm:$0xff] %v14755_v23  ;;  %v11549_v23 = vld [vmem:[%s13560_s30 + $0xb0] sm:$0xf]  ;;  %v1911_v6 = vrot.slane %v1909_v52, 5  ;;  %7455 = vrot.lane.b32.xlu1 %v12534_v61, %s20200_s9  ;;  %v1940_v52 = vor.u32 %v1939_v24, %v1936_v14  ;;  %v14799_v61 = vrot.slane %v1990_v43, 4 }
 0x113   : > { %v14764_v58 = vpop.permute.xlu1 %7183  ;;  %v12533_v33 = vcombine.low %v11549_v23, %v14775_v62  ;;  %v1962_v8 = vshrl.u32 %v11549_v23, 16  ;;  %v1965_v50 = vshll.u32 %v11549_v23, 16 }
 0x114   : > { %20288 = vst [vmem:[#allocation45_spill] sm:$0xff] %v14764_v58  ;;  %v1950_v58 = vrot.slane %v1948_v1, 4  ;;  %v14783_v1 = vrot.slane %v1800_v49, 4  ;;  %v1912_v10 = vor.u32 %v1911_v6, %v1908_v0  ;;  %v14815_v57 = vrot.slane %v1940_v52, 4  ;;  %v11554_v6 = vld [vmem:[%s13560_s30 + $0xd8] sm:$0xf] }
 0x115   : > { %v14769_v47 = vpop.permute.xlu0 %7177  ;;  %7453 = vrot.lane.b32.xlu0 %v12533_v33, %s20200_s9  ;;  %v14837_v52 = vrot.slane %v1962_v8, 4  ;;  %v2032_v15 = vshrl.u32 %v11554_v6, 16 }
 0x116   : > { %20289 = vst [vmem:[#allocation46_spill] sm:$0xff] %v14769_v47  ;;  %v1954_v35 = vor.u32 %v1953_v13, %v1950_v58  ;;  %v14791_v47 = vrot.slane %v1923_v59, 5  ;;  %v2007_v59 = vshll.u32 %v14767_v45, 16  ;;  %v11553_v13 = vld [vmem:[%s13560_s30 + $0xd0] sm:$0xf]  ;;  %v1976_v45 = vshrl.u32 %v14775_v62, 16 }
 0x117   : > { %v14777_v39 = vpop.permute.xlu1 %7187  ;;  %v14825_v43 = vrot.slane %v1912_v10, 4  ;;  %v2049_v10 = vshll.u32 %v11555_v20, 16  ;;  %v11560_v62 = vld [vmem:[%s13560_s30 + $0x118] sm:$0xf] }
 0x118   : > { %20290 = vst [vmem:[#allocation47_spill] sm:$0xff] %v14777_v39  ;;  %v1870_v39 = vor.u32 %v1869_v28, %v1866_v7  ;;  %v14808_v7 = vrot.slane %v1898_v34, 4  ;;  %v14810_v28 = vrot.slane %v1856_v51, 4  ;;  %v14817_v9 = vrot.slane %v1954_v35, 4 }
 0x119   : > { %v14779_v17 = vpop.permute.xlu0 %7181  ;;  %v1926_v0 = vor.u32 %v14791_v47, %v14789_v55  ;;  %v2046_v34 = vshrl.u32 %v11555_v20, 16  ;;  %v1996_v47 = vor.u32 %v14805_v30, %v14799_v61  ;;  %v14835_v33 = vrot.slane %v2007_v59, 5  ;;  %v11559_v55 = vld [vmem:[%s13560_s30 + $0x110] sm:$0xf] }
 0x11a   : > { %20291 = vst [vmem:[#allocation48_spill] sm:$0xff] %v14779_v17  ;;  %v11556_v17 = vld [vmem:[%s13560_s30 + $0xe8] sm:$0xf]  ;;  %v14812_v14 = vrot.slane %v1870_v39, 4  ;;  %v14827_v39 = vrot.slane %v2004_v25, 4  ;;  %v14839_v35 = vrot.slane %v1965_v50, 5  ;;  %v12538_v19 = vcombine.low %v11559_v55, %v11560_v62 }
 0x11b   : > { %v14795_v49 = vpop.permute.xlu1 %7191  ;;  %v12536_v24 = vcombine.low %v11555_v20, %v11556_v17  ;;  %v2060_v25 = vshrl.u32 %v11556_v17, 16  ;;  %v1981_v61 = vrot.slane %v1979_v2, 5  ;;  %v2048_v30 = vrot.slane %v2046_v34, 4 }
 0x11c   : > { %20292 = vst [vmem:[#allocation49_spill] sm:$0xff] %v14795_v49  ;;  %v12535_v49 = vcombine.low %v11553_v13, %v11554_v6  ;;  %v2035_v59 = vshll.u32 %v11554_v6, 16  ;;  %v2102_v8 = vshrl.u32 %v11559_v55, 16  ;;  %v2116_v38 = vshrl.u32 %v11560_v62, 16 }
 0x11d   : > { %v14803_v58 = vpop.permute.xlu0 %7185  ;;  %7459 = vrot.lane.b32.xlu1 %v12536_v24, %s20200_s9  ;;  %v2018_v24 = vshrl.u32 %v11553_v13, 16  ;;  %v2119_v3 = vshll.u32 %v11560_v62, 16  ;;  %v2051_v44 = vrot.slane %v2049_v10, 5 }
 0x11e   : > { %20293 = vst [vmem:[#allocation50_spill] sm:$0xff] %v14803_v58  ;;  %v14843_v58 = vrot.slane %v1976_v45, 4  ;;  %7457 = vrot.lane.b32.xlu0 %v12535_v49, %s20200_s9  ;;  %v11557_v45 = vld [vmem:[%s13560_s30 + $0x100] sm:$0xf]  ;;  %v2034_v49 = vrot.slane %v2032_v15, 4  ;;  %v2037_v40 = vrot.slane %v2035_v59, 5  ;;  %v1968_v15 = vor.u32 %v14839_v35, %v14837_v52 }
 0x11f   : > { %v14823_v23 = vpop.permute.xlu1 %7195  ;;  %v2074_v2 = vshrl.u32 %v11557_v45, 16  ;;  %v2020_v6 = vrot.slane %v2018_v24, 4  ;;  %v2118_v10 = vrot.slane %v2116_v38, 4  ;;  %v2010_v24 = vor.u32 %v14835_v33, %v14827_v39 }
 0x120   : > { %20294 = vst [vmem:[#allocation51_spill] sm:$0xff] %v14823_v23  ;;  %v2063_v23 = vshll.u32 %v11556_v17, 16  ;;  %v2105_v17 = vshll.u32 %v11559_v55, 16  ;;  %v2052_v38 = vor.u32 %v2051_v44, %v2048_v30  ;;  %v2093_v39 = vrot.slane %v2091_v37, 5 }
 0x121   : > { %v14831_v51 = vpop.permute.xlu0 %7189  ;;  %7463 = vrot.lane.b32.xlu1 %v12538_v19, %s20200_s9  ;;  %v2076_v19 = vrot.slane %v2074_v2, 4  ;;  %v12540_v33 = vcombine.low %v11563_v26, %v11564_v46  ;;  %v14869_v52 = vrot.slane %v1996_v47, 4  ;;  %v2038_v35 = vor.u32 %v2037_v40, %v2034_v49 }
 0x122   : > { %20295 = vst [vmem:[#allocation52_spill] sm:$0xff] %v14831_v51  ;;  %v2021_v51 = vshll.u32 %v11553_v13, 16  ;;  %v2062_v13 = vrot.slane %v2060_v25, 4  ;;  %v2065_v42 = vrot.slane %v2063_v23, 5  ;;  %v2107_v62 = vrot.slane %v2105_v17, 5 }
 0x123   : > { %v14848_v20 = vpop.permute.xlu1 %7247  ;;  %v2121_v25 = vrot.slane %v2119_v3, 5  ;;  %v12537_v23 = vcombine.low %v11557_v45, %v11558_v63  ;;  %v1982_v17 = vor.u32 %v1981_v61, %v14843_v58  ;;  %v14875_v58 = vld [vmem:[%s13560_s30 + $0x128] sm:$0xf]  ;;  %v14877_v44 = vrot.slane %v2010_v24, 4 }
 0x124   : > { %20297 = vst [vmem:[#allocation54_spill] sm:$0xff] %v14848_v20  ;;  %v2023_v34 = vrot.slane %v2021_v51, 5  ;;  %v2104_v20 = vrot.slane %v2102_v8, 4  ;;  %v14863_v8 = vrot.slane %v1926_v0, 4  ;;  %v2066_v3 = vor.u32 %v2065_v42, %v2062_v13  ;;  %v14872_v0 = vld [vmem:[%s13560_s30 + $0x120] sm:$0xf] }
 0x125   : > { %v14846_v50 = vpop.permute.xlu0 %7193  ;;  %7461 = vrot.lane.b32.xlu0 %v12537_v23, %s20200_s9  ;;  %v2122_v2 = vor.u32 %v2121_v25, %v2118_v10  ;;  %v14879_v42 = vrot.slane %v1968_v15, 4  ;;  %v2158_v37 = vshrl.u32 %v11563_v26, 16  ;;  %7467 = vrot.lane.b32.xlu1 %v12540_v33, %s20200_s9  ;;  %v14882_v61 = vrot.slane %v1982_v17, 4  ;;  %v14926_v33 = vld [vmem:[%s13560_s30 + $0x1c] sm:$0x1] }
 0x126   : > { %20296 = vst [vmem:[#allocation53_spill] sm:$0xff] %v14846_v50  ;;  %v2077_v50 = vshll.u32 %v11557_v45, 16  ;;  %v2024_v63 = vor.u32 %v2023_v34, %v2020_v6  ;;  %v2090_v45 = vrot.slane %v2088_v18, 4  ;;  %v14884_v47 = vrot.slane %v2052_v38, 4 }
 0x127   : > { %v14861_v59 = vpop.permute.xlu1 %7251  ;;  %v14886_v40 = vrot.slane %v2066_v3, 4  ;;  %v2161_v30 = vshll.u32 %v11563_v26, 16  ;;  %v2172_v34 = vshrl.u32 %v11564_v46, 16  ;;  %v12539_v49 = vcombine.low %v14872_v0, %v14875_v58  ;;  %v14917_v3 = vld [vmem:[%s13560_s30 + $0x14] sm:$0x1] }
 0x128   : > { %v2079_v51 = vrot.slane %v2077_v50, 5  ;;  %20299 = vst [vmem:[#allocation56_spill] sm:$0xff] %v14861_v59  ;;  %v2108_v50 = vor.u32 %v2107_v62, %v2104_v20  ;;  %v14889_v20 = vld [vmem:[%s13560_s30 + $0x24] sm:$0x1]  ;;  %v14891_v13 = vrot.slane %v2024_v63, 4  ;;  %v2094_v6 = vor.u32 %v2093_v39, %v2090_v45 }
 0x129   : > { %v14854_v55 = vpop.permute.xlu0 %7245  ;;  %v14896_v62 = vld [vmem:[%s13560_s30 + $0x2c] sm:$0x1]  ;;  %v14900_v25 = vrot.slane %v2038_v35, 4  ;;  %v14904_v26 = vrot.slane %v2122_v2, 4  ;;  %v2175_v24 = vshll.u32 %v11564_v46, 16  ;;  %7465 = vrot.lane.b32.xlu0 %v12539_v49, %s20200_s9  ;;  %v1772_v17 = vor.u32 %v14726_v16, %v14718_v12 }
 0x12a   : > { %20298 = vst [vmem:[#allocation55_spill] sm:$0xff] %v14854_v55  ;;  %v2080_v18 = vor.u32 %v2079_v51, %v2076_v19  ;;  %v14902_v23 = vrot.slane %v2108_v50, 4  ;;  %v14910_v51 = vrot.slane %v2158_v37, 4  ;;  %v1775_v38 = vshll.u32 %v14889_v20, 16  ;;  %v14943_v49 = vld [vmem:[%s13560_s30 + $0x44] sm:$0x1] }
 0x12b   : > { %v14919_v63 = vrot.slane %v2161_v30, 5  ;;  %v2130_v45 = vshrl.u32 %v14872_v0, 16  ;;  %v1786_v46 = vor.u32 %v14730_v21, %v14728_v41  ;;  %v1789_v39 = vshll.u32 %v14896_v62, 16 }
 0x12c   : > { %v14908_v19 = vrot.slane %v2080_v18, 4  ;;  %v14928_v35 = vrot.slane %v2094_v6, 4  ;;  %v14930_v12 = vrot.slane %v2172_v34, 4  ;;  %v1773_v16 = vrot.slane %v1772_v17, 4 }
 0x12d   : > { %v14867_v55 = vpop.permute.xlu0 %7249  ;;  %v14898_v10 = vpop.permute.xlu1 %7255  ;;  %v1777_v50 = vrot.slane %v1775_v38, 5  ;;  %v14932_v2 = vrot.slane %v2175_v24, 5  ;;  %v1787_v18 = vrot.slane %v1786_v46, 4  ;;  %v1791_v37 = vrot.slane %v1789_v39, 5  ;;  %v14946_v24 = vld [vmem:[%s13560_s30 + $0x4c] sm:$0x1] }
 0x12e   : > { %20300 = vst [vmem:[#allocation57_spill] sm:$0xff] %v14867_v55  ;;  %20301 = vst [vmem:[#allocation58_spill] sm:$0xff] %v14898_v10  ;;  %v1744_v21 = vor.u32 %v14735_v36, %v14732_v32  ;;  %v1747_v30 = vshll.u32 %v14917_v3, 16  ;;  %v1758_v6 = vor.u32 %v14739_v54, %v14737_v5  ;;  %v1761_v34 = vshll.u32 %v14926_v33, 16  ;;  %v14956_v39 = vld [vmem:[%s13560_s30 + $0x34] sm:$0x1] }
 0x12f   : > { %v1778_v41 = vsel %vm13584_vm2, %v1773_v16, %v1777_v50  ;;  %v2164_v32 = vor.u32 %v14919_v63, %v14910_v51  ;;  %v2133_v36 = vshll.u32 %v14872_v0, 16  ;;  %v1792_v38 = vsel %vm13584_vm2, %v1787_v18, %v1791_v37  ;;  %v14959_v5 = vld [vmem:[%s13560_s30 + $0x3c] sm:$0x1]  ;;  %v14969_v18 = vld [vmem:[%s13560_s30 + $0x74] sm:$0x1] }
 0x130   : > { %v1745_v46 = vrot.slane %v1744_v21, 4  ;;  %v12542_v16 = vcombine.low %v1778_v41, %v1792_v38  ;;  %v1749_v50 = vrot.slane %v1747_v30, 5  ;;  %v14963_v10 = vrot.slane %v2130_v45, 4  ;;  %v14979_v30 = vld [vmem:[%s13560_s30 + $0x7c] sm:$0x1] }
 0x131   : > { %v14906_v15 = vpop.permute.xlu0 %7253  ;;  %v2144_v0 = vshrl.u32 %v14875_v58, 16  ;;  %v1831_v51 = vshll.u32 %v14943_v49, 16  ;;  %v1845_v63 = vshll.u32 %v14946_v24, 16  ;;  %v1803_v45 = vshll.u32 %v14956_v39, 16  ;;  %v14989_v55 = vld [vmem:[%s13560_s30 + $0x6c] sm:$0x1] }
 0x132   : > { %20302 = vst [vmem:[#allocation59_spill] sm:$0xff] %v14906_v15  ;;  %v14948_v17 = vpop.permute.xlu1 %7259  ;;  %v1763_v15 = vrot.slane %v1761_v34, 5  ;;  %7519 = vrot.lane.b32.xlu1 %v12542_v16, %s13466_s10  ;;  %v1750_v37 = vsel %vm13584_vm2, %v1745_v46, %v1749_v50  ;;  %v1817_v41 = vshll.u32 %v14959_v5, 16  ;;  %v2147_v34 = vshll.u32 %v14875_v58, 16  ;;  %v15014_v46 = vld [vmem:[%s13560_s30 + $0x9c] sm:$0x1] }
 0x133   : > { %20303 = vst [vmem:[#allocation60_spill] sm:$0xff] %v14948_v17  ;;  %v1759_v17 = vrot.slane %v1758_v6, 4  ;;  %v14982_v6 = vld [vmem:[%s13560_s30 + $0x64] sm:$0x1]  ;;  %v1847_v16 = vrot.slane %v1845_v63, 5  ;;  %v1805_v50 = vrot.slane %v1803_v45, 5 }
 0x134   : > { %v1901_v63 = vshll.u32 %v14979_v30, 16 }
 0x135   : > { %v14961_v54 = vpop.permute.xlu0 %7257  ;;  %v1764_v21 = vsel %vm13584_vm2, %v1759_v17, %v1763_v15  ;;  %v1819_v15 = vrot.slane %v1817_v41, 5  ;;  %v1887_v17 = vshll.u32 %v14969_v18, 16 }
 0x136   : > { %20304 = vst [vmem:[#allocation61_spill] sm:$0xff] %v14961_v54  ;;  %v12541_v38 = vcombine.low %v1750_v37, %v1764_v21  ;;  %v1833_v54 = vrot.slane %v1831_v51, 5  ;;  %v1848_v51 = vsel %vm13584_vm2, %v14781_v29, %v1847_v16  ;;  %v1859_v37 = vshll.u32 %v14982_v6, 16  ;;  %v15003_v21 = vld [vmem:[%s13560_s30 + $0x94] sm:$0x1] }
 0x137   : > { %v15017_v29 = vld [vmem:[%s13560_s30 + $0x84] sm:$0x1] }
 0x138   : > { %v14991_v59 = vpop.permute.xlu1 %7263  ;;  %7517 = vrot.lane.b32.xlu0 %v12541_v38, %s13466_s10  ;;  %v1834_v58 = vsel %vm13584_vm2, %v14750_v4, %v1833_v54  ;;  %v1806_v38 = vsel %vm13584_vm2, %v14783_v1, %v1805_v50  ;;  %v1820_v4 = vsel %vm13584_vm2, %v14785_v60, %v1819_v15  ;;  %v1889_v54 = vrot.slane %v1887_v17, 5 }
 0x139   : > { %20305 = vst [vmem:[#allocation62_spill] sm:$0xff] %v14991_v59  ;;  %v12544_v41 = vcombine.low %v1834_v58, %v1848_v51  ;;  %v12543_v16 = vcombine.low %v1806_v38, %v1820_v4  ;;  %v1903_v59 = vrot.slane %v1901_v63, 5  ;;  %v1861_v22 = vrot.slane %v1859_v37, 5  ;;  %v15021_v51 = vld [vmem:[%s13560_s30 + $0x8c] sm:$0x1] }
 0x13a   : > { %v1873_v58 = vshll.u32 %v14989_v55, 16  ;;  %v15025_v1 = vrot.slane %v2133_v36, 5  ;;  %v1890_v60 = vsel %vm13584_vm2, %v14797_v31, %v1889_v54  ;;  %v1943_v50 = vshll.u32 %v15003_v21, 16  ;;  %v15041_v63 = vld [vmem:[%s13560_s30 + $0xc4] sm:$0x1] }
 0x13b   : > { %7523 = vrot.lane.b32.xlu1 %v12544_v41, %s13466_s10  ;;  %v1904_v15 = vsel %vm13584_vm2, %v14808_v7, %v1903_v59  ;;  %v1957_v17 = vshll.u32 %v15014_v46, 16  ;;  %v15044_v37 = vld [vmem:[%s13560_s30 + $0xcc] sm:$0x1]  ;;  %v1915_v38 = vshll.u32 %v15017_v29, 16  ;;  %v1929_v4 = vshll.u32 %v15021_v51, 16 }
 0x13c   : > { %v15005_v45 = vpop.permute.xlu0 %7261  ;;  %7521 = vrot.lane.b32.xlu0 %v12543_v16, %s13466_s10  ;;  %v1875_v36 = vrot.slane %v1873_v58, 5  ;;  %v12546_v31 = vcombine.low %v1890_v60, %v1904_v15  ;;  %v1945_v41 = vrot.slane %v1943_v50, 5  ;;  %v15049_v7 = vld [vmem:[%s13560_s30 + $0xb4] sm:$0x1]  ;;  %v15053_v54 = vrot.slane %v2144_v0, 4 }
 0x13d   : > { %20306 = vst [vmem:[#allocation63_spill] sm:$0xff] %v15005_v45  ;;  %v15023_v45 = vrot.slane %v2164_v32, 4  ;;  %v1862_v32 = vsel %vm13584_vm2, %v14810_v28, %v1861_v22  ;;  %v15055_v22 = vrot.slane %v2147_v34, 5  ;;  %v1959_v16 = vrot.slane %v1957_v17, 5  ;;  %v15061_v58 = vld [vmem:[%s13560_s30 + $0xbc] sm:$0x1] }
 0x13e   : > { %v1876_v28 = vsel %vm13584_vm2, %v14812_v14, %v1875_v36  ;;  %v1946_v0 = vsel %vm13584_vm2, %v14815_v57, %v1945_v41  ;;  %v1917_v15 = vrot.slane %v1915_v38, 5  ;;  %v15070_v34 = vld [vmem:[%s13560_s30 + $0xe4] sm:$0x1]  ;;  %v1999_v36 = vshll.u32 %v15041_v63, 16 }
 0x13f   : > { %v15051_v59 = vpop.permute.xlu1 %7267  ;;  %7527 = vrot.lane.b32.xlu1 %v12546_v31, %s13466_s10  ;;  %v12545_v50 = vcombine.low %v1862_v32, %v1876_v28  ;;  %v1960_v14 = vsel %vm13584_vm2, %v14817_v9, %v1959_v16  ;;  %v2013_v17 = vshll.u32 %v15044_v37, 16  ;;  %v1971_v31 = vshll.u32 %v15049_v7, 16  ;;  %v15079_v32 = vld [vmem:[%s13560_s30 + $0xec] sm:$0x1] }
 0x140   : > { %20307 = vst [vmem:[#allocation64_spill] sm:$0xff] %v15051_v59  ;;  %v1931_v59 = vrot.slane %v1929_v4, 5  ;;  %v12548_v57 = vcombine.low %v1946_v0, %v1960_v14  ;;  %v1918_v41 = vsel %vm13584_vm2, %v14825_v43, %v1917_v15  ;;  %v1985_v38 = vshll.u32 %v15061_v58, 16 }
 0x141   : > { %7525 = vrot.lane.b32.xlu0 %v12545_v50, %s13466_s10  ;;  %v2001_v28 = vrot.slane %v1999_v36, 5  ;;  %v2015_v16 = vrot.slane %v2013_v17, 5  ;;  %v2136_v50 = vor.u32 %v15025_v1, %v14963_v10  ;;  %v2055_v43 = vshll.u32 %v15070_v34, 16 }
 0x142   : > { %v15063_v60 = vpop.permute.xlu0 %7265  ;;  %v1932_v9 = vsel %vm13584_vm2, %v14863_v8, %v1931_v59  ;;  %v1987_v0 = vrot.slane %v1985_v38, 5  ;;  %v2069_v8 = vshll.u32 %v15079_v32, 16  ;;  %v15098_v59 = vld [vmem:[%s13560_s30 + $0xdc] sm:$0x1]  ;;  %v20310_v14 = vor.u32 %v14932_v2, %v14930_v12 }
 0x143   : > { %20308 = vst [vmem:[#allocation65_spill] sm:$0xff] %v15063_v60  ;;  %v12547_v4 = vcombine.low %v1918_v41, %v1932_v9  ;;  %v1973_v60 = vrot.slane %v1971_v31, 5  ;;  %7531 = vrot.lane.b32.xlu1 %v12548_v57, %s13466_s10  ;;  %v2002_v10 = vsel %vm13584_vm2, %v14869_v52, %v2001_v28  ;;  %v2016_v1 = vsel %vm13584_vm2, %v14877_v44, %v2015_v16  ;;  %v15117_v31 = vld [vmem:[%s13560_s30 + $0x114] sm:$0x1]  ;;  %v15128_v44 = vld [vmem:[%s13560_s30 + $0x11c] sm:$0x1] }
 0x144   : > { %v15105_v36 = vrot.slane %v20310_v14, 4  ;;  %v2150_v12 = vor.u32 %v15055_v22, %v15053_v54  ;;  %v12550_v2 = vcombine.low %v2002_v10, %v2016_v1  ;;  %v1988_v52 = vsel %vm13584_vm2, %v14882_v61, %v1987_v0  ;;  %v15131_v9 = vld [vmem:[%s13560_s30 + $0x104] sm:$0x1]  ;;  %v15136_v54 = vld [vmem:[%s13560_s30 + $0x10c] sm:$0x1] }
 0x145   : > { %v1974_v17 = vsel %vm13584_vm2, %v14879_v42, %v1973_v60  ;;  %7529 = vrot.lane.b32.xlu0 %v12547_v4, %s13466_s10  ;;  %v2057_v41 = vrot.slane %v2055_v43, 5  ;;  %v2071_v60 = vrot.slane %v2069_v8, 5  ;;  %v2027_v38 = vshll.u32 %v15090_v11, 16  ;;  %v15151_v14 = vld [vmem:[%s13560_s30 + $0x134] sm:$0x1] }
 0x146   : > { %v15100_v15 = vpop.permute.xlu1 %7271  ;;  %v12549_v42 = vcombine.low %v1974_v17, %v1988_v52  ;;  %v2041_v28 = vshll.u32 %v15098_v59, 16  ;;  %v15138_v22 = vrot.slane %v2136_v50, 4  ;;  %v2291_v4 = vrot.slane %v14889_v20, 5  ;;  %v15157_v17 = vld [vmem:[%s13560_s30 + $0x13c] sm:$0x1] }
 0x147   : > { %20309 = vst [vmem:[#allocation66_spill] sm:$0xff] %v15100_v15  ;;  %7535 = vrot.lane.b32.xlu1 %v12550_v2, %s13466_s10  ;;  %v2058_v61 = vsel %vm13584_vm2, %v14884_v47, %v2057_v41  ;;  %v2111_v16 = vshll.u32 %v15117_v31, 16  ;;  %v2072_v0 = vsel %vm13584_vm2, %v14886_v40, %v2071_v60  ;;  %v2029_v43 = vrot.slane %v2027_v38, 5  ;;  %v15169_v60 = vld [vmem:[%s13560_s30 + $0x124] sm:$0x1] }
 0x148   : > { %v15119_v57 = vpop.permute.xlu0 %7269  ;;  %v2043_v8 = vrot.slane %v2041_v28, 5  ;;  %v2125_v50 = vshll.u32 %v15128_v44, 16  ;;  %v12552_v20 = vcombine.low %v2058_v61, %v2072_v0  ;;  %v2083_v47 = vshll.u32 %v15131_v9, 16  ;;  %v11677_v15 = vld [vmem:[%s13560_s30 + $0xf0] sm:$0xf] }
 0x149   : > { %20311 = vst [vmem:[#allocation67_spill] sm:$0xff] %v15119_v57  ;;  %7533 = vrot.lane.b32.xlu0 %v12549_v42, %s13466_s10  ;;  %v2113_v10 = vrot.slane %v2111_v16, 5  ;;  %v2097_v1 = vshll.u32 %v15136_v54, 16  ;;  %v2295_v40 = vrot.slane %v14896_v62, 5  ;;  %v2030_v52 = vsel %vm13584_vm2, %v14891_v13, %v2029_v43  ;;  %v15178_v13 = vld [vmem:[%s13560_s30 + $0x12c] sm:$0x1] }
 0x14a   : > { %v2044_v41 = vsel %vm13584_vm2, %v14900_v25, %v2043_v8  ;;  %v2127_v42 = vrot.slane %v2125_v50, 5  ;;  %v2085_v61 = vrot.slane %v2083_v47, 5  ;;  %v2151_v0 = vrot.slane %v2150_v12, 4  ;;  %v11599_v50 = vld [vmem:[%s13560_s30 + $0x20] sm:$0xe] }
 0x14b   : > { %7539 = vrot.lane.b32.xlu1 %v12552_v20, %s13466_s10  ;;  %v12551_v28 = vcombine.low %v2030_v52, %v2044_v41  ;;  %v2114_v62 = vsel %vm13584_vm2, %v14902_v23, %v2113_v10  ;;  %v2099_v16 = vrot.slane %v2097_v1, 5  ;;  %v2167_v43 = vshll.u32 %v15151_v14, 16  ;;  %v11678_v57 = vld [vmem:[%s13560_s30 + $0xf8] sm:$0xf] }
 0x14c   : > { %v15159_v2 = vpop.permute.xlu1 %7275  ;;  %v2128_v25 = vsel %vm13584_vm2, %v14904_v26, %v2127_v42  ;;  %v2181_v8 = vshll.u32 %v15157_v17, 16  ;;  %v2086_v23 = vsel %vm13584_vm2, %v14908_v19, %v2085_v61  ;;  %v2139_v10 = vshll.u32 %v15169_v60, 16  ;;  %v11600_v26 = vld [vmem:[%s13560_s30 + $0x28] sm:$0xe] }
 0x14d   : > { %20312 = vst [vmem:[#allocation68_spill] sm:$0xff] %v15159_v2  ;;  %7537 = vrot.lane.b32.xlu0 %v12551_v28, %s13466_s10  ;;  %v12554_v20 = vcombine.low %v2114_v62, %v2128_v25  ;;  %v2100_v12 = vsel %vm13584_vm2, %v14928_v35, %v2099_v16  ;;  %v2169_v52 = vrot.slane %v2167_v43, 5  ;;  %v2153_v42 = vshll.u32 %v15178_v13, 16  ;;  %v11597_v28 = vld [vmem:[%s13560_s30 + $0x10] sm:$0xe] }
 0x14e   : > { %v15171_v38 = vpop.permute.xlu0 %7273  ;;  %v12553_v1 = vcombine.low %v2086_v23, %v2100_v12  ;;  %v2183_v41 = vrot.slane %v2181_v8, 5  ;;  %v2283_v19 = vrot.slane %v14917_v3, 5  ;;  %v2287_v61 = vrot.slane %v14926_v33, 5  ;;  %v11598_v25 = vld [vmem:[%s13560_s30 + $0x18] sm:$0xe] }
 0x14f   : > { %20313 = vst [vmem:[#allocation69_spill] sm:$0xff] %v15171_v38  ;;  %7543 = vrot.lane.b32.xlu1 %v12554_v20, %s13466_s10  ;;  %v2141_v35 = vrot.slane %v2139_v10, 5  ;;  %v11631_v16 = vrot.slane %v11599_v50, 9  ;;  %v2170_v43 = vsel %vm13584_vm2, %v15023_v45, %v2169_v52  ;;  %v2155_v23 = vrot.slane %v2153_v42, 5  ;;  %v11603_v10 = vld [vmem:[%s13560_s30 + $0x40] sm:$0xe] }
 0x150   : > { %v15195_v47 = vpop.permute.xlu1 %7327  ;;  %v2184_v8 = vsel %vm13584_vm2, %v15105_v36, %v2183_v41  ;;  %v11632_v12 = vrot.slane %v11600_v26, 9  ;;  %v11629_v20 = vrot.slane %v11597_v28, 9  ;;  %v11604_v45 = vld [vmem:[%s13560_s30 + $0x48] sm:$0xe]  ;;  %v11601_v52 = vld [vmem:[%s13560_s30 + $0x30] sm:$0xe] }
 0x151   : > { %20314 = vst [vmem:[#allocation70_spill] sm:$0xff] %v15195_v47  ;;  %7541 = vrot.lane.b32.xlu0 %v12553_v1, %s13466_s10  ;;  %v12556_v3 = vcombine.low %v2170_v43, %v2184_v8  ;;  %v2142_v33 = vsel %vm13584_vm2, %v15138_v22, %v2141_v35  ;;  %v2292_v50 = vsel %vm13804_vm5, %v11631_v16, %v2291_v4  ;;  %v11630_v1 = vrot.slane %v11598_v25, 9  ;;  %v11602_v28 = vld [vmem:[%s13560_s30 + $0x38] sm:$0xe]  ;;  %v11607_v43 = vld [vmem:[%s13560_s30 + $0x70] sm:$0xe] }
 0x152   : > { %v15199_v62 = vpop.permute.xlu0 %7325  ;;  %v2156_v36 = vsel %vm13584_vm2, %v2151_v0, %v2155_v23  ;;  %v2296_v26 = vsel %vm13804_vm5, %v11632_v12, %v2295_v40  ;;  %v2284_v4 = vsel %vm13804_vm5, %v11629_v20, %v2283_v19  ;;  %v11635_v40 = vrot.slane %v11603_v10, 9  ;;  %v11686_v47 = vld [vmem:[%s13560_s30 + $0x148] sm:$0xf] }
 0x153   : > { %20315 = vst [vmem:[#allocation71_spill] sm:$0xff] %v15199_v62  ;;  %7547 = vrot.lane.b32.xlu1 %v12556_v3, %s13466_s10  ;;  %v12555_v22 = vcombine.low %v2142_v33, %v2156_v36  ;;  %v12558_v42 = vcombine.low %v2292_v50, %v2296_v26  ;;  %v2288_v0 = vsel %vm13804_vm5, %v11630_v1, %v2287_v61  ;;  %v2307_v16 = vrot.slane %v14943_v49, 5  ;;  %v11608_v3 = vld [vmem:[%s13560_s30 + $0x78] sm:$0xe]  ;;  %v11605_v49 = vld [vmem:[%s13560_s30 + $0x60] sm:$0xe] }
 0x154   : > { %v15224_v41 = vpop.permute.xlu1 %7331  ;;  %v11636_v25 = vrot.slane %v11604_v45, 9  ;;  %v12557_v8 = vcombine.low %v2284_v4, %v2288_v0  ;;  %v2311_v23 = vrot.slane %v14946_v24, 5  ;;  %v11633_v12 = vrot.slane %v11601_v52, 9  ;;  %v11606_v45 = vld [vmem:[%s13560_s30 + $0x68] sm:$0xe] }
 0x155   : > { %20316 = vst [vmem:[#allocation72_spill] sm:$0xff] %v15224_v41  ;;  %7545 = vrot.lane.b32.xlu0 %v12555_v22, %s13466_s10  ;;  %v2299_v19 = vrot.slane %v14956_v39, 5  ;;  %v2308_v33 = vsel %vm13804_vm5, %v11635_v40, %v2307_v16  ;;  %v11634_v61 = vrot.slane %v11602_v28, 9  ;;  %v2303_v50 = vrot.slane %v14959_v5, 5  ;;  %v11611_v22 = vld [vmem:[%s13560_s30 + $0x90] sm:$0xe] }
 0x156   : > { %v15230_v35 = vpop.permute.xlu0 %7329  ;;  %v2312_v24 = vsel %vm13804_vm5, %v11636_v25, %v2311_v23  ;;  %v11639_v10 = vrot.slane %v11607_v43, 9  ;;  %v2323_v1 = vrot.slane %v14969_v18, 5  ;;  %v11640_v52 = vrot.slane %v11608_v3, 9  ;;  %v11612_v40 = vld [vmem:[%s13560_s30 + $0x98] sm:$0xe] }
 0x157   : > { %20317 = vst [vmem:[#allocation73_spill] sm:$0xff] %v15230_v35  ;;  %7599 = vrot.lane.b32.xlu1 %v12558_v42, %s13467_s11  ;;  %v2300_v39 = vsel %vm13804_vm5, %v11633_v12, %v2299_v19  ;;  %v12560_v26 = vcombine.low %v2308_v33, %v2312_v24  ;;  %v2304_v5 = vsel %vm13804_vm5, %v11634_v61, %v2303_v50  ;;  %v2327_v4 = vrot.slane %v14979_v30, 5  ;;  %v11609_v18 = vld [vmem:[%s13560_s30 + $0x80] sm:$0xe] }
 0x158   : > { %v15244_v20 = vpop.permute.xlu1 %7335  ;;  %v12559_v42 = vcombine.low %v2300_v39, %v2304_v5  ;;  %v11637_v28 = vrot.slane %v11605_v49, 9  ;;  %v2315_v0 = vrot.slane %v14982_v6, 5  ;;  %v2324_v16 = vsel %vm13804_vm5, %v11639_v10, %v2323_v1  ;;  %v11610_v6 = vld [vmem:[%s13560_s30 + $0x88] sm:$0xe]  ;;  %v11615_v61 = vld [vmem:[%s13560_s30 + $0xc0] sm:$0xe] }
 0x159   : > { %20318 = vst [vmem:[#allocation74_spill] sm:$0xff] %v15244_v20  ;;  %7597 = vrot.lane.b32.xlu0 %v12557_v8, %s13467_s11  ;;  %v11638_v25 = vrot.slane %v11606_v45, 9  ;;  %v2319_v43 = vrot.slane %v14989_v55, 5  ;;  %v2328_v8 = vsel %vm13804_vm5, %v11640_v52, %v2327_v4  ;;  %v11643_v23 = vrot.slane %v11611_v22, 9  ;;  %v11616_v45 = vld [vmem:[%s13560_s30 + $0xc8] sm:$0xe] }
 0x15a   : > { %v15252_v36 = vpop.permute.xlu0 %7333  ;;  %v2316_v30 = vsel %vm13804_vm5, %v11637_v28, %v2315_v0  ;;  %v12562_v19 = vcombine.low %v2324_v16, %v2328_v8  ;;  %v2339_v55 = vrot.slane %v15003_v21, 5  ;;  %v11644_v33 = vrot.slane %v11612_v40, 9  ;;  %v11613_v1 = vld [vmem:[%s13560_s30 + $0xb0] sm:$0xe] }
 0x15b   : > { %20319 = vst [vmem:[#allocation75_spill] sm:$0xff] %v15252_v36  ;;  %7603 = vrot.lane.b32.xlu1 %v12560_v26, %s13467_s11  ;;  %v2320_v3 = vsel %vm13804_vm5, %v11638_v25, %v2319_v43  ;;  %v2343_v24 = vrot.slane %v15014_v46, 5  ;;  %v11641_v39 = vrot.slane %v11609_v18, 9  ;;  %v2331_v10 = vrot.slane %v15017_v29, 5  ;;  %v11614_v29 = vld [vmem:[%s13560_s30 + $0xb8] sm:$0xe] }
 0x15c   : > { %v15272_v12 = vpop.permute.xlu1 %7339  ;;  %v12561_v49 = vcombine.low %v2316_v30, %v2320_v3  ;;  %v2340_v26 = vsel %vm13804_vm5, %v11643_v23, %v2339_v55  ;;  %v11642_v5 = vrot.slane %v11610_v6, 9  ;;  %v2335_v21 = vrot.slane %v15021_v51, 5  ;;  %v11619_v18 = vld [vmem:[%s13560_s30 + $0xe0] sm:$0xe]  ;;  %v11620_v6 = vld [vmem:[%s13560_s30 + $0xe8] sm:$0xe] }
 0x15d   : > { %20320 = vst [vmem:[#allocation76_spill] sm:$0xff] %v15272_v12  ;;  %7601 = vrot.lane.b32.xlu0 %v12559_v42, %s13467_s11  ;;  %v2344_v52 = vsel %vm13804_vm5, %v11644_v33, %v2343_v24  ;;  %v2332_v46 = vsel %vm13804_vm5, %v11641_v39, %v2331_v10  ;;  %v11647_v22 = vrot.slane %v11615_v61, 9  ;;  %v2355_v28 = vrot.slane %v15041_v63, 5  ;;  %v11617_v63 = vld [vmem:[%s13560_s30 + $0xd0] sm:$0xe] }
 0x15e   : > { %v15278_v50 = vpop.permute.xlu0 %7337  ;;  %v12564_v4 = vcombine.low %v2340_v26, %v2344_v52  ;;  %v2336_v51 = vsel %vm13804_vm5, %v11642_v5, %v2335_v21  ;;  %v11648_v0 = vrot.slane %v11616_v45, 9  ;;  %v2359_v16 = vrot.slane %v15044_v37, 5  ;;  %v11618_v3 = vld [vmem:[%s13560_s30 + $0xd8] sm:$0xe]  ;;  %v15542_v12 = vld [vmem:[%s13560_s30 + $0x128] sm:$0xf] }
 0x15f   : > { %20321 = vst [vmem:[#allocation77_spill] sm:$0xff] %v15278_v50  ;;  %7607 = vrot.lane.b32.xlu1 %v12562_v19, %s13467_s11  ;;  %v12563_v40 = vcombine.low %v2332_v46, %v2336_v51  ;;  %v11645_v25 = vrot.slane %v11613_v1, 9  ;;  %v2347_v43 = vrot.slane %v15049_v7, 5  ;;  %v2356_v8 = vsel %vm13804_vm5, %v11647_v22, %v2355_v28  ;;  %v11624_v26 = vld [vmem:[%s13560_s30 + $0x118] sm:$0xe] }
 0x160   : > { %v15294_v42 = vpop.permute.xlu1 %7343  ;;  %v11646_v30 = vrot.slane %v11614_v29, 9  ;;  %v2351_v23 = vrot.slane %v15061_v58, 5  ;;  %v2360_v37 = vsel %vm13804_vm5, %v11648_v0, %v2359_v16  ;;  %v11651_v58 = vrot.slane %v11619_v18, 9  ;;  %v11621_v46 = vld [vmem:[%s13560_s30 + $0x100] sm:$0xe] }
 0x161   : > { %20322 = vst [vmem:[#allocation78_spill] sm:$0xff] %v15294_v42  ;;  %7605 = vrot.lane.b32.xlu0 %v12561_v49, %s13467_s11  ;;  %v2348_v7 = vsel %vm13804_vm5, %v11645_v25, %v2347_v43  ;;  %v12566_v55 = vcombine.low %v2356_v8, %v2360_v37  ;;  %v2371_v61 = vrot.slane %v15070_v34, 5  ;;  %v11623_v49 = vld [vmem:[%s13560_s30 + $0x110] sm:$0xe]  ;;  %v11652_v39 = vrot.slane %v11620_v6, 9 }
 0x162   : > { %v15308_v19 = vpop.permute.xlu0 %7341  ;;  %v2352_v33 = vsel %vm13804_vm5, %v11646_v30, %v2351_v23  ;;  %v2375_v10 = vrot.slane %v15079_v32, 5  ;;  %v11649_v45 = vrot.slane %v11617_v63, 9  ;;  %v2363_v1 = vrot.slane %v15090_v11, 5  ;;  %v11622_v29 = vld [vmem:[%s13560_s30 + $0x108] sm:$0xe] }
 0x163   : > { %20323 = vst [vmem:[#allocation79_spill] sm:$0xff] %v15308_v19  ;;  %7611 = vrot.lane.b32.xlu1 %v12564_v4, %s13467_s11  ;;  %v12565_v24 = vcombine.low %v2348_v7, %v2352_v33  ;;  %v2372_v21 = vsel %vm13804_vm5, %v11651_v58, %v2371_v61  ;;  %v11650_v52 = vrot.slane %v11618_v3, 9  ;;  %v2367_v34 = vrot.slane %v15098_v59, 5  ;;  %v11627_v59 = vld [vmem:[%s13560_s30 + $0x130] sm:$0xe] }
 0x164   : > { %v15323_v5 = vpop.permute.xlu1 %7347  ;;  %v2376_v32 = vsel %vm13804_vm5, %v11652_v39, %v2375_v10  ;;  %v11655_v22 = vrot.slane %v11623_v49, 9  ;;  %v2364_v51 = vsel %vm13804_vm5, %v11649_v45, %v2363_v1  ;;  %v2387_v28 = vrot.slane %v15117_v31, 5  ;;  %v11628_v18 = vld [vmem:[%s13560_s30 + $0x138] sm:$0xe]  ;;  %v11625_v6 = vld [vmem:[%s13560_s30 + $0x120] sm:$0xe] }
 0x165   : > { %7609 = vrot.lane.b32.xlu0 %v12563_v40, %s13467_s11  ;;  %20324 = vst [vmem:[#allocation80_spill] sm:$0xff] %v15323_v5  ;;  %v12568_v4 = vcombine.low %v2372_v21, %v2376_v32  ;;  %v2368_v11 = vsel %vm13804_vm5, %v11650_v52, %v2367_v34  ;;  %v11656_v16 = vrot.slane %v11624_v26, 9  ;;  %v2391_v25 = vrot.slane %v15128_v44, 5  ;;  %v11626_v7 = vld [vmem:[%s13560_s30 + $0x128] sm:$0xe] }
 0x166   : > { %v15340_v0 = vpop.permute.xlu0 %7345  ;;  %v12567_v40 = vcombine.low %v2364_v51, %v2368_v11  ;;  %v11653_v43 = vrot.slane %v11621_v46, 9  ;;  %v2388_v8 = vsel %vm13804_vm5, %v11655_v22, %v2387_v28  ;;  %v2379_v30 = vrot.slane %v15131_v9, 5  ;;  %v11663_v1 = vld [vmem:[%s13560_s30 + $0x60] sm:$0xf]  ;;  %v11661_v46 = vld [vmem:[%s13560_s30 + $0x50] sm:$0xf] }
 0x167   : > { %7615 = vrot.lane.b32.xlu1 %v12566_v55, %s13467_s11  ;;  %20325 = vst [vmem:[#allocation81_spill] sm:$0xff] %v15340_v0  ;;  %v11654_v23 = vrot.slane %v11622_v29, 9  ;;  %v2383_v31 = vrot.slane %v15136_v54, 5  ;;  %v2392_v63 = vsel %vm13804_vm5, %v11656_v16, %v2391_v25  ;;  %v11659_v37 = vrot.slane %v11627_v59, 9  ;;  %v11662_v32 = vld [vmem:[%s13560_s30 + $0x58] sm:$0xf] }
 0x168   : > { %v15354_v3 = vpop.permute.xlu1 %7351  ;;  %v12570_v44 = vcombine.low %v2388_v8, %v2392_v63  ;;  %v2380_v55 = vsel %vm13804_vm5, %v11653_v43, %v2379_v30  ;;  %v2403_v33 = vrot.slane %v15151_v14, 5  ;;  %v11660_v58 = vrot.slane %v11628_v18, 9  ;;  %v11667_v29 = vld [vmem:[%s13560_s30 + $0x80] sm:$0xf]  ;;  %v15392_v28 = vld [vmem:[%s13560_s30 + $0x70] sm:$0xf] }
 0x169   : > { %7613 = vrot.lane.b32.xlu0 %v12565_v24, %s13467_s11  ;;  %20326 = vst [vmem:[#allocation82_spill] sm:$0xff] %v15354_v3  ;;  %v2384_v9 = vsel %vm13804_vm5, %v11654_v23, %v2383_v31  ;;  %v2407_v61 = vrot.slane %v15157_v17, 5  ;;  %v11657_v49 = vrot.slane %v11625_v6, 9  ;;  %v2395_v39 = vrot.slane %v15169_v60, 5  ;;  %v15395_v59 = vld [vmem:[%s13560_s30 + $0x78] sm:$0xf] }
 0x16a   : > { %v12569_v54 = vcombine.low %v2380_v55, %v2384_v9  ;;  %v2404_v24 = vsel %vm13804_vm5, %v11659_v37, %v2403_v33  ;;  %v11658_v10 = vrot.slane %v11626_v7, 9  ;;  %v2399_v45 = vrot.slane %v15178_v13, 5  ;;  %v15367_v14 = vpop.permute.xlu0 %7349  ;;  %v11664_v13 = vld [vmem:[%s13560_s30 + $0x68] sm:$0xf]  ;;  %v15402_v18 = vld [vmem:[%s13560_s30 + $0xb0] sm:$0xf] }
 0x16b   : > { %7619 = vrot.lane.b32.xlu1 %v12568_v4, %s13467_s11  ;;  %20327 = vst [vmem:[#allocation83_spill] sm:$0xff] %v15367_v14  ;;  %v2408_v17 = vsel %vm13804_vm5, %v11660_v58, %v2407_v61  ;;  %v2396_v21 = vsel %vm13804_vm5, %v11657_v49, %v2395_v39  ;;  %v12574_v22 = vcombine.low %v11663_v1, %v11664_v13  ;;  %v15386_v4 = vld [vmem:[%s13560_s30 + $0x88] sm:$0xf]  ;;  %v2506_v30 = vshrl.u32 %v11663_v1, 16  ;;  %v15407_v6 = vld [vmem:[%s13560_s30 + $0xb8] sm:$0xf] }
 0x16c   : > { %v12572_v26 = vcombine.low %v2404_v24, %v2408_v17  ;;  %v2400_v60 = vsel %vm13804_vm5, %v11658_v10, %v2399_v45  ;;  %v15379_v34 = vpop.permute.xlu1 %7355  ;;  %v12573_v11 = vcombine.low %v11661_v46, %v11662_v32  ;;  %v13295_v16 = vld [vmem:[%s13560_s30 + $0x28] sm:$0xf]  ;;  %v12576_v43 = vcombine.low %v11667_v29, %v15386_v4  ;;  %v11669_v45 = vld [vmem:[%s13560_s30 + $0xa0] sm:$0xf]  ;;  %v11687_v20 = vld [vmem:[%s13560_s30 + $0x150] sm:$0xf] }
 0x16d   : > { %7617 = vrot.lane.b32.xlu0 %v12567_v40, %s13467_s11  ;;  %v12571_v52 = vcombine.low %v2396_v21, %v2400_v60  ;;  %20328 = vst [vmem:[#allocation84_spill] sm:$0xff] %v15379_v34  ;;  %v13294_v40 = vld [vmem:[%s13560_s30 + $0x20] sm:$0xf]  ;;  %v2509_v23 = vshll.u32 %v11663_v1, 16  ;;  %v2520_v31 = vshrl.u32 %v11664_v13, 16  ;;  %v2523_v63 = vshll.u32 %v11664_v13, 16 }
 0x16e   : > { %v15388_v51 = vpop.permute.xlu0 %7353  ;;  %v12431_v25 = vcombine.low %v13294_v40, %v13295_v16  ;;  %v2478_v37 = vshrl.u32 %v11661_v46, 16  ;;  %v12575_v7 = vcombine.low %v15392_v28, %v15395_v59  ;;  %v15416_v55 = vld [vmem:[%s13560_s30 + $0x8] sm:$0xf]  ;;  %v2481_v33 = vshll.u32 %v11661_v46, 16 }
 0x16f   : > { %7623 = vrot.lane.b32.xlu1 %v12570_v44, %s13467_s11  ;;  %20329 = vst [vmem:[#allocation85_spill] sm:$0xff] %v15388_v51  ;;  %v15413_v44 = vld [vmem:[%s13560_s30] sm:$0xf]  ;;  %20332 = vst [vmem:[#allocation88_spill] sm:$0xff] %v15416_v55  ;;  %v2495_v58 = vshll.u32 %v11662_v32, 16  ;;  %v2562_v24 = vshrl.u32 %v11667_v29, 16  ;;  %v12578_v10 = vcombine.low %v15402_v18, %v15407_v6  ;;  %v12581_v19 = vcombine.low %v11677_v15, %v11678_v57 }
 0x170   : > { %v15404_v8 = vpop.permute.xlu1 %7439  ;;  %20331 = vst [vmem:[#allocation87_spill] sm:$0xff] %v15413_v44  ;;  %v15424_v49 = vsel %vm8285_vm6, %v12431_v25, %v14246_v53  ;;  %v2565_v39 = vshll.u32 %v11667_v29, 16  ;;  %v11670_v17 = vld [vmem:[%s13560_s30 + $0xa8] sm:$0xf]  ;;  %v15433_v21 = vrot.slane %v2509_v23, 5  ;;  %v15435_v60 = vrot.slane %v2520_v31, 4 }
 0x171   : > { %7621 = vrot.lane.b32.xlu0 %v12569_v54, %s13467_s11  ;;  %20330 = vst [vmem:[#allocation86_spill] sm:$0xff] %v15404_v8  ;;  %v2492_v54 = vshrl.u32 %v11662_v32, 16  ;;  %20334 = vst [vmem:[#allocation90_spill] sm:$0xff] %v15424_v49  ;;  %v2576_v1 = vshrl.u32 %v15386_v4, 16  ;;  %v15439_v53 = vld [vmem:[%s13560_s30 + $0xd0] sm:$0xf]  ;;  %v12577_v25 = vcombine.low %v11669_v45, %v11670_v17 }
 0x172   : > { %v15420_v61 = vpop.permute.xlu0 %7437  ;;  %v15441_v13 = vrot.slane %v2523_v63, 5  ;;  %v2579_v46 = vshll.u32 %v15386_v4, 16  ;;  %v2534_v32 = vshrl.u32 %v15392_v28, 16  ;;  %v15457_v16 = vrot.slane %v2495_v58, 5  ;;  %v15467_v31 = vld [vmem:[%s13560_s30 + $0xc0] sm:$0xf] }
 0x173   : > { %7627 = vrot.lane.b32.xlu1 %v12572_v26, %s13467_s11  ;;  %20333 = vst [vmem:[#allocation89_spill] sm:$0xff] %v15420_v61  ;;  %v15431_v26 = vrot.slane %v2506_v30, 4  ;;  %v15455_v40 = vrot.slane %v2492_v54, 4  ;;  %v15461_v30 = vrot.slane %v2565_v39, 5  ;;  %v2537_v4 = vshll.u32 %v15392_v28, 16 }
 0x174   : > { %v15451_v29 = vpop.permute.xlu1 %7443  ;;  %v2548_v23 = vshrl.u32 %v15395_v59, 16  ;;  %v15469_v63 = vrot.slane %v2576_v1, 4  ;;  %v15476_v54 = vld [vmem:[%s13560_s30 + $0xc8] sm:$0xf]  ;;  %v15480_v28 = vrot.slane %v2579_v46, 5  ;;  %v2621_v39 = vshll.u32 %v15402_v18, 16 }
 0x175   : > { %7625 = vrot.lane.b32.xlu0 %v12571_v52, %s13467_s11  ;;  %v15443_v52 = vrot.slane %v2478_v37, 4  ;;  %20335 = vst [vmem:[#allocation91_spill] sm:$0xff] %v15451_v29  ;;  %v2551_v37 = vshll.u32 %v15395_v59, 16  ;;  %v15488_v59 = vld [vmem:[%s13560_s30 + $0x100] sm:$0xf]  ;;  %v2635_v1 = vshll.u32 %v15407_v6, 16 }
 0x176   : > { %v15478_v58 = vpop.permute.xlu0 %7441  ;;  %v2590_v9 = vshrl.u32 %v11669_v45, 16  ;;  %v2593_v34 = vshll.u32 %v11669_v45, 16  ;;  %v2604_v2 = vshrl.u32 %v11670_v17, 16  ;;  %v15492_v51 = vld [vmem:[%s13560_s30 + $0x108] sm:$0xf]  ;;  %v15494_v46 = vrot.slane %v2537_v4, 5 }
 0x177   : > { %7711 = vrot.lane.b32.xlu1 %v12574_v22, %s13468_s18  ;;  %v15449_v22 = vld [vmem:[%s13560_s30 + $0xd8] sm:$0xf]  ;;  %20336 = vst [vmem:[#allocation92_spill] sm:$0xff] %v15478_v58  ;;  %v15502_v3 = vrot.slane %v2548_v23, 4  ;;  %v2677_v4 = vshll.u32 %v15439_v53, 16  ;;  %v15510_v14 = vrot.slane %v2621_v39, 5  ;;  %v12582_v23 = vcombine.low %v15488_v59, %v15492_v51 }
 0x178   : > { %v15500_v38 = vpop.permute.xlu1 %7447  ;;  %v15525_v39 = vrot.slane %v2604_v2, 4  ;;  %v2646_v42 = vshrl.u32 %v15467_v31, 16  ;;  %v2649_v2 = vshll.u32 %v15467_v31, 16  ;;  %v2702_v58 = vshrl.u32 %v11677_v15, 16  ;;  %v15603_v55 = vld [vmem:[%s13560_s30 + $0x170] sm:$0xf] }
 0x179   : > { %7709 = vrot.lane.b32.xlu0 %v12573_v11, %s13468_s18  ;;  %v15453_v11 = vrot.slane %v2481_v33, 5  ;;  %v12580_v33 = vcombine.low %v15439_v53, %v15449_v22  ;;  %20337 = vst [vmem:[#allocation93_spill] sm:$0xff] %v15500_v38  ;;  %v2747_v38 = vshll.u32 %v15492_v51, 16  ;;  %v2705_v29 = vshll.u32 %v11677_v15, 16 }
 0x17a   : > { %v15527_v5 = vpop.permute.xlu0 %7445  ;;  %v2716_v61 = vshrl.u32 %v11678_v57, 16  ;;  %v2719_v8 = vshll.u32 %v11678_v57, 16  ;;  %v15561_v50 = vrot.slane %v2646_v42, 4  ;;  %v11688_v42 = vld [vmem:[%s13560_s30 + $0x158] sm:$0xf]  ;;  %v15583_v41 = vrot.slane %v2702_v58, 4 }
 0x17b   : > { %7715 = vrot.lane.b32.xlu1 %v12576_v43, %s13468_s18  ;;  %v15459_v43 = vrot.slane %v2562_v24, 4  ;;  %v15482_v24 = vrot.slane %v2534_v32, 4  ;;  %v2607_v32 = vshll.u32 %v11670_v17, 16  ;;  %20338 = vst [vmem:[#allocation94_spill] sm:$0xff] %v15527_v5  ;;  %v2733_v5 = vshll.u32 %v15488_v59, 16 }
 0x17c   : > { %20341 = vst [vmem:[#allocation97_spill] sm:$0xff] %v15583_v41  ;;  %v15585_v62 = vrot.slane %v2705_v29, 5  ;;  %v2803_v29 = vshll.u32 %v15542_v12, 16  ;;  %v12586_v49 = vcombine.low %v11687_v20, %v11688_v42  ;;  %v2842_v48 = vshrl.u32 %v11687_v20, 16  ;;  %v15624_v41 = vld [vmem:[%s13560_s30 + $0x168] sm:$0xf] }
 0x17d   : > { %7713 = vrot.lane.b32.xlu0 %v12575_v7, %s13468_s18  ;;  %v2618_v7 = vshrl.u32 %v15402_v18, 16  ;;  %v2674_v18 = vshrl.u32 %v15439_v53, 16  ;;  %v15523_v53 = vrot.slane %v2593_v34, 5  ;;  %v2660_v34 = vshrl.u32 %v15476_v54, 16 }
 0x17e   : > { %v15568_v15 = vpop.permute.xlu0 %7449  ;;  %v15574_v35 = vrot.slane %v2733_v5, 5  ;;  %20342 = vst [vmem:[#allocation98_spill] sm:$0xff] %v15585_v62  ;;  %v2856_v44 = vshrl.u32 %v11688_v42, 16  ;;  %v2859_v56 = vshll.u32 %v11688_v42, 16 }
 0x17f   : > { %7719 = vrot.lane.b32.xlu1 %v12578_v10, %s13468_s18  ;;  %v2632_v10 = vshrl.u32 %v15407_v6, 16  ;;  %v15504_v6 = vrot.slane %v2551_v37, 5  ;;  %v15506_v45 = vrot.slane %v2618_v7, 4  ;;  %v15519_v37 = vrot.slane %v2635_v1, 5  ;;  %v11683_v1 = vld [vmem:[%s13560_s30 + $0x120] sm:$0xf] }
 0x180   : > { %v15521_v7 = vrot.slane %v2590_v9, 4  ;;  %v15531_v0 = vrot.slane %v2674_v18, 4  ;;  %v15537_v9 = vrot.slane %v2677_v4, 5  ;;  %v2663_v18 = vshll.u32 %v15476_v54, 16  ;;  %v15552_v4 = vpop.permute.xlu1 %7451  ;;  %20340 = vst [vmem:[#allocation96_spill] sm:$0xff] %v15568_v15 }
 0x181   : > { %7717 = vrot.lane.b32.xlu0 %v12577_v25, %s13468_s18  ;;  %v12579_v25 = vcombine.low %v15467_v31, %v15476_v54  ;;  %v15512_v17 = vrot.slane %v2632_v10, 4  ;;  %v15529_v10 = vrot.slane %v2607_v32, 5  ;;  %20339 = vst [vmem:[#allocation95_spill] sm:$0xff] %v15552_v4  ;;  %v2744_v31 = vshrl.u32 %v15492_v51, 16 }
 0x182   : > { %v15563_v4 = vrot.slane %v2649_v2, 5  ;;  %v15565_v36 = vrot.slane %v2660_v34, 4  ;;  %v2786_v51 = vshrl.u32 %v11683_v1, 16  ;;  %v15581_v34 = vrot.slane %v2747_v38, 5 }
 0x183   : > { %7723 = vrot.lane.b32.xlu1 %v12580_v33, %s13468_s18  ;;  %v2688_v33 = vshrl.u32 %v15449_v22, 16  ;;  %v15579_v2 = vrot.slane %v2744_v31, 4  ;;  %v15588_v15 = vrot.slane %v2716_v61, 4  ;;  %v2789_v5 = vshll.u32 %v11683_v1, 16 }
 0x184   : > { %v15595_v31 = vpop.permute.xlu1 %7455  ;;  %v15597_v38 = vrot.slane %v2786_v51, 4 }
 0x185   : > { %7721 = vrot.lane.b32.xlu0 %v12579_v25, %s13468_s18  ;;  %v2691_v25 = vshll.u32 %v15449_v22, 16  ;;  %v15544_v32 = vrot.slane %v2688_v33, 4  ;;  %v2730_v22 = vshrl.u32 %v15488_v59, 16  ;;  %v11682_v33 = vld [vmem:[%s13560_s30 + $0x118] sm:$0xf]  ;;  %v12584_v59 = vcombine.low %v11683_v1, %v15542_v12  ;;  %20343 = vst [vmem:[#allocation99_spill] sm:$0xff] %v15588_v15 }
 0x186   : > { %20345 = vst [vmem:[#allocation101_spill] sm:$0xff] %v15595_v31  ;;  %20346 = vst [vmem:[#allocation102_spill] sm:$0xff] %v15597_v38  ;;  %v2775_v1 = vshll.u32 %v11682_v33, 16  ;;  %v15607_v31 = vld [vmem:[%s13560_s30 + $0x178] sm:$0xf]  ;;  %v15611_v38 = vrot.slane %v2789_v5, 5 }
 0x187   : > { %7727 = vrot.lane.b32.xlu1 %v12582_v23, %s13468_s18  ;;  %v15550_v23 = vld [vmem:[%s13560_s30 + $0x110] sm:$0xf]  ;;  %v15558_v54 = vrot.slane %v2691_v25, 5  ;;  %v15572_v25 = vrot.slane %v2730_v22, 4  ;;  %v15590_v22 = vrot.slane %v2719_v8, 5  ;;  %v2772_v8 = vshrl.u32 %v11682_v33, 16 }
 0x188   : > { %v12583_v57 = vcombine.low %v15550_v23, %v11682_v33  ;;  %v2758_v58 = vshrl.u32 %v15550_v23, 16  ;;  %v2761_v61 = vshll.u32 %v15550_v23, 16  ;;  %v2828_v33 = vshrl.u32 %v11686_v47, 16  ;;  %v15614_v15 = vld [vmem:[%s13560_s30 + $0x160] sm:$0xf] }
 0x189   : > { %7725 = vrot.lane.b32.xlu0 %v12581_v19, %s13468_s18  ;;  %v15570_v19 = vrot.slane %v2663_v18, 5  ;;  %v11685_v18 = vld [vmem:[%s13560_s30 + $0x140] sm:$0xf]  ;;  %20344 = vst [vmem:[#allocation100_spill] sm:$0xff] %v15590_v22  ;;  %v15628_v5 = vrot.slane %v2772_v8, 4 }
 0x18a   : > { %v12585_v51 = vcombine.low %v11685_v18, %v11686_v47  ;;  %v2814_v23 = vshrl.u32 %v11685_v18, 16  ;;  %v2817_v22 = vshll.u32 %v11685_v18, 16  ;;  %v15620_v42 = vrot.slane %v2758_v58, 4  ;;  %v15648_v8 = vld [vmem:[%s13560_s30 + $0x6c] sm:$0x1] }
 0x18b   : > { %7731 = vrot.lane.b32.xlu1 %v12584_v59, %s13468_s18  ;;  %v2800_v59 = vshrl.u32 %v15542_v12, 16  ;;  %v15609_v12 = vpop.permute.xlu0 %7453  ;;  %20349 = vst [vmem:[#allocation105_spill] sm:$0xff] %v15628_v5  ;;  %v15630_v18 = vrot.slane %v2775_v1, 5  ;;  %20353 = vst [vmem:[#allocation109_spill] sm:$0xff] %v15648_v8  ;;  %v15654_v5 = vrot.slane %v2828_v33, 4 }
 0x18c   : > { %20347 = vst [vmem:[#allocation103_spill] sm:$0xff] %v15609_v12  ;;  %v15626_v12 = vrot.slane %v2761_v61, 5  ;;  %v15645_v61 = vrot.slane %v2859_v56, 5  ;;  %v15650_v1 = vrot.slane %v2814_v23, 4  ;;  %v2898_v56 = vshrl.u32 %v15603_v55, 16 }
 0x18d   : > { %7729 = vrot.lane.b32.xlu0 %v12583_v57, %s13468_s18  ;;  %v2845_v57 = vshll.u32 %v11687_v20, 16  ;;  %v15616_v62 = vrot.slane %v2800_v59, 4  ;;  %v15618_v20 = vrot.slane %v2803_v29, 5  ;;  %20350 = vst [vmem:[#allocation106_spill] sm:$0xff] %v15630_v18  ;;  %v12588_v59 = vcombine.low %v15603_v55, %v15607_v31  ;;  %20356 = vst [vmem:[#allocation112_spill] sm:$0xff] %v15654_v5 }
 0x18e   : > { %20354 = vst [vmem:[#allocation110_spill] sm:$0xff] %v15650_v1  ;;  %v15652_v18 = vrot.slane %v2817_v22, 5  ;;  %v2512_v23 = vor.u32 %v15433_v21, %v15431_v26  ;;  %v15669_v22 = vld [vmem:[%s13560_s30 + $0x5c] sm:$0x1]  ;;  %v2484_v26 = vor.u32 %v15453_v11, %v15443_v52  ;;  %v15686_v1 = vld [vmem:[%s13560_s30 + $0x84] sm:$0x1] }
 0x18f   : > { %7735 = vrot.lane.b32.xlu1 %v12586_v49, %s13468_s18  ;;  %20348 = vst [vmem:[#allocation104_spill] sm:$0xff] %v15616_v62  ;;  %v2831_v49 = vshll.u32 %v11686_v47, 16  ;;  %v15635_v62 = vld [vmem:[%s13560_s30 + $0x64] sm:$0x1]  ;;  %v15637_v29 = vpop.permute.xlu1 %7459  ;;  %v15639_v47 = vrot.slane %v2842_v48, 4  ;;  %v15641_v58 = vrot.slane %v2845_v57, 5  ;;  %v12587_v48 = vcombine.low %v15614_v15, %v15624_v41 }
 0x190   : > { %20351 = vst [vmem:[#allocation107_spill] sm:$0xff] %v15635_v62  ;;  %20352 = vst [vmem:[#allocation108_spill] sm:$0xff] %v15637_v29  ;;  %v15660_v29 = vld [vmem:[%s13560_s30 + $0x54] sm:$0x1]  ;;  %v15671_v33 = vpop.permute.xlu0 %7457  ;;  %v2515_v5 = vshll.u32 %v15635_v62, 16  ;;  %v2501_v62 = vshll.u32 %v15669_v22, 16 }
 0x191   : > { %7733 = vrot.lane.b32.xlu0 %v12585_v51, %s13468_s18  ;;  %v15643_v51 = vrot.slane %v2856_v44, 4  ;;  %20355 = vst [vmem:[#allocation111_spill] sm:$0xff] %v15652_v18  ;;  %20357 = vst [vmem:[#allocation113_spill] sm:$0xff] %v15660_v29  ;;  %v15662_v57 = vrot.slane %v2831_v49, 5  ;;  %v2526_v49 = vor.u32 %v15441_v13, %v15435_v60  ;;  %v2529_v44 = vshll.u32 %v15648_v8, 16 }
 0x192   : > { %20359 = vst [vmem:[#allocation115_spill] sm:$0xff] %v15671_v33  ;;  %v2487_v21 = vshll.u32 %v15660_v29, 16  ;;  %v2498_v33 = vor.u32 %v15457_v16, %v15455_v40  ;;  %v2915_v13 = vshll.u32 %v15607_v31, 16  ;;  %v15692_v11 = vld [vmem:[%s13560_s30 + $0x8c] sm:$0x1]  ;;  %v15694_v29 = vrot.slane %v2898_v56, 4 }
 0x193   : > { %7739 = vrot.lane.b32.xlu1 %v12588_v59, %s13468_s18  ;;  %20358 = vst [vmem:[#allocation114_spill] sm:$0xff] %v15662_v57  ;;  %v2513_v57 = vrot.slane %v2512_v23, 4  ;;  %v2517_v59 = vrot.slane %v2515_v5, 5  ;;  %v2531_v18 = vrot.slane %v2529_v44, 5  ;;  %v15688_v60 = vpop.permute.xlu1 %7463  ;;  %v2485_v23 = vrot.slane %v2484_v26, 4 }
 0x194   : > { %20360 = vst [vmem:[#allocation116_spill] sm:$0xff] %v15688_v60  ;;  %v2489_v8 = vrot.slane %v2487_v21, 5  ;;  %v2499_v52 = vrot.slane %v2498_v33, 4  ;;  %v2503_v5 = vrot.slane %v2501_v62, 5  ;;  %v15701_v44 = vld [vmem:[%s13560_s30 + $0x74] sm:$0x1]  ;;  %v2568_v33 = vor.u32 %v15461_v30, %v15459_v43 }
 0x195   : > { %7737 = vrot.lane.b32.xlu0 %v12587_v48, %s13468_s18  ;;  %v2527_v48 = vrot.slane %v2526_v49, 4  ;;  %v2518_v40 = vsel %vm13584_vm2, %v2513_v57, %v2517_v59  ;;  %v2571_v21 = vshll.u32 %v15686_v1, 16  ;;  %v2582_v62 = vor.u32 %v15480_v28, %v15469_v63  ;;  %v15716_v59 = vld [vmem:[%s13560_s30 + $0x7c] sm:$0x1] }
 0x196   : > { %v2490_v26 = vsel %vm13584_vm2, %v2485_v23, %v2489_v8  ;;  %v2504_v57 = vsel %vm13584_vm2, %v2499_v52, %v2503_v5  ;;  %v2540_v8 = vor.u32 %v15494_v46, %v15482_v24  ;;  %v2569_v30 = vrot.slane %v2568_v33, 4  ;;  %v15735_v33 = vld [vmem:[%s13560_s30 + $0xbc] sm:$0x1] }
 0x197   : > { %v2532_v16 = vsel %vm13584_vm2, %v2527_v48, %v2531_v18  ;;  %v15708_v56 = vpop.permute.xlu0 %7461  ;;  %v2585_v18 = vshll.u32 %v15692_v11, 16  ;;  %v12589_v43 = vcombine.low %v2490_v26, %v2504_v57  ;;  %v2573_v48 = vrot.slane %v2571_v21, 5  ;;  %v15727_v5 = vpop.permute.xlu1 %7467 }
 0x198   : > { %v12590_v49 = vcombine.low %v2518_v40, %v2532_v16  ;;  %20361 = vst [vmem:[#allocation117_spill] sm:$0xff] %v15708_v56  ;;  %v2543_v23 = vshll.u32 %v15701_v44, 16  ;;  %v2583_v52 = vrot.slane %v2582_v62, 4  ;;  %v2541_v63 = vrot.slane %v2540_v8, 4  ;;  %v15725_v16 = vld [vmem:[%s13560_s30 + $0xb4] sm:$0x1] }
 0x199   : > { %v2587_v40 = vrot.slane %v2585_v18, 5  ;;  %v2554_v28 = vor.u32 %v15504_v6, %v15502_v3  ;;  %20362 = vst [vmem:[#allocation118_spill] sm:$0xff] %v15727_v5  ;;  %v2870_v24 = vshrl.u32 %v15614_v15, 16  ;;  %7789 = vrot.lane.b32.xlu0 %v12589_v43, %s13469_s19  ;;  %v2574_v46 = vsel %vm13584_vm2, %v2569_v30, %v2573_v48  ;;  %v15743_v62 = vld [vmem:[%s13560_s30 + $0xa4] sm:$0x1] }
 0x19a   : > { %7791 = vrot.lane.b32.xlu1 %v12590_v49, %s13469_s19  ;;  %v2545_v49 = vrot.slane %v2543_v23, 5  ;;  %v2557_v26 = vshll.u32 %v15716_v59, 16  ;;  %v2624_v57 = vor.u32 %v15510_v14, %v15506_v45  ;;  %v2627_v30 = vshll.u32 %v15725_v16, 16  ;;  %v15891_v5 = vld [vmem:[%s13560_s30 + $0x11c] sm:$0x1]  ;;  %v20383_v56 = vld [vmem:[#allocation114_spill] sm:$0xff] }
 0x19b   : > { %v2588_v3 = vsel %vm13584_vm2, %v2583_v52, %v2587_v40  ;;  %v2555_v6 = vrot.slane %v2554_v28, 4  ;;  %v15748_v48 = vpop.permute.xlu0 %7465  ;;  %v2638_v52 = vor.u32 %v15519_v37, %v15512_v17  ;;  %v2641_v40 = vshll.u32 %v15735_v33, 16  ;;  %v15754_v28 = vld [vmem:[%s13560_s30 + $0xac] sm:$0x1] }
 0x19c   : > { %v12592_v18 = vcombine.low %v2574_v46, %v2588_v3  ;;  %v2546_v8 = vsel %vm13584_vm2, %v2541_v63, %v2545_v49  ;;  %v2559_v43 = vrot.slane %v2557_v26, 5  ;;  %20363 = vst [vmem:[#allocation119_spill] sm:$0xff] %v15748_v48  ;;  %v2625_v23 = vrot.slane %v2624_v57, 4  ;;  %v15765_v57 = vld [vmem:[%s13560_s30 + $0xd4] sm:$0x1] }
 0x19d   : > { %v2596_v14 = vor.u32 %v15523_v53, %v15521_v7  ;;  %v2629_v63 = vrot.slane %v2627_v30, 5  ;;  %v2599_v46 = vshll.u32 %v15743_v62, 16  ;;  %v2610_v49 = vor.u32 %v15529_v10, %v15525_v39  ;;  %v15773_v30 = vld [vmem:[%s13560_s30 + $0xdc] sm:$0x1] }
 0x19e   : > { %7795 = vrot.lane.b32.xlu1 %v12592_v18, %s13469_s19  ;;  %v2560_v45 = vsel %vm13584_vm2, %v2555_v6, %v2559_v43  ;;  %v2639_v37 = vrot.slane %v2638_v52, 4  ;;  %v2643_v26 = vrot.slane %v2641_v40, 5  ;;  %v2613_v43 = vshll.u32 %v15754_v28, 16 }
 0x19f   : > { %v12591_v17 = vcombine.low %v2546_v8, %v2560_v45  ;;  %v2597_v3 = vrot.slane %v2596_v14, 4  ;;  %v2630_v53 = vsel %vm13584_vm2, %v2625_v23, %v2629_v63  ;;  %v2601_v18 = vrot.slane %v2599_v46, 5  ;;  %v15789_v14 = vld [vmem:[%s13560_s30 + $0xc4] sm:$0x1] }
 0x1a0   : > { %v2611_v6 = vrot.slane %v2610_v49, 4  ;;  %v20364_v39 = vshll.u32 %v15603_v55, 16  ;;  %v20365_v8 = vshrl.u32 %v15607_v31, 16  ;;  %v2644_v23 = vsel %vm13584_vm2, %v2639_v37, %v2643_v26  ;;  %v15800_v26 = vld [vmem:[%s13560_s30 + $0xcc] sm:$0x1] }
 0x1a1   : > { %7793 = vrot.lane.b32.xlu0 %v12591_v17, %s13469_s19  ;;  %v2680_v40 = vor.u32 %v15537_v9, %v15531_v0  ;;  %v12594_v45 = vcombine.low %v2630_v53, %v2644_v23  ;;  %v2602_v55 = vsel %vm13584_vm2, %v2597_v3, %v2601_v18  ;;  %v2615_v63 = vrot.slane %v2613_v43, 5  ;;  %v15811_v23 = vld [vmem:[%s13560_s30 + $0x104] sm:$0x1] }
 0x1a2   : > { %v15777_v10 = vrot.slane %v20364_v39, 5  ;;  %v15781_v52 = vrot.slane %v20365_v8, 4  ;;  %v2683_v46 = vshll.u32 %v15765_v57, 16  ;;  %v2694_v17 = vor.u32 %v15558_v54, %v15544_v32 }
 0x1a3   : > { %v2681_v39 = vrot.slane %v2680_v40, 4  ;;  %v2697_v37 = vshll.u32 %v15773_v30, 16  ;;  %v2652_v0 = vor.u32 %v15563_v4, %v15561_v50  ;;  %7799 = vrot.lane.b32.xlu1 %v12594_v45, %s13469_s19  ;;  %v2616_v9 = vsel %vm13584_vm2, %v2611_v6, %v2615_v63  ;;  %v15819_v63 = vld [vmem:[%s13560_s30 + $0x10c] sm:$0x1] }
 0x1a4   : > { %v15767_v7 = vpop.permute.xlu1 %7519  ;;  %v2685_v3 = vrot.slane %v2683_v46, 5  ;;  %v2655_v53 = vshll.u32 %v15789_v14, 16  ;;  %v2666_v18 = vor.u32 %v15570_v19, %v15565_v36  ;;  %v12593_v32 = vcombine.low %v2602_v55, %v2616_v9 }
 0x1a5   : > { %v2695_v54 = vrot.slane %v2694_v17, 4  ;;  %v2699_v43 = vrot.slane %v2697_v37, 5  ;;  %v2653_v8 = vrot.slane %v2652_v0, 4  ;;  %v2669_v45 = vshll.u32 %v15800_v26, 16  ;;  %v15834_v17 = vld [vmem:[%s13560_s30 + $0xf4] sm:$0x1] }
 0x1a6   : > { %v2686_v4 = vsel %vm13584_vm2, %v2681_v39, %v2685_v3  ;;  %v2657_v40 = vrot.slane %v2655_v53, 5  ;;  %v2667_v6 = vrot.slane %v2666_v18, 4  ;;  %v15825_v19 = vrot.slane %v2915_v13, 5  ;;  %7797 = vrot.lane.b32.xlu0 %v12593_v32, %s13469_s19  ;;  %v15843_v18 = vld [vmem:[%s13560_s30 + $0xfc] sm:$0x1]  ;;  %v20366_v32 = vld [vmem:[#allocation97_spill] sm:$0xff] }
 0x1a7   : > { %v2700_v46 = vsel %vm13584_vm2, %v2695_v54, %v2699_v43  ;;  %v2736_v39 = vor.u32 %v15574_v35, %v15572_v25  ;;  %v2671_v31 = vrot.slane %v2669_v45, 5  ;;  %v2739_v13 = vshll.u32 %v15811_v23, 16  ;;  %v20367_v35 = vld [vmem:[#allocation98_spill] sm:$0xff]  ;;  %v15856_v45 = vld [vmem:[%s13560_s30 + $0x124] sm:$0x1] }
 0x1a8   : > { %v12596_v37 = vcombine.low %v2686_v4, %v2700_v46  ;;  %v2658_v0 = vsel %vm13584_vm2, %v2653_v8, %v2657_v40  ;;  %v2750_v3 = vor.u32 %v15581_v34, %v15579_v2  ;;  %v2753_v53 = vshll.u32 %v15819_v63, 16  ;;  %v20368_v40 = vld [vmem:[#allocation99_spill] sm:$0xff]  ;;  %v20369_v2 = vld [vmem:[#allocation100_spill] sm:$0xff] }
 0x1a9   : > { %v2737_v9 = vrot.slane %v2736_v39, 4  ;;  %v2708_v25 = vor.u32 %v20367_v35, %v20366_v32  ;;  %v2672_v43 = vsel %vm13584_vm2, %v2667_v6, %v2671_v31  ;;  %v2741_v8 = vrot.slane %v2739_v13, 5 }
 0x1aa   : > { %v15794_v49 = vpop.permute.xlu0 %7517  ;;  %7803 = vrot.lane.b32.xlu1 %v12596_v37, %s13469_s19  ;;  %v2711_v4 = vshll.u32 %v15834_v17, 16  ;;  %v2722_v34 = vor.u32 %v20369_v2, %v20368_v40  ;;  %v12595_v46 = vcombine.low %v2658_v0, %v2672_v43  ;;  %v2751_v39 = vrot.slane %v2750_v3, 4  ;;  %v15871_v3 = vld [vmem:[%s13560_s30 + $0x12c] sm:$0x1]  ;;  %v15877_v43 = vld [vmem:[%s13560_s30 + $0x114] sm:$0x1] }
 0x1ab   : > { %v2755_v32 = vrot.slane %v2753_v53, 5  ;;  %v2709_v35 = vrot.slane %v2708_v25, 4  ;;  %v2742_v37 = vsel %vm13584_vm2, %v2737_v9, %v2741_v8  ;;  %v2725_v13 = vshll.u32 %v15843_v18, 16  ;;  %v20370_v53 = vld [vmem:[#allocation102_spill] sm:$0xff] }
 0x1ac   : > { %v2713_v6 = vrot.slane %v2711_v4, 5  ;;  %v2723_v31 = vrot.slane %v2722_v34, 4  ;;  %v15865_v21 = vrot.slane %v2870_v24, 4  ;;  %7801 = vrot.lane.b32.xlu0 %v12595_v46, %s13469_s19  ;;  %v2792_v25 = vor.u32 %v15611_v38, %v20370_v53 }
 0x1ad   : > { %v15813_v50 = vpop.permute.xlu1 %7523  ;;  %v2756_v0 = vsel %vm13584_vm2, %v2751_v39, %v2755_v32  ;;  %v2795_v9 = vshll.u32 %v15856_v45, 16  ;;  %v20372_v24 = vshll.u32 %v15614_v15, 16  ;;  %v2727_v34 = vrot.slane %v2725_v13, 5  ;;  %v20373_v32 = vld [vmem:[#allocation104_spill] sm:$0xff] }
 0x1ae   : > { %v15821_v36 = vpop.permute.xlu0 %7521  ;;  %v12598_v40 = vcombine.low %v2742_v37, %v2756_v0  ;;  %v2714_v2 = vsel %vm13584_vm2, %v2709_v35, %v2713_v6  ;;  %v2887_v46 = vshll.u32 %v15624_v41, 16  ;;  %v2793_v39 = vrot.slane %v2792_v25, 4  ;;  %v20374_v25 = vld [vmem:[#allocation105_spill] sm:$0xff] }
 0x1af   : > { %v15883_v4 = vrot.slane %v20372_v24, 5  ;;  %v2797_v38 = vrot.slane %v2795_v9, 5  ;;  %v2806_v53 = vor.u32 %v15618_v20, %v20373_v32  ;;  %v2728_v15 = vsel %vm13584_vm2, %v2723_v31, %v2727_v34  ;;  %v20375_v9 = vld [vmem:[#allocation106_spill] sm:$0xff] }
 0x1b0   : > { %7807 = vrot.lane.b32.xlu1 %v12598_v40, %s13469_s19  ;;  %v2809_v35 = vshll.u32 %v15871_v3, 16  ;;  %v2764_v37 = vor.u32 %v15626_v12, %v15620_v42  ;;  %v2767_v6 = vshll.u32 %v15877_v43, 16  ;;  %v12597_v13 = vcombine.low %v2714_v2, %v2728_v15  ;;  %v15907_v40 = vld [vmem:[%s13560_s30 + $0x154] sm:$0x1]  ;;  %v15913_v42 = vld [vmem:[%s13560_s30 + $0x15c] sm:$0x1] }
 0x1b1   : > { %v15847_v54 = vpop.permute.xlu1 %7527  ;;  %v2798_v20 = vsel %vm13584_vm2, %v2793_v39, %v2797_v38  ;;  %v2807_v0 = vrot.slane %v2806_v53, 4  ;;  %v2778_v24 = vor.u32 %v20375_v9, %v20374_v25  ;;  %v2781_v12 = vshll.u32 %v15891_v5, 16 }
 0x1b2   : > { %v2811_v31 = vrot.slane %v2809_v35, 5  ;;  %v2765_v34 = vrot.slane %v2764_v37, 4  ;;  %v2769_v60 = vrot.slane %v2767_v6, 5  ;;  %v20377_v2 = vshrl.u32 %v15624_v41, 16  ;;  %7805 = vrot.lane.b32.xlu0 %v12597_v13, %s13469_s19  ;;  %v15925_v35 = vld [vmem:[%s13560_s30 + $0x144] sm:$0x1] }
 0x1b3   : > { %v15858_v55 = vpop.permute.xlu0 %7525  ;;  %v15919_v39 = vrot.slane %v2887_v46, 5  ;;  %v2779_v38 = vrot.slane %v2778_v24, 4  ;;  %v2848_v53 = vor.u32 %v15641_v58, %v15639_v47  ;;  %v2783_v25 = vrot.slane %v2781_v12, 5  ;;  %v15938_v58 = vld [vmem:[%s13560_s30 + $0x14c] sm:$0x1] }
 0x1b4   : > { %v15917_v15 = vrot.slane %v20377_v2, 4  ;;  %v2812_v6 = vsel %vm13584_vm2, %v2807_v0, %v2811_v31  ;;  %v2770_v41 = vsel %vm13584_vm2, %v2765_v34, %v2769_v60  ;;  %v2851_v46 = vshll.u32 %v15907_v40, 16  ;;  %v20380_v31 = vld [vmem:[#allocation110_spill] sm:$0xff]  ;;  %v20381_v34 = vld [vmem:[#allocation111_spill] sm:$0xff] }
 0x1b5   : > { %v15879_v8 = vpop.permute.xlu1 %7531  ;;  %v12600_v9 = vcombine.low %v2798_v20, %v2812_v6  ;;  %v2849_v13 = vrot.slane %v2848_v53, 4  ;;  %v2862_v24 = vor.u32 %v15645_v61, %v15643_v51  ;;  %v2865_v47 = vshll.u32 %v15913_v42, 16  ;;  %v20382_v6 = vld [vmem:[#allocation112_spill] sm:$0xff] }
 0x1b6   : > { %20371 = vst [vmem:[#allocation97_spill] sm:$0xff] %v15879_v8  ;;  %v2784_v0 = vsel %vm13584_vm2, %v2779_v38, %v2783_v25  ;;  %v2853_v60 = vrot.slane %v2851_v46, 5  ;;  %v2820_v12 = vor.u32 %v20381_v34, %v20380_v31  ;;  %v2823_v20 = vshll.u32 %v15925_v35, 16 }
 0x1b7   : > { %v15893_v48 = vpop.permute.xlu0 %7529  ;;  %7811 = vrot.lane.b32.xlu1 %v12600_v9, %s13469_s19  ;;  %v12599_v51 = vcombine.low %v2770_v41, %v2784_v0  ;;  %v2863_v61 = vrot.slane %v2862_v24, 4  ;;  %v2867_v53 = vrot.slane %v2865_v47, 5  ;;  %v2837_v34 = vshll.u32 %v15938_v58, 16  ;;  %v20385_v41 = vld [vmem:[#allocation23_spill] sm:$0xff]  ;;  %v20387_v24 = vld [vmem:[#allocation88_spill] sm:$0xff] }
 0x1b8   : > { %v2854_v25 = vsel %vm13584_vm2, %v2849_v13, %v2853_v60  ;;  %v2821_v46 = vrot.slane %v2820_v12, 4  ;;  %v2825_v31 = vrot.slane %v2823_v20, 5  ;;  %v20386_v9 = vld [vmem:[#allocation87_spill] sm:$0xff]  ;;  %v15974_v12 = vld [vmem:[%s13560_s30 + $0x164] sm:$0x1] }
 0x1b9   : > { %v15909_v32 = vpop.permute.xlu1 %7535  ;;  %v20388_v47 = vcombine.low %v20386_v9, %v20387_v24  ;;  %7809 = vrot.lane.b32.xlu0 %v12599_v51, %s13469_s19  ;;  %v2868_v13 = vsel %vm13584_vm2, %v2863_v61, %v2867_v53  ;;  %v2839_v9 = vrot.slane %v2837_v34, 5  ;;  %v2904_v24 = vor.u32 %v15777_v10, %v15694_v29  ;;  %v15987_v61 = vld [vmem:[%s13560_s30 + $0x16c] sm:$0x1] }
 0x1ba   : > { %20376 = vst [vmem:[#allocation98_spill] sm:$0xff] %v15909_v32  ;;  %v15951_v32 = vld [vmem:[%s13560_s30 + $0x174] sm:$0x1]  ;;  %v12602_v8 = vcombine.low %v2854_v25, %v2868_v13  ;;  %v2918_v51 = vor.u32 %v15825_v19, %v15781_v52  ;;  %v2876_v53 = vor.u32 %v15883_v4, %v15865_v21  ;;  %v2890_v52 = vor.u32 %v15919_v39, %v15917_v15  ;;  %v11727_v19 = vld [vmem:[%s13560_s30 + $0x60] sm:$0xe] }
 0x1bb   : > { %v15927_v37 = vpop.permute.xlu0 %7533  ;;  %v15966_v0 = vsel %vm8285_vm6, %v20388_v47, %v20385_v41  ;;  %v2826_v41 = vsel %vm13584_vm2, %v2821_v46, %v2825_v31  ;;  %v2907_v47 = vshll.u32 %v15951_v32, 16  ;;  %v2905_v10 = vrot.slane %v2904_v24, 4  ;;  %v11725_v24 = vld [vmem:[%s13560_s30 + $0x50] sm:$0xe]  ;;  %v13301_v39 = vld [vmem:[%s13560_s30 + $0x18] sm:$0xf] }
 0x1bc   : > { %20378 = vst [vmem:[#allocation99_spill] sm:$0xff] %v15927_v37  ;;  %v15959_v37 = vld [vmem:[%s13560_s30 + $0x17c] sm:$0x1]  ;;  %7815 = vrot.lane.b32.xlu1 %v12602_v8, %s13469_s19  ;;  %v2879_v46 = vshll.u32 %v15974_v12, 16  ;;  %v2919_v21 = vrot.slane %v2918_v51, 4 }
 0x1bd   : > { %v15940_v2 = vpop.permute.xlu1 %7539  ;;  %v2909_v34 = vrot.slane %v2907_v47, 5  ;;  %v13300_v15 = vld [vmem:[%s13560_s30 + $0x10] sm:$0xf] }
 0x1be   : > { %20379 = vst [vmem:[#allocation100_spill] sm:$0xff] %v15940_v2  ;;  %v2834_v2 = vor.u32 %v20383_v56, %v20382_v6  ;;  %v13298_v56 = vld [vmem:[%s13560_s30 + $0x30] sm:$0xf]  ;;  %v13299_v6 = vld [vmem:[%s13560_s30 + $0x38] sm:$0xf]  ;;  %v2881_v13 = vrot.slane %v2879_v46, 5 }
 0x1bf   : > { %v15953_v38 = vpop.permute.xlu0 %7537  ;;  %v2910_v47 = vsel %vm13584_vm2, %v2905_v10, %v2909_v34  ;;  %v11759_v46 = vrot.slane %v11727_v19, 9  ;;  %v11757_v34 = vrot.slane %v11725_v24, 9  ;;  %v3027_v19 = vrot.slane %v15669_v22, 5 }
 0x1c0   : > { %20384 = vst [vmem:[#allocation102_spill] sm:$0xff] %v15953_v38  ;;  %v12432_v38 = vcombine.low %v13298_v56, %v13299_v6  ;;  %v2835_v60 = vrot.slane %v2834_v2, 4  ;;  %v2921_v2 = vshll.u32 %v15959_v37, 16  ;;  %v11728_v56 = vld [vmem:[%s13560_s30 + $0x68] sm:$0xe]  ;;  %v2877_v6 = vrot.slane %v2876_v53, 4 }
 0x1c1   : > { %v15976_v20 = vpop.permute.xlu1 %7543 }
 0x1c2   : > { %20389 = vst [vmem:[#allocation104_spill] sm:$0xff] %v15976_v20  ;;  %v2840_v29 = vsel %vm13584_vm2, %v2835_v60, %v2839_v9  ;;  %v2923_v4 = vrot.slane %v2921_v2, 5  ;;  %v2891_v60 = vrot.slane %v2890_v52, 4  ;;  %v2893_v9 = vshll.u32 %v15987_v61, 16  ;;  %v20392_v20 = vld [vmem:[#allocation24_spill] sm:$0xff]  ;;  %v20394_v52 = vld [vmem:[#allocation107_spill] sm:$0xff] }
 0x1c3   : > { %v15991_v25 = vpop.permute.xlu0 %7541  ;;  %v12601_v31 = vcombine.low %v2826_v41, %v2840_v29  ;;  %v12430_v41 = vcombine.low %v13300_v15, %v13301_v39  ;;  %v11726_v2 = vld [vmem:[%s13560_s30 + $0x58] sm:$0xe]  ;;  %v11760_v15 = vrot.slane %v11728_v56, 9  ;;  %v20395_v39 = vld [vmem:[#allocation109_spill] sm:$0xff] }
 0x1c4   : > { %20390 = vst [vmem:[#allocation105_spill] sm:$0xff] %v15991_v25  ;;  %v16007_v25 = vsel %vm8285_vm6, %v12432_v38, %v20392_v20  ;;  %v2924_v51 = vsel %vm13584_vm2, %v2919_v21, %v2923_v4  ;;  %v2882_v38 = vsel %vm13584_vm2, %v2877_v6, %v2881_v13  ;;  %v2895_v20 = vrot.slane %v2893_v9, 5  ;;  %v11731_v21 = vld [vmem:[%s13560_s30 + $0x80] sm:$0xe] }
 0x1c5   : > { %v16001_v8 = vpop.permute.xlu1 %7547  ;;  %7813 = vrot.lane.b32.xlu0 %v12601_v31, %s13469_s19  ;;  %v12604_v29 = vcombine.low %v2910_v47, %v2924_v51  ;;  %v3031_v31 = vrot.slane %v20394_v52, 5  ;;  %v3035_v10 = vrot.slane %v20395_v39, 5  ;;  %v20397_v6 = vld [vmem:[#allocation113_spill] sm:$0xff]  ;;  %v11758_v9 = vrot.slane %v11726_v2, 9  ;;  %v11732_v51 = vld [vmem:[%s13560_s30 + $0x88] sm:$0xe] }
 0x1c6   : > { %20391 = vst [vmem:[#allocation106_spill] sm:$0xff] %v16001_v8  ;;  %v2896_v47 = vsel %vm13584_vm2, %v2891_v60, %v2895_v20  ;;  %v3023_v13 = vrot.slane %v20397_v6, 5  ;;  %v13302_v56 = vld [vmem:[%s13560_s30 + $0x60] sm:$0xf]  ;;  %v13303_v52 = vld [vmem:[%s13560_s30 + $0x68] sm:$0xf] }
 0x1c7   : > { %v16017_v53 = vpop.permute.xlu0 %7545  ;;  %7819 = vrot.lane.b32.xlu1 %v12604_v29, %s13469_s19  ;;  %v12434_v39 = vcombine.low %v13302_v56, %v13303_v52  ;;  %v12603_v24 = vcombine.low %v2882_v38, %v2896_v47  ;;  %v3036_v29 = vsel %vm13804_vm5, %v11760_v15, %v3035_v10  ;;  %v20399_v20 = vld [vmem:[#allocation25_spill] sm:$0xff]  ;;  %v3028_v38 = vsel %vm13804_vm5, %v11758_v9, %v3027_v19  ;;  %v11736_v19 = vld [vmem:[%s13560_s30 + $0xb8] sm:$0xe]  ;;  %v20400_v56 = vld [vmem:[#allocation7_spill] sm:$0xff] }
 0x1c8   : > { %20393 = vst [vmem:[#allocation110_spill] sm:$0xff] %v16017_v53  ;;  %v3032_v53 = vsel %vm13804_vm5, %v11759_v46, %v3031_v31  ;;  %v16044_v2 = vsel %vm8285_vm6, %v12430_v41, %v20399_v20  ;;  %v3024_v6 = vsel %vm13804_vm5, %v11757_v34, %v3023_v13  ;;  %v11763_v31 = vrot.slane %v11731_v21, 9  ;;  %v11735_v41 = vld [vmem:[%s13560_s30 + $0xb0] sm:$0xe]  ;;  %v11947_v8 = vld [vmem:[%s13560_s30 + $0x180] sm:$0xf] }
 0x1c9   : > { %v16024_v4 = vpop.permute.xlu1 %7599  ;;  %v12606_v22 = vcombine.low %v3032_v53, %v3036_v29  ;;  %7817 = vrot.lane.b32.xlu0 %v12603_v24, %s13469_s19  ;;  %v12605_v46 = vcombine.low %v3024_v6, %v3028_v38  ;;  %v3047_v15 = vrot.slane %v15686_v1, 5  ;;  %v11764_v10 = vrot.slane %v11732_v51, 9  ;;  %v13304_v1 = vld [vmem:[%s13560_s30 + $0x50] sm:$0xf]  ;;  %v13305_v51 = vld [vmem:[%s13560_s30 + $0x58] sm:$0xf] }
 0x1ca   : > { %20396 = vst [vmem:[#allocation111_spill] sm:$0xff] %v16024_v4  ;;  %v11729_v4 = vld [vmem:[%s13560_s30 + $0x70] sm:$0xe]  ;;  %v3051_v53 = vrot.slane %v15692_v11, 5  ;;  %v3039_v13 = vrot.slane %v15701_v44, 5  ;;  %v11762_v9 = vrot.slane %v11730_v27, 9  ;;  %v16061_v21 = vsel %vm8285_vm6, %v12434_v39, %v20400_v56 }
 0x1cb   : > { %v16040_v60 = vpop.permute.xlu0 %7597  ;;  %7871 = vrot.lane.b32.xlu1 %v12606_v22, %s13470_s21  ;;  %v11761_v34 = vrot.slane %v11729_v4, 9  ;;  %v12433_v52 = vcombine.low %v13304_v1, %v13305_v51  ;;  %v3048_v24 = vsel %vm13804_vm5, %v11763_v31, %v3047_v15  ;;  %v3043_v29 = vrot.slane %v15716_v59, 5  ;;  %v11733_v11 = vld [vmem:[%s13560_s30 + $0xa0] sm:$0xe]  ;;  %v11734_v22 = vld [vmem:[%s13560_s30 + $0xa8] sm:$0xe] }
 0x1cc   : > { %v3052_v27 = vsel %vm13804_vm5, %v11764_v10, %v3051_v53  ;;  %v11767_v39 = vrot.slane %v11735_v41, 9  ;;  %v3063_v20 = vrot.slane %v15725_v16, 5  ;;  %v11768_v38 = vrot.slane %v11736_v19, 9  ;;  %v11739_v15 = vld [vmem:[%s13560_s30 + $0xd0] sm:$0xe] }
 0x1cd   : > { %v16053_v47 = vpop.permute.xlu1 %7603  ;;  %v3040_v44 = vsel %vm13804_vm5, %v11761_v34, %v3039_v13  ;;  %7869 = vrot.lane.b32.xlu0 %v12605_v46, %s13470_s21  ;;  %v12608_v6 = vcombine.low %v3048_v24, %v3052_v27  ;;  %v3044_v59 = vsel %vm13804_vm5, %v11762_v9, %v3043_v29  ;;  %v3067_v31 = vrot.slane %v15735_v33, 5  ;;  %v11740_v46 = vld [vmem:[%s13560_s30 + $0xd8] sm:$0xe]  ;;  %v13306_v13 = vld [vmem:[%s13560_s30 + $0x70] sm:$0xf] }
 0x1ce   : > { %v12607_v53 = vcombine.low %v3040_v44, %v3044_v59  ;;  %v3064_v41 = vsel %vm13804_vm5, %v11767_v39, %v3063_v20  ;;  %v11765_v16 = vrot.slane %v11733_v11, 9  ;;  %v3055_v34 = vrot.slane %v15743_v62, 5  ;;  %v13307_v56 = vld [vmem:[%s13560_s30 + $0x78] sm:$0xf]  ;;  %v11737_v51 = vld [vmem:[%s13560_s30 + $0xc0] sm:$0xe] }
 0x1cf   : > { %v16069_v4 = vpop.permute.xlu0 %7601  ;;  %v12435_v1 = vcombine.low %v13306_v13, %v13307_v56  ;;  %7875 = vrot.lane.b32.xlu1 %v12608_v6, %s13470_s21  ;;  %v3068_v33 = vsel %vm13804_vm5, %v11768_v38, %v3067_v31  ;;  %v11766_v9 = vrot.slane %v11734_v22, 9  ;;  %v3059_v19 = vrot.slane %v15754_v28, 5  ;;  %v11738_v24 = vld [vmem:[%s13560_s30 + $0xc8] sm:$0xe]  ;;  %v20401_v11 = vld [vmem:[#allocation8_spill] sm:$0xff] }
 0x1d0   : > { %v16100_v62 = vsel %vm8285_vm6, %v12433_v52, %v20401_v11  ;;  %v12610_v27 = vcombine.low %v3064_v41, %v3068_v33  ;;  %v3056_v44 = vsel %vm13804_vm5, %v11765_v16, %v3055_v34  ;;  %v11771_v39 = vrot.slane %v11739_v15, 9  ;;  %v11743_v59 = vld [vmem:[%s13560_s30 + $0x100] sm:$0xe]  ;;  %v11744_v16 = vld [vmem:[%s13560_s30 + $0x108] sm:$0xe] }
 0x1d1   : > { %v16082_v10 = vpop.permute.xlu1 %7607  ;;  %7873 = vrot.lane.b32.xlu0 %v12607_v53, %s13470_s21  ;;  %v3060_v20 = vsel %vm13804_vm5, %v11766_v9, %v3059_v19  ;;  %v3079_v28 = vrot.slane %v15765_v57, 5  ;;  %v11772_v22 = vrot.slane %v11740_v46, 9  ;;  %v3083_v6 = vrot.slane %v15773_v30, 5  ;;  %v20403_v53 = vld [vmem:[#allocation10_spill] sm:$0xff]  ;;  %v11741_v13 = vld [vmem:[%s13560_s30 + $0xf0] sm:$0xe] }
 0x1d2   : > { %v12609_v38 = vcombine.low %v3056_v44, %v3060_v20  ;;  %v11769_v31 = vrot.slane %v11737_v51, 9  ;;  %v3071_v41 = vrot.slane %v15789_v14, 5  ;;  %v11770_v15 = vrot.slane %v11738_v24, 9  ;;  %v11742_v56 = vld [vmem:[%s13560_s30 + $0xf8] sm:$0xe] }
 0x1d3   : > { %v16096_v29 = vpop.permute.xlu0 %7605  ;;  %v16116_v34 = vsel %vm8285_vm6, %v12435_v1, %v20403_v53  ;;  %7879 = vrot.lane.b32.xlu1 %v12610_v27, %s13470_s21  ;;  %v3080_v57 = vsel %vm13804_vm5, %v11771_v39, %v3079_v28  ;;  %v3084_v30 = vsel %vm13804_vm5, %v11772_v22, %v3083_v6  ;;  %v3075_v46 = vrot.slane %v15800_v26, 5  ;;  %v11747_v11 = vld [vmem:[%s13560_s30 + $0x120] sm:$0xe]  ;;  %v11748_v22 = vld [vmem:[%s13560_s30 + $0x128] sm:$0xe] }
 0x1d4   : > { %v12612_v33 = vcombine.low %v3080_v57, %v3084_v30  ;;  %v3072_v1 = vsel %vm13804_vm5, %v11769_v31, %v3071_v41  ;;  %v11775_v9 = vrot.slane %v11743_v59, 9  ;;  %v3095_v51 = vrot.slane %v15811_v23, 5  ;;  %v20405_v6 = vld [vmem:[#allocation18_spill] sm:$0xff]  ;;  %v11745_v31 = vld [vmem:[%s13560_s30 + $0x110] sm:$0xe]  ;;  %v20407_v41 = vld [vmem:[#allocation20_spill] sm:$0xff] }
 0x1d5   : > { %v16110_v52 = vpop.permute.xlu1 %7611  ;;  %7877 = vrot.lane.b32.xlu0 %v12609_v38, %s13470_s21  ;;  %v3076_v19 = vsel %vm13804_vm5, %v11770_v15, %v3075_v46  ;;  %v11776_v26 = vrot.slane %v11744_v16, 9  ;;  %v3099_v24 = vrot.slane %v15819_v63, 5  ;;  %v11773_v39 = vrot.slane %v11741_v13, 9  ;;  %v11746_v30 = vld [vmem:[%s13560_s30 + $0x118] sm:$0xe] }
 0x1d6   : > { %20402 = vst [vmem:[#allocation112_spill] sm:$0xff] %v16110_v52  ;;  %v12611_v44 = vcombine.low %v3072_v1, %v3076_v19  ;;  %v3087_v20 = vrot.slane %v15834_v17, 5  ;;  %v11774_v28 = vrot.slane %v11742_v56, 9  ;;  %v16143_v59 = vsel %vm8334_vm7, %v16044_v2, %v20405_v6  ;;  %v20408_v2 = vld [vmem:[#allocation19_spill] sm:$0xff]  ;;  %v12336_v52 = vld [vmem:[%s13560_s30 + $0xcc] sm:$0x1] }
 0x1d7   : > { %v16126_v14 = vpop.permute.xlu0 %7609  ;;  %7883 = vrot.lane.b32.xlu1 %v12612_v33, %s13470_s21  ;;  %v3096_v23 = vsel %vm13804_vm5, %v11775_v9, %v3095_v51  ;;  %v3100_v63 = vsel %vm13804_vm5, %v11776_v26, %v3099_v24  ;;  %v3091_v38 = vrot.slane %v15843_v18, 5  ;;  %v16157_v15 = vsel %vm8334_vm7, %v15966_v0, %v20407_v41  ;;  %v11751_v56 = vld [vmem:[%s13560_s30 + $0x150] sm:$0xe]  ;;  %v11752_v51 = vld [vmem:[%s13560_s30 + $0x158] sm:$0xe]  ;;  %v20410_v26 = vld [vmem:[#allocation26_spill] sm:$0xff] }
 0x1d8   : > { %v16162_v16 = vsel %vm8334_vm7, %v16007_v25, %v20408_v2  ;;  %v12614_v53 = vcombine.low %v3096_v23, %v3100_v63  ;;  %v3088_v57 = vsel %vm13804_vm5, %v11773_v39, %v3087_v20  ;;  %v11779_v46 = vrot.slane %v11747_v11, 9  ;;  %v20411_v24 = vld [vmem:[#allocation90_spill] sm:$0xff]  ;;  %v11749_v20 = vld [vmem:[%s13560_s30 + $0x140] sm:$0xe] }
 0x1d9   : > { %v16136_v27 = vpop.permute.xlu1 %7615  ;;  %7881 = vrot.lane.b32.xlu0 %v12611_v44, %s13470_s21  ;;  %v3092_v18 = vsel %vm13804_vm5, %v11774_v28, %v3091_v38  ;;  %v3111_v0 = vrot.slane %v15856_v45, 5  ;;  %v11780_v13 = vrot.slane %v11748_v22, 9  ;;  %v3115_v1 = vrot.slane %v15871_v3, 5  ;;  %v20413_v28 = vld [vmem:[#allocation22_spill] sm:$0xff] }
 0x1da   : > { %20404 = vst [vmem:[#allocation114_spill] sm:$0xff] %v16136_v27  ;;  %v12613_v25 = vcombine.low %v3088_v57, %v3092_v18  ;;  %v11777_v9 = vrot.slane %v11745_v31, 9  ;;  %v3103_v19 = vrot.slane %v15877_v43, 5  ;;  %v16180_v44 = vsel %vm8334_vm7, %v20411_v24, %v20410_v26  ;;  %v11750_v63 = vld [vmem:[%s13560_s30 + $0x148] sm:$0xe] }
 0x1db   : > { %v16152_v17 = vpop.permute.xlu0 %7613  ;;  %7887 = vrot.lane.b32.xlu1 %v12614_v53, %s13470_s21  ;;  %v3112_v45 = vsel %vm13804_vm5, %v11779_v46, %v3111_v0  ;;  %v11778_v11 = vrot.slane %v11746_v30, 9  ;;  %v3107_v39 = vrot.slane %v15891_v5, 5  ;;  %v8346_v43 = vsel %vm8334_vm7, %v16061_v21, %v20413_v28  ;;  %v11755_v21 = vld [vmem:[%s13560_s30 + $0x170] sm:$0xe]  ;;  %v11756_v46 = vld [vmem:[%s13560_s30 + $0x178] sm:$0xe] }
 0x1dc   : > { %20406 = vst [vmem:[#allocation23_spill] sm:$0xff] %v16152_v17  ;;  %v3116_v22 = vsel %vm13804_vm5, %v11780_v13, %v3115_v1  ;;  %v3104_v6 = vsel %vm13804_vm5, %v11777_v9, %v3103_v19  ;;  %v11783_v23 = vrot.slane %v11751_v56, 9  ;;  %v3127_v31 = vrot.slane %v15907_v40, 5  ;;  %v20415_v0 = vld [vmem:[#allocation28_spill] sm:$0xff]  ;;  %v11753_v1 = vld [vmem:[%s13560_s30 + $0x160] sm:$0xe] }
 0x1dd   : > { %v16172_v33 = vpop.permute.xlu1 %7619  ;;  %7885 = vrot.lane.b32.xlu0 %v12613_v25, %s13470_s21  ;;  %v12616_v38 = vcombine.low %v3112_v45, %v3116_v22  ;;  %v3108_v5 = vsel %vm13804_vm5, %v11778_v11, %v3107_v39  ;;  %v11784_v41 = vrot.slane %v11752_v51, 9  ;;  %v3131_v57 = vrot.slane %v15913_v42, 5  ;;  %v20418_v22 = vld [vmem:[#allocation30_spill] sm:$0xff] }
 0x1de   : > { %20409 = vst [vmem:[#allocation87_spill] sm:$0xff] %v16172_v33  ;;  %v12615_v53 = vcombine.low %v3104_v6, %v3108_v5  ;;  %v11781_v30 = vrot.slane %v11749_v20, 9  ;;  %v3119_v18 = vrot.slane %v15925_v35, 5  ;;  %v8344_v13 = vsel %vm8334_vm7, %v16100_v62, %v20415_v0  ;;  %v11754_v62 = vld [vmem:[%s13560_s30 + $0x168] sm:$0xe]  ;;  %v20420_v5 = vld [vmem:[#allocation37_spill] sm:$0xff] }
 0x1df   : > { %v16187_v3 = vpop.permute.xlu0 %7617  ;;  %7891 = vrot.lane.b32.xlu1 %v12616_v38, %s13470_s21  ;;  %v3128_v40 = vsel %vm13804_vm5, %v11783_v23, %v3127_v31  ;;  %v11782_v56 = vrot.slane %v11750_v63, 9  ;;  %v3123_v25 = vrot.slane %v15938_v58, 5  ;;  %v3132_v42 = vsel %vm13804_vm5, %v11784_v41, %v3131_v57  ;;  %v16247_v31 = vld [vmem:[%s13560_s30 + $0x68] sm:$0xf]  ;;  %v16250_v41 = vld [vmem:[%s13560_s30 + $0x70] sm:$0xf] }
 0x1e0   : > { %20412 = vst [vmem:[#allocation88_spill] sm:$0xff] %v16187_v3  ;;  %v3120_v35 = vsel %vm13804_vm5, %v11781_v30, %v3119_v18  ;;  %v11787_v19 = vrot.slane %v11755_v21, 9  ;;  %v12618_v51 = vcombine.low %v3128_v40, %v3132_v42  ;;  %v3143_v58 = vrot.slane %v15951_v32, 5  ;;  %v20424_v40 = vld [vmem:[#allocation41_spill] sm:$0xff] }
 0x1e1   : > { %v16202_v2 = vpop.permute.xlu1 %7623  ;;  %7889 = vrot.lane.b32.xlu0 %v12615_v53, %s13470_s21  ;;  %v3124_v26 = vsel %vm13804_vm5, %v11782_v56, %v3123_v25  ;;  %v11788_v24 = vrot.slane %v11756_v46, 9  ;;  %v3147_v39 = vrot.slane %v15959_v37, 5  ;;  %v11785_v20 = vrot.slane %v11753_v1, 9  ;;  %v20422_v53 = vld [vmem:[#allocation39_spill] sm:$0xff]  ;;  %v20423_v46 = vld [vmem:[#allocation42_spill] sm:$0xff]  ;;  %v20425_v56 = vld [vmem:[#allocation44_spill] sm:$0xff] }
 0x1e2   : > { %20414 = vst [vmem:[#allocation24_spill] sm:$0xff] %v16202_v2  ;;  %v12617_v11 = vcombine.low %v3120_v35, %v3124_v26  ;;  %v3135_v28 = vrot.slane %v15974_v12, 5  ;;  %v8348_v6 = vsel %vm8334_vm7, %v16116_v34, %v20418_v22  ;;  %v3144_v32 = vsel %vm13804_vm5, %v11787_v19, %v3143_v58  ;;  %v16271_v1 = vld [vmem:[%s13560_s30 + $0x58] sm:$0xf]  ;;  %v16274_v42 = vld [vmem:[%s13560_s30 + $0x60] sm:$0xf] }
 0x1e3   : > { %v16215_v9 = vpop.permute.xlu0 %7621  ;;  %7895 = vrot.lane.b32.xlu1 %v12618_v51, %s13470_s21  ;;  %v11786_v23 = vrot.slane %v11754_v62, 9  ;;  %v3139_v63 = vrot.slane %v15987_v61, 5  ;;  %v8371_v37 = vsel %vm8367_vm8, %v16143_v59, %v20420_v5  ;;  %v3148_v12 = vsel %vm13804_vm5, %v11788_v24, %v3147_v39  ;;  %v20421_v61 = vld [vmem:[#allocation40_spill] sm:$0xff]  ;;  %v20426_v35 = vld [vmem:[#allocation46_spill] sm:$0xff] }
 0x1e4   : > { %20416 = vst [vmem:[#allocation107_spill] sm:$0xff] %v16215_v9  ;;  %v3136_v34 = vsel %vm13804_vm5, %v11785_v20, %v3135_v28  ;;  %v8369_v21 = vsel %vm8367_vm8, %v16157_v15, %v20421_v61  ;;  %v8375_v59 = vsel %vm8367_vm8, %v16162_v16, %v20422_v53  ;;  %v12620_v57 = vcombine.low %v3144_v32, %v3148_v12  ;;  %v20427_v62 = vld [vmem:[#allocation54_spill] sm:$0xff]  ;;  %v20429_v58 = vld [vmem:[#allocation56_spill] sm:$0xff]  ;;  %v20432_v32 = vld [vmem:[#allocation59_spill] sm:$0xff] }
 0x1e5   : > { %v16226_v45 = vpop.permute.xlu1 %7627  ;;  %7893 = vrot.lane.b32.xlu0 %v12617_v11, %s13470_s21  ;;  %v3140_v30 = vsel %vm13804_vm5, %v11786_v23, %v3139_v63  ;;  %v8373_v0 = vsel %vm8367_vm8, %v16180_v44, %v20423_v46  ;;  %v8379_v15 = vsel %vm8367_vm8, %v8346_v43, %v20424_v40  ;;  %v8377_v16 = vsel %vm8367_vm8, %v8344_v13, %v20425_v56  ;;  %v20428_v13 = vld [vmem:[#allocation55_spill] sm:$0xff]  ;;  %v20430_v11 = vld [vmem:[#allocation57_spill] sm:$0xff]  ;;  %v20431_v20 = vld [vmem:[#allocation58_spill] sm:$0xff] }
 0x1e6   : > { %20417 = vst [vmem:[#allocation109_spill] sm:$0xff] %v16226_v45  ;;  %v12619_v25 = vcombine.low %v3136_v34, %v3140_v30  ;;  %v8381_v19 = vsel %vm8367_vm8, %v8348_v6, %v20426_v35  ;;  %v8404_v51 = vsel %vm8400_vm9, %v8371_v37, %v20427_v62  ;;  %v12622_v44 = vcombine.low %v16247_v31, %v16250_v41  ;;  %v16294_v22 = vld [vmem:[%s13560_s30 + $0x88] sm:$0xf]  ;;  %v16297_v6 = vld [vmem:[%s13560_s30 + $0x90] sm:$0xf]  ;;  %v20433_v63 = vld [vmem:[#allocation61_spill] sm:$0xff] }
 0x1e7   : > { %v16237_v38 = vpop.permute.xlu0 %7625  ;;  %7899 = vrot.lane.b32.xlu1 %v12620_v57, %s13470_s21  ;;  %v8402_v26 = vsel %vm8400_vm9, %v8369_v21, %v20428_v13  ;;  %v8408_v24 = vsel %vm8400_vm9, %v8375_v59, %v20429_v58  ;;  %v8406_v39 = vsel %vm8400_vm9, %v8373_v0, %v20430_v11  ;;  %v8412_v28 = vsel %vm8400_vm9, %v8379_v15, %v20431_v20  ;;  %v20434_v34 = vld [vmem:[#allocation70_spill] sm:$0xff]  ;;  %v20435_v21 = vld [vmem:[#allocation71_spill] sm:$0xff]  ;;  %v20436_v59 = vld [vmem:[#allocation72_spill] sm:$0xff] }
 0x1e8   : > { %20419 = vst [vmem:[#allocation113_spill] sm:$0xff] %v16237_v38  ;;  %v8410_v23 = vsel %vm8400_vm9, %v8377_v16, %v20432_v32  ;;  %v8414_v5 = vsel %vm8400_vm9, %v8381_v19, %v20433_v63  ;;  %v12621_v37 = vcombine.low %v16271_v1, %v16274_v42  ;;  %v8437_v61 = vsel %vm20204_vm10, %v8404_v51, %v20434_v34  ;;  %v20437_v30 = vld [vmem:[#allocation73_spill] sm:$0xff]  ;;  %v20438_v0 = vld [vmem:[#allocation74_spill] sm:$0xff]  ;;  %v20439_v15 = vld [vmem:[#allocation75_spill] sm:$0xff] }
 0x1e9   : > { %v16261_v18 = vpop.permute.xlu1 %7711  ;;  %7897 = vrot.lane.b32.xlu0 %v12619_v25, %s13470_s21  ;;  %v8435_v53 = vsel %vm20204_vm10, %v8402_v26, %v20435_v21  ;;  %v8441_v57 = vsel %vm20204_vm10, %v8408_v24, %v20436_v59  ;;  %v8439_v46 = vsel %vm20204_vm10, %v8406_v39, %v20437_v30  ;;  %v8445_v40 = vsel %vm20204_vm10, %v8412_v28, %v20438_v0  ;;  %v16324_v25 = vld [vmem:[%s13560_s30 + $0x78] sm:$0xf]  ;;  %v16327_v35 = vld [vmem:[%s13560_s30 + $0x80] sm:$0xf]  ;;  %v20441_v13 = vld [vmem:[#allocation86_spill] sm:$0xff]  ;;  %s13472_s21 = smov 39  }
 0x1ea   : > { %v8443_v56 = vsel %vm20204_vm10, %v8410_v23, %v20439_v15  ;;  %v12624_v16 = vcombine.low %v16294_v22, %v16297_v6  ;;  %v20440_v62 = vld [vmem:[#allocation77_spill] sm:$0xff]  ;;  %v8470_v26 = vsel %vm8466_vm11, %v8437_v61, %v20441_v13  ;;  %v20443_v11 = vld [vmem:[#allocation91_spill] sm:$0xff]  ;;  %v20444_v39 = vld [vmem:[#allocation92_spill] sm:$0xff]  ;;  %v12623_v30 = vcombine.low %v16324_v25, %v16327_v35 }
 0x1eb   : > { %v16283_v43 = vpop.permute.xlu0 %7709  ;;  %7983 = vrot.lane.b32.xlu1 %v12622_v44, %s20192_s23  ;;  %v8447_v51 = vsel %vm20204_vm10, %v8414_v5, %v20440_v62  ;;  %v20442_v58 = vld [vmem:[#allocation89_spill] sm:$0xff]  ;;  %v8474_v44 = vsel %vm8466_vm11, %v8441_v57, %v20443_v11  ;;  %v8472_v20 = vsel %vm8466_vm11, %v8439_v46, %v20444_v39  ;;  %v20446_v23 = vld [vmem:[#allocation94_spill] sm:$0xff]  ;;  %v20447_v34 = vld [vmem:[#allocation96_spill] sm:$0xff]  ;;  %v8503_v59 = vsel %vm20205_vm12, %v8470_v26, %v15767_v7 }
 0x1ec   : > { %v8468_v24 = vsel %vm8466_vm11, %v8435_v53, %v20442_v58  ;;  %v20445_v28 = vld [vmem:[#allocation93_spill] sm:$0xff]  ;;  %v8476_v63 = vsel %vm8466_vm11, %v8443_v56, %v20446_v23  ;;  %v8480_v5 = vsel %vm8466_vm11, %v8447_v51, %v20447_v34  ;;  %v16349_v61 = vld [vmem:[%s13560_s30 + $0xb8] sm:$0xf]  ;;  %v8505_v46 = vsel %vm20205_vm12, %v8472_v20, %v15821_v36  ;;  %v16379_v56 = vld [vmem:[%s13560_s30 + $0xa8] sm:$0xf] }
 0x1ed   : > { %v16306_v12 = vpop.permute.xlu1 %7715  ;;  %v8478_v32 = vsel %vm8466_vm11, %v8445_v40, %v20445_v28  ;;  %7981 = vrot.lane.b32.xlu0 %v12621_v37, %s20192_s23  ;;  %v16352_v21 = vld [vmem:[%s13560_s30 + $0xc0] sm:$0xf]  ;;  %v8501_v57 = vsel %vm20205_vm12, %v8468_v24, %v15794_v49  ;;  %v8507_v37 = vsel %vm20205_vm12, %v8474_v44, %v15813_v50  ;;  %v3245_v0 = vshrl.u32 %v16247_v31, 16  ;;  %v20448_v62 = vld [vmem:[#allocation111_spill] sm:$0xff]  ;;  %v12046_v24 = vld [vmem:[%s13560_s30 + $0xa8] sm:$0xf] }
 0x1ee   : > { %v3248_v40 = vshll.u32 %v16247_v31, 16  ;;  %v8511_v49 = vsel %vm20205_vm12, %v8478_v32, %v15847_v54  ;;  %v8509_v15 = vsel %vm20205_vm12, %v8476_v63, %v15858_v55  ;;  %v3259_v50 = vshrl.u32 %v16250_v41, 16  ;;  %v16382_v31 = vld [vmem:[%s13560_s30 + $0xb0] sm:$0xf]  ;;  %v12045_v13 = vld [vmem:[%s13560_s30 + $0xa0] sm:$0xf] }
 0x1ef   : > { %v16329_v19 = vpop.permute.xlu0 %7713  ;;  %7987 = vrot.lane.b32.xlu1 %v12624_v16, %s20192_s23  ;;  %v12626_v36 = vcombine.low %v16349_v61, %v16352_v21  ;;  %v8513_v16 = vsel %vm20205_vm12, %v8480_v5, %v15893_v48  ;;  %v16388_v54 = vsel %vm8532_vm13, %v8503_v59, %v20448_v62  ;;  %v16392_v55 = vsel %vm8532_vm13, %v8501_v57, %v16040_v60  ;;  %v11949_v11 = vld [vmem:[%s13560_s30 + $0x64] sm:$0x1]  ;;  %v11981_v44 = vld [vmem:[%s13560_s30 + $0x60] sm:$0xe]  ;;  %v11982_v20 = vld [vmem:[%s13560_s30 + $0x68] sm:$0xe] }
 0x1f0   : > { %v16396_v51 = vsel %vm8532_vm13, %v8507_v37, %v16053_v47  ;;  %v16404_v48 = vsel %vm8532_vm13, %v8505_v46, %v16069_v4  ;;  %v16408_v58 = vsel %vm8532_vm13, %v8511_v49, %v16082_v10  ;;  %v16412_v60 = vsel %vm8532_vm13, %v8509_v15, %v16096_v29  ;;  %v11950_v34 = vld [vmem:[%s13560_s30 + $0x6c] sm:$0x1]  ;;  %v12110_v49 = vld [vmem:[%s13560_s30 + $0xa8] sm:$0xe]  ;;  %v12077_v62 = vld [vmem:[%s13560_s30 + $0xa4] sm:$0x1] }
 0x1f1   : > { %v16354_v53 = vpop.permute.xlu1 %7719  ;;  %7985 = vrot.lane.b32.xlu0 %v12623_v30, %s20192_s23  ;;  %v16416_v47 = vsel %vm8532_vm13, %v8513_v16, %v16126_v14  ;;  %v16421_v39 = vrot.slane %v3245_v0, 4  ;;  %v16423_v4 = vrot.slane %v3248_v40, 5  ;;  %v3262_v10 = vshll.u32 %v16250_v41, 16  ;;  %v12109_v30 = vld [vmem:[%s13560_s30 + $0xa0] sm:$0xe] }
 0x1f2   : > { %v12625_v29 = vcombine.low %v16379_v56, %v16382_v31  ;;  %v16432_v14 = vrot.slane %v3259_v50, 4  ;;  %v3217_v32 = vshrl.u32 %v16271_v1, 16  ;;  %v4696_v23 = vshrl.u32 %v12045_v13, 16  ;;  %v16495_v9 = vld [vmem:[%s13560_s30 + $0xb8] sm:$0xf] }
 0x1f3   : > { %v16369_v7 = vpop.permute.xlu0 %7717  ;;  %7991 = vrot.lane.b32.xlu1 %v12626_v36, %s20192_s23  ;;  %v4699_v63 = vshll.u32 %v12045_v13, 16  ;;  %v4710_v41 = vshrl.u32 %v12046_v24, 16  ;;  %v4713_v5 = vshll.u32 %v12046_v24, 16  ;;  %v12717_v59 = vcombine.low %v12045_v13, %v12046_v24 }
 0x1f4   : > { %20450 = vst [vmem:[#allocation25_spill] sm:$0xff] %v16432_v14  ;;  %v12013_v57 = vrot.slane %v11981_v44, 9  ;;  %v4698_v37 = vrot.slane %v4696_v23, 4  ;;  %v4501_v0 = vrot.slane %v11949_v11, 5  ;;  %v12014_v40 = vrot.slane %v11982_v20, 9 }
 0x1f5   : > { %v16400_v26 = vpop.permute.xlu1 %7723  ;;  %7989 = vrot.lane.b32.xlu0 %v12625_v29, %s20192_s23  ;;  %v4701_v46 = vrot.slane %v4699_v63, 5  ;;  %v3220_v15 = vshll.u32 %v16271_v1, 16  ;;  %v4712_v50 = vrot.slane %v4710_v41, 4  ;;  %v4715_v36 = vrot.slane %v4713_v5, 5  ;;  %v12078_v11 = vld [vmem:[%s13560_s30 + $0xac] sm:$0x1] }
 0x1f6   : > { %20449 = vst [vmem:[#allocation6_spill] sm:$0xff] %v16400_v26  ;;  %v4505_v16 = vrot.slane %v11950_v34, 5  ;;  %v16444_v13 = vrot.slane %v3262_v10, 5  ;;  %v4502_v24 = vsel %vm13804_vm5, %v12013_v57, %v4501_v0  ;;  %v12141_v44 = vrot.slane %v12109_v30, 9  ;;  %v16456_v57 = vld [vmem:[%s13560_s30 + $0xa8] sm:$0xf] }
 0x1f7   : > { %v16430_v28 = vpop.permute.xlu0 %7721  ;;  %9004 = vrot.lane.b32.xlu1 %v12717_v59, %s13461_s5  ;;  %v5241_v20 = vrot.slane %v12077_v62, 5  ;;  %v12142_v23 = vrot.slane %v12110_v49, 9  ;;  %v5245_v63 = vrot.slane %v12078_v11, 5  ;;  %v4702_v34 = vor.u32 %v4701_v46, %v4698_v37  ;;  %v16459_v30 = vld [vmem:[%s13560_s30 + $0xb0] sm:$0xf]  ;;  %s20512_s23 = smov 15  }
 0x1f8   : > { %20452 = vst [vmem:[#allocation8_spill] sm:$0xff] %v16444_v13  ;;  %v4506_v1 = vsel %vm13804_vm5, %v12014_v40, %v4505_v16  ;;  %v4705_v59 = vshll.u32 %v12077_v62, 16  ;;  %v4716_v45 = vor.u32 %v4715_v36, %v4712_v50  ;;  %v3231_v0 = vshrl.u32 %v16274_v42, 16  ;;  %v16465_v46 = vld [vmem:[%s13560_s30 + $0xac] sm:$0x1] }
 0x1f9   : > { %v16442_v29 = vpop.permute.xlu1 %7727  ;;  %v12701_v5 = vcombine.low %v4502_v24, %v4506_v1  ;;  %v5242_v10 = vsel %vm13804_vm5, %v12141_v44, %v5241_v20  ;;  %v5246_v40 = vsel %vm13804_vm5, %v12142_v23, %v5245_v63  ;;  %v4703_v49 = vrot.slane %v4702_v34, 4  ;;  %v16470_v36 = vld [vmem:[%s13560_s30 + $0xb4] sm:$0x1] }
 0x1fa   : > { %20451 = vst [vmem:[#allocation7_spill] sm:$0xff] %v16442_v29  ;;  %v4719_v37 = vshll.u32 %v12078_v11, 16  ;;  %v3234_v16 = vshll.u32 %v16274_v42, 16  ;;  %v12749_v24 = vcombine.low %v5242_v10, %v5246_v40  ;;  %v4707_v62 = vrot.slane %v4705_v59, 5  ;;  %v11951_v29 = vld [vmem:[%s13560_s30 + $0x74] sm:$0x1] }
 0x1fb   : > { %v16451_v41 = vpop.permute.xlu0 %7725  ;;  %8892 = vrot.lane.b32.xlu0 %v12701_v5, %s13460_s4  ;;  %v4717_v50 = vrot.slane %v4716_v45, 4  ;;  %v16472_v44 = vrot.slane %v3217_v32, 4  ;;  %v5435_v1 = vshrl.u32 %v16456_v57, 16  ;;  %v5438_v23 = vshll.u32 %v16456_v57, 16 }
 0x1fc   : > { %20453 = vst [vmem:[#allocation10_spill] sm:$0xff] %v16451_v41  ;;  %v4721_v20 = vrot.slane %v4719_v37, 5  ;;  %9164 = vrot.lane.b32.xlu1 %v12749_v24, %s13463_s7  ;;  %v4708_v63 = vsel %vm13584_vm2, %v4703_v49, %v4707_v62  ;;  %v5444_v45 = vshll.u32 %v16465_v46, 16  ;;  %v5449_v34 = vshrl.u32 %v16459_v30, 16  ;;  %v16488_v37 = vld [vmem:[%s13560_s30 + $0xb0] sm:$0xf] }
 0x1fd   : > { %v16476_v11 = vpop.permute.xlu1 %7731  ;;  %v5452_v32 = vshll.u32 %v16459_v30, 16  ;;  %v5437_v10 = vrot.slane %v5435_v1, 4  ;;  %v5440_v59 = vrot.slane %v5438_v23, 5  ;;  %v5458_v40 = vshll.u32 %v16470_v36, 16  ;;  %v12237_v23 = vld [vmem:[%s13560_s30 + $0xa8] sm:$0xe] }
 0x1fe   : > { %20454 = vst [vmem:[#allocation18_spill] sm:$0xff] %v16476_v11  ;;  %v4722_v5 = vsel %vm13584_vm2, %v4717_v50, %v4721_v20  ;;  %v16492_v49 = vrot.slane %v3220_v15, 5  ;;  %v5451_v38 = vrot.slane %v5449_v34, 4  ;;  %v16497_v11 = vrot.slane %v3231_v0, 4  ;;  %v12239_v41 = vld [vmem:[%s13560_s30 + $0xb8] sm:$0xe] }
 0x1ff   : > { %v16490_v24 = vpop.permute.xlu0 %7729  ;;  %v12733_v62 = vcombine.low %v4708_v63, %v4722_v5  ;;  %v5454_v2 = vrot.slane %v5452_v32, 5  ;;  %v5441_v50 = vor.u32 %v5440_v59, %v5437_v10  ;;  %v5446_v20 = vrot.slane %v5444_v45, 5  ;;  %v12238_v32 = vld [vmem:[%s13560_s30 + $0xb0] sm:$0xe]  ;;  %v12333_v59 = vld [vmem:[%s13560_s30 + $0xb4] sm:$0x1] }
 0x200   : > { %20456 = vst [vmem:[#allocation20_spill] sm:$0xff] %v16490_v24  ;;  %v5460_v1 = vrot.slane %v5458_v40, 5  ;;  %v12765_v15 = vcombine.low %v16456_v57, %v16459_v30  ;;  %v6174_v63 = vshrl.u32 %v16488_v37, 16  ;;  %v6177_v34 = vshll.u32 %v16488_v37, 16 }
 0x201   : > { %9084 = vrot.lane.b32.xlu0 %v12733_v62, %s13462_s6  ;;  %v5455_v33 = vor.u32 %v5454_v2, %v5451_v38  ;;  %v16506_v5 = vrot.slane %v3234_v16, 5  ;;  %v5442_v0 = vrot.slane %v5441_v50, 4  ;;  %v6188_v45 = vshrl.u32 %v16495_v9, 16  ;;  %v16511_v40 = vpop.permute.xlu1 %7735  ;;  %v12334_v62 = vld [vmem:[%s13560_s30 + $0xbc] sm:$0x1] }
 0x202   : > { %v6191_v10 = vshll.u32 %v16495_v9, 16  ;;  %20457 = vst [vmem:[#allocation19_spill] sm:$0xff] %v16511_v40  ;;  %v6176_v38 = vrot.slane %v6174_v63, 4  ;;  %v6179_v57 = vrot.slane %v6177_v34, 5  ;;  %v12269_v30 = vrot.slane %v12237_v23, 9 }
 0x203   : > { %v5456_v2 = vrot.slane %v5455_v33, 4  ;;  %v5447_v24 = vsel %vm13584_vm2, %v5442_v0, %v5446_v20  ;;  %v6190_v16 = vrot.slane %v6188_v45, 4  ;;  %v5980_v50 = vrot.slane %v16465_v46, 5  ;;  %v16518_v27 = vpop.permute.xlu0 %7733  ;;  %v11983_v20 = vld [vmem:[%s13560_s30 + $0x70] sm:$0xe] }
 0x204   : > { %v6193_v3 = vrot.slane %v6191_v10, 5  ;;  %20458 = vst [vmem:[#allocation26_spill] sm:$0xff] %v16518_v27  ;;  %v12270_v23 = vrot.slane %v12238_v32, 9  ;;  %v5984_v63 = vrot.slane %v16470_v36, 5  ;;  %v12813_v46 = vcombine.low %v16488_v37, %v16495_v9  ;;  %v11984_v10 = vld [vmem:[%s13560_s30 + $0x78] sm:$0xe] }
 0x205   : > { %v5461_v33 = vsel %vm13584_vm2, %v5456_v2, %v5460_v1  ;;  %9276 = vrot.lane.b32.xlu0 %v12765_v15, %s20194_s8  ;;  %v5981_v0 = vsel %vm13804_vm5, %v12269_v30, %v5980_v50  ;;  %v6180_v45 = vor.u32 %v6179_v57, %v6176_v38  ;;  %v6183_v1 = vshll.u32 %v12333_v59, 16  ;;  %v11952_v2 = vld [vmem:[%s13560_s30 + $0x7c] sm:$0x1]  ;;  %v12365_v37 = vld [vmem:[%s13560_s30 + $0xb0] sm:$0xe]  ;;  %v16536_v27 = vpop.permute.xlu1 %7739 }
 0x206   : > { %v12781_v34 = vcombine.low %v5447_v24, %v5461_v33  ;;  %v5985_v40 = vsel %vm13804_vm5, %v12270_v23, %v5984_v63  ;;  %v6194_v15 = vor.u32 %v6193_v3, %v6190_v16  ;;  %v6197_v32 = vshll.u32 %v12334_v62, 16  ;;  %20459 = vst [vmem:[#allocation90_spill] sm:$0xff] %v16536_v27  ;;  %v12366_v23 = vld [vmem:[%s13560_s30 + $0xb8] sm:$0xe] }
 0x207   : > { %v12797_v36 = vcombine.low %v5981_v0, %v5985_v40  ;;  %v6181_v24 = vrot.slane %v6180_v45, 4  ;;  %v12015_v33 = vrot.slane %v11983_v20, 9  ;;  %v4509_v9 = vrot.slane %v11951_v29, 5  ;;  %v12047_v29 = vld [vmem:[%s13560_s30 + $0xb0] sm:$0xf]  ;;  %v16545_v20 = vpop.permute.xlu0 %7737 }
 0x208   : > { %9356 = vrot.lane.b32.xlu1 %v12781_v34, %s20200_s9  ;;  %v6185_v38 = vrot.slane %v6183_v1, 5  ;;  %v6195_v57 = vrot.slane %v6194_v15, 4  ;;  %v6199_v30 = vrot.slane %v6197_v32, 5  ;;  %v12016_v50 = vrot.slane %v11984_v10, 9  ;;  %20460 = vst [vmem:[#allocation22_spill] sm:$0xff] %v16545_v20 }
 0x209   : > { %v3304_v3 = vshll.u32 %v16294_v22, 16  ;;  %9436 = vrot.lane.b32.xlu0 %v12797_v36, %s13466_s10  ;;  %v4510_v40 = vsel %vm13804_vm5, %v12015_v33, %v4509_v9  ;;  %v4513_v63 = vrot.slane %v11952_v2, 5  ;;  %v12397_v45 = vrot.slane %v12365_v37, 9  ;;  %v12048_v1 = vld [vmem:[%s13560_s30 + $0xb8] sm:$0xf] }
 0x20a   : > { %v6186_v34 = vsel %vm13584_vm2, %v6181_v24, %v6185_v38  ;;  %v6200_v0 = vsel %vm13584_vm2, %v6195_v57, %v6199_v30  ;;  %v6719_v10 = vrot.slane %v12333_v59, 5  ;;  %v12398_v2 = vrot.slane %v12366_v23, 9  ;;  %v12079_v57 = vld [vmem:[%s13560_s30 + $0xb4] sm:$0x1]  ;;  %v12111_v37 = vld [vmem:[%s13560_s30 + $0xb0] sm:$0xe] }
 0x20b   : > { %v12829_v15 = vcombine.low %v6186_v34, %v6200_v0  ;;  %v4514_v32 = vsel %vm13804_vm5, %v12016_v50, %v4513_v63  ;;  %v6723_v36 = vrot.slane %v12334_v62, 5  ;;  %v4724_v24 = vshrl.u32 %v12047_v29, 16  ;;  %v12112_v50 = vld [vmem:[%s13560_s30 + $0xb8] sm:$0xe]  ;;  %v16572_v16 = vpop.permute.xlu0 %7789 }
 0x20c   : > { %9548 = vrot.lane.b32.xlu1 %v12813_v46, %s13467_s11  ;;  %v12702_v33 = vcombine.low %v4510_v40, %v4514_v32  ;;  %v6720_v9 = vsel %vm13804_vm5, %v12397_v45, %v6719_v10  ;;  %v4727_v38 = vshll.u32 %v12047_v29, 16  ;;  %v4738_v30 = vshrl.u32 %v12048_v1, 16  ;;  %v16563_v23 = vpop.permute.xlu1 %7791  ;;  %v12080_v45 = vld [vmem:[%s13560_s30 + $0xbc] sm:$0x1]  ;;  %v16570_v59 = vld [vmem:[%s13560_s30 + $0xb8] sm:$0xf] }
 0x20d   : > { %v6724_v46 = vsel %vm13804_vm5, %v12398_v2, %v6723_v36  ;;  %v4741_v34 = vshll.u32 %v12048_v1, 16  ;;  %v4726_v40 = vrot.slane %v4724_v24, 4  ;;  %v12718_v0 = vcombine.low %v12047_v29, %v12048_v1  ;;  %v16575_v24 = vld [vmem:[%s13560_s30 + $0xc0] sm:$0xf] }
 0x20e   : > { %8894 = vrot.lane.b32.xlu0 %v12702_v33, %s13460_s4  ;;  %v4729_v63 = vrot.slane %v4727_v38, 5  ;;  %v12845_v10 = vcombine.low %v6720_v9, %v6724_v46  ;;  %v4740_v32 = vrot.slane %v4738_v30, 4  ;;  %v12143_v36 = vrot.slane %v12111_v37, 9  ;;  %v16582_v46 = vld [vmem:[%s13560_s30 + $0xbc] sm:$0x1] }
 0x20f   : > { %v4743_v2 = vrot.slane %v4741_v34, 5  ;;  %v5249_v62 = vrot.slane %v12079_v57, 5  ;;  %v12144_v27 = vrot.slane %v12112_v50, 9  ;;  %v5253_v33 = vrot.slane %v12080_v45, 5 }
 0x210   : > { %9628 = vrot.lane.b32.xlu1 %v12829_v15, %s13468_s18  ;;  %v4730_v20 = vor.u32 %v4729_v63, %v4726_v40  ;;  %v20461_v29 = vshrl.u32 %v16294_v22, 16  ;;  %v4733_v15 = vshll.u32 %v12079_v57, 16  ;;  %v4747_v38 = vshll.u32 %v12080_v45, 16  ;;  %v16592_v22 = vld [vmem:[%s13560_s30 + $0xc4] sm:$0x1] }
 0x211   : > { %v4744_v9 = vor.u32 %v4743_v2, %v4740_v32  ;;  %v16584_v37 = vrot.slane %v3304_v3, 5  ;;  %v5250_v30 = vsel %vm13804_vm5, %v12143_v36, %v5249_v62  ;;  %v5254_v34 = vsel %vm13804_vm5, %v12144_v27, %v5253_v33  ;;  %v16595_v3 = vpop.permute.xlu1 %7795  ;;  %v16608_v33 = vld [vmem:[%s13560_s30 + $0xc0] sm:$0xf] }
 0x212   : > { %v16579_v1 = vrot.slane %v20461_v29, 4  ;;  %9006 = vrot.lane.b32.xlu0 %v12718_v0, %s13461_s5  ;;  %v4731_v50 = vrot.slane %v4730_v20, 4  ;;  %v12750_v57 = vcombine.low %v5250_v30, %v5254_v34  ;;  %v4735_v40 = vrot.slane %v4733_v15, 5  ;;  %v16614_v34 = vld [vmem:[%s13560_s30 + $0xc8] sm:$0xf] }
 0x213   : > { %20463 = vst [vmem:[#allocation30_spill] sm:$0xff] %v16584_v37  ;;  %v4745_v63 = vrot.slane %v4744_v9, 4  ;;  %v4749_v45 = vrot.slane %v4747_v38, 5  ;;  %v5463_v0 = vshrl.u32 %v16570_v59, 16  ;;  %v5466_v62 = vshll.u32 %v16570_v59, 16  ;;  %v16610_v29 = vpop.permute.xlu0 %7793 }
 0x214   : > { %20462 = vst [vmem:[#allocation28_spill] sm:$0xff] %v16579_v1  ;;  %9708 = vrot.lane.b32.xlu1 %v12845_v10, %s13469_s19  ;;  %v5472_v32 = vshll.u32 %v16582_v46, 16  ;;  %v5477_v27 = vshrl.u32 %v16575_v24, 16  ;;  %v4736_v20 = vsel %vm13584_vm2, %v4731_v50, %v4735_v40  ;;  %v5480_v2 = vshll.u32 %v16575_v24, 16 }
 0x215   : > { %v4750_v10 = vsel %vm13584_vm2, %v4745_v63, %v4749_v45  ;;  %v5486_v36 = vshll.u32 %v16592_v22, 16  ;;  %v5465_v38 = vrot.slane %v5463_v0, 4  ;;  %v5468_v30 = vrot.slane %v5466_v62, 5 }
 0x216   : > { %v12734_v9 = vcombine.low %v4736_v20, %v4750_v10  ;;  %v5474_v40 = vrot.slane %v5472_v32, 5  ;;  %v5479_v63 = vrot.slane %v5477_v27, 4  ;;  %v5482_v45 = vrot.slane %v5480_v2, 5  ;;  %v12240_v27 = vld [vmem:[%s13560_s30 + $0xc0] sm:$0xe]  ;;  %v16627_v2 = vpop.permute.xlu1 %7799 }
 0x217   : > { %v5469_v17 = vor.u32 %v5468_v30, %v5465_v38  ;;  %v5488_v26 = vrot.slane %v5486_v36, 5  ;;  %v12766_v0 = vcombine.low %v16570_v59, %v16575_v24  ;;  %v6202_v62 = vshrl.u32 %v16608_v33, 16  ;;  %v12335_v30 = vld [vmem:[%s13560_s30 + $0xc4] sm:$0x1] }
 0x218   : > { %9166 = vrot.lane.b32.xlu1 %v12750_v57, %s13463_s7  ;;  %9086 = vrot.lane.b32.xlu0 %v12734_v9, %s13462_s6  ;;  %v5483_v20 = vor.u32 %v5482_v45, %v5479_v63  ;;  %v6205_v10 = vshll.u32 %v16608_v33, 16  ;;  %v6216_v57 = vshrl.u32 %v16614_v34, 16  ;;  %v6219_v32 = vshll.u32 %v16614_v34, 16  ;;  %v16635_v37 = vpop.permute.xlu0 %7797 }
 0x219   : > { %v20464_v9 = vshrl.u32 %v16297_v6, 16  ;;  %v5470_v36 = vrot.slane %v5469_v17, 4  ;;  %v6204_v59 = vrot.slane %v6202_v62, 4  ;;  %v12271_v24 = vrot.slane %v12239_v41, 9 }
 0x21a   : > { %v5484_v50 = vrot.slane %v5483_v20, 4  ;;  %v6207_v63 = vrot.slane %v6205_v10, 5  ;;  %v6218_v45 = vrot.slane %v6216_v57, 4  ;;  %v6221_v15 = vrot.slane %v6219_v32, 5  ;;  %v11953_v20 = vld [vmem:[%s13560_s30 + $0x84] sm:$0x1] }
 0x21b   : > { %v16631_v38 = vrot.slane %v20464_v9, 4  ;;  %v5475_v1 = vsel %vm13584_vm2, %v5470_v36, %v5474_v40  ;;  %v5988_v17 = vrot.slane %v16582_v46, 5  ;;  %v12272_v62 = vrot.slane %v12240_v27, 9  ;;  %v11985_v36 = vld [vmem:[%s13560_s30 + $0x80] sm:$0xe] }
 0x21c   : > { %9278 = vrot.lane.b32.xlu0 %v12766_v0, %s20194_s8  ;;  %v5992_v41 = vrot.slane %v16592_v22, 5  ;;  %v20466_v10 = vshll.u32 %v16297_v6, 16  ;;  %v5489_v57 = vsel %vm13584_vm2, %v5484_v50, %v5488_v26  ;;  %v12814_v32 = vcombine.low %v16608_v33, %v16614_v34  ;;  %v11954_v27 = vld [vmem:[%s13560_s30 + $0x8c] sm:$0x1]  ;;  %v16658_v13 = vpop.permute.xlu1 %7803 }
 0x21d   : > { %20465 = vst [vmem:[#allocation37_spill] sm:$0xff] %v16631_v38  ;;  %v6208_v40 = vor.u32 %v6207_v63, %v6204_v59  ;;  %v11986_v38 = vld [vmem:[%s13560_s30 + $0x88] sm:$0xe]  ;;  %v12782_v0 = vcombine.low %v5475_v1, %v5489_v57  ;;  %v5989_v46 = vsel %vm13804_vm5, %v12271_v24, %v5988_v17  ;;  %v6211_v6 = vshll.u32 %v12335_v30, 16  ;;  %20468 = vst [vmem:[#allocation39_spill] sm:$0xff] %v16658_v13 }
 0x21e   : > { %v16645_v9 = vrot.slane %v20466_v10, 5  ;;  %v5993_v22 = vsel %vm13804_vm5, %v12272_v62, %v5992_v41  ;;  %v6222_v26 = vor.u32 %v6221_v15, %v6218_v45  ;;  %v6225_v50 = vshll.u32 %v12336_v52, 16  ;;  %v12367_v24 = vld [vmem:[%s13560_s30 + $0xc0] sm:$0xe]  ;;  %v12368_v41 = vld [vmem:[%s13560_s30 + $0xc8] sm:$0xe]  ;;  %v16668_v57 = vpop.permute.xlu0 %7801 }
 0x21f   : > { %v12798_v10 = vcombine.low %v5989_v46, %v5993_v22  ;;  %9358 = vrot.lane.b32.xlu1 %v12782_v0, %s20200_s9  ;;  %v6213_v33 = vrot.slane %v6211_v6, 5  ;;  %v12017_v1 = vrot.slane %v11985_v36, 9  ;;  %v4517_v34 = vrot.slane %v11953_v20, 5  ;;  %20471 = vst [vmem:[#allocation41_spill] sm:$0xff] %v16668_v57  ;;  %v12049_v46 = vld [vmem:[%s13560_s30 + $0xc0] sm:$0xf] }
 0x220   : > { %20467 = vst [vmem:[#allocation40_spill] sm:$0xff] %v16645_v9  ;;  %v6209_v9 = vrot.slane %v6208_v40, 4  ;;  %v12018_v59 = vrot.slane %v11986_v38, 9  ;;  %v20469_v63 = vshrl.u32 %v16324_v25, 16  ;;  %v6223_v62 = vrot.slane %v6222_v26, 4 }
 0x221   : > { %9438 = vrot.lane.b32.xlu0 %v12798_v10, %s13466_s10  ;;  %v6227_v15 = vrot.slane %v6225_v50, 5  ;;  %v4521_v45 = vrot.slane %v11954_v27, 5  ;;  %v20472_v40 = vshll.u32 %v16324_v25, 16  ;;  %v3290_v20 = vshll.u32 %v16327_v35, 16  ;;  %v12050_v22 = vld [vmem:[%s13560_s30 + $0xc8] sm:$0xf] }
 0x222   : > { %v16664_v17 = vrot.slane %v20469_v63, 4  ;;  %v6214_v38 = vsel %vm13584_vm2, %v6209_v9, %v6213_v33  ;;  %v4518_v36 = vsel %vm13804_vm5, %v12017_v1, %v4517_v34  ;;  %v12399_v25 = vrot.slane %v12367_v24, 9 }
 0x223   : > { %v16672_v0 = vrot.slane %v20472_v40, 5  ;;  %v6228_v6 = vsel %vm13584_vm2, %v6223_v62, %v6227_v15  ;;  %v4522_v27 = vsel %vm13804_vm5, %v12018_v59, %v4521_v45  ;;  %v6727_v10 = vrot.slane %v12335_v30, 5  ;;  %9550 = vrot.lane.b32.xlu1 %v12814_v32, %s13467_s11  ;;  %v12113_v15 = vld [vmem:[%s13560_s30 + $0xc0] sm:$0xe]  ;;  %v16689_v40 = vpop.permute.xlu1 %7807  ;;  %v12081_v45 = vld [vmem:[%s13560_s30 + $0xc4] sm:$0x1] }
 0x224   : > { %20470 = vst [vmem:[#allocation42_spill] sm:$0xff] %v16664_v17  ;;  %v12830_v26 = vcombine.low %v6214_v38, %v6228_v6  ;;  %v12703_v9 = vcombine.low %v4518_v36, %v4522_v27  ;;  %v12400_v50 = vrot.slane %v12368_v41, 9  ;;  %v6731_v33 = vrot.slane %v12336_v52, 5  ;;  %20474 = vst [vmem:[#allocation46_spill] sm:$0xff] %v16689_v40  ;;  %v12114_v41 = vld [vmem:[%s13560_s30 + $0xc8] sm:$0xe] }
 0x225   : > { %20473 = vst [vmem:[#allocation44_spill] sm:$0xff] %v16672_v0  ;;  %v6728_v1 = vsel %vm13804_vm5, %v12399_v25, %v6727_v10  ;;  %v4752_v34 = vshrl.u32 %v12049_v46, 16  ;;  %v4755_v63 = vshll.u32 %v12049_v46, 16  ;;  %v4766_v62 = vshrl.u32 %v12050_v22, 16  ;;  %v12082_v25 = vld [vmem:[%s13560_s30 + $0xcc] sm:$0x1]  ;;  %v16703_v10 = vpop.permute.xlu0 %7805 }
 0x226   : > { %v20475_v30 = vshrl.u32 %v16327_v35, 16  ;;  %8896 = vrot.lane.b32.xlu0 %v12703_v9, %s13460_s4  ;;  %v6732_v32 = vsel %vm13804_vm5, %v12400_v50, %v6731_v33  ;;  %v4769_v52 = vshll.u32 %v12050_v22, 16  ;;  %v12719_v24 = vcombine.low %v12049_v46, %v12050_v22  ;;  %20478 = vst [vmem:[#allocation56_spill] sm:$0xff] %v16703_v10  ;;  %v16707_v40 = vld [vmem:[%s13560_s30 + $0xc8] sm:$0xf] }
 0x227   : > { %v16700_v38 = vrot.slane %v3290_v20, 5  ;;  %v4754_v36 = vrot.slane %v4752_v34, 4  ;;  %v4757_v6 = vrot.slane %v4755_v63, 5  ;;  %v4768_v27 = vrot.slane %v4766_v62, 4  ;;  %9630 = vrot.lane.b32.xlu1 %v12830_v26, %s13468_s18  ;;  %v16873_v17 = vld [vmem:[%s13560_s30 + $0xe8] sm:$0xf] }
 0x228   : > { %v16693_v59 = vrot.slane %v20475_v30, 4  ;;  %v12846_v35 = vcombine.low %v6728_v1, %v6732_v32  ;;  %v4771_v9 = vrot.slane %v4769_v52, 5  ;;  %v12145_v50 = vrot.slane %v12113_v15, 9  ;;  %v12178_v1 = vld [vmem:[%s13560_s30 + $0xd0] sm:$0xf] }
 0x229   : > { %20477 = vst [vmem:[#allocation55_spill] sm:$0xff] %v16700_v38  ;;  %v5257_v33 = vrot.slane %v12081_v45, 5  ;;  %v12146_v46 = vrot.slane %v12114_v41, 9  ;;  %v5261_v22 = vrot.slane %v12082_v25, 5  ;;  %v4758_v30 = vor.u32 %v4757_v6, %v4754_v36  ;;  %v16715_v32 = vld [vmem:[%s13560_s30 + $0xcc] sm:$0x1]  ;;  %v16723_v6 = vpop.permute.xlu1 %7811 }
 0x22a   : > { %20476 = vst [vmem:[#allocation54_spill] sm:$0xff] %v16693_v59  ;;  %v4761_v20 = vshll.u32 %v12081_v45, 16  ;;  %v3357_v34 = vshrl.u32 %v16349_v61, 16  ;;  %9008 = vrot.lane.b32.xlu0 %v12719_v24, %s13461_s5  ;;  %v4772_v26 = vor.u32 %v4771_v9, %v4768_v27  ;;  %v4775_v62 = vshll.u32 %v12082_v25, 16  ;;  %v16721_v36 = vld [vmem:[%s13560_s30 + $0xd4] sm:$0x1] }
 0x22b   : > { %v5258_v63 = vsel %vm13804_vm5, %v12145_v50, %v5257_v33  ;;  %v5262_v52 = vsel %vm13804_vm5, %v12146_v46, %v5261_v22  ;;  %v4759_v45 = vrot.slane %v4758_v30, 4  ;;  %20479 = vst [vmem:[#allocation57_spill] sm:$0xff] %v16723_v6  ;;  %9710 = vrot.lane.b32.xlu1 %v12846_v35, %s13469_s19  ;;  %v5491_v9 = vshrl.u32 %v16707_v40, 16  ;;  %v16731_v30 = vpop.permute.xlu0 %7809  ;;  %v16741_v6 = vld [vmem:[%s13560_s30 + $0xd8] sm:$0xf] }
 0x22c   : > { %v4763_v41 = vrot.slane %v4761_v20, 5  ;;  %v12751_v24 = vcombine.low %v5258_v63, %v5262_v52  ;;  %v4773_v27 = vrot.slane %v4772_v26, 4  ;;  %v4777_v25 = vrot.slane %v4775_v62, 5  ;;  %20480 = vst [vmem:[#allocation58_spill] sm:$0xff] %v16731_v30  ;;  %v16737_v62 = vld [vmem:[%s13560_s30 + $0xd0] sm:$0xf] }
 0x22d   : > { %v5494_v33 = vshll.u32 %v16707_v40, 16  ;;  %v5500_v46 = vshll.u32 %v16715_v32, 16  ;;  %v5505_v22 = vshrl.u32 %v12178_v1, 16  ;;  %v5493_v20 = vrot.slane %v5491_v9, 4  ;;  %v12241_v9 = vld [vmem:[%s13560_s30 + $0xc8] sm:$0xe] }
 0x22e   : > { %v4764_v50 = vsel %vm13584_vm2, %v4759_v45, %v4763_v41  ;;  %v4778_v35 = vsel %vm13584_vm2, %v4773_v27, %v4777_v25  ;;  %v5508_v63 = vshll.u32 %v12178_v1, 16  ;;  %v5514_v26 = vshll.u32 %v16721_v36, 16  ;;  %v16747_v13 = vpop.permute.xlu1 %7815  ;;  %v12369_v59 = vld [vmem:[%s13560_s30 + $0xd0] sm:$0xe] }
 0x22f   : > { %v12735_v45 = vcombine.low %v4764_v50, %v4778_v35  ;;  %v5496_v41 = vrot.slane %v5494_v33, 5  ;;  %v5507_v15 = vrot.slane %v5505_v22, 4  ;;  %9168 = vrot.lane.b32.xlu1 %v12751_v24, %s13463_s7  ;;  %v5502_v27 = vrot.slane %v5500_v46, 5  ;;  %20481 = vst [vmem:[#allocation59_spill] sm:$0xff] %v16747_v13 }
 0x230   : > { %v5510_v25 = vrot.slane %v5508_v63, 5  ;;  %v12767_v33 = vcombine.low %v16707_v40, %v12178_v1  ;;  %v6230_v22 = vshrl.u32 %v16737_v62, 16  ;;  %v6233_v35 = vshll.u32 %v16737_v62, 16  ;;  %v12242_v63 = vld [vmem:[%s13560_s30 + $0xd0] sm:$0xe] }
 0x231   : > { %9088 = vrot.lane.b32.xlu0 %v12735_v45, %s13462_s6  ;;  %v5497_v50 = vor.u32 %v5496_v41, %v5493_v20  ;;  %v5516_v30 = vrot.slane %v5514_v26, 5  ;;  %v6244_v24 = vshrl.u32 %v16741_v6, 16  ;;  %v6247_v46 = vshll.u32 %v16741_v6, 16  ;;  %v12337_v20 = vld [vmem:[%s13560_s30 + $0xd4] sm:$0x1] }
 0x232   : > { %v5511_v10 = vor.u32 %v5510_v25, %v5507_v15  ;;  %v6232_v13 = vrot.slane %v6230_v22, 4  ;;  %v6235_v57 = vrot.slane %v6233_v35, 5  ;;  %v12273_v45 = vrot.slane %v12241_v9, 9  ;;  %v12338_v26 = vld [vmem:[%s13560_s30 + $0xdc] sm:$0x1] }
 0x233   : > { %v5498_v52 = vrot.slane %v5497_v50, 4  ;;  %v6246_v1 = vrot.slane %v6244_v24, 4  ;;  %v6249_v38 = vrot.slane %v6247_v46, 5  ;;  %v5996_v15 = vrot.slane %v16715_v32, 5  ;;  %v11987_v35 = vld [vmem:[%s13560_s30 + $0x90] sm:$0xe] }
 0x234   : > { %v5512_v40 = vrot.slane %v5511_v10, 4  ;;  %v16761_v25 = vrot.slane %v3357_v34, 4  ;;  %v12274_v9 = vrot.slane %v12242_v63, 9  ;;  %v6000_v22 = vrot.slane %v16721_v36, 5  ;;  %v11955_v46 = vld [vmem:[%s13560_s30 + $0x94] sm:$0x1] }
 0x235   : > { %v5503_v50 = vsel %vm13584_vm2, %v5498_v52, %v5502_v27  ;;  %9280 = vrot.lane.b32.xlu0 %v12767_v33, %s20194_s8  ;;  %v12815_v32 = vcombine.low %v16737_v62, %v16741_v6  ;;  %v5997_v34 = vsel %vm13804_vm5, %v12273_v45, %v5996_v15  ;;  %v6236_v24 = vor.u32 %v6235_v57, %v6232_v13  ;;  %v11988_v52 = vld [vmem:[%s13560_s30 + $0x98] sm:$0xe] }
 0x236   : > { %20483 = vst [vmem:[#allocation70_spill] sm:$0xff] %v16761_v25  ;;  %v5517_v10 = vsel %vm13584_vm2, %v5512_v40, %v5516_v30  ;;  %v6001_v36 = vsel %vm13804_vm5, %v12274_v9, %v6000_v22  ;;  %v6239_v63 = vshll.u32 %v12337_v20, 16  ;;  %v11956_v30 = vld [vmem:[%s13560_s30 + $0x9c] sm:$0x1]  ;;  %v6253_v6 = vshll.u32 %v12338_v26, 16 }
 0x237   : > { %v16757_v41 = vpop.permute.xlu0 %7813  ;;  %v12783_v33 = vcombine.low %v5503_v50, %v5517_v10  ;;  %v12799_v40 = vcombine.low %v5997_v34, %v6001_v36  ;;  %v6237_v25 = vrot.slane %v6236_v24, 4  ;;  %v12019_v62 = vrot.slane %v11987_v35, 9  ;;  %v12370_v50 = vld [vmem:[%s13560_s30 + $0xd8] sm:$0xe]  ;;  %v12051_v34 = vld [vmem:[%s13560_s30 + $0xd0] sm:$0xf] }
 0x238   : > { %20482 = vst [vmem:[#allocation61_spill] sm:$0xff] %v16757_v41  ;;  %v6250_v41 = vor.u32 %v6249_v38, %v6246_v1  ;;  %v6241_v13 = vrot.slane %v6239_v63, 5  ;;  %v4525_v45 = vrot.slane %v11955_v46, 5  ;;  %v12020_v15 = vrot.slane %v11988_v52, 9 }
 0x239   : > { %v16776_v27 = vpop.permute.xlu1 %7819  ;;  %9360 = vrot.lane.b32.xlu1 %v12783_v33, %s20200_s9  ;;  %v20486_v9 = vshll.u32 %v16349_v61, 16  ;;  %9440 = vrot.lane.b32.xlu0 %v12799_v40, %s13466_s10  ;;  %v6255_v22 = vrot.slane %v6253_v6, 5  ;;  %v4529_v35 = vrot.slane %v11956_v30, 5  ;;  %v12401_v61 = vrot.slane %v12369_v59, 9  ;;  %v12052_v33 = vld [vmem:[%s13560_s30 + $0xd8] sm:$0xf] }
 0x23a   : > { %20484 = vst [vmem:[#allocation71_spill] sm:$0xff] %v16776_v27  ;;  %v6251_v57 = vrot.slane %v6250_v41, 4  ;;  %v6242_v41 = vsel %vm13584_vm2, %v6237_v25, %v6241_v13  ;;  %v4526_v46 = vsel %vm13804_vm5, %v12019_v62, %v4525_v45  ;;  %v6735_v52 = vrot.slane %v12337_v20, 5  ;;  %v12083_v20 = vld [vmem:[%s13560_s30 + $0xd4] sm:$0x1] }
 0x23b   : > { %v16784_v10 = vpop.permute.xlu0 %7817  ;;  %v16788_v38 = vrot.slane %v20486_v9, 5  ;;  %v4530_v63 = vsel %vm13804_vm5, %v12020_v15, %v4529_v35  ;;  %v12402_v30 = vrot.slane %v12370_v50, 9  ;;  %v6739_v40 = vrot.slane %v12338_v26, 5  ;;  %v12115_v62 = vld [vmem:[%s13560_s30 + $0xd0] sm:$0xe] }
 0x23c   : > { %20485 = vst [vmem:[#allocation72_spill] sm:$0xff] %v16784_v10  ;;  %v6256_v36 = vsel %vm13584_vm2, %v6251_v57, %v6255_v22  ;;  %v12704_v9 = vcombine.low %v4526_v46, %v4530_v63  ;;  %v6736_v25 = vsel %vm13804_vm5, %v12401_v61, %v6735_v52  ;;  %v4780_v59 = vshrl.u32 %v12051_v34, 16  ;;  %v12116_v26 = vld [vmem:[%s13560_s30 + $0xd8] sm:$0xe]  ;;  %v12084_v61 = vld [vmem:[%s13560_s30 + $0xdc] sm:$0x1] }
 0x23d   : > { %20487 = vst [vmem:[#allocation73_spill] sm:$0xff] %v16788_v38  ;;  %v16793_v24 = vpop.permute.xlu1 %7871  ;;  %9552 = vrot.lane.b32.xlu1 %v12815_v32, %s13467_s11  ;;  %v12831_v6 = vcombine.low %v6242_v41, %v6256_v36  ;;  %v6740_v57 = vsel %vm13804_vm5, %v12402_v30, %v6739_v40  ;;  %v4783_v45 = vshll.u32 %v12051_v34, 16  ;;  %v4794_v15 = vshrl.u32 %v12052_v33, 16  ;;  %v16827_v38 = vld [vmem:[%s13560_s30 + $0xd8] sm:$0xf] }
 0x23e   : > { %v4797_v50 = vshll.u32 %v12052_v33, 16  ;;  %v20488_v32 = vshrl.u32 %v16352_v21, 16  ;;  %v3343_v35 = vshrl.u32 %v16382_v31, 16  ;;  %8898 = vrot.lane.b32.xlu0 %v12704_v9, %s13460_s4  ;;  %v4782_v41 = vrot.slane %v4780_v59, 4 }
 0x23f   : > { %v16809_v13 = vpop.permute.xlu0 %7869  ;;  %v12720_v46 = vcombine.low %v12051_v34, %v12052_v33  ;;  %v12847_v36 = vcombine.low %v6736_v25, %v6740_v57  ;;  %v4785_v63 = vrot.slane %v4783_v45, 5  ;;  %v4796_v30 = vrot.slane %v4794_v15, 4  ;;  %v16830_v25 = vld [vmem:[%s13560_s30 + $0xdc] sm:$0x1] }
 0x240   : > { %v16816_v22 = vrot.slane %v20488_v32, 4  ;;  %v4799_v40 = vrot.slane %v4797_v50, 5  ;;  %v12147_v1 = vrot.slane %v12115_v62, 9  ;;  %v5265_v32 = vrot.slane %v12083_v20, 5  ;;  %v12180_v50 = vld [vmem:[%s13560_s30 + $0xe0] sm:$0xf] }
 0x241   : > { %v16821_v52 = vpop.permute.xlu1 %7875  ;;  %9632 = vrot.lane.b32.xlu1 %v12831_v6, %s13468_s18  ;;  %v12148_v27 = vrot.slane %v12116_v26, 9  ;;  %v5269_v10 = vrot.slane %v12084_v61, 5  ;;  %v4786_v34 = vor.u32 %v4785_v63, %v4782_v41  ;;  %v4789_v33 = vshll.u32 %v12083_v20, 16  ;;  %v16847_v26 = vld [vmem:[%s13560_s30 + $0xe4] sm:$0x1] }
 0x242   : > { %20489 = vst [vmem:[#allocation74_spill] sm:$0xff] %v16816_v22  ;;  %v4800_v59 = vor.u32 %v4799_v40, %v4796_v30  ;;  %v4803_v22 = vshll.u32 %v12084_v61, 16  ;;  %v20490_v57 = vshll.u32 %v16352_v21, 16  ;;  %v20492_v6 = vshrl.u32 %v16379_v56, 16  ;;  %9010 = vrot.lane.b32.xlu0 %v12720_v46, %s13461_s5 }
 0x243   : > { %v16824_v9 = vpop.permute.xlu0 %7873  ;;  %v5266_v15 = vsel %vm13804_vm5, %v12147_v1, %v5265_v32  ;;  %v5270_v20 = vsel %vm13804_vm5, %v12148_v27, %v5269_v10  ;;  %v4787_v61 = vrot.slane %v4786_v34, 4  ;;  %v4791_v63 = vrot.slane %v4789_v33, 5  ;;  %v16861_v33 = vld [vmem:[%s13560_s30 + $0xe0] sm:$0xf] }
 0x244   : > { %v16834_v45 = vrot.slane %v20490_v57, 5  ;;  %v16838_v62 = vrot.slane %v20492_v6, 4  ;;  %v12752_v21 = vcombine.low %v5266_v15, %v5270_v20  ;;  %v4801_v30 = vrot.slane %v4800_v59, 4 }
 0x245   : > { %v16849_v41 = vpop.permute.xlu1 %7879  ;;  %9712 = vrot.lane.b32.xlu1 %v12847_v36, %s13469_s19  ;;  %v4805_v40 = vrot.slane %v4803_v22, 5  ;;  %v5519_v46 = vshrl.u32 %v16827_v38, 16  ;;  %v5522_v1 = vshll.u32 %v16827_v38, 16  ;;  %v5528_v32 = vshll.u32 %v16830_v25, 16 }
 0x246   : > { %20491 = vst [vmem:[#allocation75_spill] sm:$0xff] %v16834_v45  ;;  %20493 = vst [vmem:[#allocation77_spill] sm:$0xff] %v16838_v62  ;;  %v4792_v10 = vsel %vm13584_vm2, %v4787_v61, %v4791_v63  ;;  %v5533_v57 = vshrl.u32 %v12180_v50, 16  ;;  %v5536_v6 = vshll.u32 %v12180_v50, 16  ;;  %v5542_v34 = vshll.u32 %v16847_v26, 16 }
 0x247   : > { %v16855_v27 = vpop.permute.xlu0 %7877  ;;  %v3346_v22 = vshll.u32 %v16382_v31, 16  ;;  %v4806_v36 = vsel %vm13584_vm2, %v4801_v30, %v4805_v40  ;;  %v5521_v59 = vrot.slane %v5519_v46, 4  ;;  %v5524_v15 = vrot.slane %v5522_v1, 5  ;;  %v12243_v46 = vld [vmem:[%s13560_s30 + $0xd8] sm:$0xe] }
 0x248   : > { %v20495_v45 = vshll.u32 %v16379_v56, 16  ;;  %v12736_v61 = vcombine.low %v4792_v10, %v4806_v36  ;;  %v5535_v63 = vrot.slane %v5533_v57, 4  ;;  %v5538_v0 = vrot.slane %v5536_v6, 5  ;;  %v12244_v57 = vld [vmem:[%s13560_s30 + $0xe0] sm:$0xe] }
 0x249   : > { %v16866_v20 = vpop.permute.xlu1 %7883  ;;  %v16875_v14 = vrot.slane %v3343_v35, 4  ;;  %9170 = vrot.lane.b32.xlu1 %v12752_v21, %s13463_s7  ;;  %v5525_v31 = vor.u32 %v5524_v15, %v5521_v59  ;;  %v5530_v30 = vrot.slane %v5528_v32, 5  ;;  %v6258_v40 = vshrl.u32 %v16861_v33, 16  ;;  %v16889_v59 = vld [vmem:[%s13560_s30 + $0xe4] sm:$0x1] }
 0x24a   : > { %20494 = vst [vmem:[#allocation86_spill] sm:$0xff] %v16866_v20  ;;  %v16870_v62 = vrot.slane %v20495_v45, 5  ;;  %9090 = vrot.lane.b32.xlu0 %v12736_v61, %s13462_s6  ;;  %v5539_v56 = vor.u32 %v5538_v0, %v5535_v63  ;;  %v5544_v45 = vrot.slane %v5542_v34, 5  ;;  %v12768_v10 = vcombine.low %v16827_v38, %v12180_v50  ;;  %v12340_v50 = vld [vmem:[%s13560_s30 + $0xec] sm:$0x1] }
 0x24b   : > { %20496 = vst [vmem:[#allocation89_spill] sm:$0xff] %v16875_v14  ;;  %v16880_v1 = vpop.permute.xlu0 %7881  ;;  %v6261_v35 = vshll.u32 %v16861_v33, 16  ;;  %v5526_v21 = vrot.slane %v5525_v31, 4  ;;  %v6260_v6 = vrot.slane %v6258_v40, 4  ;;  %v6272_v32 = vshrl.u32 %v16873_v17, 16 }
 0x24c   : > { %20497 = vst [vmem:[#allocation91_spill] sm:$0xff] %v16880_v1  ;;  %v6275_v36 = vshll.u32 %v16873_v17, 16  ;;  %v16893_v61 = vrot.slane %v3346_v22, 5  ;;  %v5540_v0 = vrot.slane %v5539_v56, 4  ;;  %v12275_v38 = vrot.slane %v12243_v46, 9 }
 0x24d   : > { %v16891_v15 = vpop.permute.xlu1 %7887  ;;  %v6263_v34 = vrot.slane %v6261_v35, 5  ;;  %v5531_v63 = vsel %vm13584_vm2, %v5526_v21, %v5530_v30  ;;  %v6274_v31 = vrot.slane %v6272_v32, 4  ;;  %v6004_v20 = vrot.slane %v16830_v25, 5  ;;  %v11957_v1 = vld [vmem:[%s13560_s30 + $0xb4] sm:$0x1] }
 0x24e   : > { %20498 = vst [vmem:[#allocation92_spill] sm:$0xff] %v16891_v15  ;;  %v6277_v40 = vrot.slane %v6275_v36, 5  ;;  %v5545_v22 = vsel %vm13584_vm2, %v5540_v0, %v5544_v45  ;;  %9282 = vrot.lane.b32.xlu0 %v12768_v10, %s20194_s8  ;;  %v12276_v46 = vrot.slane %v12244_v57, 9  ;;  %v6008_v56 = vrot.slane %v16847_v26, 5  ;;  %v11989_v35 = vld [vmem:[%s13560_s30 + $0xb0] sm:$0xe] }
 0x24f   : > { %v16900_v14 = vpop.permute.xlu0 %7885  ;;  %v12784_v30 = vcombine.low %v5531_v63, %v5545_v22  ;;  %v12816_v21 = vcombine.low %v16861_v33, %v16873_v17  ;;  %v6005_v25 = vsel %vm13804_vm5, %v12275_v38, %v6004_v20  ;;  %v6264_v32 = vor.u32 %v6263_v34, %v6260_v6  ;;  %v11990_v36 = vld [vmem:[%s13560_s30 + $0xb8] sm:$0xe]  ;;  %v11958_v0 = vld [vmem:[%s13560_s30 + $0xbc] sm:$0x1]  ;;  %v12371_v6 = vld [vmem:[%s13560_s30 + $0xe0] sm:$0xe] }
 0x250   : > { %20499 = vst [vmem:[#allocation93_spill] sm:$0xff] %v16900_v14  ;;  %v6009_v45 = vsel %vm13804_vm5, %v12276_v46, %v6008_v56  ;;  %v6267_v10 = vshll.u32 %v16889_v59, 16  ;;  %v6278_v26 = vor.u32 %v6277_v40, %v6274_v31  ;;  %v6281_v57 = vshll.u32 %v12340_v50, 16 }
 0x251   : > { %v16912_v15 = vpop.permute.xlu1 %7891  ;;  %9362 = vrot.lane.b32.xlu1 %v12784_v30, %s20200_s9  ;;  %v12800_v63 = vcombine.low %v6005_v25, %v6009_v45  ;;  %v6265_v17 = vrot.slane %v6264_v32, 4  ;;  %v12021_v33 = vrot.slane %v11989_v35, 9  ;;  %v4533_v20 = vrot.slane %v11957_v1, 5  ;;  %v12053_v30 = vld [vmem:[%s13560_s30 + $0xf0] sm:$0xf] }
 0x252   : > { %20500 = vst [vmem:[#allocation94_spill] sm:$0xff] %v16912_v15  ;;  %v6269_v38 = vrot.slane %v6267_v10, 5  ;;  %v6279_v22 = vrot.slane %v6278_v26, 4  ;;  %v6283_v46 = vrot.slane %v6281_v57, 5  ;;  %v12022_v56 = vrot.slane %v11990_v36, 9 }
 0x253   : > { %v16920_v34 = vpop.permute.xlu0 %7889  ;;  %v12372_v15 = vld [vmem:[%s13560_s30 + $0xe8] sm:$0xe]  ;;  %v16926_v31 = vsel %vm8565_vm14, %v16388_v54, %v16261_v18  ;;  %v16931_v40 = vsel %vm8565_vm14, %v16392_v55, %v16283_v43  ;;  %9442 = vrot.lane.b32.xlu0 %v12800_v63, %s13466_s10  ;;  %v4534_v1 = vsel %vm13804_vm5, %v12021_v33, %v4533_v20  ;;  %v4537_v35 = vrot.slane %v11958_v0, 5  ;;  %v12054_v55 = vld [vmem:[%s13560_s30 + $0xf8] sm:$0xf] }
 0x254   : > { %20501 = vst [vmem:[#allocation96_spill] sm:$0xff] %v16920_v34  ;;  %v6270_v32 = vsel %vm13584_vm2, %v6265_v17, %v6269_v38  ;;  %v6284_v18 = vsel %vm13584_vm2, %v6279_v22, %v6283_v46  ;;  %v12403_v54 = vrot.slane %v12371_v6, 9  ;;  %v6743_v43 = vrot.slane %v16889_v59, 5  ;;  %v12117_v33 = vld [vmem:[%s13560_s30 + $0xf0] sm:$0xe] }
 0x255   : > { %v16937_v25 = vpop.permute.xlu1 %7895  ;;  %9554 = vrot.lane.b32.xlu1 %v12816_v21, %s13467_s11  ;;  %v12832_v36 = vcombine.low %v6270_v32, %v6284_v18  ;;  %v4538_v45 = vsel %vm13804_vm5, %v12022_v56, %v4537_v35  ;;  %v12404_v10 = vrot.slane %v12372_v15, 9  ;;  %v6747_v26 = vrot.slane %v12340_v50, 5  ;;  %v12118_v6 = vld [vmem:[%s13560_s30 + $0xf8] sm:$0xe] }
 0x256   : > { %20502 = vst [vmem:[#allocation111_spill] sm:$0xff] %v16937_v25  ;;  %v12705_v0 = vcombine.low %v4534_v1, %v4538_v45  ;;  %v6744_v63 = vsel %vm13804_vm5, %v12403_v54, %v6743_v43  ;;  %v4808_v17 = vshrl.u32 %v12053_v30, 16  ;;  %v4811_v59 = vshll.u32 %v12053_v30, 16  ;;  %v12086_v1 = vld [vmem:[%s13560_s30 + $0xfc] sm:$0x1] }
 0x257   : > { %v16948_v57 = vpop.permute.xlu0 %7893  ;;  %v16956_v21 = vsel %vm8565_vm14, %v16396_v51, %v16306_v12  ;;  %v6748_v15 = vsel %vm13804_vm5, %v12404_v10, %v6747_v26  ;;  %v4822_v50 = vshrl.u32 %v12054_v55, 16  ;;  %v4825_v20 = vshll.u32 %v12054_v55, 16  ;;  %v12085_v51 = vld [vmem:[%s13560_s30 + $0xf4] sm:$0x1]  ;;  %v16975_v26 = vld [vmem:[%s13560_s30 + $0xf8] sm:$0xf] }
 0x258   : > { %20503 = vst [vmem:[#allocation5_spill] sm:$0xff] %v16948_v57  ;;  %v16966_v22 = vsel %vm8565_vm14, %v16404_v48, %v16329_v19  ;;  %8900 = vrot.lane.b32.xlu0 %v12705_v0, %s13460_s4  ;;  %v4810_v46 = vrot.slane %v4808_v17, 4  ;;  %v4813_v56 = vrot.slane %v4811_v59, 5  ;;  %v12721_v12 = vcombine.low %v12053_v30, %v12054_v55  ;;  %v16984_v17 = vld [vmem:[%s13560_s30 + $0xfc] sm:$0x1] }
 0x259   : > { %v16961_v38 = vpop.permute.xlu1 %7899  ;;  %9634 = vrot.lane.b32.xlu1 %v12832_v36, %s13468_s18  ;;  %v12848_v35 = vcombine.low %v6744_v63, %v6748_v15  ;;  %v4824_v32 = vrot.slane %v4822_v50, 4  ;;  %v4827_v18 = vrot.slane %v4825_v20, 5  ;;  %v12149_v54 = vrot.slane %v12117_v33, 9  ;;  %v12182_v63 = vld [vmem:[%s13560_s30 + $0x100] sm:$0xf] }
 0x25a   : > { %20504 = vst [vmem:[#allocation120_spill] sm:$0xff] %v16961_v38  ;;  %v5273_v19 = vrot.slane %v12085_v51, 5  ;;  %v12150_v48 = vrot.slane %v12118_v6, 9  ;;  %v5277_v45 = vrot.slane %v12086_v1, 5  ;;  %v4814_v10 = vor.u32 %v4813_v56, %v4810_v46  ;;  %v16999_v50 = vld [vmem:[%s13560_s30 + $0x104] sm:$0x1] }
 0x25b   : > { %v16972_v43 = vpop.permute.xlu0 %7897  ;;  %v16980_v30 = vsel %vm8565_vm14, %v16408_v58, %v16354_v53  ;;  %v4817_v55 = vshll.u32 %v12085_v51, 16  ;;  %v4828_v36 = vor.u32 %v4827_v18, %v4824_v32  ;;  %v4831_v0 = vshll.u32 %v12086_v1, 16  ;;  %v12374_v25 = vld [vmem:[%s13560_s30 + $0x108] sm:$0xe]  ;;  %v11994_v57 = vld [vmem:[%s13560_s30 + $0xd8] sm:$0xe] }
 0x25c   : > { %20505 = vst [vmem:[#allocation121_spill] sm:$0xff] %v16972_v43  ;;  %v16991_v33 = vsel %vm8565_vm14, %v16412_v60, %v16369_v7  ;;  %9012 = vrot.lane.b32.xlu0 %v12721_v12, %s13461_s5  ;;  %v5274_v15 = vsel %vm13804_vm5, %v12149_v54, %v5273_v19  ;;  %v5278_v53 = vsel %vm13804_vm5, %v12150_v48, %v5277_v45  ;;  %v4815_v58 = vrot.slane %v4814_v10, 4  ;;  %v17013_v19 = vld [vmem:[%s13560_s30 + $0x100] sm:$0xf] }
 0x25d   : > { %v16986_v59 = vpop.permute.xlu1 %7983  ;;  %9714 = vrot.lane.b32.xlu1 %v12848_v35, %s13469_s19  ;;  %v12753_v20 = vcombine.low %v5274_v15, %v5278_v53  ;;  %v4819_v6 = vrot.slane %v4817_v55, 5  ;;  %v4829_v46 = vrot.slane %v4828_v36, 4  ;;  %v4833_v7 = vrot.slane %v4831_v0, 5  ;;  %v17021_v36 = vld [vmem:[%s13560_s30 + $0x108] sm:$0xf] }
 0x25e   : > { %v5547_v56 = vshrl.u32 %v16975_v26, 16  ;;  %v5550_v12 = vshll.u32 %v16975_v26, 16  ;;  %v5556_v51 = vshll.u32 %v16984_v17, 16  ;;  %v5561_v1 = vshrl.u32 %v12182_v63, 16 }
 0x25f   : > { %v17002_v60 = vpop.permute.xlu0 %7981  ;;  %v4820_v32 = vsel %vm13584_vm2, %v4815_v58, %v4819_v6  ;;  %v4834_v35 = vsel %vm13584_vm2, %v4829_v46, %v4833_v7  ;;  %v5564_v18 = vshll.u32 %v12182_v63, 16  ;;  %v5570_v54 = vshll.u32 %v16999_v50, 16  ;;  %v12245_v58 = vld [vmem:[%s13560_s30 + $0xf8] sm:$0xe] }
 0x260   : > { %v17018_v48 = vsel %vm8565_vm14, %v16416_v47, %v16430_v28  ;;  %v12737_v45 = vcombine.low %v4820_v32, %v4834_v35  ;;  %v5549_v10 = vrot.slane %v5547_v56, 4  ;;  %v5552_v55 = vrot.slane %v5550_v12, 5  ;;  %v12246_v32 = vld [vmem:[%s13560_s30 + $0x100] sm:$0xe] }
 0x261   : > { %20506 = vst [vmem:[#allocation122_spill] sm:$0xff] %v17018_v48  ;;  %9172 = vrot.lane.b32.xlu1 %v12753_v20, %s13463_s7  ;;  %v5558_v0 = vrot.slane %v5556_v51, 5  ;;  %v5563_v15 = vrot.slane %v5561_v1, 4  ;;  %v5566_v53 = vrot.slane %v5564_v18, 5  ;;  %v17025_v6 = vpop.permute.xlu1 %7987  ;;  %v5572_v28 = vrot.slane %v5570_v54, 5 }
 0x262   : > { %9092 = vrot.lane.b32.xlu0 %v12737_v45, %s13462_s6  ;;  %v5553_v47 = vor.u32 %v5552_v55, %v5549_v10  ;;  %v12769_v7 = vcombine.low %v16975_v26, %v12182_v63  ;;  %v6286_v56 = vshrl.u32 %v17013_v19, 16  ;;  %v6289_v20 = vshll.u32 %v17013_v19, 16 }
 0x263   : > { %v17027_v46 = vpop.permute.xlu0 %7985  ;;  %v5567_v12 = vor.u32 %v5566_v53, %v5563_v15  ;;  %v6300_v51 = vshrl.u32 %v17021_v36, 16  ;;  %v6303_v1 = vshll.u32 %v17021_v36, 16  ;;  %v17039_v35 = vsel %vm8598_vm15, %v16926_v31, %v16563_v23  ;;  %v12341_v15 = vld [vmem:[%s13560_s30 + $0x104] sm:$0x1] }
 0x264   : > { %v5554_v18 = vrot.slane %v5553_v47, 4  ;;  %v6288_v54 = vrot.slane %v6286_v56, 4  ;;  %v12277_v45 = vrot.slane %v12245_v58, 9  ;;  %v6291_v63 = vrot.slane %v6289_v20, 5  ;;  %v12342_v58 = vld [vmem:[%s13560_s30 + $0x10c] sm:$0x1] }
 0x265   : > { %v5568_v26 = vrot.slane %v5567_v12, 4  ;;  %v6302_v10 = vrot.slane %v6300_v51, 4  ;;  %v6305_v55 = vrot.slane %v6303_v1, 5  ;;  %v6012_v38 = vrot.slane %v16984_v17, 5  ;;  %v11991_v20 = vld [vmem:[%s13560_s30 + $0xc0] sm:$0xe] }
 0x266   : > { %v5559_v53 = vsel %vm13584_vm2, %v5554_v18, %v5558_v0  ;;  %9284 = vrot.lane.b32.xlu0 %v12769_v7, %s20194_s8  ;;  %v12278_v23 = vrot.slane %v12246_v32, 9  ;;  %v6016_v31 = vrot.slane %v16999_v50, 5  ;;  %v17053_v56 = vsel %vm8598_vm15, %v16931_v40, %v16572_v16  ;;  %v11959_v7 = vld [vmem:[%s13560_s30 + $0xc4] sm:$0x1]  ;;  %v11992_v51 = vld [vmem:[%s13560_s30 + $0xc8] sm:$0xe]  ;;  %v17062_v50 = vpop.permute.xlu1 %7991 }
 0x267   : > { %v17048_v47 = vpop.permute.xlu0 %7989  ;;  %v5573_v12 = vsel %vm13584_vm2, %v5568_v26, %v5572_v28  ;;  %v12817_v0 = vcombine.low %v17013_v19, %v17021_v36  ;;  %v6292_v17 = vor.u32 %v6291_v63, %v6288_v54  ;;  %20507 = vst [vmem:[#allocation123_spill] sm:$0xff] %v17062_v50  ;;  %v6013_v32 = vsel %vm13804_vm5, %v12277_v45, %v6012_v38  ;;  %v11960_v28 = vld [vmem:[%s13560_s30 + $0xcc] sm:$0x1]  ;;  %v12373_v54 = vld [vmem:[%s13560_s30 + $0x100] sm:$0xe] }
 0x268   : > { %v12785_v1 = vcombine.low %v5559_v53, %v5573_v12  ;;  %v6017_v16 = vsel %vm13804_vm5, %v12278_v23, %v6016_v31  ;;  %v6295_v40 = vshll.u32 %v12341_v15, 16  ;;  %v6306_v19 = vor.u32 %v6305_v55, %v6302_v10  ;;  %v12055_v55 = vld [vmem:[%s13560_s30 + $0x100] sm:$0xf] }
 0x269   : > { %v12801_v18 = vcombine.low %v6013_v32, %v6017_v16  ;;  %v6293_v26 = vrot.slane %v6292_v17, 4  ;;  %v6309_v36 = vshll.u32 %v12342_v58, 16  ;;  %v12023_v43 = vrot.slane %v11991_v20, 9 }
 0x26a   : > { %9364 = vrot.lane.b32.xlu1 %v12785_v1, %s20200_s9  ;;  %v6297_v63 = vrot.slane %v6295_v40, 5  ;;  %v4541_v53 = vrot.slane %v11959_v7, 5  ;;  %v12024_v12 = vrot.slane %v11992_v51, 9  ;;  %v17075_v38 = vsel %vm8598_vm15, %v16956_v21, %v16595_v3  ;;  %v12056_v3 = vld [vmem:[%s13560_s30 + $0x108] sm:$0xf] }
 0x26b   : > { %9444 = vrot.lane.b32.xlu0 %v12801_v18, %s13466_s10  ;;  %v6307_v45 = vrot.slane %v6306_v19, 4  ;;  %v6311_v23 = vrot.slane %v6309_v36, 5  ;;  %v4545_v10 = vrot.slane %v11960_v28, 5  ;;  %v17082_v31 = vsel %vm8598_vm15, %v16966_v22, %v16610_v29  ;;  %v17095_v22 = vpop.permute.xlu1 %9004 }
 0x26c   : > { %v6298_v17 = vsel %vm13584_vm2, %v6293_v26, %v6297_v63  ;;  %v4542_v7 = vsel %vm13804_vm5, %v12023_v43, %v4541_v53  ;;  %v12405_v20 = vrot.slane %v12373_v54, 9  ;;  %v6751_v32 = vrot.slane %v12341_v15, 5  ;;  %v12119_v54 = vld [vmem:[%s13560_s30 + $0x100] sm:$0xe]  ;;  %v12087_v63 = vld [vmem:[%s13560_s30 + $0x104] sm:$0x1] }
 0x26d   : > { %v17089_v21 = vpop.permute.xlu0 %8892  ;;  %v6312_v51 = vsel %vm13584_vm2, %v6307_v45, %v6311_v23  ;;  %v4546_v1 = vsel %vm13804_vm5, %v12024_v12, %v4545_v10  ;;  %v12406_v29 = vrot.slane %v12374_v25, 9  ;;  %v6755_v40 = vrot.slane %v12342_v58, 5  ;;  %v12120_v53 = vld [vmem:[%s13560_s30 + $0x108] sm:$0xe]  ;;  %v12088_v10 = vld [vmem:[%s13560_s30 + $0x10c] sm:$0x1] }
 0x26e   : > { %9556 = vrot.lane.b32.xlu1 %v12817_v0, %s13467_s11  ;;  %v12833_v43 = vcombine.low %v6298_v17, %v6312_v51  ;;  %v12706_v16 = vcombine.low %v4542_v7, %v4546_v1  ;;  %v4836_v28 = vshrl.u32 %v12055_v55, 16  ;;  %v6752_v18 = vsel %vm13804_vm5, %v12405_v20, %v6751_v32  ;;  %v17121_v32 = vld [vmem:[%s13560_s30 + $0x108] sm:$0xf] }
 0x26f   : > { %v4839_v26 = vshll.u32 %v12055_v55, 16  ;;  %v4850_v19 = vshrl.u32 %v12056_v3, 16  ;;  %v4853_v36 = vshll.u32 %v12056_v3, 16  ;;  %v17104_v25 = vsel %vm8598_vm15, %v16980_v30, %v16627_v2 }
 0x270   : > { %8902 = vrot.lane.b32.xlu0 %v12706_v16, %s13460_s4  ;;  %v6756_v15 = vsel %vm13804_vm5, %v12406_v29, %v6755_v40  ;;  %v4838_v58 = vrot.slane %v4836_v28, 4  ;;  %v12722_v0 = vcombine.low %v12055_v55, %v12056_v3  ;;  %v17115_v2 = vsel %vm8598_vm15, %v16991_v33, %v16635_v37  ;;  %v17123_v29 = vpop.permute.xlu1 %9164  ;;  %v12184_v40 = vld [vmem:[%s13560_s30 + $0x110] sm:$0xf]  ;;  %v17135_v28 = vld [vmem:[%s13560_s30 + $0x10c] sm:$0x1] }
 0x271   : > { %v4841_v12 = vrot.slane %v4839_v26, 5  ;;  %v4852_v45 = vrot.slane %v4850_v19, 4  ;;  %v4855_v23 = vrot.slane %v4853_v36, 5  ;;  %v12849_v30 = vcombine.low %v6752_v18, %v6756_v15  ;;  %v17145_v19 = vld [vmem:[%s13560_s30 + $0x114] sm:$0x1] }
 0x272   : > { %9636 = vrot.lane.b32.xlu1 %v12833_v43, %s13468_s18  ;;  %v12151_v17 = vrot.slane %v12119_v54, 9  ;;  %v5281_v55 = vrot.slane %v12087_v63, 5  ;;  %v12152_v20 = vrot.slane %v12120_v53, 9  ;;  %v5285_v3 = vrot.slane %v12088_v10, 5 }
 0x273   : > { %v17118_v7 = vpop.permute.xlu0 %9084  ;;  %v4842_v51 = vor.u32 %v4841_v12, %v4838_v58  ;;  %v4845_v1 = vshll.u32 %v12087_v63, 16  ;;  %v17128_v37 = vsel %vm20203_vm0, %v17039_v35, %v16793_v24  ;;  %v4856_v43 = vor.u32 %v4855_v23, %v4852_v45 }
 0x274   : > { %9014 = vrot.lane.b32.xlu0 %v12722_v0, %s13461_s5  ;;  %v5282_v33 = vsel %vm13804_vm5, %v12151_v17, %v5281_v55  ;;  %v4859_v16 = vshll.u32 %v12088_v10, 16  ;;  %v17140_v18 = vsel %vm20203_vm0, %v17053_v56, %v16809_v13  ;;  %v5286_v26 = vsel %vm13804_vm5, %v12152_v20, %v5285_v3 }
 0x275   : > { %v4843_v24 = vrot.slane %v4842_v51, 4  ;;  %v4847_v35 = vrot.slane %v4845_v1, 5  ;;  %v12754_v36 = vcombine.low %v5282_v33, %v5286_v26  ;;  %v4857_v54 = vrot.slane %v4856_v43, 4  ;;  %v17167_v51 = vld [vmem:[%s13560_s30 + $0x118] sm:$0xf] }
 0x276   : > { %9716 = vrot.lane.b32.xlu1 %v12849_v30, %s13469_s19  ;;  %v4861_v15 = vrot.slane %v4859_v16, 5  ;;  %v5575_v58 = vshrl.u32 %v17121_v32, 16  ;;  %v5578_v56 = vshll.u32 %v17121_v32, 16  ;;  %v5584_v63 = vshll.u32 %v17135_v28, 16  ;;  %v17159_v30 = vld [vmem:[%s13560_s30 + $0x110] sm:$0xf] }
 0x277   : > { %v17149_v0 = vpop.permute.xlu0 %9276  ;;  %v4848_v13 = vsel %vm13584_vm2, %v4843_v24, %v4847_v35  ;;  %v5589_v53 = vshrl.u32 %v12184_v40, 16  ;;  %v5592_v23 = vshll.u32 %v12184_v40, 16  ;;  %v5598_v10 = vshll.u32 %v17145_v19, 16 }
 0x278   : > { %v4862_v12 = vsel %vm13584_vm2, %v4857_v54, %v4861_v15  ;;  %v5577_v45 = vrot.slane %v5575_v58, 4  ;;  %v17164_v17 = vsel %vm20203_vm0, %v17075_v38, %v16821_v52  ;;  %v5580_v20 = vrot.slane %v5578_v56, 5  ;;  %v12247_v38 = vld [vmem:[%s13560_s30 + $0x108] sm:$0xe]  ;;  %v11917_v56 = vld [vmem:[%s13560_s30 + $0x60] sm:$0xf] }
 0x279   : > { %v12738_v55 = vcombine.low %v4848_v13, %v4862_v12  ;;  %v5591_v3 = vrot.slane %v5589_v53, 4  ;;  %v17174_v33 = vsel %vm20203_vm0, %v17082_v31, %v16824_v9  ;;  %v5586_v43 = vrot.slane %v5584_v63, 5  ;;  %v12248_v13 = vld [vmem:[%s13560_s30 + $0x110] sm:$0xe] }
 0x27a   : > { %v17169_v1 = vpop.permute.xlu1 %9356  ;;  %9174 = vrot.lane.b32.xlu1 %v12754_v36, %s13463_s7  ;;  %v5594_v16 = vrot.slane %v5592_v23, 5  ;;  %v5600_v52 = vrot.slane %v5598_v10, 5  ;;  %v5581_v26 = vor.u32 %v5580_v20, %v5577_v45  ;;  %v12770_v24 = vcombine.low %v17121_v32, %v12184_v40  ;;  %v11918_v20 = vld [vmem:[%s13560_s30 + $0x68] sm:$0xf] }
 0x27b   : > { %9094 = vrot.lane.b32.xlu0 %v12738_v55, %s13462_s6  ;;  %v6314_v35 = vshrl.u32 %v17159_v30, 16  ;;  %v6317_v54 = vshll.u32 %v17159_v30, 16  ;;  %v17182_v15 = vpop.permute.xlu0 %9436  ;;  %v6328_v31 = vshrl.u32 %v17167_v51, 16  ;;  %v6331_v36 = vshll.u32 %v17167_v51, 16 }
 0x27c   : > { %v5595_v9 = vor.u32 %v5594_v16, %v5591_v3  ;;  %v12818_v58 = vcombine.low %v17159_v30, %v17167_v51  ;;  %v5582_v63 = vrot.slane %v5581_v26, 4  ;;  %v12279_v40 = vrot.slane %v12247_v38, 9 }
 0x27d   : > { %v6316_v53 = vrot.slane %v6314_v35, 4  ;;  %v6319_v32 = vrot.slane %v6317_v54, 5  ;;  %v6330_v23 = vrot.slane %v6328_v31, 4  ;;  %v6333_v10 = vrot.slane %v6331_v36, 5 }
 0x27e   : > { %v17190_v12 = vpop.permute.xlu1 %9548  ;;  %v5596_v45 = vrot.slane %v5595_v9, 4  ;;  %v6020_v55 = vrot.slane %v17135_v28, 5  ;;  %v5587_v3 = vsel %vm13584_vm2, %v5582_v63, %v5586_v43  ;;  %v12280_v30 = vrot.slane %v12248_v13, 9  ;;  %v13308_v28 = vld [vmem:[%s13560_s30 + $0x64] sm:$0x1] }
 0x27f   : > { %9286 = vrot.lane.b32.xlu0 %v12770_v24, %s20194_s8  ;;  %v6024_v51 = vrot.slane %v17145_v19, 5  ;;  %v3956_v16 = vshrl.u32 %v11917_v56, 16  ;;  %v3959_v35 = vshll.u32 %v11917_v56, 16  ;;  %v3965_v54 = vshll.u32 %v13308_v28, 16  ;;  %v17204_v9 = vld [vmem:[%s13560_s30 + $0x114] sm:$0x1] }
 0x280   : > { %v5601_v38 = vsel %vm13584_vm2, %v5596_v45, %v5600_v52  ;;  %v6021_v26 = vsel %vm13804_vm5, %v12279_v40, %v6020_v55  ;;  %v17206_v43 = vpop.permute.xlu0 %8894  ;;  %v3970_v36 = vshrl.u32 %v11918_v20, 16  ;;  %v17211_v52 = vld [vmem:[%s13560_s30 + $0x11c] sm:$0x1]  ;;  %v3973_v45 = vshll.u32 %v11918_v20, 16  ;;  %v11993_v55 = vld [vmem:[%s13560_s30 + $0xd0] sm:$0xe] }
 0x281   : > { %v12786_v24 = vcombine.low %v5587_v3, %v5601_v38  ;;  %v6025_v19 = vsel %vm13804_vm5, %v12280_v30, %v6024_v51  ;;  %v3958_v31 = vrot.slane %v3956_v16, 4  ;;  %v3961_v56 = vrot.slane %v3959_v35, 5  ;;  %v13309_v38 = vld [vmem:[%s13560_s30 + $0x6c] sm:$0x1]  ;;  %v11961_v16 = vld [vmem:[%s13560_s30 + $0xd4] sm:$0x1] }
 0x282   : > { %v17213_v13 = vpop.permute.xlu1 %9628  ;;  %v12802_v63 = vcombine.low %v6021_v26, %v6025_v19  ;;  %v3967_v40 = vrot.slane %v3965_v54, 5  ;;  %v3972_v3 = vrot.slane %v3970_v36, 4  ;;  %v3979_v28 = vshll.u32 %v13309_v38, 16  ;;  %v11962_v19 = vld [vmem:[%s13560_s30 + $0xdc] sm:$0x1] }
 0x283   : > { %9366 = vrot.lane.b32.xlu1 %v12786_v24, %s20200_s9  ;;  %v6320_v30 = vor.u32 %v6319_v32, %v6316_v53  ;;  %v6323_v51 = vshll.u32 %v17204_v9, 16  ;;  %v3962_v26 = vor.u32 %v3961_v56, %v3958_v31  ;;  %v3975_v35 = vrot.slane %v3973_v45, 5  ;;  %v12375_v38 = vld [vmem:[%s13560_s30 + $0x110] sm:$0xe] }
 0x284   : > { %9446 = vrot.lane.b32.xlu0 %v12802_v63, %s13466_s10  ;;  %v6334_v54 = vor.u32 %v6333_v10, %v6330_v23  ;;  %v6337_v20 = vshll.u32 %v17211_v52, 16  ;;  %v17224_v34 = vpop.permute.xlu0 %9006  ;;  %v3981_v24 = vrot.slane %v3979_v28, 5  ;;  %v12025_v32 = vrot.slane %v11993_v55, 9  ;;  %v12376_v28 = vld [vmem:[%s13560_s30 + $0x118] sm:$0xe] }
 0x285   : > { %v6321_v36 = vrot.slane %v6320_v30, 4  ;;  %v6325_v53 = vrot.slane %v6323_v51, 5  ;;  %v3963_v14 = vrot.slane %v3962_v26, 4  ;;  %v3976_v48 = vor.u32 %v3975_v35, %v3972_v3  ;;  %v12057_v26 = vld [vmem:[%s13560_s30 + $0x110] sm:$0xf] }
 0x286   : > { %v6335_v50 = vrot.slane %v6334_v54, 4  ;;  %v6339_v63 = vrot.slane %v6337_v20, 5  ;;  %v17227_v31 = vpop.permute.xlu1 %9708  ;;  %v4549_v10 = vrot.slane %v11961_v16, 5  ;;  %v12026_v56 = vrot.slane %v11994_v57, 9  ;;  %v12058_v54 = vld [vmem:[%s13560_s30 + $0x118] sm:$0xf] }
 0x287   : > { %9558 = vrot.lane.b32.xlu1 %v12818_v58, %s13467_s11  ;;  %v6326_v23 = vsel %vm13584_vm2, %v6321_v36, %v6325_v53  ;;  %v4553_v45 = vrot.slane %v11962_v19, 5  ;;  %v3968_v55 = vsel %vm13584_vm2, %v3963_v14, %v3967_v40  ;;  %v3977_v30 = vrot.slane %v3976_v48, 4 }
 0x288   : > { %v6340_v3 = vsel %vm13584_vm2, %v6335_v50, %v6339_v63  ;;  %v12407_v51 = vrot.slane %v12375_v38, 9  ;;  %v4550_v58 = vsel %vm13804_vm5, %v12025_v32, %v4549_v10  ;;  %v6759_v57 = vrot.slane %v17204_v9, 5  ;;  %v12121_v32 = vld [vmem:[%s13560_s30 + $0x110] sm:$0xe] }
 0x289   : > { %v12834_v35 = vcombine.low %v6326_v23, %v6340_v3  ;;  %v4554_v16 = vsel %vm13804_vm5, %v12026_v56, %v4553_v45  ;;  %v3982_v14 = vsel %vm13584_vm2, %v3977_v30, %v3981_v24  ;;  %v12408_v40 = vrot.slane %v12376_v28, 9  ;;  %v12122_v23 = vld [vmem:[%s13560_s30 + $0x118] sm:$0xe]  ;;  %v12089_v30 = vld [vmem:[%s13560_s30 + $0x114] sm:$0x1] }
 0x28a   : > { %v12707_v48 = vcombine.low %v4550_v58, %v4554_v16  ;;  %v6763_v50 = vrot.slane %v17211_v52, 5  ;;  %v17247_v20 = vpop.permute.xlu0 %9086  ;;  %v12685_v19 = vcombine.low %v3968_v55, %v3982_v14  ;;  %v6760_v36 = vsel %vm13804_vm5, %v12407_v51, %v6759_v57  ;;  %v17257_v10 = vpop.permute.xlu1 %9166 }
 0x28b   : > { %9638 = vrot.lane.b32.xlu1 %v12834_v35, %s13468_s18  ;;  %v4864_v53 = vshrl.u32 %v12057_v26, 16  ;;  %v4867_v9 = vshll.u32 %v12057_v26, 16  ;;  %v4878_v38 = vshrl.u32 %v12058_v54, 16  ;;  %v4881_v52 = vshll.u32 %v12058_v54, 16  ;;  %v12090_v35 = vld [vmem:[%s13560_s30 + $0x11c] sm:$0x1] }
 0x28c   : > { %8904 = vrot.lane.b32.xlu0 %v12707_v48, %s13460_s4  ;;  %v6764_v24 = vsel %vm13804_vm5, %v12408_v40, %v6763_v50  ;;  %v12723_v63 = vcombine.low %v12057_v26, %v12058_v54  ;;  %v17262_v56 = vsel %vm20203_vm0, %v17104_v25, %v16849_v41  ;;  %v17268_v3 = vsel %vm20203_vm0, %v17115_v2, %v16855_v27  ;;  %v12185_v40 = vld [vmem:[%s13560_s30 + $0x118] sm:$0xf] }
 0x28d   : > { %20508 = vst [vmem:[#allocation124_spill] sm:$0xff] %v17262_v56  ;;  %v12850_v45 = vcombine.low %v6760_v36, %v6764_v24  ;;  %v4866_v28 = vrot.slane %v4864_v53, 4  ;;  %v4869_v55 = vrot.slane %v4867_v9, 5  ;;  %v4880_v51 = vrot.slane %v4878_v38, 4 }
 0x28e   : > { %v4883_v26 = vrot.slane %v4881_v52, 5  ;;  %v12153_v58 = vrot.slane %v12121_v32, 9  ;;  %v17271_v16 = vpop.permute.xlu0 %9278  ;;  %v17276_v41 = vsel %vm20202_vm1, %v17128_v37, %v16986_v59  ;;  %v5289_v25 = vrot.slane %v12089_v30, 5  ;;  %v17301_v52 = vld [vmem:[%s13560_s30 + $0x124] sm:$0x1] }
 0x28f   : > { %9718 = vrot.lane.b32.xlu1 %v12850_v45, %s13469_s19  ;;  %v12154_v57 = vrot.slane %v12122_v23, 9  ;;  %v5293_v27 = vrot.slane %v12090_v35, 5  ;;  %v9742_v2 = vsel %vm8285_vm6, %v12685_v19, %v17089_v21  ;;  %v4870_v54 = vor.u32 %v4869_v55, %v4866_v28  ;;  %v12186_v21 = vld [vmem:[%s13560_s30 + $0x120] sm:$0xf]  ;;  %v17294_v19 = vld [vmem:[%s13560_s30 + $0x11c] sm:$0x1] }
 0x290   : > { %9016 = vrot.lane.b32.xlu0 %v12723_v63, %s13461_s5  ;;  %v4873_v14 = vshll.u32 %v12089_v30, 16  ;;  %v4884_v48 = vor.u32 %v4883_v26, %v4880_v51  ;;  %v17286_v59 = vsel %vm20202_vm1, %v17140_v18, %v17002_v60  ;;  %v5290_v37 = vsel %vm13804_vm5, %v12153_v58, %v5289_v25  ;;  %v11919_v25 = vld [vmem:[%s13560_s30 + $0x70] sm:$0xf] }
 0x291   : > { %v5294_v50 = vsel %vm13804_vm5, %v12154_v57, %v5293_v27  ;;  %v4887_v36 = vshll.u32 %v12090_v35, 16  ;;  %v4871_v9 = vrot.slane %v4870_v54, 4  ;;  %v17296_v38 = vpop.permute.xlu1 %9358  ;;  %v9789_v60 = vsel %vm8334_vm7, %v9742_v2, %v17095_v22  ;;  %v11920_v54 = vld [vmem:[%s13560_s30 + $0x78] sm:$0xf] }
 0x292   : > { %v12755_v53 = vcombine.low %v5290_v37, %v5294_v50  ;;  %v4875_v32 = vrot.slane %v4873_v14, 5  ;;  %v4885_v24 = vrot.slane %v4884_v48, 4  ;;  %v5603_v63 = vshrl.u32 %v12185_v40, 16 }
 0x293   : > { %v4889_v18 = vrot.slane %v4887_v36, 5  ;;  %v5606_v23 = vshll.u32 %v12185_v40, 16  ;;  %v17303_v45 = vpop.permute.xlu0 %9438  ;;  %v9821_v28 = vsel %vm8367_vm8, %v9789_v60, %v17118_v7  ;;  %v5612_v30 = vshll.u32 %v17294_v19, 16 }
 0x294   : > { %9176 = vrot.lane.b32.xlu1 %v12755_v53, %s13463_s7  ;;  %v4876_v55 = vsel %vm13584_vm2, %v4871_v9, %v4875_v32  ;;  %v5617_v51 = vshrl.u32 %v12186_v21, 16  ;;  %v5605_v26 = vrot.slane %v5603_v63, 4  ;;  %v5620_v58 = vshll.u32 %v12186_v21, 16 }
 0x295   : > { %v4890_v22 = vsel %vm13584_vm2, %v4885_v24, %v4889_v18  ;;  %v5608_v35 = vrot.slane %v5606_v23, 5  ;;  %v17317_v57 = vsel %vm20202_vm1, %v17164_v17, %v17025_v6  ;;  %v5626_v2 = vshll.u32 %v17301_v52, 16  ;;  %v17321_v14 = vpop.permute.xlu1 %9550  ;;  %v13310_v18 = vld [vmem:[%s13560_s30 + $0x74] sm:$0x1] }
 0x296   : > { %v12739_v7 = vcombine.low %v4876_v55, %v4890_v22  ;;  %v5619_v27 = vrot.slane %v5617_v51, 4  ;;  %v9853_v48 = vsel %vm8400_vm9, %v9821_v28, %v17123_v29  ;;  %v5614_v50 = vrot.slane %v5612_v30, 5  ;;  %v12313_v55 = vld [vmem:[%s13560_s30 + $0x120] sm:$0xf]  ;;  %v12314_v22 = vld [vmem:[%s13560_s30 + $0x128] sm:$0xf] }
 0x297   : > { %v5609_v37 = vor.u32 %v5608_v35, %v5605_v26  ;;  %v5622_v36 = vrot.slane %v5620_v58, 5  ;;  %v5628_v6 = vrot.slane %v5626_v2, 5  ;;  %v12771_v17 = vcombine.low %v12185_v40, %v12186_v21  ;;  %v13311_v58 = vld [vmem:[%s13560_s30 + $0x7c] sm:$0x1] }
 0x298   : > { %9096 = vrot.lane.b32.xlu0 %v12739_v7, %s13462_s6  ;;  %v3984_v53 = vshrl.u32 %v11919_v25, 16  ;;  %v3987_v9 = vshll.u32 %v11919_v25, 16  ;;  %v17326_v32 = vpop.permute.xlu0 %8896  ;;  %v3993_v63 = vshll.u32 %v13310_v18, 16  ;;  %v3998_v23 = vshrl.u32 %v11920_v54, 16 }
 0x299   : > { %v5610_v24 = vrot.slane %v5609_v37, 4  ;;  %v5623_v60 = vor.u32 %v5622_v36, %v5619_v27  ;;  %v9885_v29 = vsel %vm20204_vm10, %v9853_v48, %v17149_v0  ;;  %v4001_v51 = vshll.u32 %v11920_v54, 16  ;;  %v17333_v40 = vpop.permute.xlu1 %9630 }
 0x29a   : > { %v3986_v28 = vrot.slane %v3984_v53, 4  ;;  %v3989_v30 = vrot.slane %v3987_v9, 5  ;;  %v4000_v35 = vrot.slane %v3998_v23, 4  ;;  %v4007_v25 = vshll.u32 %v13311_v58, 16  ;;  %v12249_v53 = vld [vmem:[%s13560_s30 + $0x118] sm:$0xe] }
 0x29b   : > { %v5615_v21 = vsel %vm13584_vm2, %v5610_v24, %v5614_v50  ;;  %v5624_v26 = vrot.slane %v5623_v60, 4  ;;  %v3995_v27 = vrot.slane %v3993_v63, 5  ;;  %v4003_v0 = vrot.slane %v4001_v51, 5  ;;  %v12345_v51 = vld [vmem:[%s13560_s30 + $0x124] sm:$0x1] }
 0x29c   : > { %9288 = vrot.lane.b32.xlu0 %v12771_v17, %s20194_s8  ;;  %v3990_v7 = vor.u32 %v3989_v30, %v3986_v28  ;;  %v6342_v2 = vshrl.u32 %v12313_v55, 16  ;;  %v6345_v48 = vshll.u32 %v12313_v55, 16  ;;  %v6356_v37 = vshrl.u32 %v12314_v22, 16  ;;  %v17342_v50 = vpop.permute.xlu0 %9008  ;;  %v12250_v17 = vld [vmem:[%s13560_s30 + $0x120] sm:$0xe] }
 0x29d   : > { %v5629_v54 = vsel %vm13584_vm2, %v5624_v26, %v5628_v6  ;;  %v6359_v36 = vshll.u32 %v12314_v22, 16  ;;  %v4004_v60 = vor.u32 %v4003_v0, %v4000_v35  ;;  %v4009_v23 = vrot.slane %v4007_v25, 5  ;;  %v17346_v58 = vpop.permute.xlu1 %9710 }
 0x29e   : > { %v12787_v9 = vcombine.low %v5615_v21, %v5629_v54  ;;  %v3991_v24 = vrot.slane %v3990_v7, 4  ;;  %v6344_v18 = vrot.slane %v6342_v2, 4  ;;  %v6347_v63 = vrot.slane %v6345_v48, 5  ;;  %v12346_v2 = vld [vmem:[%s13560_s30 + $0x12c] sm:$0x1] }
 0x29f   : > { %v6358_v28 = vrot.slane %v6356_v37, 4  ;;  %v6361_v30 = vrot.slane %v6359_v36, 5  ;;  %v4005_v6 = vrot.slane %v4004_v60, 4  ;;  %v12819_v26 = vcombine.low %v12313_v55, %v12314_v22  ;;  %v11995_v48 = vld [vmem:[%s13560_s30 + $0xe0] sm:$0xe] }
 0x2a0   : > { %9368 = vrot.lane.b32.xlu1 %v12787_v9, %s20200_s9  ;;  %v12281_v21 = vrot.slane %v12249_v53, 9  ;;  %v6028_v35 = vrot.slane %v17294_v19, 5  ;;  %v9917_v7 = vsel %vm8466_vm11, %v9885_v29, %v17169_v1  ;;  %v12282_v25 = vrot.slane %v12250_v17, 9  ;;  %v11963_v22 = vld [vmem:[%s13560_s30 + $0xe4] sm:$0x1] }
 0x2a1   : > { %v6032_v0 = vrot.slane %v17301_v52, 5  ;;  %v6348_v54 = vor.u32 %v6347_v63, %v6344_v18  ;;  %v9949_v37 = vsel %vm20205_vm12, %v9917_v7, %v17182_v15  ;;  %v3996_v36 = vsel %vm13584_vm2, %v3991_v24, %v3995_v27  ;;  %v11996_v1 = vld [vmem:[%s13560_s30 + $0xe8] sm:$0xe]  ;;  %v11964_v15 = vld [vmem:[%s13560_s30 + $0xec] sm:$0x1] }
 0x2a2   : > { %v6029_v19 = vsel %vm13804_vm5, %v12281_v21, %v6028_v35  ;;  %v6351_v55 = vshll.u32 %v12345_v51, 16  ;;  %v4010_v29 = vsel %vm13584_vm2, %v4005_v6, %v4009_v23  ;;  %v6362_v9 = vor.u32 %v6361_v30, %v6358_v28  ;;  %v12377_v63 = vld [vmem:[%s13560_s30 + $0x120] sm:$0xe]  ;;  %v12378_v30 = vld [vmem:[%s13560_s30 + $0x128] sm:$0xe]  ;;  %v17378_v35 = vpop.permute.xlu1 %9168 }
 0x2a3   : > { %v6033_v52 = vsel %vm13804_vm5, %v12282_v25, %v6032_v0  ;;  %v6349_v53 = vrot.slane %v6348_v54, 4  ;;  %v17368_v60 = vpop.permute.xlu0 %9088  ;;  %v6365_v18 = vshll.u32 %v12346_v2, 16  ;;  %v12027_v17 = vrot.slane %v11995_v48, 9 }
 0x2a4   : > { %9560 = vrot.lane.b32.xlu1 %v12819_v26, %s13467_s11  ;;  %v12803_v27 = vcombine.low %v6029_v19, %v6033_v52  ;;  %v6353_v24 = vrot.slane %v6351_v55, 5  ;;  %v17375_v23 = vsel %vm20202_vm1, %v17174_v33, %v17027_v46  ;;  %v6363_v6 = vrot.slane %v6362_v9, 4  ;;  %v12059_v46 = vld [vmem:[%s13560_s30 + $0x120] sm:$0xf]  ;;  %v12060_v55 = vld [vmem:[%s13560_s30 + $0x128] sm:$0xf] }
 0x2a5   : > { %v4557_v21 = vrot.slane %v11963_v22, 5  ;;  %v12028_v28 = vrot.slane %v11996_v1, 9  ;;  %v9981_v26 = vsel %vm8532_vm13, %v9949_v37, %v17190_v12  ;;  %v6367_v25 = vrot.slane %v6365_v18, 5  ;;  %v12123_v9 = vld [vmem:[%s13560_s30 + $0x120] sm:$0xe] }
 0x2a6   : > { %9448 = vrot.lane.b32.xlu0 %v12803_v27, %s13466_s10  ;;  %v6354_v7 = vsel %vm13584_vm2, %v6349_v53, %v6353_v24  ;;  %v4561_v0 = vrot.slane %v11964_v15, 5  ;;  %v12686_v33 = vcombine.low %v3996_v36, %v4010_v29  ;;  %v12409_v48 = vrot.slane %v12377_v63, 9 }
 0x2a7   : > { %v4558_v54 = vsel %vm13804_vm5, %v12027_v17, %v4557_v21  ;;  %v6767_v19 = vrot.slane %v12345_v51, 5  ;;  %v17389_v22 = vpop.permute.xlu0 %9280  ;;  %v6368_v12 = vsel %vm13584_vm2, %v6363_v6, %v6367_v25  ;;  %v12410_v1 = vrot.slane %v12378_v30, 9  ;;  %v12124_v17 = vld [vmem:[%s13560_s30 + $0x128] sm:$0xe]  ;;  %v12092_v30 = vld [vmem:[%s13560_s30 + $0x12c] sm:$0x1] }
 0x2a8   : > { %v4562_v37 = vsel %vm13804_vm5, %v12028_v28, %v4561_v0  ;;  %v6771_v52 = vrot.slane %v12346_v2, 5  ;;  %v12835_v53 = vcombine.low %v6354_v7, %v6368_v12  ;;  %v4892_v51 = vshrl.u32 %v12059_v46, 16  ;;  %v12091_v28 = vld [vmem:[%s13560_s30 + $0x124] sm:$0x1] }
 0x2a9   : > { %v12708_v36 = vcombine.low %v4558_v54, %v4562_v37  ;;  %v6768_v29 = vsel %vm13804_vm5, %v12409_v48, %v6767_v19  ;;  %v4895_v27 = vshll.u32 %v12059_v46, 16  ;;  %v4906_v24 = vshrl.u32 %v12060_v55, 16  ;;  %v17412_v19 = vld [vmem:[%s13560_s30 + $0x128] sm:$0xf] }
 0x2aa   : > { %v6772_v15 = vsel %vm13804_vm5, %v12410_v1, %v6771_v52  ;;  %v4909_v18 = vshll.u32 %v12060_v55, 16  ;;  %v10013_v2 = vsel %vm8565_vm14, %v9981_v26, %v17213_v13  ;;  %9640 = vrot.lane.b32.xlu1 %v12835_v53, %s13468_s18  ;;  %v4894_v6 = vrot.slane %v4892_v51, 4  ;;  %v17426_v51 = vld [vmem:[%s13560_s30 + $0x12c] sm:$0x1] }
 0x2ab   : > { %8906 = vrot.lane.b32.xlu0 %v12708_v36, %s13460_s4  ;;  %v12851_v63 = vcombine.low %v6768_v29, %v6772_v15  ;;  %v12724_v21 = vcombine.low %v12059_v46, %v12060_v55  ;;  %v17407_v7 = vpop.permute.xlu1 %9360  ;;  %v9745_v25 = vsel %vm8285_vm6, %v12686_v33, %v17206_v43  ;;  %v4897_v0 = vrot.slane %v4895_v27, 5  ;;  %v17414_v13 = vpop.permute.xlu0 %9440  ;;  %v12188_v29 = vld [vmem:[%s13560_s30 + $0x130] sm:$0xf] }
 0x2ac   : > { %v4908_v54 = vrot.slane %v4906_v24, 4  ;;  %v4911_v48 = vrot.slane %v4909_v18, 5  ;;  %v12155_v26 = vrot.slane %v12123_v9, 9  ;;  %v5297_v12 = vrot.slane %v12091_v28, 5 }
 0x2ad   : > { %v12156_v37 = vrot.slane %v12124_v17, 9  ;;  %v5301_v46 = vrot.slane %v12092_v30, 5  ;;  %v4898_v55 = vor.u32 %v4897_v0, %v4894_v6  ;;  %v4901_v1 = vshll.u32 %v12091_v28, 16  ;;  %v17432_v17 = vld [vmem:[%s13560_s30 + $0x134] sm:$0x1] }
 0x2ae   : > { %v4912_v52 = vor.u32 %v4911_v48, %v4908_v54  ;;  %v4915_v53 = vshll.u32 %v12092_v30, 16  ;;  %v9791_v43 = vsel %vm8334_vm7, %v9745_v25, %v17224_v34  ;;  %9720 = vrot.lane.b32.xlu1 %v12851_v63, %s13469_s19  ;;  %v5298_v33 = vsel %vm13804_vm5, %v12155_v26, %v5297_v12  ;;  %v11921_v26 = vld [vmem:[%s13560_s30 + $0x80] sm:$0xf] }
 0x2af   : > { %9018 = vrot.lane.b32.xlu0 %v12724_v21, %s13461_s5  ;;  %v5302_v36 = vsel %vm13804_vm5, %v12156_v37, %v5301_v46  ;;  %v5631_v9 = vshrl.u32 %v17412_v19, 16  ;;  %v17429_v15 = vpop.permute.xlu1 %9552  ;;  %v4899_v34 = vrot.slane %v4898_v55, 4  ;;  %v4903_v24 = vrot.slane %v4901_v1, 5 }
 0x2b0   : > { %v12756_v27 = vcombine.low %v5298_v33, %v5302_v36  ;;  %v4913_v18 = vrot.slane %v4912_v52, 4  ;;  %v9823_v63 = vsel %vm8367_vm8, %v9791_v43, %v17247_v20  ;;  %v4917_v6 = vrot.slane %v4915_v53, 5  ;;  %v17437_v30 = vpop.permute.xlu0 %8898  ;;  %v11922_v33 = vld [vmem:[%s13560_s30 + $0x88] sm:$0xf] }
 0x2b1   : > { %v5633_v21 = vrot.slane %v5631_v9, 4  ;;  %v5634_v28 = vshll.u32 %v17412_v19, 16  ;;  %v4904_v25 = vsel %vm13584_vm2, %v4899_v34, %v4903_v24  ;;  %v5640_v0 = vshll.u32 %v17426_v51, 16 }
 0x2b2   : > { %v5645_v54 = vshrl.u32 %v12188_v29, 16  ;;  %v5648_v48 = vshll.u32 %v12188_v29, 16  ;;  %v10045_v12 = vsel %vm8598_vm15, %v10013_v2, %v17227_v31  ;;  %9178 = vrot.lane.b32.xlu1 %v12756_v27, %s13463_s7  ;;  %v4918_v20 = vsel %vm13584_vm2, %v4913_v18, %v4917_v6  ;;  %v12315_v6 = vld [vmem:[%s13560_s30 + $0x130] sm:$0xf] }
 0x2b3   : > { %v5636_v37 = vrot.slane %v5634_v28, 5  ;;  %v5654_v46 = vshll.u32 %v17432_v17, 16  ;;  %v17449_v55 = vpop.permute.xlu1 %9632  ;;  %v9855_v1 = vsel %vm8400_vm9, %v9823_v63, %v17257_v10  ;;  %v12740_v52 = vcombine.low %v4904_v25, %v4918_v20 }
 0x2b4   : > { %v5647_v53 = vrot.slane %v5645_v54, 4  ;;  %v5650_v43 = vrot.slane %v5648_v48, 5  ;;  %v9887_v31 = vsel %vm20204_vm10, %v9855_v1, %v17271_v16  ;;  %v5642_v36 = vrot.slane %v5640_v0, 5  ;;  %v17459_v10 = vpop.permute.xlu0 %9010  ;;  %v12316_v48 = vld [vmem:[%s13560_s30 + $0x138] sm:$0xf] }
 0x2b5   : > { %v5637_v2 = vor.u32 %v5636_v37, %v5633_v21  ;;  %v4012_v9 = vshrl.u32 %v11921_v26, 16  ;;  %9098 = vrot.lane.b32.xlu0 %v12740_v52, %s13462_s6  ;;  %v5656_v34 = vrot.slane %v5654_v46, 5  ;;  %v12772_v24 = vcombine.low %v17412_v19, %v12188_v29 }
 0x2b6   : > { %v5651_v27 = vor.u32 %v5650_v43, %v5647_v53  ;;  %v4015_v18 = vshll.u32 %v11921_v26, 16  ;;  %v4026_v25 = vshrl.u32 %v11922_v33, 16  ;;  %v4029_v54 = vshll.u32 %v11922_v33, 16  ;;  %v12251_v53 = vld [vmem:[%s13560_s30 + $0x128] sm:$0xe] }
 0x2b7   : > { %v5638_v63 = vrot.slane %v5637_v2, 4  ;;  %v4014_v28 = vrot.slane %v4012_v9, 4  ;;  %v17461_v16 = vpop.permute.xlu1 %9712  ;;  %v17466_v21 = vsel %vm20202_vm1, %v17268_v3, %v17048_v47  ;;  %v17469_v0 = vsel %vm20203_vm0, %v10045_v12, 0  ;;  %v13312_v3 = vld [vmem:[%s13560_s30 + $0x84] sm:$0x1] }
 0x2b8   : > { %v5652_v19 = vrot.slane %v5651_v27, 4  ;;  %v4017_v29 = vrot.slane %v4015_v18, 5  ;;  %v4028_v20 = vrot.slane %v4026_v25, 4  ;;  %v4031_v37 = vrot.slane %v4029_v54, 5  ;;  %v12252_v9 = vld [vmem:[%s13560_s30 + $0x130] sm:$0xe] }
 0x2b9   : > { %v5643_v26 = vsel %vm13584_vm2, %v5638_v63, %v5642_v36  ;;  %v6370_v46 = vshrl.u32 %v12315_v6, 16  ;;  %v9919_v1 = vsel %vm8466_vm11, %v9887_v31, %v17296_v38  ;;  %9290 = vrot.lane.b32.xlu0 %v12772_v24, %s20194_s8  ;;  %v4021_v12 = vshll.u32 %v13312_v3, 16  ;;  %v13313_v18 = vld [vmem:[%s13560_s30 + $0x8c] sm:$0x1] }
 0x2ba   : > { %v5657_v47 = vsel %vm13584_vm2, %v5652_v19, %v5656_v34  ;;  %v6373_v52 = vshll.u32 %v12315_v6, 16  ;;  %v4018_v33 = vor.u32 %v4017_v29, %v4014_v28  ;;  %v6384_v36 = vshrl.u32 %v12316_v48, 16  ;;  %v12347_v19 = vld [vmem:[%s13560_s30 + $0x134] sm:$0x1] }
 0x2bb   : > { %v12788_v43 = vcombine.low %v5643_v26, %v5657_v47  ;;  %v6372_v2 = vrot.slane %v6370_v46, 4  ;;  %v4032_v27 = vor.u32 %v4031_v37, %v4028_v20  ;;  %v4035_v63 = vshll.u32 %v13313_v18, 16  ;;  %v17488_v29 = vpop.permute.xlu1 %9170  ;;  %v12348_v47 = vld [vmem:[%s13560_s30 + $0x13c] sm:$0x1] }
 0x2bc   : > { %v6375_v38 = vrot.slane %v6373_v52, 5  ;;  %v6387_v31 = vshll.u32 %v12316_v48, 16  ;;  %v17483_v25 = vpop.permute.xlu0 %9090  ;;  %v6386_v34 = vrot.slane %v6384_v36, 4  ;;  %v12820_v24 = vcombine.low %v12315_v6, %v12316_v48  ;;  %v11965_v48 = vld [vmem:[%s13560_s30 + $0x104] sm:$0x1] }
 0x2bd   : > { %9370 = vrot.lane.b32.xlu1 %v12788_v43, %s20200_s9  ;;  %v12283_v54 = vrot.slane %v12251_v53, 9  ;;  %v6036_v28 = vrot.slane %v17426_v51, 5  ;;  %v9951_v26 = vsel %vm20205_vm12, %v9919_v1, %v17303_v45  ;;  %v12284_v37 = vrot.slane %v12252_v9, 9  ;;  %v11997_v53 = vld [vmem:[%s13560_s30 + $0x100] sm:$0xe] }
 0x2be   : > { %v6389_v20 = vrot.slane %v6387_v31, 5  ;;  %v6040_v46 = vrot.slane %v17432_v17, 5  ;;  %v17494_v3 = vrot.slane %v4018_v33, 4  ;;  %v17496_v52 = vrot.slane %v4021_v12, 5  ;;  %v11998_v1 = vld [vmem:[%s13560_s30 + $0x108] sm:$0xe] }
 0x2bf   : > { %v6037_v51 = vsel %vm13804_vm5, %v12283_v54, %v6036_v28  ;;  %v6376_v6 = vor.u32 %v6375_v38, %v6372_v2  ;;  %v4033_v43 = vrot.slane %v4032_v27, 4  ;;  %v4037_v36 = vrot.slane %v4035_v63, 5  ;;  %v11966_v2 = vld [vmem:[%s13560_s30 + $0x10c] sm:$0x1]  ;;  %v12379_v38 = vld [vmem:[%s13560_s30 + $0x130] sm:$0xe] }
 0x2c0   : > { %v6041_v45 = vsel %vm13804_vm5, %v12284_v37, %v6040_v46  ;;  %v6379_v17 = vshll.u32 %v12347_v19, 16  ;;  %v17505_v33 = vpop.permute.xlu0 %9282  ;;  %v6390_v18 = vor.u32 %v6389_v20, %v6386_v34  ;;  %v6393_v31 = vshll.u32 %v12348_v47, 16  ;;  %v12380_v37 = vld [vmem:[%s13560_s30 + $0x138] sm:$0xe] }
 0x2c1   : > { %9562 = vrot.lane.b32.xlu1 %v12820_v24, %s13467_s11  ;;  %v12804_v12 = vcombine.low %v6037_v51, %v6041_v45  ;;  %v6377_v9 = vrot.slane %v6376_v6, 4  ;;  %v9983_v27 = vsel %vm8532_vm13, %v9951_v26, %v17321_v14  ;;  %v12029_v54 = vrot.slane %v11997_v53, 9  ;;  %v12061_v51 = vld [vmem:[%s13560_s30 + $0x140] sm:$0xf] }
 0x2c2   : > { %v6381_v63 = vrot.slane %v6379_v17, 5  ;;  %v4565_v28 = vrot.slane %v11965_v48, 5  ;;  %v4024_v24 = vsel %vm13584_vm2, %v17494_v3, %v17496_v52  ;;  %v6391_v46 = vrot.slane %v6390_v18, 4  ;;  %v12062_v3 = vld [vmem:[%s13560_s30 + $0x148] sm:$0xf] }
 0x2c3   : > { %9450 = vrot.lane.b32.xlu0 %v12804_v12, %s13466_s10  ;;  %v6395_v34 = vrot.slane %v6393_v31, 5  ;;  %v12030_v20 = vrot.slane %v11998_v1, 9  ;;  %v17519_v6 = vpop.permute.xlu1 %9362  ;;  %v4038_v14 = vsel %vm13584_vm2, %v4033_v43, %v4037_v36  ;;  %v4569_v53 = vrot.slane %v11966_v2, 5 }
 0x2c4   : > { %v6382_v26 = vsel %vm13584_vm2, %v6377_v9, %v6381_v63  ;;  %v4566_v48 = vsel %vm13804_vm5, %v12029_v54, %v4565_v28  ;;  %v12411_v45 = vrot.slane %v12379_v38, 9  ;;  %v6775_v17 = vrot.slane %v12347_v19, 5  ;;  %v12093_v28 = vld [vmem:[%s13560_s30 + $0x144] sm:$0x1]  ;;  %v17538_v38 = vld [vmem:[%s13560_s30 + $0x14c] sm:$0x1] }
 0x2c5   : > { %v6396_v52 = vsel %vm13584_vm2, %v6391_v46, %v6395_v34  ;;  %v12412_v1 = vrot.slane %v12380_v37, 9  ;;  %v17530_v12 = vpop.permute.xlu0 %9442  ;;  %v4570_v43 = vsel %vm13804_vm5, %v12030_v20, %v4569_v53  ;;  %v6779_v36 = vrot.slane %v12348_v47, 5  ;;  %v17550_v20 = vld [vmem:[%s13560_s30 + $0x5c] sm:$0x1] }
 0x2c6   : > { %v12836_v18 = vcombine.low %v6382_v26, %v6396_v52  ;;  %v4920_v9 = vshrl.u32 %v12061_v51, 16  ;;  %v12709_v31 = vcombine.low %v4566_v48, %v4570_v43  ;;  %v6776_v2 = vsel %vm13804_vm5, %v12411_v45, %v6775_v17  ;;  %v17554_v45 = vld [vmem:[%s13560_s30 + $0x64] sm:$0x1] }
 0x2c7   : > { %v4923_v63 = vshll.u32 %v12061_v51, 16  ;;  %v4934_v54 = vshrl.u32 %v12062_v3, 16  ;;  %v17540_v19 = vpop.permute.xlu1 %9554  ;;  %v17544_v37 = vsel %vm8565_vm14, %v9983_v27, %v17333_v40  ;;  %v6780_v47 = vsel %vm13804_vm5, %v12412_v1, %v6779_v36 }
 0x2c8   : > { %9642 = vrot.lane.b32.xlu1 %v12836_v18, %s13468_s18  ;;  %v4922_v46 = vrot.slane %v4920_v9, 4  ;;  %v4937_v34 = vshll.u32 %v12062_v3, 16  ;;  %8908 = vrot.lane.b32.xlu0 %v12709_v31, %s13460_s4  ;;  %v12852_v26 = vcombine.low %v6776_v2, %v6780_v47  ;;  %v12725_v52 = vcombine.low %v12061_v51, %v12062_v3  ;;  %v12125_v51 = vld [vmem:[%s13560_s30 + $0x140] sm:$0xe]  ;;  %v12126_v3 = vld [vmem:[%s13560_s30 + $0x148] sm:$0xe] }
 0x2c9   : > { %v4925_v48 = vrot.slane %v4923_v63, 5  ;;  %v4936_v53 = vrot.slane %v4934_v54, 4  ;;  %v12687_v40 = vcombine.low %v4024_v24, %v4038_v14  ;;  %v4929_v17 = vshll.u32 %v12093_v28, 16  ;;  %v11853_v47 = vld [vmem:[%s13560_s30 + $0x58] sm:$0xe] }
 0x2ca   : > { %v4939_v27 = vrot.slane %v4937_v34, 5  ;;  %v4943_v1 = vshll.u32 %v17538_v38, 16  ;;  %v17557_v18 = vpop.permute.xlu0 %8900  ;;  %v3223_v36 = vor.u32 %v16492_v49, %v16472_v44  ;;  %v3226_v9 = vshll.u32 %v17550_v20, 16 }
 0x2cb   : > { %v4926_v43 = vor.u32 %v4925_v48, %v4922_v46  ;;  %v3237_v31 = vor.u32 %v16506_v5, %v16497_v11  ;;  %v17566_v2 = vpop.permute.xlu1 %9634  ;;  %v4931_v24 = vrot.slane %v4929_v17, 5  ;;  %v3240_v54 = vshll.u32 %v17554_v45, 16  ;;  %v13211_v11 = vld [vmem:[%s20176_s1 + $0x4] ss:$16 sps:$4 sm:$0xff]  }
 0x2cc   : > { %9722 = vrot.lane.b32.xlu1 %v12852_v26, %s13469_s19  ;;  %v4940_v14 = vor.u32 %v4939_v27, %v4936_v53  ;;  %v4945_v63 = vrot.slane %v4943_v1, 5  ;;  %9020 = vrot.lane.b32.xlu0 %v12725_v52, %s13461_s5  ;;  %v3224_v49 = vrot.slane %v3223_v36, 4  ;;  %v3228_v46 = vrot.slane %v3226_v9, 5  ;;  %v13213_v52 = vld [vmem:[%s20176_s1 + $0xc] ss:$16 sps:$4 sm:$0xff]  }
 0x2cd   : > { %v4927_v44 = vrot.slane %v4926_v43, 4  ;;  %v3238_v34 = vrot.slane %v3237_v31, 4  ;;  %v9748_v5 = vsel %vm8285_vm6, %v12687_v40, %v17326_v32  ;;  %v3242_v48 = vrot.slane %v3240_v54, 5  ;;  %v11854_v43 = vld [vmem:[%s13560_s30 + $0x60] sm:$0xe]  ;;  %10404 = vmatprep.subr.bf16.mxu0 %v13211_v11  ;;  %10597 = vmatprep.subr.bf16.mxu1 %v13213_v52 }
 0x2ce   : > { %v4941_v26 = vrot.slane %v4940_v14, 4  ;;  %v12157_v53 = vrot.slane %v12125_v51, 9  ;;  %v17577_v27 = vpop.permute.xlu0 %9012  ;;  %v9793_v17 = vsel %vm8334_vm7, %v9748_v5, %v17342_v50  ;;  %v3229_v32 = vsel %vm13584_vm2, %v3224_v49, %v3228_v46  ;;  %v11923_v51 = vld [vmem:[%s13560_s30 + $0x90] sm:$0xf]  ;;  %v11924_v49 = vld [vmem:[%s13560_s30 + $0x98] sm:$0xf] }
 0x2cf   : > { %v4932_v1 = vsel %vm13584_vm2, %v4927_v44, %v4931_v24  ;;  %v5305_v40 = vrot.slane %v12093_v28, 5  ;;  %v3243_v9 = vsel %vm13584_vm2, %v3238_v34, %v3242_v48  ;;  %v12158_v31 = vrot.slane %v12126_v3, 9  ;;  %v17595_v24 = vpop.permute.xlu1 %9714  ;;  %v17601_v46 = vld [vmem:[%s13560_s30 + $0x148] sm:$0xf]  ;;  %v17608_v11 = vld [vmem:[%s13560_s30 + $0x150] sm:$0xf] }
 0x2d0   : > { %v4946_v36 = vsel %vm13584_vm2, %v4941_v26, %v4945_v63  ;;  %v5309_v50 = vrot.slane %v17538_v38, 5  ;;  %v12637_v54 = vcombine.low %v3229_v32, %v3243_v9  ;;  %v11885_v44 = vrot.slane %v11853_v47, 9 }
 0x2d1   : > { %v12741_v14 = vcombine.low %v4932_v1, %v4946_v36  ;;  %v5306_v28 = vsel %vm13804_vm5, %v12157_v53, %v5305_v40  ;;  %v3762_v3 = vrot.slane %v17550_v20, 5  ;;  %v11886_v38 = vrot.slane %v11854_v43, 9  ;;  %v13215_v20 = vld [vmem:[%s20176_s1] ss:$16 sps:$4 sm:$0xff]   ;;  %v13217_v40 = vld [vmem:[%s20176_s1 + $0x24] ss:$16 sps:$4 sm:$0xff]  }
 0x2d2   : > { %v5310_v63 = vsel %vm13804_vm5, %v12158_v31, %v5309_v50  ;;  %v3766_v34 = vrot.slane %v17554_v45, 5  ;;  %v9825_v5 = vsel %vm8367_vm8, %v9793_v17, %v17368_v60  ;;  %8061 = vrot.lane.b32.xlu0 %v12637_v54, %s13472_s21  ;;  %v4040_v26 = vshrl.u32 %v11923_v51, 16  ;;  %v13216_v45 = vld [vmem:[%s20176_s1 + $0x8] ss:$16 sps:$4 sm:$0xff]   ;;  %v13314_v17 = vld [vmem:[%s13560_s30 + $0x94] sm:$0x1]  ;;  %10405 = vmatpush1.bf16.msra.mxu0 %v13215_v20 }
 0x2d3   : > { %9100 = vrot.lane.b32.xlu1 %v12741_v14, %s13462_s6  ;;  %v12757_v47 = vcombine.low %v5306_v28, %v5310_v63  ;;  %v4043_v48 = vshll.u32 %v11923_v51, 16  ;;  %v17623_v60 = vsel %vm8598_vm15, %v17544_v37, %v17346_v58  ;;  %v3763_v53 = vsel %vm13804_vm5, %v11885_v44, %v3762_v3  ;;  %v13219_v58 = vld [vmem:[%s20176_s1 + $0x2c] ss:$16 sps:$4 sm:$0xff]   ;;  %10598 = vmatpush1.bf16.msra.mxu1 %v13216_v45  ;;  %v17645_v44 = vpop.permute.xlu1 %9172 }
 0x2d4   : > { %v3767_v52 = vsel %vm13804_vm5, %v11886_v38, %v3766_v34  ;;  %v4049_v1 = vshll.u32 %v13314_v17, 16  ;;  %v17630_v32 = vpop.permute.xlu0 %9092  ;;  %v4042_v43 = vrot.slane %v4040_v26, 4  ;;  %v4054_v9 = vshrl.u32 %v11924_v49, 16  ;;  %v13315_v51 = vld [vmem:[%s13560_s30 + $0x9c] sm:$0x1]  ;;  %10406 = vmatprep.subr.bf16.mxu0 %v13217_v40  ;;  %10599 = vmatprep.subr.bf16.mxu1 %v13219_v58 }
 0x2d5   : > { %v12653_v37 = vcombine.low %v3763_v53, %v3767_v52  ;;  %v4045_v36 = vrot.slane %v4043_v48, 5  ;;  %v9857_v31 = vsel %vm8400_vm9, %v9825_v5, %v17378_v35  ;;  %v4057_v50 = vshll.u32 %v11924_v49, 16  ;;  %v17643_v28 = vld [vmem:[%s13560_s30 + $0x14c] sm:$0x1]  ;;  %v12222_v38 = vld [vmem:[%s13560_s30 + $0x154] sm:$0x1] }
 0x2d6   : > { %v4063_v14 = vshll.u32 %v13315_v51, 16  ;;  %v5659_v54 = vshrl.u32 %v17601_v46, 16  ;;  %v4056_v35 = vrot.slane %v4054_v9, 4  ;;  %v5662_v49 = vshll.u32 %v17601_v46, 16  ;;  %v12253_v34 = vld [vmem:[%s13560_s30 + $0x148] sm:$0xe] }
 0x2d7   : > { %9180 = vrot.lane.b32.xlu1 %v12757_v47, %s13463_s7  ;;  %8141 = vrot.lane.b32.xlu0 %v12653_v37, %s13473_s26  ;;  %v4046_v63 = vor.u32 %v4045_v36, %v4042_v43  ;;  %v5673_v3 = vshrl.u32 %v17608_v11, 16  ;;  %v13222_v5 = vld [vmem:[%s20176_s1 + $0x20] ss:$16 sps:$4 sm:$0xff]   ;;  %v9889_v26 = vsel %vm20204_vm10, %v9857_v31, %v17389_v22  ;;  %v4059_v47 = vrot.slane %v4057_v50, 5  ;;  %v13223_v53 = vld [vmem:[%s20176_s1 + $0x28] ss:$16 sps:$4 sm:$0xff]  }
 0x2d8   : > { %v5661_v48 = vrot.slane %v5659_v54, 4  ;;  %v5676_v20 = vshll.u32 %v17608_v11, 16  ;;  %v17659_v45 = vpop.permute.xlu0 %9284  ;;  %v17664_v52 = vrot.slane %v4049_v1, 5  ;;  %v5664_v17 = vrot.slane %v5662_v49, 5  ;;  %10407 = vmatpush1.bf16.msra.mxu0 %v13222_v5  ;;  %v13224_v22 = vld [vmem:[%s20176_s1 + $0x44] ss:$16 sps:$4 sm:$0xff]   ;;  %10600 = vmatpush1.bf16.msra.mxu1 %v13223_v53 }
 0x2d9   : > { %v5675_v40 = vrot.slane %v5673_v3, 4  ;;  %v12773_v58 = vcombine.low %v17601_v46, %v17608_v11  ;;  %v4047_v37 = vrot.slane %v4046_v63, 4  ;;  %v4060_v43 = vor.u32 %v4059_v47, %v4056_v35  ;;  %v13316_v9 = vld [vmem:[%s13560_s30 + $0x60] sm:$0xf]  ;;  %v13317_v31 = vld [vmem:[%s13560_s30 + $0x68] sm:$0xf]  ;;  %10408 = vmatprep.subr.bf16.mxu0 %v13224_v22 }
 0x2da   : > { %v5678_v36 = vrot.slane %v5676_v20, 5  ;;  %v12669_v50 = vcombine.low %v13316_v9, %v13317_v31  ;;  %v12254_v51 = vld [vmem:[%s13560_s30 + $0x150] sm:$0xe]  ;;  %v13226_v1 = vld [vmem:[%s20176_s1 + $0x4c] ss:$16 sps:$4 sm:$0xff]   ;;  %v9921_v46 = vsel %vm8466_vm11, %v9889_v26, %v17407_v7  ;;  %v4065_v11 = vrot.slane %v4063_v14, 5 }
 0x2db   : > { %9292 = vrot.lane.b32.xlu1 %v12773_v58, %s20194_s8  ;;  %v5665_v54 = vor.u32 %v5664_v17, %v5661_v48  ;;  %v5668_v63 = vshll.u32 %v17643_v28, 16  ;;  %v4061_v35 = vrot.slane %v4060_v43, 4  ;;  %v5682_v3 = vshll.u32 %v12222_v38, 16  ;;  %v12317_v47 = vld [vmem:[%s13560_s30 + $0x150] sm:$0xf]  ;;  %10601 = vmatprep.subr.bf16.mxu1 %v13226_v1  ;;  %s20513_s8 = smov 18  }
 0x2dc   : > { %8253 = vrot.lane.b32.xlu0 %v12669_v50, %s20196_s27  ;;  %v5679_v49 = vor.u32 %v5678_v36, %v5675_v40  ;;  %v12285_v5 = vrot.slane %v12253_v34, 9  ;;  %v17683_v20 = vpop.permute.xlu1 %9364  ;;  %v6044_v26 = vrot.slane %v17643_v28, 5  ;;  %v12286_v48 = vrot.slane %v12254_v51, 9  ;;  %v12318_v53 = vld [vmem:[%s13560_s30 + $0x158] sm:$0xf]  ;;  %s20514_s27 = smov 48  }
 0x2dd   : > { %v5666_v7 = vrot.slane %v5665_v54, 4  ;;  %v5670_v14 = vrot.slane %v5668_v63, 5  ;;  %v17687_v17 = vpop.permute.xlu0 %9444  ;;  %v4052_v58 = vsel %vm13584_vm2, %v4047_v37, %v17664_v52  ;;  %v5684_v34 = vrot.slane %v5682_v3, 5  ;;  %v13228_v43 = vld [vmem:[%s20176_s1 + $0x40] ss:$16 sps:$4 sm:$0xff]  }
 0x2de   : > { %v5680_v40 = vrot.slane %v5679_v49, 4  ;;  %v6048_v22 = vrot.slane %v12222_v38, 5  ;;  %v4066_v28 = vsel %vm13584_vm2, %v4061_v35, %v4065_v11  ;;  %v6045_v52 = vsel %vm13804_vm5, %v12285_v5, %v6044_v26  ;;  %v13229_v38 = vld [vmem:[%s20176_s1 + $0x48] ss:$16 sps:$4 sm:$0xff]   ;;  %v11967_v1 = vld [vmem:[%s13560_s30 + $0x114] sm:$0x1]  ;;  %10409 = vmatpush1.bf16.msra.mxu0 %v13228_v43 }
 0x2df   : > { %v5671_v36 = vsel %vm13584_vm2, %v5666_v7, %v5670_v14  ;;  %10109 = vrot.lane.b32.xlu1 %v17469_v0, %s20198_s29  ;;  %v6398_v37 = vshrl.u32 %v12317_v47, 16  ;;  %v6401_v50 = vshll.u32 %v12317_v47, 16  ;;  %v6412_v51 = vshrl.u32 %v12318_v53, 16  ;;  %v11999_v0 = vld [vmem:[%s13560_s30 + $0x110] sm:$0xe]  ;;  %10602 = vmatpush1.bf16.msra.mxu1 %v13229_v38  ;;  %s20511_s29 = smov 45  }
 0x2e0   : > { %v5685_v9 = vsel %vm13584_vm2, %v5680_v40, %v5684_v34  ;;  %v6049_v31 = vsel %vm13804_vm5, %v12286_v48, %v6048_v22  ;;  %v17713_v11 = vld [vmem:[%s13560_s30 + $0x154] sm:$0x1]  ;;  %v17715_v54 = vpop.permute.xlu1 %9556  ;;  %v17719_v63 = vsel %vm20203_vm0, %v17623_v60, 0  ;;  %v9953_v35 = vsel %vm20205_vm12, %v9921_v46, %v17414_v13  ;;  %v11968_v5 = vld [vmem:[%s13560_s30 + $0x11c] sm:$0x1] }
 0x2e1   : > { %v12789_v49 = vcombine.low %v5671_v36, %v5685_v9  ;;  %v6400_v3 = vrot.slane %v6398_v37, 4  ;;  %v12000_v7 = vld [vmem:[%s13560_s30 + $0x118] sm:$0xe]  ;;  %v12688_v14 = vcombine.low %v4052_v58, %v4066_v28  ;;  %v6403_v26 = vrot.slane %v6401_v50, 5  ;;  %v17726_v34 = vld [vmem:[%s13560_s30 + $0x15c] sm:$0x1] }
 0x2e2   : > { %v6414_v48 = vrot.slane %v6412_v51, 4  ;;  %v6415_v40 = vshll.u32 %v12318_v53, 16  ;;  %v17728_v22 = vpop.permute.xlu0 %8902  ;;  %v12805_v60 = vcombine.low %v6045_v52, %v6049_v31  ;;  %v12821_v43 = vcombine.low %v12317_v47, %v12318_v53  ;;  %v17732_v46 = vld [vmem:[%s13560_s30 + $0x150] sm:$0xf]  ;;  %v13230_v36 = vld [vmem:[%s20176_s1 + $0x64] ss:$16 sps:$4 sm:$0xff]  }
 0x2e3   : > { %9372 = vrot.lane.b32.xlu0 %v12789_v49, %s20200_s9  ;;  %v12031_v56 = vrot.slane %v11999_v0, 9  ;;  %v4573_v13 = vrot.slane %v11967_v1, 5  ;;  %v13232_v58 = vld [vmem:[%s20176_s1 + $0x6c] ss:$16 sps:$4 sm:$0xff]   ;;  %v9985_v28 = vsel %vm8532_vm13, %v9953_v35, %v17429_v15  ;;  %v12032_v38 = vrot.slane %v12000_v7, 9  ;;  %10410 = vmatprep.subr.bf16.mxu0 %v13230_v36  ;;  %s13477_s9 = smov [#allocation2]  }
 0x2e4   : > { %v6417_v37 = vrot.slane %v6415_v40, 5  ;;  %v4577_v52 = vrot.slane %v11968_v5, 5  ;;  %v17742_v47 = vpop.permute.xlu1 %9636  ;;  %v13235_v53 = vld [vmem:[%s20176_s1 + $0x60] ss:$16 sps:$4 sm:$0xff]   ;;  %v10017_v9 = vsel %vm8565_vm14, %v9985_v28, %v17449_v55  ;;  %9564 = vrot.lane.b32.xlu1 %v12821_v43, %s13467_s11  ;;  %v6404_v50 = vor.u32 %v6403_v26, %v6400_v3  ;;  %v13236_v51 = vld [vmem:[%s20176_s1 + $0x68] ss:$16 sps:$4 sm:$0xff]   ;;  %10603 = vmatprep.subr.bf16.mxu1 %v13232_v58 }
 0x2e5   : > { %v4574_v31 = vsel %vm13804_vm5, %v12031_v56, %v4573_v13  ;;  %v6407_v15 = vshll.u32 %v17713_v11, 16  ;;  %v13237_v1 = vld [vmem:[%s20176_s1 + $0x84] ss:$16 sps:$4 sm:$0xff]   ;;  %v17761_v55 = vsel %vm8598_vm15, %v10017_v9, %v17461_v16  ;;  %v6421_v35 = vshll.u32 %v17726_v34, 16  ;;  %v12064_v49 = vld [vmem:[%s13560_s30 + $0x158] sm:$0xf]  ;;  %10411 = vmatpush1.bf16.msra.mxu0 %v13235_v53  ;;  %10604 = vmatpush1.bf16.msra.mxu1 %v13236_v51 }
 0x2e6   : > { %v4578_v56 = vsel %vm13804_vm5, %v12032_v38, %v4577_v52  ;;  %v6418_v0 = vor.u32 %v6417_v37, %v6414_v48  ;;  %v13239_v3 = vld [vmem:[%s20176_s1 + $0x8c] ss:$16 sps:$4 sm:$0xff]   ;;  %v9751_v5 = vsel %vm8285_vm6, %v12688_v14, %v17437_v30  ;;  %v6405_v7 = vrot.slane %v6404_v50, 4  ;;  %v12381_v48 = vld [vmem:[%s13560_s30 + $0x150] sm:$0xe]  ;;  %v17776_v58 = vpop.permute.xlu0 %9014  ;;  %10412 = vmatprep.subr.bf16.mxu0 %v13237_v1 }
 0x2e7   : > { %9452 = vrot.lane.b32.xlu0 %v12805_v60, %s13466_s10  ;;  %v12710_v16 = vcombine.low %v4574_v31, %v4578_v56  ;;  %v6409_v26 = vrot.slane %v6407_v15, 5  ;;  %v6423_v43 = vrot.slane %v6421_v35, 5  ;;  %v4948_v13 = vshrl.u32 %v17732_v46, 16  ;;  %10605 = vmatprep.subr.bf16.mxu1 %v13239_v3  ;;  %v12382_v37 = vld [vmem:[%s13560_s30 + $0x158] sm:$0xe] }
 0x2e8   : > { %v6419_v40 = vrot.slane %v6418_v0, 4  ;;  %v4951_v36 = vshll.u32 %v17732_v46, 16  ;;  %v9795_v30 = vsel %vm8334_vm7, %v9751_v5, %v17459_v10  ;;  %v4962_v60 = vshrl.u32 %v12064_v49, 16  ;;  %v11925_v38 = vld [vmem:[%s13560_s30 + $0xb0] sm:$0xf]  ;;  %v17784_v52 = vpop.permute.xlu1 %9716 }
 0x2e9   : > { %v6410_v14 = vsel %vm13584_vm2, %v6405_v7, %v6409_v26  ;;  %v4965_v28 = vshll.u32 %v12064_v49, 16  ;;  %v17788_v53 = vsel %vm8367_vm8, %v9795_v30, %v17483_v25  ;;  %v12726_v10 = vcombine.low %v17732_v46, %v12064_v49  ;;  %v11926_v50 = vld [vmem:[%s13560_s30 + $0xb8] sm:$0xf]  ;;  %v13241_v15 = vld [vmem:[%s20176_s1 + $0x80] ss:$16 sps:$4 sm:$0xff]  }
 0x2ea   : > { %v6424_v9 = vsel %vm13584_vm2, %v6419_v40, %v6423_v43  ;;  %v12413_v31 = vrot.slane %v12381_v48, 9  ;;  %v17798_v1 = vrot.slane %v4948_v13, 4  ;;  %v17800_v25 = vrot.slane %v4951_v36, 5  ;;  %v17804_v0 = vld [vmem:[%s13560_s30 + $0x6c] sm:$0x1]  ;;  %10413 = vmatpush1.bf16.msra.mxu0 %v13241_v15 }
 0x2eb   : > { %8910 = vrot.lane.b32.xlu0 %v12710_v16, %s13460_s4  ;;  %v12837_v51 = vcombine.low %v6410_v14, %v6424_v9  ;;  %v6783_v56 = vrot.slane %v17713_v11, 5  ;;  %v13242_v46 = vld [vmem:[%s20176_s1 + $0x88] ss:$16 sps:$4 sm:$0xff]   ;;  %v17809_v35 = vrot.slane %v4962_v60, 4  ;;  %v12414_v49 = vrot.slane %v12382_v37, 9 }
 0x2ec   : > { %v6787_v3 = vrot.slane %v17726_v34, 5  ;;  %v4068_v5 = vshrl.u32 %v11925_v38, 16  ;;  %v17813_v16 = vld [vmem:[%s13560_s30 + $0x74] sm:$0x1]  ;;  %v17819_v7 = vrot.slane %v4965_v28, 5  ;;  %v4071_v48 = vshll.u32 %v11925_v38, 16  ;;  %10606 = vmatpush1.bf16.msra.mxu1 %v13242_v46 }
 0x2ed   : > { %v13243_v11 = vld [vmem:[%s20176_s1 + $0xa4] ss:$16 sps:$4 sm:$0xff]   ;;  %9644 = vrot.lane.b32.xlu1 %v12837_v51, %s13468_s18  ;;  %v6784_v26 = vsel %vm13804_vm5, %v12413_v31, %v6783_v56  ;;  %v13245_v43 = vld [vmem:[%s20176_s1 + $0xac] ss:$16 sps:$4 sm:$0xff]   ;;  %v4082_v30 = vshrl.u32 %v11926_v50, 16  ;;  %v4085_v14 = vshll.u32 %v11926_v50, 16  ;;  %v17832_v28 = vpop.permute.xlu0 %9094  ;;  %v17836_v51 = vpop.permute.xlu1 %9174 }
 0x2ee   : > { %v13318_v40 = vld [vmem:[%s13560_s30 + $0xb4] sm:$0x1]  ;;  %v6788_v13 = vsel %vm13804_vm5, %v12414_v49, %v6787_v3  ;;  %v4070_v36 = vrot.slane %v4068_v5, 4  ;;  %10414 = vmatprep.subr.bf16.mxu0 %v13243_v11  ;;  %v4073_v38 = vrot.slane %v4071_v48, 5  ;;  %v13319_v31 = vld [vmem:[%s13560_s30 + $0xbc] sm:$0x1]  ;;  %10607 = vmatprep.subr.bf16.mxu1 %v13245_v43  ;;  %v3251_v49 = vor.u32 %v16423_v4, %v16421_v39 }
 0x2ef   : > { %v4077_v34 = vshll.u32 %v13318_v40, 16  ;;  %v17830_v60 = vld [vmem:[%s13560_s30 + $0x154] sm:$0x1]  ;;  %9022 = vrot.lane.b32.xlu0 %v12726_v10, %s13461_s5  ;;  %v12853_v37 = vcombine.low %v6784_v26, %v6788_v13  ;;  %v4091_v15 = vshll.u32 %v13319_v31, 16  ;;  %v13247_v56 = vld [vmem:[%s20176_s1 + $0xa0] ss:$16 sps:$4 sm:$0xff]  }
 0x2f0   : > { %v4084_v50 = vrot.slane %v4082_v30, 4  ;;  %v4087_v46 = vrot.slane %v4085_v14, 5  ;;  %v3254_v10 = vshll.u32 %v17804_v0, 16  ;;  %v13248_v3 = vld [vmem:[%s20176_s1 + $0xa8] ss:$16 sps:$4 sm:$0xff]   ;;  %v4074_v5 = vor.u32 %v4073_v38, %v4070_v36  ;;  %v20509_v26 = vld [vmem:[#allocation25_spill] sm:$0xff]  ;;  %10415 = vmatpush1.bf16.msra.mxu0 %v13247_v56 }
 0x2f1   : > { %v4079_v9 = vrot.slane %v4077_v34, 5  ;;  %9724 = vrot.lane.b32.xlu1 %v12853_v37, %s13469_s19  ;;  %v4093_v11 = vrot.slane %v4091_v15, 5  ;;  %v20510_v48 = vld [vmem:[#allocation8_spill] sm:$0xff]  ;;  %v3268_v34 = vshll.u32 %v17813_v16, 16  ;;  %v13249_v39 = vld [vmem:[%s20176_s1 + $0xc4] ss:$16 sps:$4 sm:$0xff]   ;;  %v4954_v14 = vor.u32 %v17800_v25, %v17798_v1  ;;  %10608 = vmatpush1.bf16.msra.mxu1 %v13248_v3  ;;  %v17871_v25 = vpop.permute.xlu0 %9286 }
 0x2f2   : > { %v3265_v40 = vor.u32 %v20510_v48, %v20509_v26  ;;  %v13251_v4 = vld [vmem:[%s20176_s1 + $0xcc] ss:$16 sps:$4 sm:$0xff]   ;;  %v4088_v43 = vor.u32 %v4087_v46, %v4084_v50  ;;  %v3252_v13 = vrot.slane %v3251_v49, 4  ;;  %v3256_v30 = vrot.slane %v3254_v10, 5  ;;  %v11855_v56 = vld [vmem:[%s13560_s30 + $0x68] sm:$0xe]  ;;  %10416 = vmatprep.subr.bf16.mxu0 %v13249_v39 }
 0x2f3   : > { %v17858_v36 = vld [vmem:[%s13560_s30 + $0x15c] sm:$0x1]  ;;  %v4075_v37 = vrot.slane %v4074_v5, 4  ;;  %v3270_v31 = vrot.slane %v3268_v34, 5  ;;  %v4957_v15 = vshll.u32 %v17830_v60, 16  ;;  %10609 = vmatprep.subr.bf16.mxu1 %v13251_v4  ;;  %v4955_v10 = vrot.slane %v4954_v14, 4 }
 0x2f4   : > { %v3266_v38 = vrot.slane %v3265_v40, 4  ;;  %v13255_v50 = vld [vmem:[%s20176_s1 + $0xc0] ss:$16 sps:$4 sm:$0xff]   ;;  %v4089_v46 = vrot.slane %v4088_v43, 4  ;;  %v3257_v49 = vsel %vm13584_vm2, %v3252_v13, %v3256_v30  ;;  %v4968_v1 = vor.u32 %v17819_v7, %v17809_v35  ;;  %v13256_v3 = vld [vmem:[%s20176_s1 + $0xc8] ss:$16 sps:$4 sm:$0xff]  }
 0x2f5   : > { %v13257_v5 = vld [vmem:[%s20176_s1 + $0xe4] ss:$16 sps:$4 sm:$0xff]   ;;  %v4080_v26 = vsel %vm13584_vm2, %v4075_v37, %v4079_v9  ;;  %v4959_v40 = vrot.slane %v4957_v15, 5  ;;  %v4971_v35 = vshll.u32 %v17858_v36, 16  ;;  %v11856_v7 = vld [vmem:[%s13560_s30 + $0x70] sm:$0xe]  ;;  %v17885_v34 = vpop.permute.xlu1 %9366  ;;  %10417 = vmatpush1.bf16.msra.mxu0 %v13255_v50  ;;  %10610 = vmatpush1.bf16.msra.mxu1 %v13256_v3  ;;  %v9859_v37 = vsel %vm8400_vm9, %v17788_v53, %v17488_v29 }
 0x2f6   : > { %v3271_v48 = vsel %vm13584_vm2, %v3266_v38, %v3270_v31  ;;  %v13259_v39 = vld [vmem:[%s20176_s1 + $0xec] ss:$16 sps:$4 sm:$0xff]   ;;  %v17892_v4 = vsel %vm20203_vm0, %v17761_v55, 0  ;;  %v4094_v9 = vsel %vm13584_vm2, %v4089_v46, %v4093_v11  ;;  %v4969_v13 = vrot.slane %v4968_v1, 4  ;;  %v12127_v30 = vld [vmem:[%s13560_s30 + $0x150] sm:$0xe]  ;;  %10418 = vmatprep.subr.bf16.mxu0 %v13257_v5 }
 0x2f7   : > { %v12638_v43 = vcombine.low %v3257_v49, %v3271_v48  ;;  %v13261_v14 = vld [vmem:[%s20176_s1 + $0xe0] ss:$16 sps:$4 sm:$0xff]   ;;  %v12689_v55 = vcombine.low %v4080_v26, %v4094_v9  ;;  %v4960_v38 = vsel %vm13584_vm2, %v4955_v10, %v4959_v40  ;;  %v4973_v11 = vrot.slane %v4971_v35, 5  ;;  %10611 = vmatprep.subr.bf16.mxu1 %v13259_v39  ;;  %v13262_v31 = vld [vmem:[%s20176_s1 + $0xe8] ss:$16 sps:$4 sm:$0xff]   ;;  %v17927_v40 = vpop.permute.xlu0 %9446 }
 0x2f8   : > { %v11887_v15 = vrot.slane %v11855_v56, 9  ;;  %v3770_v50 = vrot.slane %v17804_v0, 5  ;;  %v11888_v46 = vrot.slane %v11856_v7, 9  ;;  %v3774_v29 = vrot.slane %v17813_v16, 5  ;;  %v12128_v53 = vld [vmem:[%s13560_s30 + $0x158] sm:$0xe] }
 0x2f9   : > { %8063 = vrot.lane.b32.xlu0 %v12638_v43, %s13472_s21  ;;  %v9891_v49 = vsel %vm20204_vm10, %v9859_v37, %v17505_v33  ;;  %v4974_v10 = vsel %vm13584_vm2, %v4969_v13, %v4973_v11  ;;  %v12159_v1 = vrot.slane %v12127_v30, 9  ;;  %v5313_v3 = vrot.slane %v17830_v60, 5  ;;  %v12191_v5 = vld [vmem:[%s13560_s30 + $0x158] sm:$0xf]  ;;  %10419 = vmatpush1.bf16.msra.mxu0 %v13261_v14  ;;  %v12192_v33 = vld [vmem:[%s13560_s30 + $0x160] sm:$0xf]  ;;  %v17925_v48 = vpop.permute.xlu1 %9558 }
 0x2fa   : > { %v9754_v56 = vsel %vm8285_vm6, %v12689_v55, %v17557_v18  ;;  %v12742_v26 = vcombine.low %v4960_v38, %v4974_v10  ;;  %v3771_v0 = vsel %vm13804_vm5, %v11887_v15, %v3770_v50  ;;  %v3775_v16 = vsel %vm13804_vm5, %v11888_v46, %v3774_v29  ;;  %10612 = vmatpush1.bf16.msra.mxu1 %v13262_v31  ;;  %v12223_v30 = vld [vmem:[%s13560_s30 + $0x15c] sm:$0x1]  ;;  %v13320_v37 = vld [vmem:[%s13560_s30 + $0x70] sm:$0xf]  ;;  %v13321_v55 = vld [vmem:[%s13560_s30 + $0x78] sm:$0xf] }
 0x2fb   : > { %v12654_v60 = vcombine.low %v3771_v0, %v3775_v16  ;;  %v5314_v18 = vsel %vm13804_vm5, %v12159_v1, %v5313_v3  ;;  %v12160_v35 = vrot.slane %v12128_v53, 9  ;;  %v5317_v7 = vrot.slane %v17858_v36, 5  ;;  %v12255_v31 = vld [vmem:[%s13560_s30 + $0x158] sm:$0xe]  ;;  %v12256_v1 = vld [vmem:[%s13560_s30 + $0x160] sm:$0xe] }
 0x2fc   : > { %v9923_v39 = vsel %vm8466_vm11, %v9891_v49, %v17519_v6  ;;  %9102 = vrot.lane.b32.xlu1 %v12742_v26, %s13462_s6  ;;  %v9797_v9 = vsel %vm8334_vm7, %v9754_v56, %v17577_v27  ;;  %v5687_v43 = vshrl.u32 %v12191_v5, 16  ;;  %v5690_v13 = vshll.u32 %v12191_v5, 16  ;;  %v12224_v6 = vld [vmem:[%s13560_s30 + $0x164] sm:$0x1]  ;;  %v17952_v16 = vld [vmem:[%s13560_s30 + $0x160] sm:$0xf] }
 0x2fd   : > { %8143 = vrot.lane.b32.xlu0 %v12654_v60, %s13473_s26  ;;  %v5318_v14 = vsel %vm13804_vm5, %v12160_v35, %v5317_v7  ;;  %v12670_v36 = vcombine.low %v13320_v37, %v13321_v55  ;;  %v5701_v38 = vshrl.u32 %v12192_v33, 16  ;;  %v5704_v11 = vshll.u32 %v12192_v33, 16  ;;  %v17954_v60 = vpop.permute.xlu1 %9638 }
 0x2fe   : > { %v12758_v15 = vcombine.low %v5314_v18, %v5318_v14  ;;  %v9829_v27 = vsel %vm8367_vm8, %v9797_v9, %v17630_v32  ;;  %v5689_v50 = vrot.slane %v5687_v43, 4  ;;  %v5692_v46 = vrot.slane %v5690_v13, 5  ;;  %v17956_v32 = vpop.permute.xlu0 %8904 }
 0x2ff   : > { %v9955_v29 = vsel %vm20205_vm12, %v9923_v39, %v17530_v12  ;;  %v5703_v53 = vrot.slane %v5701_v38, 4  ;;  %v5706_v49 = vrot.slane %v5704_v11, 5  ;;  %v5696_v10 = vshll.u32 %v12223_v30, 16  ;;  %v12320_v39 = vld [vmem:[%s13560_s30 + $0x168] sm:$0xf] }
 0x300   : > { %9182 = vrot.lane.b32.xlu1 %v12758_v15, %s13463_s7  ;;  %v12774_v3 = vcombine.low %v12191_v5, %v12192_v33  ;;  %v5693_v56 = vor.u32 %v5692_v46, %v5689_v50  ;;  %v5710_v26 = vshll.u32 %v12224_v6, 16  ;;  %v12287_v0 = vrot.slane %v12255_v31, 9  ;;  %v11927_v11 = vld [vmem:[%s13560_s30 + $0xc0] sm:$0xf]  ;;  %v11928_v50 = vld [vmem:[%s13560_s30 + $0xc8] sm:$0xf] }
 0x301   : > { %8255 = vrot.lane.b32.xlu0 %v12670_v36, %s20511_s29  ;;  %v9861_v12 = vsel %vm8400_vm9, %v9829_v27, %v17645_v44  ;;  %v5698_v18 = vrot.slane %v5696_v10, 5  ;;  %v5707_v35 = vor.u32 %v5706_v49, %v5703_v53  ;;  %v6052_v7 = vrot.slane %v12223_v30, 5  ;;  %v11969_v46 = vld [vmem:[%s13560_s30 + $0x124] sm:$0x1] }
 0x302   : > { %v5694_v5 = vrot.slane %v5693_v56, 4  ;;  %v5712_v33 = vrot.slane %v5710_v26, 5  ;;  %v12288_v9 = vrot.slane %v12256_v1, 9  ;;  %v6056_v43 = vrot.slane %v12224_v6, 5 }
 0x303   : > { %v5708_v13 = vrot.slane %v5707_v35, 4  ;;  %v6053_v14 = vsel %vm13804_vm5, %v12287_v0, %v6052_v7  ;;  %v6426_v37 = vshrl.u32 %v17952_v16, 16  ;;  %v6429_v55 = vshll.u32 %v17952_v16, 16  ;;  %v13322_v0 = vld [vmem:[%s13560_s30 + $0xc4] sm:$0x1] }
 0x304   : > { %9294 = vrot.lane.b32.xlu1 %v12774_v3, %s20512_s23  ;;  %v5699_v44 = vsel %vm13584_vm2, %v5694_v5, %v5698_v18  ;;  %v6057_v30 = vsel %vm13804_vm5, %v12288_v9, %v6056_v43  ;;  %v6440_v36 = vshrl.u32 %v12320_v39, 16  ;;  %v6443_v38 = vshll.u32 %v12320_v39, 16  ;;  %v12001_v3 = vld [vmem:[%s13560_s30 + $0x120] sm:$0xe]  ;;  %v11970_v18 = vld [vmem:[%s13560_s30 + $0x12c] sm:$0x1] }
 0x305   : > { %v9987_v6 = vsel %vm8532_vm13, %v9955_v29, %v17540_v19  ;;  %v17976_v31 = vsel %vm20204_vm10, %v9861_v12, %v17659_v45  ;;  %v5713_v15 = vsel %vm13584_vm2, %v5708_v13, %v5712_v33  ;;  %v12806_v27 = vcombine.low %v6053_v14, %v6057_v30  ;;  %v17983_v19 = vpop.permute.xlu1 %9718  ;;  %v17985_v29 = vpop.permute.xlu0 %9016  ;;  %v13323_v33 = vld [vmem:[%s13560_s30 + $0xcc] sm:$0x1]  ;;  %v12002_v43 = vld [vmem:[%s13560_s30 + $0x128] sm:$0xe] }
 0x306   : > { %v12790_v53 = vcombine.low %v5699_v44, %v5713_v15  ;;  %v6428_v49 = vrot.slane %v6426_v37, 4  ;;  %v6431_v10 = vrot.slane %v6429_v55, 5  ;;  %v6442_v1 = vrot.slane %v6440_v36, 4  ;;  %v17996_v44 = vld [vmem:[%s13560_s30 + $0x164] sm:$0x1] }
 0x307   : > { %v6445_v45 = vrot.slane %v6443_v38, 5  ;;  %v4096_v56 = vshrl.u32 %v11927_v11, 16  ;;  %v4099_v26 = vshll.u32 %v11927_v11, 16  ;;  %v4105_v12 = vshll.u32 %v13322_v0, 16  ;;  %v12065_v0 = vld [vmem:[%s13560_s30 + $0x160] sm:$0xf] }
 0x308   : > { %9374 = vrot.lane.b32.xlu0 %v12790_v53, %s20513_s8  ;;  %10111 = vrot.lane.b32.xlu1 %v17719_v63, %s20514_s27  ;;  %v12822_v35 = vcombine.low %v17952_v16, %v12320_v39  ;;  %v4110_v7 = vshrl.u32 %v11928_v50, 16  ;;  %v4113_v5 = vshll.u32 %v11928_v50, 16  ;;  %v4119_v9 = vshll.u32 %v13323_v33, 16  ;;  %v17999_v63 = vld [vmem:[%s13560_s30 + $0x16c] sm:$0x1] }
 0x309   : > { %v4098_v13 = vrot.slane %v4096_v56, 4  ;;  %v4101_v14 = vrot.slane %v4099_v26, 5  ;;  %v4107_v37 = vrot.slane %v4105_v12, 5  ;;  %v12033_v55 = vrot.slane %v12001_v3, 9 }
 0x30a   : > { %v4112_v30 = vrot.slane %v4110_v7, 4  ;;  %v4115_v36 = vrot.slane %v4113_v5, 5  ;;  %v4121_v38 = vrot.slane %v4119_v9, 5  ;;  %v4581_v11 = vrot.slane %v11969_v46, 5  ;;  %v18007_v46 = vpop.permute.xlu1 %9176  ;;  %v18009_v12 = vpop.permute.xlu0 %9096  ;;  %v12066_v9 = vld [vmem:[%s13560_s30 + $0x168] sm:$0xf] }
 0x30b   : > { %v4102_v15 = vor.u32 %v4101_v14, %v4098_v13  ;;  %v12034_v16 = vrot.slane %v12002_v43, 9  ;;  %v4585_v39 = vrot.slane %v11970_v18, 5  ;;  %v6432_v50 = vor.u32 %v6431_v10, %v6428_v49 }
 0x30c   : > { %9454 = vrot.lane.b32.xlu0 %v12806_v27, %s13466_s10  ;;  %9566 = vrot.lane.b32.xlu1 %v12822_v35, %s13467_s11  ;;  %v4116_v53 = vor.u32 %v4115_v36, %v4112_v30  ;;  %v4582_v3 = vsel %vm13804_vm5, %v12033_v55, %v4581_v11  ;;  %v6435_v56 = vshll.u32 %v17996_v44, 16  ;;  %v6446_v26 = vor.u32 %v6445_v45, %v6442_v1 }
 0x30d   : > { %v4103_v7 = vrot.slane %v4102_v15, 4  ;;  %v4586_v49 = vsel %vm13804_vm5, %v12034_v16, %v4585_v39  ;;  %v6433_v27 = vrot.slane %v6432_v50, 4  ;;  %v6449_v10 = vshll.u32 %v17999_v63, 16  ;;  %v12384_v16 = vld [vmem:[%s13560_s30 + $0x168] sm:$0xe] }
 0x30e   : > { %v4117_v18 = vrot.slane %v4116_v53, 4  ;;  %v12711_v35 = vcombine.low %v4582_v3, %v4586_v49  ;;  %v6437_v5 = vrot.slane %v6435_v56, 5  ;;  %v6447_v33 = vrot.slane %v6446_v26, 4  ;;  %v11825_v50 = vld [vmem:[%s13560_s30 + $0x7c] sm:$0x1]  ;;  %v18034_v3 = vpop.permute.xlu0 %9288 }
 0x30f   : > { %v10019_v1 = vsel %vm8565_vm14, %v9987_v6, %v17566_v2  ;;  %v4108_v45 = vsel %vm13584_vm2, %v4103_v7, %v4107_v37  ;;  %v6451_v43 = vrot.slane %v6449_v10, 5  ;;  %v4976_v13 = vshrl.u32 %v12065_v0, 16  ;;  %v12383_v2 = vld [vmem:[%s13560_s30 + $0x160] sm:$0xe] }
 0x310   : > { %v9925_v14 = vsel %vm8466_vm11, %v17976_v31, %v17683_v20  ;;  %v4122_v55 = vsel %vm13584_vm2, %v4117_v18, %v4121_v38  ;;  %8912 = vrot.lane.b32.xlu0 %v12711_v35, %s13460_s4  ;;  %v6438_v30 = vsel %vm13584_vm2, %v6433_v27, %v6437_v5  ;;  %v4979_v36 = vshll.u32 %v12065_v0, 16  ;;  %v11826_v27 = vld [vmem:[%s13560_s30 + $0x84] sm:$0x1] }
 0x311   : > { %v12690_v6 = vcombine.low %v4108_v45, %v4122_v55  ;;  %v6452_v37 = vsel %vm13584_vm2, %v6447_v33, %v6451_v43  ;;  %v4978_v11 = vrot.slane %v4976_v13, 4  ;;  %v4990_v15 = vshrl.u32 %v12066_v9, 16  ;;  %v20516_v33 = vld [vmem:[#allocation44_spill] sm:$0xff]  ;;  %v20517_v43 = vld [vmem:[#allocation54_spill] sm:$0xff]  ;;  %v20518_v13 = vld [vmem:[#allocation55_spill] sm:$0xff] }
 0x312   : > { %v12838_v39 = vcombine.low %v6438_v30, %v6452_v37  ;;  %v4981_v20 = vrot.slane %v4979_v36, 5  ;;  %v4993_v31 = vshll.u32 %v12066_v9, 16  ;;  %v12727_v38 = vcombine.low %v12065_v0, %v12066_v9  ;;  %v18032_v53 = vpop.permute.xlu1 %9368  ;;  %v12098_v30 = vld [vmem:[%s13560_s30 + $0x16c] sm:$0x1]  ;;  %v11857_v37 = vld [vmem:[%s13560_s30 + $0x78] sm:$0xe] }
 0x313   : > { %v18038_v56 = vsel %vm8598_vm15, %v10019_v1, %v17595_v24  ;;  %v9957_v26 = vsel %vm20205_vm12, %v9925_v14, %v17687_v17  ;;  %v12415_v7 = vrot.slane %v12383_v2, 9  ;;  %v6791_v49 = vrot.slane %v17996_v44, 5  ;;  %v12097_v24 = vld [vmem:[%s13560_s30 + $0x164] sm:$0x1]  ;;  %v20515_v44 = vld [vmem:[#allocation42_spill] sm:$0xff] }
 0x314   : > { %9646 = vrot.lane.b32.xlu1 %v12838_v39, %s13468_s18  ;;  %v4992_v0 = vrot.slane %v4990_v15, 4  ;;  %v4995_v10 = vrot.slane %v4993_v31, 5  ;;  %9024 = vrot.lane.b32.xlu0 %v12727_v38, %s13461_s5  ;;  %v12416_v18 = vrot.slane %v12384_v16, 9  ;;  %v6795_v35 = vrot.slane %v17999_v63, 5 }
 0x315   : > { %v9757_v5 = vsel %vm8285_vm6, %v12690_v6, %v17728_v22  ;;  %v6792_v17 = vsel %vm13804_vm5, %v12415_v7, %v6791_v49  ;;  %v3279_v9 = vor.u32 %v20516_v33, %v20515_v44  ;;  %v3282_v1 = vshll.u32 %v11825_v50, 16 }
 0x316   : > { %v6796_v45 = vsel %vm13804_vm5, %v12416_v18, %v6795_v35  ;;  %v3293_v14 = vor.u32 %v20518_v13, %v20517_v43  ;;  %v3296_v55 = vshll.u32 %v11826_v27, 16  ;;  %v4982_v63 = vor.u32 %v4981_v20, %v4978_v11  ;;  %v18060_v15 = vpop.permute.xlu1 %9560  ;;  %v11858_v35 = vld [vmem:[%s13560_s30 + $0x80] sm:$0xe] }
 0x317   : > { %v12854_v36 = vcombine.low %v6792_v17, %v6796_v45  ;;  %v3280_v2 = vrot.slane %v3279_v9, 4  ;;  %v3284_v22 = vrot.slane %v3282_v1, 5  ;;  %v4985_v6 = vshll.u32 %v12097_v24, 16  ;;  %v12129_v17 = vld [vmem:[%s13560_s30 + $0x160] sm:$0xe] }
 0x318   : > { %v3294_v16 = vrot.slane %v3293_v14, 4  ;;  %v3298_v39 = vrot.slane %v3296_v55, 5  ;;  %v4983_v31 = vrot.slane %v4982_v63, 4  ;;  %v4996_v38 = vor.u32 %v4995_v10, %v4992_v0  ;;  %v18062_v7 = vpop.permute.xlu0 %9448  ;;  %v18079_v63 = vld [vmem:[%s13560_s30 + $0x168] sm:$0xf] }
 0x319   : > { %v9799_v49 = vsel %vm8334_vm7, %v9757_v5, %v17776_v58  ;;  %9726 = vrot.lane.b32.xlu1 %v12854_v36, %s13469_s19  ;;  %v3285_v11 = vsel %vm13584_vm2, %v3280_v2, %v3284_v22  ;;  %v4987_v20 = vrot.slane %v4985_v6, 5  ;;  %v4999_v18 = vshll.u32 %v12098_v30, 16  ;;  %v12130_v58 = vld [vmem:[%s13560_s30 + $0x168] sm:$0xe]  ;;  %v12194_v6 = vld [vmem:[%s13560_s30 + $0x170] sm:$0xf] }
 0x31a   : > { %v9831_v44 = vsel %vm8367_vm8, %v9799_v49, %v17832_v28  ;;  %v3299_v0 = vsel %vm13584_vm2, %v3294_v16, %v3298_v39  ;;  %v4997_v10 = vrot.slane %v4996_v38, 4  ;;  %v11889_v33 = vrot.slane %v11857_v37, 9 }
 0x31b   : > { %v12639_v5 = vcombine.low %v3285_v11, %v3299_v0  ;;  %v4988_v9 = vsel %vm13584_vm2, %v4983_v31, %v4987_v20  ;;  %v5001_v1 = vrot.slane %v4999_v18, 5  ;;  %v3778_v45 = vrot.slane %v11825_v50, 5  ;;  %v13324_v0 = vld [vmem:[%s13560_s30 + $0x80] sm:$0xf] }
 0x31c   : > { %v11890_v43 = vrot.slane %v11858_v35, 9  ;;  %v3782_v13 = vrot.slane %v11826_v27, 5  ;;  %v12161_v14 = vrot.slane %v12129_v17, 9  ;;  %v5321_v55 = vrot.slane %v12097_v24, 5  ;;  %v18087_v37 = vpop.permute.xlu1 %9640  ;;  %v11930_v35 = vld [vmem:[%s13560_s30 + $0xd8] sm:$0xf] }
 0x31d   : > { %8065 = vrot.lane.b32.xlu0 %v12639_v5, %s13472_s21  ;;  %v5002_v28 = vsel %vm13584_vm2, %v4997_v10, %v5001_v1  ;;  %v3779_v36 = vsel %vm13804_vm5, %v11889_v33, %v3778_v45  ;;  %v12162_v2 = vrot.slane %v12130_v58, 9  ;;  %v5325_v22 = vrot.slane %v12098_v30, 5  ;;  %v18089_v50 = vpop.permute.xlu0 %8906  ;;  %v13325_v10 = vld [vmem:[%s13560_s30 + $0x88] sm:$0xf]  ;;  %v12225_v58 = vld [vmem:[%s13560_s30 + $0x16c] sm:$0x1] }
 0x31e   : > { %v9989_v27 = vsel %vm8532_vm13, %v9957_v26, %v17715_v54  ;;  %v12743_v24 = vcombine.low %v4988_v9, %v5002_v28  ;;  %v3783_v16 = vsel %vm13804_vm5, %v11890_v43, %v3782_v13  ;;  %v5322_v39 = vsel %vm13804_vm5, %v12161_v14, %v5321_v55  ;;  %v11929_v54 = vld [vmem:[%s13560_s30 + $0xd0] sm:$0xf] }
 0x31f   : > { %v9863_v30 = vsel %vm8400_vm9, %v9831_v44, %v17836_v51  ;;  %v12655_v31 = vcombine.low %v3779_v36, %v3783_v16  ;;  %v5326_v38 = vsel %vm13804_vm5, %v12162_v2, %v5325_v22  ;;  %v5715_v49 = vshrl.u32 %v18079_v63, 16  ;;  %v13327_v2 = vld [vmem:[%s13560_s30 + $0xdc] sm:$0x1] }
 0x320   : > { %9104 = vrot.lane.b32.xlu1 %v12743_v24, %s13462_s6  ;;  %v12759_v26 = vcombine.low %v5322_v39, %v5326_v38  ;;  %v5718_v11 = vshll.u32 %v18079_v63, 16  ;;  %v5729_v20 = vshrl.u32 %v12194_v6, 16  ;;  %v5732_v18 = vshll.u32 %v12194_v6, 16  ;;  %v18116_v55 = vpop.permute.xlu1 %9720 }
 0x321   : > { %v10021_v51 = vsel %vm8565_vm14, %v9989_v27, %v17742_v47  ;;  %v9895_v17 = vsel %vm20204_vm10, %v9863_v30, %v17871_v25  ;;  %8145 = vrot.lane.b32.xlu0 %v12655_v31, %s13473_s26  ;;  %v5717_v44 = vrot.slane %v5715_v49, 4  ;;  %v12671_v33 = vcombine.low %v13324_v0, %v13325_v10  ;;  %v13326_v47 = vld [vmem:[%s13560_s30 + $0xd4] sm:$0x1]  ;;  %v18118_v28 = vpop.permute.xlu0 %9018  ;;  %v12257_v31 = vld [vmem:[%s13560_s30 + $0x168] sm:$0xe] }
 0x322   : > { %v5720_v5 = vrot.slane %v5718_v11, 5  ;;  %v5731_v9 = vrot.slane %v5729_v20, 4  ;;  %v5734_v1 = vrot.slane %v5732_v18, 5  ;;  %v12775_v45 = vcombine.low %v18079_v63, %v12194_v6  ;;  %v12226_v27 = vld [vmem:[%s13560_s30 + $0x174] sm:$0x1] }
 0x323   : > { %v4124_v43 = vshrl.u32 %v11929_v54, 16  ;;  %v4127_v13 = vshll.u32 %v11929_v54, 16  ;;  %v4133_v14 = vshll.u32 %v13326_v47, 16  ;;  %v4138_v25 = vshrl.u32 %v11930_v35, 16 }
 0x324   : > { %9184 = vrot.lane.b32.xlu1 %v12759_v26, %s13463_s7  ;;  %v4141_v36 = vshll.u32 %v11930_v35, 16  ;;  %v4147_v22 = vshll.u32 %v13327_v2, 16  ;;  %v5721_v24 = vor.u32 %v5720_v5, %v5717_v44  ;;  %v5724_v16 = vshll.u32 %v12225_v58, 16  ;;  %v12258_v44 = vld [vmem:[%s13560_s30 + $0x170] sm:$0xe] }
 0x325   : > { %v18125_v63 = vsel %vm8598_vm15, %v10021_v51, %v17784_v52  ;;  %8257 = vrot.lane.b32.xlu0 %v12671_v33, %s20511_s29  ;;  %v4126_v6 = vrot.slane %v4124_v43, 4  ;;  %v4129_v39 = vrot.slane %v4127_v13, 5  ;;  %v4140_v30 = vrot.slane %v4138_v25, 4  ;;  %v12321_v52 = vld [vmem:[%s13560_s30 + $0x170] sm:$0xf]  ;;  %v18136_v13 = vpop.permute.xlu1 %9178 }
 0x326   : > { %v9927_v38 = vsel %vm8466_vm11, %v9895_v17, %v17885_v34  ;;  %v4143_v49 = vrot.slane %v4141_v36, 5  ;;  %v5722_v54 = vrot.slane %v5721_v24, 4  ;;  %v5726_v26 = vrot.slane %v5724_v16, 5  ;;  %v11971_v24 = vld [vmem:[%s13560_s30 + $0x134] sm:$0x1] }
 0x327   : > { %v4130_v11 = vor.u32 %v4129_v39, %v4126_v6  ;;  %v4135_v20 = vrot.slane %v4133_v14, 5  ;;  %v5735_v18 = vor.u32 %v5734_v1, %v5731_v9  ;;  %v5738_v35 = vshll.u32 %v12226_v27, 16  ;;  %v18138_v9 = vpop.permute.xlu0 %9098  ;;  %v12322_v14 = vld [vmem:[%s13560_s30 + $0x178] sm:$0xf]  ;;  %v12003_v16 = vld [vmem:[%s13560_s30 + $0x130] sm:$0xe] }
 0x328   : > { %9296 = vrot.lane.b32.xlu1 %v12775_v45, %s20512_s23  ;;  %v4144_v51 = vor.u32 %v4143_v49, %v4140_v30  ;;  %v4149_v0 = vrot.slane %v4147_v22, 5  ;;  %v5727_v10 = vsel %vm13584_vm2, %v5722_v54, %v5726_v26  ;;  %v12289_v33 = vrot.slane %v12257_v31, 9  ;;  %v11972_v31 = vld [vmem:[%s13560_s30 + $0x13c] sm:$0x1]  ;;  %v12004_v49 = vld [vmem:[%s13560_s30 + $0x138] sm:$0xe] }
 0x329   : > { %v4131_v34 = vrot.slane %v4130_v11, 4  ;;  %v5736_v17 = vrot.slane %v5735_v18, 4  ;;  %v5740_v5 = vrot.slane %v5738_v35, 5  ;;  %v6060_v43 = vrot.slane %v12225_v58, 5  ;;  %v18160_v18 = vld [vmem:[%s13560_s30 + $0x174] sm:$0x1] }
 0x32a   : > { %v4145_v1 = vrot.slane %v4144_v51, 4  ;;  %v12290_v47 = vrot.slane %v12258_v44, 9  ;;  %v6064_v45 = vrot.slane %v12226_v27, 5  ;;  %v6454_v25 = vshrl.u32 %v12321_v52, 16 }
 0x32b   : > { %v4136_v36 = vsel %vm13584_vm2, %v4131_v34, %v4135_v20  ;;  %v5741_v2 = vsel %vm13584_vm2, %v5736_v17, %v5740_v5  ;;  %v6061_v58 = vsel %vm13804_vm5, %v12289_v33, %v6060_v43  ;;  %v6457_v22 = vshll.u32 %v12321_v52, 16 }
 0x32c   : > { %v4150_v6 = vsel %vm13584_vm2, %v4145_v1, %v4149_v0  ;;  %v12791_v39 = vcombine.low %v5727_v10, %v5741_v2  ;;  %10113 = vrot.lane.b32.xlu1 %v17892_v4, %s20514_s27  ;;  %v6065_v27 = vsel %vm13804_vm5, %v12290_v47, %v6064_v45  ;;  %v6456_v30 = vrot.slane %v6454_v25, 4  ;;  %v12354_v0 = vld [vmem:[%s13560_s30 + $0x17c] sm:$0x1]  ;;  %v12067_v47 = vld [vmem:[%s13560_s30 + $0x170] sm:$0xf] }
 0x32d   : > { %v9959_v54 = vsel %vm20205_vm12, %v9927_v38, %v17927_v40  ;;  %v12807_v26 = vcombine.low %v6061_v58, %v6065_v27  ;;  %v6459_v11 = vrot.slane %v6457_v22, 5  ;;  %v6468_v20 = vshrl.u32 %v12322_v14, 16  ;;  %v18166_v40 = vpop.permute.xlu0 %9290 }
 0x32e   : > { %9376 = vrot.lane.b32.xlu0 %v12791_v39, %s20513_s8  ;;  %v6471_v35 = vshll.u32 %v12322_v14, 16  ;;  %v12823_v44 = vcombine.low %v12321_v52, %v12322_v14  ;;  %v12035_v4 = vrot.slane %v12003_v16, 9  ;;  %v4589_v51 = vrot.slane %v11971_v24, 5 }
 0x32f   : > { %v12691_v10 = vcombine.low %v4136_v36, %v4150_v6  ;;  %v6470_v33 = vrot.slane %v6468_v20, 4  ;;  %v12036_v34 = vrot.slane %v12004_v49, 9  ;;  %v4593_v17 = vrot.slane %v11972_v31, 5  ;;  %v18164_v5 = vpop.permute.xlu1 %9370  ;;  %v12068_v36 = vld [vmem:[%s13560_s30 + $0x178] sm:$0xf] }
 0x330   : > { %v18170_v38 = vsel %vm20203_vm0, %v18038_v56, 0  ;;  %v6473_v43 = vrot.slane %v6471_v35, 5  ;;  %9568 = vrot.lane.b32.xlu1 %v12823_v44, %s13467_s11  ;;  %v4590_v52 = vsel %vm13804_vm5, %v12035_v4, %v4589_v51  ;;  %v6460_v1 = vor.u32 %v6459_v11, %v6456_v30  ;;  %v18198_v4 = vld [vmem:[%s13560_s30 + $0x174] sm:$0x1] }
 0x331   : > { %v18178_v45 = vsel %vm20203_vm0, %v18125_v63, 0  ;;  %v4594_v14 = vsel %vm13804_vm5, %v12036_v34, %v4593_v17  ;;  %v6463_v25 = vshll.u32 %v18160_v18, 16  ;;  %v6477_v56 = vshll.u32 %v12354_v0, 16  ;;  %v12385_v63 = vld [vmem:[%s13560_s30 + $0x170] sm:$0xe] }
 0x332   : > { %v18186_v2 = vsel %vm8532_vm13, %v9959_v54, %v17925_v48  ;;  %9456 = vrot.lane.b32.xlu0 %v12807_v26, %s13466_s10  ;;  %v12712_v58 = vcombine.low %v4590_v52, %v4594_v14  ;;  %v6461_v22 = vrot.slane %v6460_v1, 4  ;;  %v6474_v24 = vor.u32 %v6473_v43, %v6470_v33  ;;  %v12386_v48 = vld [vmem:[%s13560_s30 + $0x178] sm:$0xe]  ;;  %v18206_v17 = vld [vmem:[%s13560_s30 + $0x17c] sm:$0x1] }
 0x333   : > { %v9760_v16 = vsel %vm8285_vm6, %v12691_v10, %v17956_v32  ;;  %v6465_v6 = vrot.slane %v6463_v25, 5  ;;  %v6479_v39 = vrot.slane %v6477_v56, 5  ;;  %v5004_v27 = vshrl.u32 %v12067_v47, 16  ;;  %v18193_v54 = vpop.permute.xlu1 %9562 }
 0x334   : > { %v6475_v30 = vrot.slane %v6474_v24, 4  ;;  %v5007_v31 = vshll.u32 %v12067_v47, 16  ;;  %v5018_v49 = vshrl.u32 %v12068_v36, 16  ;;  %v5021_v11 = vshll.u32 %v12068_v36, 16 }
 0x335   : > { %v6466_v26 = vsel %vm13584_vm2, %v6461_v22, %v6465_v6  ;;  %v5006_v20 = vrot.slane %v5004_v27, 4  ;;  %v12728_v35 = vcombine.low %v12067_v47, %v12068_v36  ;;  %v12417_v44 = vrot.slane %v12385_v63, 9  ;;  %v18200_v32 = vpop.permute.xlu0 %9450  ;;  %v11931_v63 = vld [vmem:[%s13560_s30 + $0xe0] sm:$0xf] }
 0x336   : > { %8914 = vrot.lane.b32.xlu0 %v12712_v58, %s13460_s4  ;;  %v6480_v51 = vsel %vm13584_vm2, %v6475_v30, %v6479_v39  ;;  %v5009_v10 = vrot.slane %v5007_v31, 5  ;;  %v5020_v33 = vrot.slane %v5018_v49, 4  ;;  %v5023_v34 = vrot.slane %v5021_v11, 5  ;;  %v18213_v58 = vld [vmem:[%s13560_s30 + $0x8c] sm:$0x1]  ;;  %v20519_v31 = vld [vmem:[#allocation28_spill] sm:$0xff] }
 0x337   : > { %v12839_v43 = vcombine.low %v6466_v26, %v6480_v51  ;;  %v6799_v52 = vrot.slane %v18160_v18, 5  ;;  %v12418_v1 = vrot.slane %v12386_v48, 9  ;;  %v6803_v47 = vrot.slane %v12354_v0, 5  ;;  %v20520_v49 = vld [vmem:[#allocation30_spill] sm:$0xff]  ;;  %v20521_v26 = vld [vmem:[#allocation37_spill] sm:$0xff] }
 0x338   : > { %v9801_v14 = vsel %vm8334_vm7, %v9760_v16, %v17985_v29  ;;  %v5010_v25 = vor.u32 %v5009_v10, %v5006_v20  ;;  %v5013_v56 = vshll.u32 %v18198_v4, 16  ;;  %v5024_v36 = vor.u32 %v5023_v34, %v5020_v33  ;;  %v18224_v29 = vld [vmem:[%s13560_s30 + $0x94] sm:$0x1]  ;;  %v20522_v20 = vld [vmem:[#allocation40_spill] sm:$0xff]  ;;  %v11932_v34 = vld [vmem:[%s13560_s30 + $0xe8] sm:$0xf] }
 0x339   : > { %v9833_v22 = vsel %vm8367_vm8, %v9801_v14, %v18009_v12  ;;  %9648 = vrot.lane.b32.xlu1 %v12839_v43, %s13468_s18  ;;  %v6800_v24 = vsel %vm13804_vm5, %v12417_v44, %v6799_v52  ;;  %v6804_v18 = vsel %vm13804_vm5, %v12418_v1, %v6803_v47  ;;  %v5027_v0 = vshll.u32 %v18206_v17, 16 }
 0x33a   : > { %9026 = vrot.lane.b32.xlu0 %v12728_v35, %s13461_s5  ;;  %v12855_v16 = vcombine.low %v6800_v24, %v6804_v18  ;;  %v5011_v6 = vrot.slane %v5010_v25, 4  ;;  %v5015_v39 = vrot.slane %v5013_v56, 5  ;;  %v5025_v12 = vrot.slane %v5024_v36, 4  ;;  %v18228_v27 = vpop.permute.xlu1 %9642  ;;  %v18235_v51 = vpop.permute.xlu0 %8908  ;;  %v12131_v25 = vld [vmem:[%s13560_s30 + $0x170] sm:$0xe] }
 0x33b   : > { %v5029_v30 = vrot.slane %v5027_v0, 5  ;;  %v3307_v11 = vor.u32 %v20520_v49, %v20519_v31  ;;  %v3310_v48 = vshll.u32 %v18213_v58, 16  ;;  %v3321_v44 = vor.u32 %v20522_v20, %v20521_v26  ;;  %v13328_v0 = vld [vmem:[%s13560_s30 + $0xe4] sm:$0x1]  ;;  %v13329_v49 = vld [vmem:[%s13560_s30 + $0xec] sm:$0x1] }
 0x33c   : > { %v9865_v35 = vsel %vm8400_vm9, %v9833_v22, %v18007_v46  ;;  %v5016_v10 = vsel %vm13584_vm2, %v5011_v6, %v5015_v39  ;;  %v3324_v33 = vshll.u32 %v18224_v29, 16  ;;  %v4152_v43 = vshrl.u32 %v11931_v63, 16  ;;  %v12132_v39 = vld [vmem:[%s13560_s30 + $0x178] sm:$0xe]  ;;  %v11859_v26 = vld [vmem:[%s13560_s30 + $0x88] sm:$0xe] }
 0x33d   : > { %9728 = vrot.lane.b32.xlu1 %v12855_v16, %s13469_s19  ;;  %v5030_v52 = vsel %vm13584_vm2, %v5025_v12, %v5029_v30  ;;  %v3308_v1 = vrot.slane %v3307_v11, 4  ;;  %v3312_v47 = vrot.slane %v3310_v48, 5  ;;  %v3322_v14 = vrot.slane %v3321_v44, 4 }
 0x33e   : > { %v9897_v46 = vsel %vm20204_vm10, %v9865_v35, %v18034_v3  ;;  %v12744_v56 = vcombine.low %v5016_v10, %v5030_v52  ;;  %v3326_v36 = vrot.slane %v3324_v33, 5  ;;  %v4154_v22 = vrot.slane %v4152_v43, 4  ;;  %v18253_v12 = vpop.permute.xlu1 %9722  ;;  %v18255_v30 = vpop.permute.xlu0 %9020  ;;  %v11860_v10 = vld [vmem:[%s13560_s30 + $0x90] sm:$0xe] }
 0x33f   : > { %v3313_v24 = vsel %vm13584_vm2, %v3308_v1, %v3312_v47  ;;  %v4155_v18 = vshll.u32 %v11931_v63, 16  ;;  %v4161_v16 = vshll.u32 %v13328_v0, 16  ;;  %v4166_v6 = vshrl.u32 %v11932_v34, 16  ;;  %v12195_v0 = vld [vmem:[%s13560_s30 + $0x178] sm:$0xf] }
 0x340   : > { %v3327_v3 = vsel %vm13584_vm2, %v3322_v14, %v3326_v36  ;;  %v4169_v31 = vshll.u32 %v11932_v34, 16  ;;  %v4175_v11 = vshll.u32 %v13329_v49, 16  ;;  %v12163_v48 = vrot.slane %v12131_v25, 9 }
 0x341   : > { %9106 = vrot.lane.b32.xlu1 %v12744_v56, %s13462_s6  ;;  %v12640_v63 = vcombine.low %v3313_v24, %v3327_v3  ;;  %v4157_v20 = vrot.slane %v4155_v18, 5  ;;  %v4163_v44 = vrot.slane %v4161_v16, 5  ;;  %v4168_v35 = vrot.slane %v4166_v6, 4 }
 0x342   : > { %v4171_v33 = vrot.slane %v4169_v31, 5  ;;  %v4177_v43 = vrot.slane %v4175_v11, 5  ;;  %v5329_v52 = vrot.slane %v18198_v4, 5  ;;  %v12164_v1 = vrot.slane %v12132_v39, 9 }
 0x343   : > { %8067 = vrot.lane.b32.xlu0 %v12640_v63, %s13472_s21  ;;  %v4158_v34 = vor.u32 %v4157_v20, %v4154_v22  ;;  %v5333_v47 = vrot.slane %v18206_v17, 5  ;;  %v11891_v14 = vrot.slane %v11859_v26, 9  ;;  %v3786_v25 = vrot.slane %v18213_v58, 5  ;;  %v12196_v22 = vld [vmem:[%s13560_s30 + $0x180] sm:$0xf] }
 0x344   : > { %v4172_v56 = vor.u32 %v4171_v33, %v4168_v35  ;;  %v5330_v36 = vsel %vm13804_vm5, %v12163_v48, %v5329_v52  ;;  %v11892_v24 = vrot.slane %v11860_v10, 9  ;;  %v3790_v18 = vrot.slane %v18224_v29, 5  ;;  %v18280_v39 = vpop.permute.xlu0 %8061  ;;  %v12227_v26 = vld [vmem:[%s13560_s30 + $0x17c] sm:$0x1]  ;;  %v12228_v63 = vld [vmem:[%s13560_s30 + $0x184] sm:$0x1] }
 0x345   : > { %v9929_v4 = vsel %vm8466_vm11, %v9897_v46, %v18032_v53  ;;  %v4159_v16 = vrot.slane %v4158_v34, 4  ;;  %v5334_v17 = vsel %vm13804_vm5, %v12164_v1, %v5333_v47  ;;  %v3787_v58 = vsel %vm13804_vm5, %v11891_v14, %v3786_v25  ;;  %v18278_v6 = vpop.permute.xlu1 %9100  ;;  %v12259_v33 = vld [vmem:[%s13560_s30 + $0x178] sm:$0xe]  ;;  %v13330_v34 = vld [vmem:[%s13560_s30 + $0x90] sm:$0xf] }
 0x346   : > { %v9961_v29 = vsel %vm20205_vm12, %v9929_v4, %v18062_v7  ;;  %v4173_v3 = vrot.slane %v4172_v56, 4  ;;  %v12760_v31 = vcombine.low %v5330_v36, %v5334_v17  ;;  %v3791_v53 = vsel %vm13804_vm5, %v11892_v24, %v3790_v18  ;;  %v13331_v47 = vld [vmem:[%s13560_s30 + $0x98] sm:$0xf]  ;;  %v12260_v18 = vld [vmem:[%s13560_s30 + $0x180] sm:$0xe] }
 0x347   : > { %v4164_v46 = vsel %vm13584_vm2, %v4159_v16, %v4163_v44  ;;  %v12656_v49 = vcombine.low %v3787_v58, %v3791_v53  ;;  %v5743_v11 = vshrl.u32 %v12195_v0, 16  ;;  %v5746_v48 = vshll.u32 %v12195_v0, 16 }
 0x348   : > { %v4178_v20 = vsel %vm13584_vm2, %v4173_v3, %v4177_v43  ;;  %9186 = vrot.lane.b32.xlu1 %v12760_v31, %s13463_s7  ;;  %v5757_v7 = vshrl.u32 %v12196_v22, 16  ;;  %v5760_v35 = vshll.u32 %v12196_v22, 16  ;;  %v12776_v10 = vcombine.low %v12195_v0, %v12196_v22  ;;  %v12323_v22 = vld [vmem:[%s13560_s30 + $0x180] sm:$0xf] }
 0x349   : > { %v12692_v52 = vcombine.low %v4164_v46, %v4178_v20  ;;  %8147 = vrot.lane.b32.xlu0 %v12656_v49, %s13473_s26  ;;  %v5745_v44 = vrot.slane %v5743_v11, 4  ;;  %v5748_v1 = vrot.slane %v5746_v48, 5  ;;  %v12672_v14 = vcombine.low %v13330_v34, %v13331_v47  ;;  %v18297_v25 = vpop.permute.xlu0 %8141  ;;  %v18300_v4 = vpop.permute.xlu1 %9180  ;;  %v12324_v49 = vld [vmem:[%s13560_s30 + $0x188] sm:$0xf]  ;;  %v12005_v34 = vld [vmem:[%s13560_s30 + $0x150] sm:$0xe] }
 0x34a   : > { %v5759_v56 = vrot.slane %v5757_v7, 4  ;;  %v5762_v43 = vrot.slane %v5760_v35, 5  ;;  %v5752_v36 = vshll.u32 %v12227_v26, 16  ;;  %v5766_v24 = vshll.u32 %v12228_v63, 16 }
 0x34b   : > { %v10023_v0 = vsel %vm8565_vm14, %v18186_v2, %v17954_v60  ;;  %v5749_v16 = vor.u32 %v5748_v1, %v5745_v44  ;;  %v12291_v17 = vrot.slane %v12259_v33, 9  ;;  %v6068_v58 = vrot.slane %v12227_v26, 5  ;;  %v18337_v1 = vld [vmem:[%s13560_s30 + $0x18c] sm:$0x1] }
 0x34c   : > { %v9993_v3 = vsel %vm8532_vm13, %v9961_v29, %v18060_v15  ;;  %9298 = vrot.lane.b32.xlu1 %v12776_v10, %s20512_s23  ;;  %v5754_v31 = vrot.slane %v5752_v36, 5  ;;  %v5763_v53 = vor.u32 %v5762_v43, %v5759_v56  ;;  %v5768_v46 = vrot.slane %v5766_v24, 5  ;;  %v18326_v10 = vld [vmem:[%s13560_s30 + $0x184] sm:$0x1]  ;;  %v11973_v24 = vld [vmem:[%s13560_s30 + $0x154] sm:$0x1] }
 0x34d   : > { %v18312_v11 = vsel %vm8598_vm15, %v10023_v0, %v17983_v19  ;;  %v18316_v60 = vsel %vm8565_vm14, %v9993_v3, %v18087_v37  ;;  %8259 = vrot.lane.b32.xlu0 %v12672_v14, %s20511_s29  ;;  %v5750_v2 = vrot.slane %v5749_v16, 4  ;;  %v12292_v48 = vrot.slane %v12260_v18, 9  ;;  %v18340_v47 = vpop.permute.xlu1 %9292 }
 0x34e   : > { %v9763_v15 = vsel %vm8285_vm6, %v12692_v52, %v18089_v50  ;;  %v5764_v29 = vrot.slane %v5763_v53, 4  ;;  %v6072_v26 = vrot.slane %v12228_v63, 5  ;;  %v6482_v20 = vshrl.u32 %v12323_v22, 16  ;;  %v18328_v33 = vpop.permute.xlu0 %8253 }
 0x34f   : > { %v5755_v19 = vsel %vm13584_vm2, %v5750_v2, %v5754_v31  ;;  %v6069_v7 = vsel %vm13804_vm5, %v12291_v17, %v6068_v58  ;;  %v6485_v37 = vshll.u32 %v12323_v22, 16  ;;  %v6496_v35 = vshrl.u32 %v12324_v49, 16  ;;  %v11974_v58 = vld [vmem:[%s13560_s30 + $0x15c] sm:$0x1] }
 0x350   : > { %v5769_v50 = vsel %vm13584_vm2, %v5764_v29, %v5768_v46  ;;  %10115 = vrot.lane.b32.xlu1 %v18170_v38, %s20514_s27  ;;  %v6073_v63 = vsel %vm13804_vm5, %v12292_v48, %v6072_v26  ;;  %v6484_v52 = vrot.slane %v6482_v20, 4  ;;  %v6499_v44 = vshll.u32 %v12324_v49, 16  ;;  %v12006_v38 = vld [vmem:[%s13560_s30 + $0x158] sm:$0xe]  ;;  %v11933_v46 = vld [vmem:[%s13560_s30 + $0x100] sm:$0xf] }
 0x351   : > { %v9803_v14 = vsel %vm8334_vm7, %v9763_v15, %v18118_v28  ;;  %v12792_v56 = vcombine.low %v5755_v19, %v5769_v50  ;;  %v6487_v43 = vrot.slane %v6485_v37, 5  ;;  %v6498_v36 = vrot.slane %v6496_v35, 4  ;;  %v11934_v20 = vld [vmem:[%s13560_s30 + $0x108] sm:$0xf] }
 0x352   : > { %v9835_v18 = vsel %vm8367_vm8, %v9803_v14, %v18138_v9  ;;  %v6501_v0 = vrot.slane %v6499_v44, 5  ;;  %v12824_v16 = vcombine.low %v12323_v22, %v12324_v49  ;;  %v6491_v17 = vshll.u32 %v18326_v10, 16  ;;  %v12387_v14 = vld [vmem:[%s13560_s30 + $0x180] sm:$0xe] }
 0x353   : > { %9378 = vrot.lane.b32.xlu0 %v12792_v56, %s20513_s8  ;;  %v12808_v3 = vcombine.low %v6069_v7, %v6073_v63  ;;  %v6488_v31 = vor.u32 %v6487_v43, %v6484_v52  ;;  %v6505_v28 = vshll.u32 %v18337_v1, 16  ;;  %v12037_v53 = vrot.slane %v12005_v34, 9  ;;  %v18363_v63 = vpop.permute.xlu1 %10109 }
 0x354   : > { %9570 = vrot.lane.b32.xlu1 %v12824_v16, %s13467_s11  ;;  %v6493_v2 = vrot.slane %v6491_v17, 5  ;;  %v6502_v48 = vor.u32 %v6501_v0, %v6498_v36  ;;  %v4597_v15 = vrot.slane %v11973_v24, 5  ;;  %v12038_v9 = vrot.slane %v12006_v38, 9  ;;  %v12388_v38 = vld [vmem:[%s13560_s30 + $0x188] sm:$0xe] }
 0x355   : > { %v9867_v22 = vsel %vm8400_vm9, %v9835_v18, %v18136_v13  ;;  %v6489_v49 = vrot.slane %v6488_v31, 4  ;;  %v6507_v29 = vrot.slane %v6505_v28, 5  ;;  %v4601_v26 = vrot.slane %v11974_v58, 5  ;;  %v18357_v19 = vpop.permute.xlu0 %9372  ;;  %v12069_v58 = vld [vmem:[%s13560_s30 + $0x190] sm:$0xf] }
 0x356   : > { %v9899_v7 = vsel %vm20204_vm10, %v9867_v22, %v18166_v40  ;;  %v6503_v37 = vrot.slane %v6502_v48, 4  ;;  %v4598_v35 = vsel %vm13804_vm5, %v12037_v53, %v4597_v15  ;;  %v4180_v50 = vshrl.u32 %v11933_v46, 16  ;;  %v13332_v40 = vld [vmem:[%s13560_s30 + $0x104] sm:$0x1]  ;;  %v13333_v28 = vld [vmem:[%s13560_s30 + $0x10c] sm:$0x1] }
 0x357   : > { %9458 = vrot.lane.b32.xlu0 %v12808_v3, %s13466_s10  ;;  %v6494_v13 = vsel %vm13584_vm2, %v6489_v49, %v6493_v2  ;;  %v4602_v52 = vsel %vm13804_vm5, %v12038_v9, %v4601_v26  ;;  %v4183_v44 = vshll.u32 %v11933_v46, 16  ;;  %v4189_v34 = vshll.u32 %v13332_v40, 16  ;;  %v12070_v48 = vld [vmem:[%s13560_s30 + $0x198] sm:$0xf] }
 0x358   : > { %v6508_v56 = vsel %vm13584_vm2, %v6503_v37, %v6507_v29  ;;  %v12713_v43 = vcombine.low %v4598_v35, %v4602_v52  ;;  %v4182_v36 = vrot.slane %v4180_v50, 4  ;;  %v4194_v24 = vshrl.u32 %v11934_v20, 16  ;;  %v18388_v35 = vpop.permute.xlu1 %9564 }
 0x359   : > { %v12840_v18 = vcombine.low %v6494_v13, %v6508_v56  ;;  %v4185_v0 = vrot.slane %v4183_v44, 5  ;;  %v18375_v16 = vrot.slane %v4189_v34, 5  ;;  %v4197_v17 = vshll.u32 %v11934_v20, 16  ;;  %v18378_v3 = vpop.permute.xlu0 %9452  ;;  %v18393_v44 = vld [vmem:[%s13560_s30 + $0x194] sm:$0x1] }
 0x35a   : > { %v4196_v31 = vrot.slane %v4194_v24, 4  ;;  %v4203_v53 = vshll.u32 %v13333_v28, 16  ;;  %v12419_v46 = vrot.slane %v12387_v14, 9  ;;  %v6807_v2 = vrot.slane %v18326_v10, 5  ;;  %v18396_v56 = vld [vmem:[%s13560_s30 + $0x19c] sm:$0x1] }
 0x35b   : > { %9650 = vrot.lane.b32.xlu1 %v12840_v18, %s13468_s18  ;;  %8916 = vrot.lane.b32.xlu0 %v12713_v43, %s13460_s4  ;;  %v4186_v15 = vor.u32 %v4185_v0, %v4182_v36  ;;  %v4199_v9 = vrot.slane %v4197_v17, 5  ;;  %v12420_v22 = vrot.slane %v12388_v38, 9  ;;  %v6811_v49 = vrot.slane %v18337_v1, 5 }
 0x35c   : > { %v4205_v29 = vrot.slane %v4203_v53, 5  ;;  %v6808_v26 = vsel %vm13804_vm5, %v12419_v46, %v6807_v2  ;;  %v5032_v20 = vshrl.u32 %v12069_v58, 16  ;;  %v5035_v37 = vshll.u32 %v12069_v58, 16  ;;  %v11829_v53 = vld [vmem:[%s13560_s30 + $0xac] sm:$0x1] }
 0x35d   : > { %v4187_v10 = vrot.slane %v4186_v15, 4  ;;  %v4200_v50 = vor.u32 %v4199_v9, %v4196_v31  ;;  %v6812_v13 = vsel %vm13804_vm5, %v12420_v22, %v6811_v49  ;;  %v5046_v52 = vshrl.u32 %v12070_v48, 16  ;;  %v18398_v43 = vpop.permute.xlu0 %8910 }
 0x35e   : > { %v12856_v40 = vcombine.low %v6808_v26, %v6812_v13  ;;  %v5034_v34 = vrot.slane %v5032_v20, 4  ;;  %v5037_v1 = vrot.slane %v5035_v37, 5  ;;  %v5049_v14 = vshll.u32 %v12070_v48, 16  ;;  %v20524_v26 = vld [vmem:[#allocation89_spill] sm:$0xff]  ;;  %v12133_v37 = vld [vmem:[%s13560_s30 + $0x190] sm:$0xe] }
 0x35f   : > { %v10057_v36 = vsel %vm8598_vm15, %v18316_v60, %v18116_v55  ;;  %v4201_v24 = vrot.slane %v4200_v50, 4  ;;  %v5048_v38 = vrot.slane %v5046_v52, 4  ;;  %v12729_v18 = vcombine.low %v12069_v58, %v12070_v48  ;;  %v12134_v13 = vld [vmem:[%s13560_s30 + $0x198] sm:$0xe] }
 0x360   : > { %v9931_v0 = vsel %vm8466_vm11, %v9899_v7, %v18164_v5  ;;  %9730 = vrot.lane.b32.xlu1 %v12856_v40, %s13469_s19  ;;  %v5051_v17 = vrot.slane %v5049_v14, 5  ;;  %v5038_v31 = vor.u32 %v5037_v1, %v5034_v34  ;;  %v5041_v28 = vshll.u32 %v18393_v44, 16  ;;  %v11830_v5 = vld [vmem:[%s13560_s30 + $0xb4] sm:$0x1]  ;;  %v20523_v7 = vld [vmem:[#allocation77_spill] sm:$0xff] }
 0x361   : > { %v9963_v46 = vsel %vm20205_vm12, %v9931_v0, %v18200_v32  ;;  %v4192_v55 = vsel %vm13584_vm2, %v4187_v10, %v18375_v16  ;;  %9028 = vrot.lane.b32.xlu0 %v12729_v18, %s13461_s5  ;;  %v5055_v60 = vshll.u32 %v18396_v56, 16  ;;  %v3335_v58 = vor.u32 %v16870_v62, %v20523_v7  ;;  %v18420_v32 = vpop.permute.xlu1 %9644  ;;  %v18432_v52 = vpop.permute.xlu0 %9022  ;;  %v11861_v14 = vld [vmem:[%s13560_s30 + $0xa8] sm:$0xe]  ;;  %v11862_v0 = vld [vmem:[%s13560_s30 + $0xb0] sm:$0xe] }
 0x362   : > { %v4206_v2 = vsel %vm13584_vm2, %v4201_v24, %v4205_v29  ;;  %v5039_v48 = vrot.slane %v5038_v31, 4  ;;  %v5043_v15 = vrot.slane %v5041_v28, 5  ;;  %v5052_v9 = vor.u32 %v5051_v17, %v5048_v38 }
 0x363   : > { %v5057_v22 = vrot.slane %v5055_v60, 5  ;;  %v3336_v16 = vrot.slane %v3335_v58, 4  ;;  %v3338_v49 = vshll.u32 %v11829_v53, 16  ;;  %v3349_v20 = vor.u32 %v16893_v61, %v20524_v26  ;;  %v12197_v60 = vld [vmem:[%s13560_s30 + $0x198] sm:$0xf] }
 0x364   : > { %v18427_v62 = vsel %vm20203_vm0, %v18312_v11, 0  ;;  %v5044_v29 = vsel %vm13584_vm2, %v5039_v48, %v5043_v15  ;;  %v5053_v10 = vrot.slane %v5052_v9, 4  ;;  %v3352_v50 = vshll.u32 %v11830_v5, 16 }
 0x365   : > { %v18435_v40 = vsel %vm20203_vm0, %v10057_v36, 0  ;;  %v9995_v61 = vsel %vm8532_vm13, %v9963_v46, %v18193_v54  ;;  %v3340_v34 = vrot.slane %v3338_v49, 5  ;;  %v3350_v1 = vrot.slane %v3349_v20, 4  ;;  %v18454_v7 = vpop.permute.xlu1 %9724  ;;  %v18470_v20 = vld [vmem:[%s13560_s30 + $0x19c] sm:$0x1] }
 0x366   : > { %v18442_v11 = vsel %vm8565_vm14, %v9995_v61, %v18228_v27  ;;  %v12693_v24 = vcombine.low %v4192_v55, %v4206_v2  ;;  %v5058_v38 = vsel %vm13584_vm2, %v5053_v10, %v5057_v22  ;;  %v3354_v18 = vrot.slane %v3352_v50, 5  ;;  %v18475_v10 = vld [vmem:[%s13560_s30 + $0x1a4] sm:$0x1] }
 0x367   : > { %v12745_v36 = vcombine.low %v5044_v29, %v5058_v38  ;;  %v3341_v17 = vsel %vm13584_vm2, %v3336_v16, %v3340_v34  ;;  %v12165_v54 = vrot.slane %v12133_v37, 9  ;;  %v5337_v31 = vrot.slane %v18393_v44, 5  ;;  %v12198_v44 = vld [vmem:[%s13560_s30 + $0x1a0] sm:$0xf] }
 0x368   : > { %v3355_v28 = vsel %vm13584_vm2, %v3350_v1, %v3354_v18  ;;  %v12166_v46 = vrot.slane %v12134_v13, 9  ;;  %v5341_v27 = vrot.slane %v18396_v56, 5  ;;  %v11893_v55 = vrot.slane %v11861_v14, 9  ;;  %v18486_v18 = vld [vmem:[%s13560_s30 + $0x1a0] sm:$0xf] }
 0x369   : > { %9108 = vrot.lane.b32.xlu1 %v12745_v36, %s13462_s6  ;;  %v12641_v58 = vcombine.low %v3341_v17, %v3355_v28  ;;  %v5338_v2 = vsel %vm13804_vm5, %v12165_v54, %v5337_v31  ;;  %v3794_v48 = vrot.slane %v11829_v53, 5  ;;  %v11894_v15 = vrot.slane %v11862_v0, 9  ;;  %v13334_v36 = vld [vmem:[%s13560_s30 + $0xb0] sm:$0xf]  ;;  %v13335_v17 = vld [vmem:[%s13560_s30 + $0xb8] sm:$0xf] }
 0x36a   : > { %v9766_v9 = vsel %vm8285_vm6, %v12693_v24, %v18235_v51  ;;  %v5342_v56 = vsel %vm13804_vm5, %v12166_v46, %v5341_v27  ;;  %v3798_v22 = vrot.slane %v11830_v5, 5  ;;  %v5771_v53 = vshrl.u32 %v12197_v60, 16 }
 0x36b   : > { %v18464_v16 = vpop.permute.xlu0 %8063  ;;  %8069 = vrot.lane.b32.xlu0 %v12641_v58, %s13472_s21  ;;  %v12761_v49 = vcombine.low %v5338_v2, %v5342_v56  ;;  %v3795_v26 = vsel %vm13804_vm5, %v11893_v55, %v3794_v48  ;;  %v5774_v37 = vshll.u32 %v12197_v60, 16  ;;  %v5785_v29 = vshrl.u32 %v12198_v44, 16  ;;  %v12261_v55 = vld [vmem:[%s13560_s30 + $0x198] sm:$0xe] }
 0x36c   : > { %v3799_v51 = vsel %vm13804_vm5, %v11894_v15, %v3798_v22  ;;  %v5788_v5 = vshll.u32 %v12198_v44, 16  ;;  %v18479_v50 = vsel %vm8334_vm7, %v9766_v9, %v18255_v30  ;;  %v5773_v61 = vrot.slane %v5771_v53, 4  ;;  %v12262_v22 = vld [vmem:[%s13560_s30 + $0x1a0] sm:$0xe] }
 0x36d   : > { %9188 = vrot.lane.b32.xlu1 %v12761_v49, %s13463_s7  ;;  %v12657_v13 = vcombine.low %v3795_v26, %v3799_v51  ;;  %v12777_v34 = vcombine.low %v12197_v60, %v12198_v44  ;;  %v8699_v1 = vsel %vm8697_vm3, %v17286_v59, %v18280_v39  ;;  %v5776_v14 = vrot.slane %v5774_v37, 5  ;;  %v12326_v39 = vld [vmem:[%s13560_s30 + $0x1a8] sm:$0xf] }
 0x36e   : > { %v5787_v24 = vrot.slane %v5785_v29, 4  ;;  %v5790_v38 = vrot.slane %v5788_v5, 5  ;;  %v18488_v0 = vpop.permute.xlu1 %9102  ;;  %v8732_v30 = vsel %vm8730_vm4, %v8699_v1, %v18297_v25  ;;  %v12673_v54 = vcombine.low %v13334_v36, %v13335_v17  ;;  %v18512_v29 = vld [vmem:[%s13560_s30 + $0x1a4] sm:$0x1]  ;;  %v18519_v1 = vld [vmem:[%s13560_s30 + $0x1ac] sm:$0x1] }
 0x36f   : > { %8149 = vrot.lane.b32.xlu0 %v12657_v13, %s13473_s26  ;;  %v5780_v31 = vshll.u32 %v18470_v20, 16  ;;  %v5794_v59 = vshll.u32 %v18475_v10, 16  ;;  %v18498_v28 = vpop.permute.xlu0 %8143  ;;  %vm8763_vm1 = vcmask 367616   ;;  %v5777_v46 = vor.u32 %v5776_v14, %v5773_v61  ;;  %v11975_v17 = vld [vmem:[%s13560_s30 + $0x164] sm:$0x1] }
 0x370   : > { %v5791_v27 = vor.u32 %v5790_v38, %v5787_v24  ;;  %v13476_v25 = vmov 0   ;;  %v6510_v2 = vshrl.u32 %v18486_v18, 16  ;;  %v6513_v48 = vshll.u32 %v18486_v18, 16 }
 0x371   : > { %9300 = vrot.lane.b32.xlu1 %v12777_v34, %s20512_s23  ;;  %v5782_v60 = vrot.slane %v5780_v31, 5  ;;  %v5796_v58 = vrot.slane %v5794_v59, 5  ;;  %10436 = vmatprep.mubr.bf16.mxu0 %v13476_v25  ;;  %v5778_v15 = vrot.slane %v5777_v46, 4  ;;  %v6524_v9 = vshrl.u32 %v12326_v39, 16  ;;  %v12008_v46 = vld [vmem:[%s13560_s30 + $0x168] sm:$0xe] }
 0x372   : > { %v5792_v44 = vrot.slane %v5791_v27, 4  ;;  %10629 = vmatprep.mubr.bf16.mxu1 %v13476_v25  ;;  %v6527_v56 = vshll.u32 %v12326_v39, 16  ;;  %v18507_v49 = vpop.permute.xlu1 %9182  ;;  %v6512_v26 = vrot.slane %v6510_v2, 4  ;;  %v6515_v53 = vrot.slane %v6513_v48, 5  ;;  %v11935_v48 = vld [vmem:[%s13560_s30 + $0x110] sm:$0xf] }
 0x373   : > { %8261 = vrot.lane.b32.xlu0 %v12673_v54, %s20511_s29  ;;  %v12825_v51 = vcombine.low %v18486_v18, %v12326_v39  ;;  %v12293_v37 = vrot.slane %v12261_v55, 9  ;;  %v5783_v5 = vsel %vm13584_vm2, %v5778_v15, %v5782_v60  ;;  %v6526_v61 = vrot.slane %v6524_v9, 4  ;;  %v18521_v14 = vpop.permute.xlu0 %8255  ;;  %v12007_v39 = vld [vmem:[%s13560_s30 + $0x160] sm:$0xe] }
 0x374   : > { %v5797_v13 = vsel %vm13584_vm2, %v5792_v44, %v5796_v58  ;;  %v6529_v34 = vrot.slane %v6527_v56, 5  ;;  %v6076_v38 = vrot.slane %v18470_v20, 5  ;;  %v12294_v18 = vrot.slane %v12262_v22, 9  ;;  %v11936_v22 = vld [vmem:[%s13560_s30 + $0x118] sm:$0xf] }
 0x375   : > { %10117 = vrot.lane.b32.xlu1 %v18178_v45, %s20514_s27  ;;  %v12793_v24 = vcombine.low %v5783_v5, %v5797_v13  ;;  %v6080_v36 = vrot.slane %v18475_v10, 5  ;;  %v8765_v54 = vsel %vm8763_vm1, %v8732_v30, %v18328_v33  ;;  %vm10141_vm0 = vcmask 392192   ;;  %v11976_v30 = vld [vmem:[%s13560_s30 + $0x16c] sm:$0x1] }
 0x376   : > { %v6516_v31 = vor.u32 %v6515_v53, %v6512_v26  ;;  %v6519_v59 = vshll.u32 %v18512_v29, 16  ;;  %v18533_v27 = vpop.permute.xlu1 %9294  ;;  %v6077_v45 = vsel %vm13804_vm5, %v12293_v37, %v6076_v38  ;;  %v10143_v33 = vsel %vm10141_vm0, %v8765_v54, %v18363_v63  ;;  %v13336_v38 = vld [vmem:[%s13560_s30 + $0x114] sm:$0x1] }
 0x377   : > { %9380 = vrot.lane.b32.xlu0 %v12793_v24, %s20513_s8  ;;  %v6081_v20 = vsel %vm13804_vm5, %v12294_v18, %v6080_v36  ;;  %v6530_v10 = vor.u32 %v6529_v34, %v6526_v61  ;;  %10437 = vmatmul.mubr.bf16.vlgmr.msra.gmra.mrb[0].mxu0 %v10143_v33  ;;  %v6533_v2 = vshll.u32 %v18519_v1, 16  ;;  %v12039_v44 = vrot.slane %v12007_v39, 9 }
 0x378   : > { %v12809_v55 = vcombine.low %v6077_v45, %v6081_v20  ;;  %10630 = vmatmul.mubr.bf16.vlgmr.msra.gmra.mrb[0].mxu1 %v10143_v33  ;;  %v6517_v60 = vrot.slane %v6516_v31, 4  ;;  %v6521_v58 = vrot.slane %v6519_v59, 5  ;;  %v4605_v9 = vrot.slane %v11975_v17, 5  ;;  %10446 = vmatprep.mubr.bf16.mxu0 %v13476_v25  ;;  %v12390_v17 = vld [vmem:[%s13560_s30 + $0x1a8] sm:$0xe] }
 0x379   : > { %9572 = vrot.lane.b32.xlu1 %v12825_v51, %s13467_s11  ;;  %v6531_v15 = vrot.slane %v6530_v10, 4  ;;  %v12040_v56 = vrot.slane %v12008_v46, 9  ;;  %v9837_v63 = vsel %vm8367_vm8, %v18479_v50, %v18278_v6  ;;  %v6535_v53 = vrot.slane %v6533_v2, 5  ;;  %10639 = vmatprep.mubr.bf16.mxu1 %v13476_v25  ;;  %v12071_v46 = vld [vmem:[%s13560_s30 + $0x1a0] sm:$0xf] }
 0x37a   : > { %v6522_v26 = vsel %vm13584_vm2, %v6517_v60, %v6521_v58  ;;  %v4609_v37 = vrot.slane %v11976_v30, 5  ;;  %v18553_v51 = vpop.permute.xlu1 %10111  ;;  %v18555_v5 = vpop.permute.xlu0 %9374  ;;  %v9869_v13 = vsel %vm8400_vm9, %v9837_v63, %v18300_v4  ;;  %v4606_v6 = vsel %vm13804_vm5, %v12039_v44, %v4605_v9  ;;  %v12389_v4 = vld [vmem:[%s13560_s30 + $0x1a0] sm:$0xe]  ;;  %v13337_v10 = vld [vmem:[%s13560_s30 + $0x11c] sm:$0x1] }
 0x37b   : > { %9460 = vrot.lane.b32.xlu0 %v12809_v55, %s13466_s10  ;;  %v4208_v50 = vshrl.u32 %v11935_v48, 16  ;;  %v4211_v61 = vshll.u32 %v11935_v48, 16  ;;  %v6536_v34 = vsel %vm13584_vm2, %v6531_v15, %v6535_v53  ;;  %v4217_v18 = vshll.u32 %v13336_v38, 16  ;;  %v12072_v55 = vld [vmem:[%s13560_s30 + $0x1a8] sm:$0xf] }
 0x37c   : > { %v4610_v24 = vsel %vm13804_vm5, %v12040_v56, %v4609_v37  ;;  %v4222_v36 = vshrl.u32 %v11936_v22, 16  ;;  %v12841_v54 = vcombine.low %v6522_v26, %v6536_v34  ;;  %v9901_v45 = vsel %vm20204_vm10, %v9869_v13, %v18340_v47  ;;  %v18591_v34 = vld [vmem:[%s13560_s30 + $0x1ac] sm:$0x1] }
 0x37d   : > { %v12714_v31 = vcombine.low %v4606_v6, %v4610_v24  ;;  %v4210_v59 = vrot.slane %v4208_v50, 4  ;;  %v4213_v39 = vrot.slane %v4211_v61, 5  ;;  %v4225_v33 = vshll.u32 %v11936_v22, 16  ;;  %v18588_v61 = vld [vmem:[%s13560_s30 + $0x1a4] sm:$0x1] }
 0x37e   : > { %v4224_v20 = vrot.slane %v4222_v36, 4  ;;  %v4231_v30 = vshll.u32 %v13337_v10, 16  ;;  %v18575_v60 = vpop.permute.xlu0 %9454  ;;  %9652 = vrot.lane.b32.xlu1 %v12841_v54, %s13468_s18  ;;  %v12421_v2 = vrot.slane %v12389_v4, 9  ;;  %v6815_v48 = vrot.slane %v18512_v29, 5  ;;  %v18581_v22 = vpop.permute.xlu1 %9566  ;;  %v18594_v36 = vld [vmem:[%s13560_s30 + $0xbc] sm:$0x1] }
 0x37f   : > { %8918 = vrot.lane.b32.xlu0 %v12714_v31, %s13460_s4  ;;  %v4214_v58 = vor.u32 %v4213_v39, %v4210_v59  ;;  %v12422_v15 = vrot.slane %v12390_v17, 9  ;;  %v4219_v44 = vrot.slane %v4217_v18, 5  ;;  %v4227_v47 = vrot.slane %v4225_v33, 5 }
 0x380   : > { %v6819_v9 = vrot.slane %v18519_v1, 5  ;;  %v5060_v56 = vshrl.u32 %v12071_v46, 16  ;;  %v6816_v26 = vsel %vm13804_vm5, %v12421_v2, %v6815_v48  ;;  %v5063_v53 = vshll.u32 %v12071_v46, 16 }
 0x381   : > { %v4215_v63 = vrot.slane %v4214_v58, 4  ;;  %v5074_v37 = vshrl.u32 %v12072_v55, 16  ;;  %v4228_v13 = vor.u32 %v4227_v47, %v4224_v20  ;;  %v5077_v50 = vshll.u32 %v12072_v55, 16  ;;  %v20525_v58 = vld [vmem:[#allocation70_spill] sm:$0xff] }
 0x382   : > { %v6820_v29 = vsel %vm13804_vm5, %v12422_v15, %v6819_v9  ;;  %v5062_v6 = vrot.slane %v5060_v56, 4  ;;  %v4233_v1 = vrot.slane %v4231_v30, 5  ;;  %v5065_v38 = vrot.slane %v5063_v53, 5  ;;  %v18596_v4 = vpop.permute.xlu0 %8912  ;;  %v20528_v53 = vld [vmem:[#allocation75_spill] sm:$0xff] }
 0x383   : > { %v12857_v24 = vcombine.low %v6816_v26, %v6820_v29  ;;  %v5076_v18 = vrot.slane %v5074_v37, 4  ;;  %v9933_v17 = vsel %vm8466_vm11, %v9901_v45, %v18357_v19  ;;  %v4229_v54 = vrot.slane %v4228_v13, 4  ;;  %v11832_v45 = vld [vmem:[%s13560_s30 + $0xc4] sm:$0x1]  ;;  %v20527_v26 = vld [vmem:[#allocation74_spill] sm:$0xff] }
 0x384   : > { %v5079_v31 = vrot.slane %v5077_v50, 5  ;;  %v12730_v59 = vcombine.low %v12071_v46, %v12072_v55  ;;  %v9965_v39 = vsel %vm20205_vm12, %v9933_v17, %v18378_v3  ;;  %v5066_v20 = vor.u32 %v5065_v38, %v5062_v6  ;;  %v20526_v46 = vld [vmem:[#allocation73_spill] sm:$0xff]  ;;  %v11863_v38 = vld [vmem:[%s13560_s30 + $0xb8] sm:$0xe] }
 0x385   : > { %9732 = vrot.lane.b32.xlu1 %v12857_v24, %s13469_s19  ;;  %v5069_v33 = vshll.u32 %v18588_v61, 16  ;;  %v5083_v10 = vshll.u32 %v18591_v34, 16  ;;  %v4220_v30 = vsel %vm13584_vm2, %v4215_v63, %v4219_v44  ;;  %v3363_v55 = vor.u32 %v20526_v46, %v20525_v58  ;;  %v12135_v13 = vld [vmem:[%s13560_s30 + $0x1a0] sm:$0xe]  ;;  %v12136_v24 = vld [vmem:[%s13560_s30 + $0x1a8] sm:$0xe] }
 0x386   : > { %9030 = vrot.lane.b32.xlu0 %v12730_v59, %s13461_s5  ;;  %v5080_v19 = vor.u32 %v5079_v31, %v5076_v18  ;;  %v3366_v3 = vshll.u32 %v18594_v36, 16  ;;  %v18612_v2 = vpop.permute.xlu1 %9646  ;;  %v4234_v48 = vsel %vm13584_vm2, %v4229_v54, %v4233_v1  ;;  %v5067_v15 = vrot.slane %v5066_v20, 4  ;;  %v18630_v18 = vpop.permute.xlu0 %9024  ;;  %v11864_v31 = vld [vmem:[%s13560_s30 + $0xc0] sm:$0xe]  ;;  %v12199_v58 = vld [vmem:[%s13560_s30 + $0x1a8] sm:$0xf] }
 0x387   : > { %v5071_v47 = vrot.slane %v5069_v33, 5  ;;  %v5085_v9 = vrot.slane %v5083_v10, 5  ;;  %v3364_v56 = vrot.slane %v3363_v55, 4  ;;  %v3377_v37 = vor.u32 %v20528_v53, %v20527_v26 }
 0x388   : > { %v5081_v44 = vrot.slane %v5080_v19, 4  ;;  %v3368_v63 = vrot.slane %v3366_v3, 5  ;;  %v18622_v29 = vsel %vm8598_vm15, %v18442_v11, %v18253_v12  ;;  %v9997_v6 = vsel %vm8532_vm13, %v9965_v39, %v18388_v35 }
 0x389   : > { %v5072_v50 = vsel %vm13584_vm2, %v5067_v15, %v5071_v47  ;;  %v3380_v1 = vshll.u32 %v11832_v45, 16  ;;  %v18634_v17 = vsel %vm8565_vm14, %v9997_v6, %v18420_v32  ;;  %v12694_v54 = vcombine.low %v4220_v30, %v4234_v48  ;;  %v12200_v15 = vld [vmem:[%s13560_s30 + $0x1b0] sm:$0xf] }
 0x38a   : > { %v5086_v12 = vsel %vm13584_vm2, %v5081_v44, %v5085_v9  ;;  %v3378_v11 = vrot.slane %v3377_v37, 4  ;;  %v3369_v59 = vsel %vm13584_vm2, %v3364_v56, %v3368_v63  ;;  %v12167_v20 = vrot.slane %v12135_v13, 9  ;;  %v12232_v13 = vld [vmem:[%s13560_s30 + $0x1b4] sm:$0x1] }
 0x38b   : > { %v12746_v35 = vcombine.low %v5072_v50, %v5086_v12  ;;  %v3382_v39 = vrot.slane %v3380_v1, 5  ;;  %v5345_v33 = vrot.slane %v18588_v61, 5  ;;  %v12168_v10 = vrot.slane %v12136_v24, 9  ;;  %v18644_v30 = vpop.permute.xlu1 %9726 }
 0x38c   : > { %v5349_v19 = vrot.slane %v18591_v34, 5  ;;  %v11895_v32 = vrot.slane %v11863_v38, 9  ;;  %v3802_v55 = vrot.slane %v18594_v36, 5  ;;  %v11896_v3 = vrot.slane %v11864_v31, 9  ;;  %v18679_v38 = vld [vmem:[%s13560_s30 + $0x1b0] sm:$0xf] }
 0x38d   : > { %9110 = vrot.lane.b32.xlu1 %v12746_v35, %s13462_s6  ;;  %v3383_v46 = vsel %vm13584_vm2, %v3378_v11, %v3382_v39  ;;  %v3806_v48 = vrot.slane %v11832_v45, 5  ;;  %v9769_v61 = vsel %vm8285_vm6, %v12694_v54, %v18398_v43  ;;  %v5346_v47 = vsel %vm13804_vm5, %v12167_v20, %v5345_v33  ;;  %v18664_v43 = vld [vmem:[%s13560_s30 + $0x1ac] sm:$0x1]  ;;  %v18682_v54 = vld [vmem:[%s13560_s30 + $0x1b8] sm:$0xf] }
 0x38e   : > { %v12642_v34 = vcombine.low %v3369_v59, %v3383_v46  ;;  %v5350_v9 = vsel %vm13804_vm5, %v12168_v10, %v5349_v19  ;;  %v9807_v44 = vsel %vm8334_vm7, %v9769_v61, %v18432_v52  ;;  %v3803_v36 = vsel %vm13804_vm5, %v11895_v32, %v3802_v55  ;;  %v13338_v39 = vld [vmem:[%s13560_s30 + $0xc0] sm:$0xf]  ;;  %v12264_v61 = vld [vmem:[%s13560_s30 + $0x1b0] sm:$0xe] }
 0x38f   : > { %v12762_v56 = vcombine.low %v5346_v47, %v5350_v9  ;;  %v3807_v45 = vsel %vm13804_vm5, %v11896_v3, %v3806_v48  ;;  %v18666_v63 = vpop.permute.xlu0 %8065  ;;  %v5799_v53 = vshrl.u32 %v12199_v58, 16  ;;  %v5802_v37 = vshll.u32 %v12199_v58, 16 }
 0x390   : > { %8071 = vrot.lane.b32.xlu0 %v12642_v34, %s13472_s21  ;;  %v12658_v26 = vcombine.low %v3803_v36, %v3807_v45  ;;  %v5813_v52 = vshrl.u32 %v12200_v15, 16  ;;  %v18672_v6 = vsel %vm8367_vm8, %v9807_v44, %v18488_v0  ;;  %v8701_v50 = vsel %vm8697_vm3, %v17276_v41, %v18464_v16  ;;  %v13339_v41 = vld [vmem:[%s13560_s30 + $0xc8] sm:$0xf] }
 0x391   : > { %9190 = vrot.lane.b32.xlu1 %v12762_v56, %s13463_s7  ;;  %v5816_v1 = vshll.u32 %v12200_v15, 16  ;;  %v12778_v24 = vcombine.low %v12199_v58, %v12200_v15  ;;  %v8734_v12 = vsel %vm8730_vm4, %v8701_v50, %v18498_v28  ;;  %v5801_v11 = vrot.slane %v5799_v53, 4  ;;  %v12263_v58 = vld [vmem:[%s13560_s30 + $0x1a8] sm:$0xe] }
 0x392   : > { %v5804_v31 = vrot.slane %v5802_v37, 5  ;;  %v5815_v0 = vrot.slane %v5813_v52, 4  ;;  %v18686_v35 = vpop.permute.xlu1 %9104  ;;  %v12674_v16 = vcombine.low %v13338_v39, %v13339_v41  ;;  %v5808_v20 = vshll.u32 %v18664_v43, 16  ;;  %v18706_v37 = vld [vmem:[%s13560_s30 + $0x1b4] sm:$0x1] }
 0x393   : > { %v5818_v59 = vrot.slane %v5816_v1, 5  ;;  %v5822_v33 = vshll.u32 %v12232_v13, 16  ;;  %v6538_v19 = vshrl.u32 %v18679_v38, 16  ;;  %v6541_v28 = vshll.u32 %v18679_v38, 16  ;;  %v18696_v46 = vpop.permute.xlu0 %8145 }
 0x394   : > { %8151 = vrot.lane.b32.xlu0 %v12658_v26, %s13473_s26  ;;  %v5805_v10 = vor.u32 %v5804_v31, %v5801_v11  ;;  %v6552_v32 = vshrl.u32 %v18682_v54, 16  ;;  %v5810_v55 = vrot.slane %v5808_v20, 5  ;;  %v6555_v15 = vshll.u32 %v18682_v54, 16 }
 0x395   : > { %9302 = vrot.lane.b32.xlu1 %v12778_v24, %s20512_s23  ;;  %v5819_v3 = vor.u32 %v5818_v59, %v5815_v0  ;;  %v5824_v48 = vrot.slane %v5822_v33, 5  ;;  %v8767_v34 = vsel %vm8763_vm1, %v8734_v12, %v18521_v14  ;;  %v6540_v9 = vrot.slane %v6538_v19, 4  ;;  %v18713_v24 = vld [vmem:[%s13560_s30 + $0x1bc] sm:$0x1]  ;;  %v11977_v59 = vld [vmem:[%s13560_s30 + $0x174] sm:$0x1] }
 0x396   : > { %v5806_v47 = vrot.slane %v5805_v10, 4  ;;  %v6543_v44 = vrot.slane %v6541_v28, 5  ;;  %v18703_v56 = vpop.permute.xlu1 %9184  ;;  %v6554_v45 = vrot.slane %v6552_v32, 4  ;;  %v6557_v26 = vrot.slane %v6555_v15, 5  ;;  %v11937_v28 = vld [vmem:[%s13560_s30 + $0x120] sm:$0xf] }
 0x397   : > { %v5820_v36 = vrot.slane %v5819_v3, 4  ;;  %v12295_v53 = vrot.slane %v12263_v58, 9  ;;  %v6084_v14 = vrot.slane %v18664_v43, 5  ;;  %v12296_v50 = vrot.slane %v12264_v61, 9  ;;  %v12009_v43 = vld [vmem:[%s13560_s30 + $0x170] sm:$0xe] }
 0x398   : > { %8263 = vrot.lane.b32.xlu0 %v12674_v16, %s20511_s29  ;;  %v5811_v52 = vsel %vm13584_vm2, %v5806_v47, %v5810_v55  ;;  %v6088_v1 = vrot.slane %v12232_v13, 5  ;;  %v12826_v11 = vcombine.low %v18679_v38, %v18682_v54  ;;  %v10146_v31 = vsel %vm10141_vm0, %v8767_v34, %v18553_v51  ;;  %v12010_v13 = vld [vmem:[%s13560_s30 + $0x178] sm:$0xe]  ;;  %v11978_v38 = vld [vmem:[%s13560_s30 + $0x17c] sm:$0x1]  ;;  %v18734_v51 = vpop.permute.xlu0 %8257 }
 0x399   : > { %10119 = vrot.lane.b32.xlu1 %v18427_v62, %s20514_s27  ;;  %v5825_v12 = vsel %vm13584_vm2, %v5820_v36, %v5824_v48  ;;  %v6544_v0 = vor.u32 %v6543_v44, %v6540_v9  ;;  %v6085_v41 = vsel %vm13804_vm5, %v12295_v53, %v6084_v14  ;;  %10447 = vmatmul.mubr.bf16.gmra.mrb[4].mxu0 %v10146_v31  ;;  %v6547_v16 = vshll.u32 %v18706_v37, 16  ;;  %v11938_v47 = vld [vmem:[%s13560_s30 + $0x128] sm:$0xf]  ;;  %v13340_v53 = vld [vmem:[%s13560_s30 + $0x124] sm:$0x1] }
 0x39a   : > { %v12794_v39 = vcombine.low %v5811_v52, %v5825_v12  ;;  %v6089_v62 = vsel %vm13804_vm5, %v12296_v50, %v6088_v1  ;;  %10640 = vmatmul.mubr.bf16.gmra.mrb[4].mxu1 %v10146_v31  ;;  %v18732_v54 = vpop.permute.xlu1 %9296  ;;  %v6558_v10 = vor.u32 %v6557_v26, %v6554_v45  ;;  %v6561_v19 = vshll.u32 %v18713_v24, 16  ;;  %10456 = vmatprep.mubr.bf16.mxu0 %v13476_v25 }
 0x39b   : > { %v12810_v20 = vcombine.low %v6085_v41, %v6089_v62  ;;  %v6545_v33 = vrot.slane %v6544_v0, 4  ;;  %10649 = vmatprep.mubr.bf16.mxu1 %v13476_v25  ;;  %v6549_v32 = vrot.slane %v6547_v16, 5  ;;  %v12041_v58 = vrot.slane %v12009_v43, 9  ;;  %v12074_v41 = vld [vmem:[%s13560_s30 + $0x1b8] sm:$0xf] }
 0x39c   : > { %9382 = vrot.lane.b32.xlu0 %v12794_v39, %s20513_s8  ;;  %v4613_v55 = vrot.slane %v11977_v59, 5  ;;  %v12042_v3 = vrot.slane %v12010_v13, 9  ;;  %v9871_v48 = vsel %vm8400_vm9, %v18672_v6, %v18507_v49  ;;  %v6559_v15 = vrot.slane %v6558_v10, 4  ;;  %v13341_v13 = vld [vmem:[%s13560_s30 + $0x12c] sm:$0x1] }
 0x39d   : > { %9574 = vrot.lane.b32.xlu1 %v12826_v11, %s13467_s11  ;;  %v6563_v61 = vrot.slane %v6561_v19, 5  ;;  %v4617_v34 = vrot.slane %v11978_v38, 5  ;;  %v9903_v9 = vsel %vm20204_vm10, %v9871_v48, %v18533_v27  ;;  %v6550_v44 = vsel %vm13584_vm2, %v6545_v33, %v6549_v32  ;;  %v12073_v11 = vld [vmem:[%s13560_s30 + $0x1b0] sm:$0xf] }
 0x39e   : > { %v4614_v36 = vsel %vm13804_vm5, %v12041_v58, %v4613_v55  ;;  %v4236_v45 = vshrl.u32 %v11937_v28, 16  ;;  %v4239_v26 = vshll.u32 %v11937_v28, 16  ;;  %v4245_v52 = vshll.u32 %v13340_v53, 16  ;;  %v18757_v14 = vpop.permute.xlu1 %10113  ;;  %v18783_v55 = vld [vmem:[%s13560_s30 + $0xcc] sm:$0x1] }
 0x39f   : > { %v6564_v49 = vsel %vm13584_vm2, %v6559_v15, %v6563_v61  ;;  %v4618_v6 = vsel %vm13804_vm5, %v12042_v3, %v4617_v34  ;;  %v4250_v12 = vshrl.u32 %v11938_v47, 16  ;;  %v9935_v0 = vsel %vm8466_vm11, %v9903_v9, %v18555_v5  ;;  %v18788_v34 = vld [vmem:[%s13560_s30 + $0xd4] sm:$0x1] }
 0x3a0   : > { %9462 = vrot.lane.b32.xlu0 %v12810_v20, %s13466_s10  ;;  %v12842_v27 = vcombine.low %v6550_v44, %v6564_v49  ;;  %v12715_v50 = vcombine.low %v4614_v36, %v4618_v6  ;;  %v4238_v1 = vrot.slane %v4236_v45, 4  ;;  %v18761_v31 = vpop.permute.xlu0 %9376  ;;  %v4241_v59 = vrot.slane %v4239_v26, 5  ;;  %v11801_v20 = vld [vmem:[%s13560_s30 + $0xc8] sm:$0xf]  ;;  %v12391_v49 = vld [vmem:[%s13560_s30 + $0x1b0] sm:$0xe] }
 0x3a1   : > { %v4253_v43 = vshll.u32 %v11938_v47, 16  ;;  %v4259_v39 = vshll.u32 %v13341_v13, 16  ;;  %vm20529_vm10 = vcmask 269312   ;;  %v10061_v16 = vsel %vm8598_vm15, %v18634_v17, %v18454_v7 }
 0x3a2   : > { %v18769_v62 = vsel %vm20529_vm10, %v18622_v29, 0  ;;  %v18776_v38 = vsel %vm20205_vm12, %v9935_v0, %v18575_v60  ;;  %9654 = vrot.lane.b32.xlu1 %v12842_v27, %s13468_s18  ;;  %v4252_v5 = vrot.slane %v4250_v12, 4  ;;  %v4242_v33 = vor.u32 %v4241_v59, %v4238_v1  ;;  %v11802_v29 = vld [vmem:[%s13560_s30 + $0xd0] sm:$0xf]  ;;  %v18790_v47 = vpop.permute.xlu1 %9568 }
 0x3a3   : > { %v4255_v10 = vrot.slane %v4253_v43, 5  ;;  %v5088_v19 = vshrl.u32 %v12073_v11, 16  ;;  %v5091_v28 = vshll.u32 %v12073_v11, 16  ;;  %v4247_v32 = vrot.slane %v4245_v52, 5 }
 0x3a4   : > { %8920 = vrot.lane.b32.xlu0 %v12715_v50, %s13460_s4  ;;  %v4261_v58 = vrot.slane %v4259_v39, 5  ;;  %v5102_v7 = vshrl.u32 %v12074_v41, 16  ;;  %v12731_v17 = vcombine.low %v12073_v11, %v12074_v41  ;;  %v18785_v60 = vpop.permute.xlu0 %9456  ;;  %v4243_v3 = vrot.slane %v4242_v33, 4  ;;  %v12392_v11 = vld [vmem:[%s13560_s30 + $0x1b8] sm:$0xe] }
 0x3a5   : > { %v4256_v48 = vor.u32 %v4255_v10, %v4252_v5  ;;  %v5105_v15 = vshll.u32 %v12074_v41, 16  ;;  %v3385_v61 = vshrl.u32 %v11801_v20, 16  ;;  %v3388_v9 = vshll.u32 %v11801_v20, 16  ;;  %v11865_v10 = vld [vmem:[%s13560_s30 + $0xc8] sm:$0xe] }
 0x3a6   : > { %9032 = vrot.lane.b32.xlu1 %v12731_v17, %s13461_s5  ;;  %v3399_v44 = vshrl.u32 %v11802_v29, 16  ;;  %v3402_v36 = vshll.u32 %v11802_v29, 16  ;;  %v12627_v45 = vcombine.low %v11801_v20, %v11802_v29  ;;  %v5090_v26 = vrot.slane %v5088_v19, 4 }
 0x3a7   : > { %v4257_v6 = vrot.slane %v4256_v48, 4  ;;  %v5093_v53 = vrot.slane %v5091_v28, 5  ;;  %v3387_v52 = vrot.slane %v3385_v61, 4  ;;  %v5104_v27 = vrot.slane %v5102_v7, 4  ;;  %v11866_v61 = vld [vmem:[%s13560_s30 + $0xd0] sm:$0xe] }
 0x3a8   : > { %v3390_v50 = vrot.slane %v3388_v9, 5  ;;  %v3401_v1 = vrot.slane %v3399_v44, 4  ;;  %v3404_v12 = vrot.slane %v3402_v36, 5  ;;  %7993 = vrot.lane.b32.xlu0 %v12627_v45, %s20530_s28  ;;  %v4248_v0 = vsel %vm13584_vm2, %v4243_v3, %v4247_v32  ;;  %v18800_v39 = vpop.permute.xlu0 %8914  ;;  %v12105_v45 = vld [vmem:[%s13560_s30 + $0x1b4] sm:$0x1] }
 0x3a9   : > { %v3394_v59 = vshll.u32 %v18783_v55, 16  ;;  %v3408_v43 = vshll.u32 %v18788_v34, 16  ;;  %v12423_v13 = vrot.slane %v12391_v49, 9  ;;  %v4262_v41 = vsel %vm13584_vm2, %v4257_v6, %v4261_v58  ;;  %v12106_v49 = vld [vmem:[%s13560_s30 + $0x1bc] sm:$0x1] }
 0x3aa   : > { %v3391_v5 = vor.u32 %v3390_v50, %v3387_v52  ;;  %v3405_v20 = vor.u32 %v3404_v12, %v3401_v1  ;;  %v6823_v33 = vrot.slane %v18706_v37, 5  ;;  %v12424_v29 = vrot.slane %v12392_v11, 9 }
 0x3ab   : > { %v3396_v19 = vrot.slane %v3394_v59, 5  ;;  %v3410_v28 = vrot.slane %v3408_v43, 5  ;;  %v6827_v32 = vrot.slane %v18713_v24, 5  ;;  %v18807_v7 = vpop.permute.xlu1 %9648  ;;  %v5107_v17 = vrot.slane %v5105_v15, 5 }
 0x3ac   : > { %v3392_v3 = vrot.slane %v3391_v5, 4  ;;  %v3406_v48 = vrot.slane %v3405_v20, 4  ;;  %v6824_v58 = vsel %vm13804_vm5, %v12423_v13, %v6823_v33  ;;  %v18813_v9 = vsel %vm20529_vm10, %v10061_v16, 0  ;;  %v12137_v13 = vld [vmem:[%s13560_s30 + $0x1b0] sm:$0xe] }
 0x3ad   : > { %v12695_v37 = vcombine.low %v4248_v0, %v4262_v41  ;;  %v6828_v44 = vsel %vm13804_vm5, %v12424_v29, %v6827_v32  ;;  %v11897_v36 = vrot.slane %v11865_v10, 9  ;;  %v9999_v24 = vsel %vm8532_vm13, %v18776_v38, %v18581_v22  ;;  %v18830_v0 = vpop.permute.xlu0 %9026  ;;  %v18852_v29 = vld [vmem:[%s13560_s30 + $0x1bc] sm:$0x1] }
 0x3ae   : > { %v3397_v15 = vsel %vm13584_vm2, %v3392_v3, %v3396_v19  ;;  %v3411_v6 = vsel %vm13584_vm2, %v3406_v48, %v3410_v28  ;;  %v12858_v16 = vcombine.low %v6824_v58, %v6828_v44  ;;  %v3810_v50 = vrot.slane %v18783_v55, 5  ;;  %v18860_v58 = vld [vmem:[%s13560_s30 + $0x1c0] sm:$0xf]  ;;  %v13343_v44 = vld [vmem:[%s13560_s30 + $0xd8] sm:$0xf] }
 0x3af   : > { %v12643_v52 = vcombine.low %v3397_v15, %v3411_v6  ;;  %v11898_v1 = vrot.slane %v11866_v61, 9  ;;  %v3814_v12 = vrot.slane %v18788_v34, 5  ;;  %v18828_v11 = vpop.permute.xlu1 %9728  ;;  %v5094_v22 = vor.u32 %v5093_v53, %v5090_v26  ;;  %v12138_v53 = vld [vmem:[%s13560_s30 + $0x1b8] sm:$0xe] }
 0x3b0   : > { %9734 = vrot.lane.b32.xlu0 %v12858_v16, %s13469_s19  ;;  %v5097_v38 = vshll.u32 %v12105_v45, 16  ;;  %v5108_v59 = vor.u32 %v5107_v17, %v5104_v27  ;;  %v5111_v43 = vshll.u32 %v12106_v49, 16  ;;  %v18836_v55 = vsel %vm8565_vm14, %v9999_v24, %v18612_v2  ;;  %v18847_v2 = vld [vmem:[%s13560_s30 + $0x1b8] sm:$0xf] }
 0x3b1   : > { %v9772_v34 = vsel %vm8285_vm6, %v12695_v37, %v18596_v4  ;;  %8073 = vrot.lane.b32.xlu1 %v12643_v52, %s13472_s21  ;;  %v3811_v41 = vsel %vm13804_vm5, %v11897_v36, %v3810_v50  ;;  %v3815_v26 = vsel %vm13804_vm5, %v11898_v1, %v3814_v12  ;;  %v5095_v5 = vrot.slane %v5094_v22, 4  ;;  %v13342_v37 = vld [vmem:[%s13560_s30 + $0xd0] sm:$0xf]  ;;  %v12265_v52 = vld [vmem:[%s13560_s30 + $0x1b8] sm:$0xe] }
 0x3b2   : > { %v12659_v27 = vcombine.low %v3811_v41, %v3815_v26  ;;  %v5099_v20 = vrot.slane %v5097_v38, 5  ;;  %v5109_v33 = vrot.slane %v5108_v59, 4  ;;  %v9809_v4 = vsel %vm8334_vm7, %v9772_v34, %v18630_v18  ;;  %v12266_v38 = vld [vmem:[%s13560_s30 + $0x1c0] sm:$0xe]  ;;  %v11979_v41 = vld [vmem:[%s13560_s30 + $0x184] sm:$0x1] }
 0x3b3   : > { %v5113_v10 = vrot.slane %v5111_v43, 5  ;;  %v12169_v19 = vrot.slane %v12137_v13, 9  ;;  %v5353_v28 = vrot.slane %v12105_v45, 5  ;;  %v8703_v32 = vsel %vm8697_vm3, %v17375_v23, %v18666_v63  ;;  %v18862_v61 = vpop.permute.xlu1 %9106  ;;  %v12234_v63 = vld [vmem:[%s13560_s30 + $0x1c4] sm:$0x1] }
 0x3b4   : > { %v5100_v17 = vsel %vm13584_vm2, %v5095_v5, %v5099_v20  ;;  %v12170_v3 = vrot.slane %v12138_v53, 9  ;;  %v5357_v48 = vrot.slane %v12106_v49, 5  ;;  %v12675_v36 = vcombine.low %v13342_v37, %v13343_v44  ;;  %v11980_v26 = vld [vmem:[%s13560_s30 + $0x18c] sm:$0x1]  ;;  %v12011_v20 = vld [vmem:[%s13560_s30 + $0x180] sm:$0xe] }
 0x3b5   : > { %8153 = vrot.lane.b32.xlu1 %v12659_v27, %s13473_s26  ;;  %v5114_v18 = vsel %vm13584_vm2, %v5109_v33, %v5113_v10  ;;  %v5354_v23 = vsel %vm13804_vm5, %v12169_v19, %v5353_v28  ;;  %v5827_v45 = vshrl.u32 %v18847_v2, 16  ;;  %v18873_v49 = vpop.permute.xlu0 %8067  ;;  %v5830_v6 = vshll.u32 %v18847_v2, 16  ;;  %v12012_v19 = vld [vmem:[%s13560_s30 + $0x188] sm:$0xe] }
 0x3b6   : > { %v12747_v24 = vcombine.low %v5100_v17, %v5114_v18  ;;  %v5358_v15 = vsel %vm13804_vm5, %v12170_v3, %v5357_v48  ;;  %v5836_v16 = vshll.u32 %v18852_v29, 16  ;;  %v9841_v50 = vsel %vm8367_vm8, %v9809_v4, %v18686_v35 }
 0x3b7   : > { %v5829_v1 = vrot.slane %v5827_v45, 4  ;;  %v5841_v12 = vshrl.u32 %v18860_v58, 16  ;;  %v5844_v22 = vshll.u32 %v18860_v58, 16  ;;  %v8736_v59 = vsel %vm8730_vm4, %v8703_v32, %v18696_v46 }
 0x3b8   : > { %9112 = vrot.lane.b32.xlu0 %v12747_v24, %s13462_s6  ;;  %v12763_v43 = vcombine.low %v5354_v23, %v5358_v15  ;;  %v5832_v13 = vrot.slane %v5830_v6, 5  ;;  %v5850_v34 = vshll.u32 %v12234_v63, 16  ;;  %v8769_v35 = vsel %vm8763_vm1, %v8736_v59, %v18734_v51  ;;  %v18901_v51 = vld [vmem:[%s13560_s30 + $0x1c0] sm:$0xf]  ;;  %v18911_v23 = vld [vmem:[%s13560_s30 + $0x1c8] sm:$0xf] }
 0x3b9   : > { %8265 = vrot.lane.b32.xlu1 %v12675_v36, %s20511_s29  ;;  %v5838_v53 = vrot.slane %v5836_v16, 5  ;;  %v5843_v27 = vrot.slane %v5841_v12, 4  ;;  %v5846_v5 = vrot.slane %v5844_v22, 5  ;;  %v12297_v4 = vrot.slane %v12265_v52, 9  ;;  %v18931_v12 = vld [vmem:[%s13560_s30 + $0x130] sm:$0xf] }
 0x3ba   : > { %v5833_v33 = vor.u32 %v5832_v13, %v5829_v1  ;;  %v6092_v46 = vrot.slane %v18852_v29, 5  ;;  %v12298_v10 = vrot.slane %v12266_v38, 9  ;;  %v18896_v28 = vpop.permute.xlu1 %9186  ;;  %v5852_v17 = vrot.slane %v5850_v34, 5  ;;  %v18943_v13 = vld [vmem:[%s13560_s30 + $0x138] sm:$0xf] }
 0x3bb   : > { %v5847_v32 = vor.u32 %v5846_v5, %v5843_v27  ;;  %v6096_v3 = vrot.slane %v12234_v63, 5  ;;  %v10149_v48 = vsel %vm10141_vm0, %v8769_v35, %v18757_v14  ;;  %v18903_v18 = vpop.permute.xlu0 %8147  ;;  %v9873_v37 = vsel %vm8400_vm9, %v9841_v50, %v18703_v56  ;;  %v18953_v27 = vld [vmem:[%s13560_s30 + $0xd8] sm:$0xf] }
 0x3bc   : > { %9192 = vrot.lane.b32.xlu0 %v12763_v43, %s13463_s7  ;;  %v5834_v29 = vrot.slane %v5833_v33, 4  ;;  %v12779_v44 = vcombine.low %v18847_v2, %v18860_v58  ;;  %10457 = vmatmul.mubr.bf16.gmra.mrb[8].mxu0 %v10149_v48  ;;  %v12043_v36 = vrot.slane %v12011_v20, 9  ;;  %v4621_v14 = vrot.slane %v11979_v41, 5  ;;  %v13344_v20 = vld [vmem:[%s13560_s30 + $0x134] sm:$0x1] }
 0x3bd   : > { %v5848_v63 = vrot.slane %v5847_v32, 4  ;;  %10650 = vmatmul.mubr.bf16.gmra.mrb[8].mxu1 %v10149_v48  ;;  %v12044_v45 = vrot.slane %v12012_v19, 9  ;;  %v4625_v24 = vrot.slane %v11980_v26, 5  ;;  %10466 = vmatprep.mubr.bf16.mxu0 %v13476_v25  ;;  %v6093_v15 = vsel %vm13804_vm5, %v12297_v4, %v6092_v46 }
 0x3be   : > { %v5839_v56 = vsel %vm13584_vm2, %v5834_v29, %v5838_v53  ;;  %v6097_v2 = vsel %vm13804_vm5, %v12298_v10, %v6096_v3  ;;  %v6566_v58 = vshrl.u32 %v18901_v51, 16  ;;  %v18921_v6 = vpop.permute.xlu1 %9298  ;;  %10659 = vmatprep.mubr.bf16.mxu1 %v13476_v25  ;;  %vm20531_vm10 = vcmask 121856   ;;  %v13345_v3 = vld [vmem:[%s13560_s30 + $0x13c] sm:$0x1] }
 0x3bf   : > { %v9905_v16 = vsel %vm20531_vm10, %v9873_v37, %v18732_v54  ;;  %v5853_v52 = vsel %vm13584_vm2, %v5848_v63, %v5852_v17  ;;  %v6569_v50 = vshll.u32 %v18901_v51, 16  ;;  %v6580_v1 = vshrl.u32 %v18911_v23, 16  ;;  %v18933_v22 = vpop.permute.xlu0 %8259  ;;  %v11804_v37 = vld [vmem:[%s13560_s30 + $0xe0] sm:$0xf] }
 0x3c0   : > { %v10063_v38 = vsel %vm8598_vm15, %v18836_v55, %v18644_v30  ;;  %v12795_v59 = vcombine.low %v5839_v56, %v5853_v52  ;;  %9304 = vrot.lane.b32.xlu0 %v12779_v44, %s20512_s23  ;;  %v9937_v54 = vsel %vm8466_vm11, %v9905_v16, %v18761_v31  ;;  %v6583_v43 = vshll.u32 %v18911_v23, 16  ;;  %v12362_v56 = vld [vmem:[%s13560_s30 + $0x1cc] sm:$0x1] }
 0x3c1   : > { %v12811_v34 = vcombine.low %v6093_v15, %v6097_v2  ;;  %v4622_v41 = vsel %vm13804_vm5, %v12043_v36, %v4621_v14  ;;  %v4626_v26 = vsel %vm13804_vm5, %v12044_v45, %v4625_v24  ;;  %v6568_v35 = vrot.slane %v6566_v58, 4 }
 0x3c2   : > { %9384 = vrot.lane.b32.xlu1 %v12795_v59, %s20513_s8  ;;  %v6571_v30 = vrot.slane %v6569_v50, 5  ;;  %v6582_v55 = vrot.slane %v6580_v1, 4  ;;  %v4264_v31 = vshrl.u32 %v18931_v12, 16  ;;  %v4267_v53 = vshll.u32 %v18931_v12, 16  ;;  %v18960_v10 = vpop.permute.xlu1 %10115  ;;  %v12393_v59 = vld [vmem:[%s13560_s30 + $0x1c0] sm:$0xe] }
 0x3c3   : > { %v12827_v5 = vcombine.low %v18901_v51, %v18911_v23  ;;  %v4273_v33 = vshll.u32 %v13344_v20, 16  ;;  %v4278_v4 = vshrl.u32 %v18943_v13, 16  ;;  %v4281_v46 = vshll.u32 %v18943_v13, 16  ;;  %v12361_v23 = vld [vmem:[%s13560_s30 + $0x1c4] sm:$0x1] }
 0x3c4   : > { %10121 = vrot.lane.b32.xlu0 %v18435_v40, %s20514_s27  ;;  %v6585_v19 = vrot.slane %v6583_v43, 5  ;;  %v4266_v32 = vrot.slane %v4264_v31, 4  ;;  %v4269_v17 = vrot.slane %v4267_v53, 5  ;;  %v4287_v48 = vshll.u32 %v13345_v3, 16 }
 0x3c5   : > { %v4280_v51 = vrot.slane %v4278_v4, 4  ;;  %v4283_v29 = vrot.slane %v4281_v46, 5  ;;  %v3413_v44 = vshrl.u32 %v18953_v27, 16  ;;  %v3416_v36 = vshll.u32 %v18953_v27, 16  ;;  %v18969_v63 = vpop.permute.xlu0 %9378  ;;  %v12076_v46 = vld [vmem:[%s13560_s30 + $0x1c8] sm:$0xf] }
 0x3c6   : > { %vm20532_vm10 = vcmask 269312   ;;  %9464 = vrot.lane.b32.xlu1 %v12811_v34, %s13466_s10  ;;  %v9969_v40 = vsel %vm20205_vm12, %v9937_v54, %v18785_v60  ;;  %v12716_v45 = vcombine.low %v4622_v41, %v4626_v26  ;;  %v4270_v24 = vor.u32 %v4269_v17, %v4266_v32  ;;  %v12394_v41 = vld [vmem:[%s13560_s30 + $0x1c8] sm:$0xe]  ;;  %v18983_v26 = vpop.permute.xlu1 %9570 }
 0x3c7   : > { %v18972_v14 = vsel %vm20532_vm10, %v10063_v38, 0  ;;  %v4275_v15 = vrot.slane %v4273_v33, 5  ;;  %v4284_v2 = vor.u32 %v4283_v29, %v4280_v51  ;;  %v3427_v58 = vshrl.u32 %v11804_v37, 16 }
 0x3c8   : > { %v6572_v16 = vor.u32 %v6571_v30, %v6568_v35  ;;  %9576 = vrot.lane.b32.xlu0 %v12827_v5, %s13467_s11  ;;  %v4271_v52 = vrot.slane %v4270_v24, 4  ;;  %v4289_v50 = vrot.slane %v4287_v48, 5  ;;  %v6575_v1 = vshll.u32 %v12361_v23, 16  ;;  %v12075_v5 = vld [vmem:[%s13560_s30 + $0x1c0] sm:$0xf] }
 0x3c9   : > { %v6586_v38 = vor.u32 %v6585_v19, %v6582_v55  ;;  %v18980_v43 = vrot.slane %v3413_v44, 4  ;;  %v3418_v60 = vrot.slane %v3416_v36, 5  ;;  %v6589_v34 = vshll.u32 %v12362_v56, 16  ;;  %v18989_v19 = vpop.permute.xlu0 %9458 }
 0x3ca   : > { %v6573_v54 = vrot.slane %v6572_v16, 4  ;;  %8922 = vrot.lane.b32.xlu1 %v12716_v45, %s13460_s4  ;;  %v4285_v35 = vrot.slane %v4284_v2, 4  ;;  %v12628_v30 = vcombine.low %v18953_v27, %v11804_v37  ;;  %v6577_v31 = vrot.slane %v6575_v1, 5 }
 0x3cb   : > { %v6587_v53 = vrot.slane %v6586_v38, 4  ;;  %v3429_v20 = vrot.slane %v3427_v58, 4  ;;  %v3430_v55 = vshll.u32 %v11804_v37, 16  ;;  %v6591_v33 = vrot.slane %v6589_v34, 5  ;;  %v19011_v34 = vld [vmem:[%s13560_s30 + $0xe4] sm:$0x1] }
 0x3cc   : > { %v12425_v4 = vrot.slane %v12393_v59, 9  ;;  %v4276_v32 = vsel %vm13584_vm2, %v4271_v52, %v4275_v15  ;;  %v6578_v17 = vsel %vm13584_vm2, %v6573_v54, %v6577_v31  ;;  %v6831_v3 = vrot.slane %v12361_v23, 5  ;;  %v12107_v23 = vld [vmem:[%s13560_s30 + $0x1c4] sm:$0x1]  ;;  %v12108_v15 = vld [vmem:[%s13560_s30 + $0x1cc] sm:$0x1] }
 0x3cd   : > { %v12426_v27 = vrot.slane %v12394_v41, 9  ;;  %v6592_v48 = vsel %vm13584_vm2, %v6587_v53, %v6591_v33  ;;  %v6835_v37 = vrot.slane %v12362_v56, 5  ;;  %v5116_v51 = vshrl.u32 %v12075_v5, 16  ;;  %v11835_v52 = vld [vmem:[%s13560_s30 + $0xdc] sm:$0x1]  ;;  %v19007_v1 = vpop.permute.xlu1 %9650  ;;  %v19017_v53 = vpop.permute.xlu0 %8916 }
 0x3ce   : > { %v5119_v29 = vshll.u32 %v12075_v5, 16  ;;  %v4290_v44 = vsel %vm13584_vm2, %v4285_v35, %v4289_v50  ;;  %7995 = vrot.lane.b32.xlu1 %v12628_v30, %s20530_s28  ;;  %v12843_v36 = vcombine.low %v6578_v17, %v6592_v48  ;;  %v6832_v45 = vsel %vm13804_vm5, %v12425_v4, %v6831_v3 }
 0x3cf   : > { %v5130_v24 = vshrl.u32 %v12076_v46, 16  ;;  %v3432_v2 = vrot.slane %v3430_v55, 5  ;;  %v6836_v58 = vsel %vm13804_vm5, %v12426_v27, %v6835_v37  ;;  %v5118_v56 = vrot.slane %v5116_v51, 4  ;;  %v12140_v51 = vld [vmem:[%s13560_s30 + $0x1c8] sm:$0xe] }
 0x3d0   : > { %v5121_v16 = vrot.slane %v5119_v29, 5  ;;  %9656 = vrot.lane.b32.xlu0 %v12843_v36, %s13468_s18  ;;  %v12859_v50 = vcombine.low %v6832_v45, %v6836_v58  ;;  %v5133_v59 = vshll.u32 %v12076_v46, 16  ;;  %v12732_v54 = vcombine.low %v12075_v5, %v12076_v46 }
 0x3d1   : > { %v5132_v38 = vrot.slane %v5130_v24, 4  ;;  %v19015_v41 = vsel %vm8532_vm13, %v9969_v40, %v18790_v47  ;;  %v12696_v35 = vcombine.low %v4276_v32, %v4290_v44  ;;  %v5125_v31 = vshll.u32 %v12107_v23, 16  ;;  %v12139_v40 = vld [vmem:[%s13560_s30 + $0x1c0] sm:$0xe]  ;;  %v11867_v44 = vld [vmem:[%s13560_s30 + $0xd8] sm:$0xe] }
 0x3d2   : > { %v5122_v30 = vor.u32 %v5121_v16, %v5118_v56  ;;  %9736 = vrot.lane.b32.xlu1 %v12859_v50, %s13469_s19  ;;  %v5135_v55 = vrot.slane %v5133_v59, 5  ;;  %v5139_v33 = vshll.u32 %v12108_v15, 16  ;;  %v3419_v4 = vor.u32 %v3418_v60, %v18980_v43  ;;  %v19031_v36 = vpop.permute.xlu1 %9730 }
 0x3d3   : > { %v3422_v5 = vshll.u32 %v11835_v52, 16  ;;  %v5127_v17 = vrot.slane %v5125_v31, 5  ;;  %v3433_v3 = vor.u32 %v3432_v2, %v3429_v20  ;;  %v3436_v47 = vshll.u32 %v19011_v34, 16  ;;  %v19040_v50 = vpop.permute.xlu0 %9028  ;;  %v12204_v31 = vld [vmem:[%s13560_s30 + $0x1d0] sm:$0xf] }
 0x3d4   : > { %v5123_v46 = vrot.slane %v5122_v30, 4  ;;  %9034 = vrot.lane.b32.xlu0 %v12732_v54, %s13461_s5  ;;  %v5136_v32 = vor.u32 %v5135_v55, %v5132_v38  ;;  %v5141_v27 = vrot.slane %v5139_v33, 5  ;;  %v3420_v48 = vrot.slane %v3419_v4, 4  ;;  %v19045_v30 = vld [vmem:[%s13560_s30 + $0x1c8] sm:$0xf] }
 0x3d5   : > { %v3424_v37 = vrot.slane %v3422_v5, 5  ;;  %v9775_v29 = vsel %vm8285_vm6, %v12696_v35, %v18800_v39  ;;  %v8705_v43 = vsel %vm8697_vm3, %v17317_v57, %v18873_v49  ;;  %v3434_v60 = vrot.slane %v3433_v3, 4  ;;  %v11868_v39 = vld [vmem:[%s13560_s30 + $0xe0] sm:$0xe] }
 0x3d6   : > { %v3438_v20 = vrot.slane %v3436_v47, 5  ;;  %v5128_v45 = vsel %vm13584_vm2, %v5123_v46, %v5127_v17  ;;  %v5137_v24 = vrot.slane %v5136_v32, 4  ;;  %v12171_v58 = vrot.slane %v12139_v40, 9  ;;  %v19061_v17 = vld [vmem:[%s13560_s30 + $0x1cc] sm:$0x1] }
 0x3d7   : > { %v3425_v2 = vsel %vm13584_vm2, %v3420_v48, %v3424_v37  ;;  %v5361_v57 = vrot.slane %v12107_v23, 5  ;;  %v12172_v49 = vrot.slane %v12140_v51, 9  ;;  %v5365_v16 = vrot.slane %v12108_v15, 5  ;;  %v19067_v32 = vld [vmem:[%s13560_s30 + $0x1d4] sm:$0x1] }
 0x3d8   : > { %v3439_v56 = vsel %vm13584_vm2, %v3434_v60, %v3438_v20  ;;  %v5142_v38 = vsel %vm13584_vm2, %v5137_v24, %v5141_v27  ;;  %v11899_v54 = vrot.slane %v11867_v44, 9  ;;  %v3818_v35 = vrot.slane %v11835_v52, 5  ;;  %v19078_v51 = vld [vmem:[%s13560_s30 + $0x1d0] sm:$0xf] }
 0x3d9   : > { %v12644_v59 = vcombine.low %v3425_v2, %v3439_v56  ;;  %v12748_v55 = vcombine.low %v5128_v45, %v5142_v38  ;;  %v5362_v33 = vsel %vm13804_vm5, %v12171_v58, %v5361_v57  ;;  %v5366_v23 = vsel %vm13804_vm5, %v12172_v49, %v5365_v16  ;;  %v19086_v58 = vld [vmem:[%s13560_s30 + $0x1d8] sm:$0xf]  ;;  %v12267_v38 = vld [vmem:[%s13560_s30 + $0x1c8] sm:$0xe] }
 0x3da   : > { %v11900_v15 = vrot.slane %v11868_v39, 9  ;;  %v9811_v4 = vsel %vm8334_vm7, %v9775_v29, %v18830_v0  ;;  %v8738_v52 = vsel %vm8730_vm4, %v8705_v43, %v18903_v18  ;;  %v3819_v5 = vsel %vm13804_vm5, %v11899_v54, %v3818_v35  ;;  %v13347_v39 = vld [vmem:[%s13560_s30 + $0xe8] sm:$0xf] }
 0x3db   : > { %8075 = vrot.lane.b32.xlu0 %v12644_v59, %s13472_s21  ;;  %v3822_v46 = vrot.slane %v19011_v34, 5  ;;  %9114 = vrot.lane.b32.xlu1 %v12748_v55, %s13462_s6  ;;  %v12764_v3 = vcombine.low %v5362_v33, %v5366_v23  ;;  %v5855_v47 = vshrl.u32 %v19045_v30, 16  ;;  %v5858_v0 = vshll.u32 %v19045_v30, 16  ;;  %v19069_v27 = vpop.permute.xlu1 %9108  ;;  %s175_s6 = sand.u32 1, %s13442_s13  }
 0x3dc   : > { %v5869_v40 = vshrl.u32 %v12204_v31, 16  ;;  %v9843_v18 = vsel %vm8367_vm8, %v9811_v4, %v18862_v61  ;;  %v8771_v48 = vsel %vm8763_vm1, %v8738_v52, %v18933_v22  ;;  %v5872_v37 = vshll.u32 %v12204_v31, 16  ;;  %v13346_v22 = vld [vmem:[%s13560_s30 + $0xe0] sm:$0xf] }
 0x3dd   : > { %v3823_v34 = vsel %vm13804_vm5, %v11900_v15, %v3822_v46  ;;  %v5857_v43 = vrot.slane %v5855_v47, 4  ;;  %v5860_v60 = vrot.slane %v5858_v0, 5  ;;  %v19080_v44 = vpop.permute.xlu0 %8069  ;;  %v12780_v61 = vcombine.low %v19045_v30, %v12204_v31  ;;  %v12268_v15 = vld [vmem:[%s13560_s30 + $0x1d0] sm:$0xe] }
 0x3de   : > { %v12660_v29 = vcombine.low %v3819_v5, %v3823_v34  ;;  %v5871_v20 = vrot.slane %v5869_v40, 4  ;;  %v5874_v45 = vrot.slane %v5872_v37, 5  ;;  %v5864_v24 = vshll.u32 %v19061_v17, 16 }
 0x3df   : > { %v5878_v2 = vshll.u32 %v19067_v32, 16  ;;  %9194 = vrot.lane.b32.xlu1 %v12764_v3, %s13463_s7  ;;  %v12676_v56 = vcombine.low %v13346_v22, %v13347_v39  ;;  %v5861_v57 = vor.u32 %v5860_v60, %v5857_v43  ;;  %v10152_v49 = vsel %vm10141_vm0, %v8771_v48, %v18960_v10  ;;  %v19096_v59 = vpop.permute.xlu1 %9188  ;;  %v19115_v3 = vld [vmem:[%s13560_s30 + $0x150] sm:$0xf]  ;;  %v11806_v39 = vld [vmem:[%s13560_s30 + $0x100] sm:$0xf]  ;;  %s19631_s7 = sshll.u32 %s175_s6, 9 }
 0x3e0   : > { %8155 = vrot.lane.b32.xlu0 %v12660_v29, %s13473_s26  ;;  %v6594_v16 = vshrl.u32 %v19078_v51, 16  ;;  %v5866_v54 = vrot.slane %v5864_v24, 5  ;;  %v5875_v35 = vor.u32 %v5874_v45, %v5871_v20  ;;  %10467 = vmatmul.mubr.bf16.gmra.mrb[12].mxu0 %v10152_v49  ;;  %v6597_v31 = vshll.u32 %v19078_v51, 16  ;;  %v11805_v45 = vld [vmem:[%s13560_s30 + $0xf8] sm:$0xf] }
 0x3e1   : > { %v5880_v30 = vrot.slane %v5878_v2, 5  ;;  %10660 = vmatmul.mubr.bf16.gmra.mrb[12].mxu1 %v10152_v49  ;;  %v9875_v55 = vsel %vm8400_vm9, %v9843_v18, %v18896_v28  ;;  %v5862_v33 = vrot.slane %v5861_v57, 4  ;;  %v6608_v23 = vshrl.u32 %v19086_v58, 16  ;;  %v19104_v4 = vpop.permute.xlu0 %8149  ;;  %10476 = vmatprep.mubr.bf16.mxu0 %v13476_v25  ;;  %v19125_v18 = vld [vmem:[%s13560_s30 + $0x158] sm:$0xf] }
 0x3e2   : > { %v6611_v10 = vshll.u32 %v19086_v58, 16  ;;  %10669 = vmatprep.mubr.bf16.mxu1 %v13476_v25  ;;  %vm20533_vm10 = vcmask 121856   ;;  %v5876_v5 = vrot.slane %v5875_v35, 4  ;;  %v19112_v46 = vrot.slane %v6594_v16, 4  ;;  %v13349_v16 = vld [vmem:[%s13560_s30 + $0x15c] sm:$0x1] }
 0x3e3   : > { %v19110_v52 = vsel %vm20533_vm10, %v9875_v55, %v18921_v6  ;;  %v12299_v28 = vrot.slane %v12267_v38, 9  ;;  %9306 = vrot.lane.b32.xlu1 %v12780_v61, %s20512_s23  ;;  %v5867_v47 = vsel %vm13584_vm2, %v5862_v33, %v5866_v54  ;;  %v6599_v0 = vrot.slane %v6597_v31, 5  ;;  %v19127_v34 = vpop.permute.xlu1 %9300 }
 0x3e4   : > { %8267 = vrot.lane.b32.xlu0 %v12676_v56, %s20511_s29  ;;  %v12828_v40 = vcombine.low %v19078_v51, %v19086_v58  ;;  %v6100_v6 = vrot.slane %v19061_v17, 5  ;;  %v5881_v48 = vsel %vm13584_vm2, %v5876_v5, %v5880_v30  ;;  %v6610_v37 = vrot.slane %v6608_v23, 4  ;;  %v13348_v58 = vld [vmem:[%s13560_s30 + $0x154] sm:$0x1] }
 0x3e5   : > { %v12300_v29 = vrot.slane %v12268_v15, 9  ;;  %v6104_v43 = vrot.slane %v19067_v32, 5  ;;  %v12796_v60 = vcombine.low %v5867_v47, %v5881_v48  ;;  %v6613_v20 = vrot.slane %v6611_v10, 5  ;;  %v19136_v61 = vpop.permute.xlu0 %8261  ;;  %v19152_v15 = vld [vmem:[%s13560_s30 + $0x1d4] sm:$0x1] }
 0x3e6   : > { %v6101_v51 = vsel %vm13804_vm5, %v12299_v28, %v6100_v6  ;;  %v4292_v17 = vshrl.u32 %v19115_v3, 16  ;;  %v4295_v2 = vshll.u32 %v19115_v3, 16  ;;  %v4301_v22 = vshll.u32 %v13348_v58, 16  ;;  %v19155_v48 = vld [vmem:[%s13560_s30 + $0x1dc] sm:$0x1] }
 0x3e7   : > { %v6105_v24 = vsel %vm13804_vm5, %v12300_v29, %v6104_v43  ;;  %v4306_v32 = vshrl.u32 %v19125_v18, 16  ;;  %10123 = vrot.lane.b32.xlu1 %v18769_v62, %s20514_s27  ;;  %v4309_v49 = vshll.u32 %v19125_v18, 16  ;;  %v4315_v38 = vshll.u32 %v13349_v16, 16  ;;  %v19149_v54 = vpop.permute.xlu1 %10117  ;;  %v12395_v16 = vld [vmem:[%s13560_s30 + $0x1d0] sm:$0xe] }
 0x3e8   : > { %9386 = vrot.lane.b32.xlu0 %v12796_v60, %s20513_s8  ;;  %v12812_v56 = vcombine.low %v6101_v51, %v6105_v24  ;;  %v4294_v57 = vrot.slane %v4292_v17, 4  ;;  %v4297_v35 = vrot.slane %v4295_v2, 5  ;;  %v4303_v30 = vrot.slane %v4301_v22, 5  ;;  %v19164_v22 = vld [vmem:[%s13560_s30 + $0xfc] sm:$0x1] }
 0x3e9   : > { %v4308_v31 = vrot.slane %v4306_v32, 4  ;;  %v3441_v55 = vshrl.u32 %v11805_v45, 16  ;;  %v4311_v33 = vrot.slane %v4309_v49, 5  ;;  %v4317_v23 = vrot.slane %v4315_v38, 5  ;;  %v19157_v29 = vpop.permute.xlu0 %9380 }
 0x3ea   : > { %v3444_v10 = vshll.u32 %v11805_v45, 16  ;;  %v3455_v62 = vshrl.u32 %v11806_v39, 16  ;;  %v4298_v5 = vor.u32 %v4297_v35, %v4294_v57  ;;  %v3458_v47 = vshll.u32 %v11806_v39, 16  ;;  %v11838_v57 = vld [vmem:[%s13560_s30 + $0x104] sm:$0x1] }
 0x3eb   : > { %v3443_v28 = vrot.slane %v3441_v55, 4  ;;  %v12629_v6 = vcombine.low %v11805_v45, %v11806_v39  ;;  %9578 = vrot.lane.b32.xlu1 %v12828_v40, %s13467_s11  ;;  %v4312_v43 = vor.u32 %v4311_v33, %v4308_v31  ;;  %v6600_v17 = vor.u32 %v6599_v0, %v19112_v46  ;;  %v19171_v49 = vpop.permute.xlu1 %9572  ;;  %v12396_v55 = vld [vmem:[%s13560_s30 + $0x1d8] sm:$0xe] }
 0x3ec   : > { %9466 = vrot.lane.b32.xlu0 %v12812_v56, %s13466_s10  ;;  %v3446_v60 = vrot.slane %v3444_v10, 5  ;;  %v3457_v51 = vrot.slane %v3455_v62, 4  ;;  %v4299_v24 = vrot.slane %v4298_v5, 4  ;;  %v3460_v2 = vrot.slane %v3458_v47, 5  ;;  %s19653_s10 = scalar_lea.vmem [#allocation2], %s19631_s7 }
 0x3ed   : > { %v6603_v58 = vshll.u32 %v19152_v15, 16  ;;  %v6614_v45 = vor.u32 %v6613_v20, %v6610_v37  ;;  %v9939_v32 = vsel %vm8466_vm11, %v19110_v52, %v18969_v63  ;;  %v4313_v40 = vrot.slane %v4312_v43, 4  ;;  %v19188_v33 = vpop.permute.xlu0 %9460  ;;  %v11869_v43 = vld [vmem:[%s13560_s30 + $0xf8] sm:$0xe]  ;;  %s11255_s11 = sshll.u32 %s19653_s10, 4  ;;  %s20121_s11 = int_to_ptr.vmem [resolvable:$true] %s11255_s11 }
 0x3ee   : > { %v6601_v39 = vrot.slane %v6600_v17, 4  ;;  %v6617_v56 = vshll.u32 %v19155_v48, 16  ;;  %v10033_v46 = vsel %vm8565_vm14, %v19015_v41, %v18807_v7  ;;  %v9971_v0 = vsel %vm20205_vm12, %v9939_v32, %v18989_v19 }
 0x3ef   : > { %v6605_v37 = vrot.slane %v6603_v58, 5  ;;  %v6615_v20 = vrot.slane %v6614_v45, 4  ;;  %v4304_v63 = vsel %vm13584_vm2, %v4299_v24, %v4303_v30  ;;  %7997 = vrot.lane.b32.xlu1 %v12629_v6, %s20530_s28  ;;  %v3447_v38 = vor.u32 %v3446_v60, %v3443_v28 }
 0x3f0   : > { %v6619_v52 = vrot.slane %v6617_v56, 5  ;;  %v3450_v35 = vshll.u32 %v19164_v22, 16  ;;  %v4318_v31 = vsel %vm13584_vm2, %v4313_v40, %v4317_v23  ;;  %v3461_v19 = vor.u32 %v3460_v2, %v3457_v51  ;;  %v11870_v2 = vld [vmem:[%s13560_s30 + $0x100] sm:$0xe]  ;;  %v19199_v58 = vpop.permute.xlu1 %9652 }
 0x3f1   : > { %v6606_v7 = vsel %vm13584_vm2, %v6601_v39, %v6605_v37  ;;  %v3464_v41 = vshll.u32 %v11838_v57, 16  ;;  %v3448_v10 = vrot.slane %v3447_v38, 4  ;;  %v12427_v5 = vrot.slane %v12395_v16, 9  ;;  %v19222_v16 = vpop.permute.xlu0 %8918  ;;  %v13351_v38 = vld [vmem:[%s13560_s30 + $0x108] sm:$0xf] }
 0x3f2   : > { %v6620_v30 = vsel %vm13584_vm2, %v6615_v20, %v6619_v52  ;;  %v3452_v62 = vrot.slane %v3450_v35, 5  ;;  %v10003_v28 = vsel %vm8532_vm13, %v9971_v0, %v18983_v26  ;;  %v3462_v47 = vrot.slane %v3461_v19, 4  ;;  %v13350_v52 = vld [vmem:[%s13560_s30 + $0x100] sm:$0xf] }
 0x3f3   : > { %v12844_v23 = vcombine.low %v6606_v7, %v6620_v30  ;;  %v3466_v6 = vrot.slane %v3464_v41, 5  ;;  %v12697_v60 = vcombine.low %v4304_v63, %v4318_v31  ;;  %v6839_v17 = vrot.slane %v19152_v15, 5  ;;  %v11807_v15 = vld [vmem:[%s13560_s30 + $0x108] sm:$0xf] }
 0x3f4   : > { %v3453_v51 = vsel %vm13584_vm2, %v3448_v10, %v3452_v62  ;;  %v12428_v24 = vrot.slane %v12396_v55, 9  ;;  %v19203_v45 = vsel %vm8598_vm15, %v10033_v46, %v18828_v11  ;;  %v10035_v26 = vsel %vm8565_vm14, %v10003_v28, %v19007_v1  ;;  %v11808_v1 = vld [vmem:[%s13560_s30 + $0x110] sm:$0xf]  ;;  %v11871_v41 = vld [vmem:[%s13560_s30 + $0x108] sm:$0xe] }
 0x3f5   : > { %9658 = vrot.lane.b32.xlu0 %v12844_v23, %s13468_s18  ;;  %v3467_v32 = vsel %vm13584_vm2, %v3462_v47, %v3466_v6  ;;  %v6843_v40 = vrot.slane %v19155_v48, 5  ;;  %v19214_v39 = vsel %vm8598_vm15, %v10035_v26, %v19031_v36  ;;  %v6840_v11 = vsel %vm13804_vm5, %v12427_v5, %v6839_v17  ;;  %v11872_v55 = vld [vmem:[%s13560_s30 + $0x110] sm:$0xe]  ;;  %v11839_v5 = vld [vmem:[%s13560_s30 + $0x10c] sm:$0x1] }
 0x3f6   : > { %v12645_v56 = vcombine.low %v3453_v51, %v3467_v32  ;;  %v11901_v46 = vrot.slane %v11869_v43, 9  ;;  %v3826_v37 = vrot.slane %v19164_v22, 5  ;;  %v11902_v48 = vrot.slane %v11870_v2, 9  ;;  %v11840_v28 = vld [vmem:[%s13560_s30 + $0x114] sm:$0x1] }
 0x3f7   : > { %v6844_v0 = vsel %vm13804_vm5, %v12428_v24, %v6843_v40  ;;  %v3830_v20 = vrot.slane %v11838_v57, 5  ;;  %v9778_v36 = vsel %vm8285_vm6, %v12697_v60, %v19017_v53  ;;  %v12677_v35 = vcombine.low %v13350_v52, %v13351_v38  ;;  %v19241_v23 = vpop.permute.xlu1 %9732 }
 0x3f8   : > { %8077 = vrot.lane.b32.xlu1 %v12645_v56, %s13472_s21  ;;  %v12860_v63 = vcombine.low %v6840_v11, %v6844_v0  ;;  %v3469_v31 = vshrl.u32 %v11807_v15, 16  ;;  %v3827_v22 = vsel %vm13804_vm5, %v11901_v46, %v3826_v37  ;;  %v3472_v7 = vshll.u32 %v11807_v15, 16  ;;  %v19246_v40 = vpop.permute.xlu0 %9030  ;;  %v19256_v46 = vld [vmem:[%s13560_s30 + $0x118] sm:$0xf]  ;;  %v19262_v0 = vld [vmem:[%s13560_s30 + $0x11c] sm:$0x1] }
 0x3f9   : > { %v3831_v57 = vsel %vm13804_vm5, %v11902_v48, %v3830_v20  ;;  %v3483_v19 = vshrl.u32 %v11808_v1, 16  ;;  %v8707_v53 = vsel %vm8697_vm3, %v17466_v21, %v19080_v44  ;;  %v3486_v62 = vshll.u32 %v11808_v1, 16 }
 0x3fa   : > { %9738 = vrot.lane.b32.xlu0 %v12860_v63, %s13469_s19  ;;  %v12661_v30 = vcombine.low %v3827_v22, %v3831_v57  ;;  %v3471_v10 = vrot.slane %v3469_v31, 4  ;;  %v8740_v47 = vsel %vm8730_vm4, %v8707_v53, %v19104_v4  ;;  %v3474_v6 = vrot.slane %v3472_v7, 5 }
 0x3fb   : > { %v3485_v43 = vrot.slane %v3483_v19, 4  ;;  %v12630_v60 = vcombine.low %v11807_v15, %v11808_v1  ;;  %v3488_v51 = vrot.slane %v3486_v62, 5  ;;  %v11903_v21 = vrot.slane %v11871_v41, 9  ;;  %v19259_v1 = vld [vmem:[%s13560_s30 + $0x120] sm:$0xf] }
 0x3fc   : > { %8269 = vrot.lane.b32.xlu1 %v12677_v35, %s20511_s29  ;;  %v3834_v44 = vrot.slane %v11839_v5, 5  ;;  %v11904_v17 = vrot.slane %v11872_v55, 9  ;;  %v3838_v24 = vrot.slane %v11840_v28, 5  ;;  %v3475_v2 = vor.u32 %v3474_v6, %v3471_v10  ;;  %v19289_v55 = vld [vmem:[%s13560_s30 + $0x160] sm:$0xf] }
 0x3fd   : > { %v3478_v26 = vshll.u32 %v11839_v5, 16  ;;  %v3492_v32 = vshll.u32 %v11840_v28, 16  ;;  %v9813_v4 = vsel %vm8334_vm7, %v9778_v36, %v19040_v50  ;;  %v8773_v15 = vsel %vm8763_vm1, %v8740_v47, %v19136_v61  ;;  %v19267_v36 = vld [vmem:[%s13560_s30 + $0x124] sm:$0x1]  ;;  %v19295_v62 = vld [vmem:[%s13560_s30 + $0x168] sm:$0xf] }
 0x3fe   : > { %8157 = vrot.lane.b32.xlu0 %v12661_v30, %s13473_s26  ;;  %v3835_v56 = vsel %vm13804_vm5, %v11903_v21, %v3834_v44  ;;  %v3489_v11 = vor.u32 %v3488_v51, %v3485_v43  ;;  %v3839_v37 = vsel %vm13804_vm5, %v11904_v17, %v3838_v24  ;;  %v3476_v48 = vrot.slane %v3475_v2, 4  ;;  %v13352_v47 = vld [vmem:[%s13560_s30 + $0x110] sm:$0xf]  ;;  %v13353_v6 = vld [vmem:[%s13560_s30 + $0x118] sm:$0xf] }
 0x3ff   : > { %v3480_v50 = vrot.slane %v3478_v26, 5  ;;  %v3494_v20 = vrot.slane %v3492_v32, 5  ;;  %v9845_v61 = vsel %vm8367_vm8, %v9813_v4, %v19069_v27  ;;  %v12662_v63 = vcombine.low %v3835_v56, %v3839_v37  ;;  %v19274_v35 = vpop.permute.xlu1 %9110  ;;  %v13354_v26 = vld [vmem:[%s13560_s30 + $0x164] sm:$0x1] }
 0x400   : > { %7999 = vrot.lane.b32.xlu1 %v12630_v60, %s20530_s28  ;;  %v3490_v52 = vrot.slane %v3489_v11, 4  ;;  %v10155_v38 = vsel %vm10141_vm0, %v8773_v15, %v19149_v54  ;;  %v3497_v22 = vshrl.u32 %v19256_v46, 16  ;;  %v3500_v27 = vshll.u32 %v19256_v46, 16 }
 0x401   : > { %v3481_v31 = vsel %vm13584_vm2, %v3476_v48, %v3480_v50  ;;  %10477 = vmatmul.mubr.bf16.gmra.mrb[16].mxu0 %v10155_v38  ;;  %10670 = vmatmul.mubr.bf16.gmra.mrb[16].mxu1 %v10155_v38  ;;  %v3506_v57 = vshll.u32 %v19262_v0, 16  ;;  %v3511_v7 = vshrl.u32 %v19259_v1, 16  ;;  %v3514_v19 = vshll.u32 %v19259_v1, 16  ;;  %v11873_v48 = vld [vmem:[%s13560_s30 + $0x118] sm:$0xe] }
 0x402   : > { %10125 = vrot.lane.b32.xlu0 %v18813_v9, %s20514_s27  ;;  %v3495_v54 = vsel %vm13584_vm2, %v3490_v52, %v3494_v20  ;;  %v3520_v41 = vshll.u32 %v19267_v36, 16  ;;  %10486 = vmatprep.mubr.bf16.mxu0 %v13476_v25  ;;  %v9877_v53 = vsel %vm8400_vm9, %v9845_v61, %v19096_v59  ;;  %v3499_v9 = vrot.slane %v3497_v22, 4  ;;  %v19297_v5 = vpop.permute.xlu0 %8071  ;;  %v13355_v52 = vld [vmem:[%s13560_s30 + $0x16c] sm:$0x1] }
 0x403   : > { %v12646_v30 = vcombine.low %v3481_v31, %v3495_v54  ;;  %v3502_v10 = vrot.slane %v3500_v27, 5  ;;  %10679 = vmatprep.mubr.bf16.mxu1 %v13476_v25  ;;  %v9909_v28 = vsel %vm20533_vm10, %v9877_v53, %v19127_v34  ;;  %v12678_v43 = vcombine.low %v13352_v47, %v13353_v6  ;;  %v19305_v51 = vpop.permute.xlu1 %9190  ;;  %v11874_v31 = vld [vmem:[%s13560_s30 + $0x120] sm:$0xe]  ;;  %v11812_v47 = vld [vmem:[%s13560_s30 + $0x130] sm:$0xf] }
 0x404   : > { %8159 = vrot.lane.b32.xlu1 %v12662_v63, %s13473_s26  ;;  %v3513_v60 = vrot.slane %v3511_v7, 4  ;;  %v3516_v59 = vrot.slane %v3514_v19, 5  ;;  %v3508_v44 = vrot.slane %v3506_v57, 5  ;;  %v4320_v17 = vshrl.u32 %v19289_v55, 16  ;;  %v19327_v19 = vld [vmem:[%s13560_s30 + $0x128] sm:$0xf] }
 0x405   : > { %v3503_v21 = vor.u32 %v3502_v10, %v3499_v9  ;;  %v4323_v24 = vshll.u32 %v19289_v55, 16  ;;  %v3522_v2 = vrot.slane %v3520_v41, 5  ;;  %v4329_v32 = vshll.u32 %v13354_v26, 16 }
 0x406   : > { %8079 = vrot.lane.b32.xlu0 %v12646_v30, %s13472_s21  ;;  %v3517_v34 = vor.u32 %v3516_v59, %v3513_v60  ;;  %v4334_v4 = vshrl.u32 %v19295_v62, 16  ;;  %v4322_v56 = vrot.slane %v4320_v17, 4  ;;  %v4337_v37 = vshll.u32 %v19295_v62, 16  ;;  %v19314_v50 = vpop.permute.xlu0 %8151 }
 0x407   : > { %v3504_v15 = vrot.slane %v3503_v21, 4  ;;  %v4325_v11 = vrot.slane %v4323_v24, 5  ;;  %v12631_v61 = vcombine.low %v19256_v46, %v19259_v1  ;;  %v4343_v38 = vshll.u32 %v13355_v52, 16  ;;  %v19322_v22 = vpop.permute.xlu1 %9302  ;;  %v13356_v24 = vld [vmem:[%s13560_s30 + $0x120] sm:$0xf] }
 0x408   : > { %10127 = vrot.lane.b32.xlu1 %v18972_v14, %s20514_s27  ;;  %v3518_v20 = vrot.slane %v3517_v34, 4  ;;  %v4336_v63 = vrot.slane %v4334_v4, 4  ;;  %v4331_v54 = vrot.slane %v4329_v32, 5  ;;  %v4339_v7 = vrot.slane %v4337_v37, 5  ;;  %v13357_v34 = vld [vmem:[%s13560_s30 + $0x128] sm:$0xf] }
 0x409   : > { %v3509_v27 = vsel %vm13584_vm2, %v3504_v15, %v3508_v44  ;;  %v4326_v57 = vor.u32 %v4325_v11, %v4322_v56  ;;  %v4345_v46 = vrot.slane %v4343_v38, 5  ;;  %v11905_v1 = vrot.slane %v11873_v48, 9  ;;  %v11876_v15 = vld [vmem:[%s13560_s30 + $0x130] sm:$0xe] }
 0x40a   : > { %8271 = vrot.lane.b32.xlu0 %v12678_v43, %s20511_s29  ;;  %v3523_v14 = vsel %vm13584_vm2, %v3518_v20, %v3522_v2  ;;  %v3842_v41 = vrot.slane %v19262_v0, 5  ;;  %v4340_v9 = vor.u32 %v4339_v7, %v4336_v63  ;;  %v11906_v10 = vrot.slane %v11874_v31, 9  ;;  %v19334_v6 = vpop.permute.xlu0 %8263  ;;  %v11875_v2 = vld [vmem:[%s13560_s30 + $0x128] sm:$0xe]  ;;  %v11843_v20 = vld [vmem:[%s13560_s30 + $0x12c] sm:$0x1] }
 0x40b   : > { %v12647_v53 = vcombine.low %v3509_v27, %v3523_v14  ;;  %v4327_v30 = vrot.slane %v4326_v57, 4  ;;  %v9941_v43 = vsel %vm8466_vm11, %v9909_v28, %v19157_v29  ;;  %v3846_v59 = vrot.slane %v19267_v36, 5  ;;  %v19342_v21 = vpop.permute.xlu1 %10119  ;;  %v11844_v27 = vld [vmem:[%s13560_s30 + $0x134] sm:$0x1] }
 0x40c   : > { %v3843_v60 = vsel %vm13804_vm5, %v11905_v1, %v3842_v41  ;;  %v3525_v0 = vshrl.u32 %v19327_v19, 16  ;;  %v4341_v17 = vrot.slane %v4340_v9, 4  ;;  %v12679_v29 = vcombine.low %v13356_v24, %v13357_v34  ;;  %v20534_v14 = vld [vmem:[#allocation123_spill] sm:$0xff] }
 0x40d   : > { %8081 = vrot.lane.b32.xlu1 %v12647_v53, %s13472_s21  ;;  %v4332_v44 = vsel %vm13584_vm2, %v4327_v30, %v4331_v54  ;;  %v3528_v28 = vshll.u32 %v19327_v19, 16  ;;  %v3847_v36 = vsel %vm13804_vm5, %v11906_v10, %v3846_v59  ;;  %v3539_v32 = vshrl.u32 %v11812_v47, 16  ;;  %v19387_v24 = vld [vmem:[%s13560_s30 + $0x150] sm:$0xf] }
 0x40e   : > { %8001 = vrot.lane.b32.xlu0 %v12631_v61, %s20530_s28  ;;  %v3527_v26 = vrot.slane %v3525_v0, 4  ;;  %v3542_v4 = vshll.u32 %v11812_v47, 16  ;;  %v9973_v56 = vsel %vm20205_vm12, %v9941_v43, %v19188_v33  ;;  %v4346_v11 = vsel %vm13584_vm2, %v4341_v17, %v4345_v46  ;;  %v19360_v63 = vpop.permute.xlu0 %9382  ;;  %v20535_v46 = vld [vmem:[#allocation124_spill] sm:$0xff] }
 0x40f   : > { %v12663_v37 = vcombine.low %v3843_v60, %v3847_v36  ;;  %v3530_v48 = vrot.slane %v3528_v28, 5  ;;  %v12698_v61 = vcombine.low %v4332_v44, %v4346_v11  ;;  %v3541_v52 = vrot.slane %v3539_v32, 4  ;;  %v19369_v9 = vpop.permute.xlu1 %9574  ;;  %v19378_v60 = vld [vmem:[%s13560_s30 + $0x148] sm:$0xf]  ;;  %v11845_v36 = vld [vmem:[%s13560_s30 + $0x14c] sm:$0x1] }
 0x410   : > { %v3544_v38 = vrot.slane %v3542_v4, 5  ;;  %v12632_v31 = vcombine.low %v19327_v19, %v11812_v47  ;;  %v11907_v57 = vrot.slane %v11875_v2, 9  ;;  %v3850_v54 = vrot.slane %v11843_v20, 5  ;;  %v11846_v32 = vld [vmem:[%s13560_s30 + $0x154] sm:$0x1] }
 0x411   : > { %8273 = vrot.lane.b32.xlu1 %v12679_v29, %s20511_s29  ;;  %v11908_v33 = vrot.slane %v11876_v15, 9  ;;  %v3854_v7 = vrot.slane %v11844_v27, 5  ;;  %vm20536_vm10 = vcmask 293888   ;;  %v3531_v41 = vor.u32 %v3530_v48, %v3527_v26  ;;  %v11877_v11 = vld [vmem:[%s13560_s30 + $0x148] sm:$0xe] }
 0x412   : > { %v8676_v1 = vsel %vm20536_vm10, %v20535_v46, %v20534_v14  ;;  %8161 = vrot.lane.b32.xlu0 %v12663_v37, %s13473_s26  ;;  %v3534_v53 = vshll.u32 %v11843_v20, 16  ;;  %v3545_v30 = vor.u32 %v3544_v38, %v3541_v52  ;;  %vm20537_vm12 = vcmask 269312   ;;  %v19380_v59 = vpop.permute.xlu0 %9462  ;;  %v11878_v20 = vld [vmem:[%s13560_s30 + $0x150] sm:$0xe]  ;;  %v19424_v14 = vld [vmem:[%s13560_s30 + $0x158] sm:$0xf] }
 0x413   : > { %v10087_v19 = vsel %vm20537_vm12, %v19203_v45, 0  ;;  %v3851_v10 = vsel %vm13804_vm5, %v11907_v57, %v3850_v54  ;;  %v3855_v47 = vsel %vm13804_vm5, %v11908_v33, %v3854_v7  ;;  %v3548_v43 = vshll.u32 %v11844_v27, 16  ;;  %vm20538_vm10 = vmmov %vm20537_vm12 }
 0x414   : > { %v10088_v0 = vsel %vm20538_vm10, %v19214_v39, 0  ;;  %v10005_v44 = vsel %vm8532_vm13, %v9973_v56, %v19171_v49  ;;  %v3532_v45 = vrot.slane %v3531_v41, 4  ;;  %v3536_v17 = vrot.slane %v3534_v53, 5 }
 0x415   : > { %v9781_v34 = vsel %vm8285_vm6, %v12698_v61, %v19222_v16  ;;  %8003 = vrot.lane.b32.xlu1 %v12632_v31, %s20530_s28  ;;  %v12664_v29 = vcombine.low %v3851_v10, %v3855_v47  ;;  %v3546_v28 = vrot.slane %v3545_v30, 4  ;;  %v3550_v2 = vrot.slane %v3548_v43, 5  ;;  %v19413_v61 = vpop.permute.xlu1 %9654  ;;  %v19427_v30 = vld [vmem:[%s13560_s30 + $0x160] sm:$0xf] }
 0x416   : > { %v10037_v39 = vsel %vm8565_vm14, %v10005_v44, %v19199_v58  ;;  %v9815_v49 = vsel %vm8334_vm7, %v9781_v34, %v19246_v40  ;;  %10129 = vrot.lane.b32.xlu0 %v10087_v19, %s20514_s27  ;;  %v8709_v26 = vsel %vm8697_vm3, %v8676_v1, %v19297_v5  ;;  %v3537_v16 = vsel %vm13584_vm2, %v3532_v45, %v3536_v17  ;;  %v19416_v57 = vpop.permute.xlu0 %8920 }
 0x417   : > { %v3551_v4 = vsel %vm13584_vm2, %v3546_v28, %v3550_v2  ;;  %v3553_v15 = vshrl.u32 %v19378_v60, 16  ;;  %v3556_v56 = vshll.u32 %v19378_v60, 16  ;;  %v3567_v58 = vshrl.u32 %v19387_v24, 16  ;;  %v19453_v2 = vld [vmem:[%s13560_s30 + $0x178] sm:$0xf] }
 0x418   : > { %v12648_v40 = vcombine.low %v3537_v16, %v3551_v4  ;;  %v8742_v37 = vsel %vm8730_vm4, %v8709_v26, %v19314_v50  ;;  %v3570_v5 = vshll.u32 %v19387_v24, 16  ;;  %v3562_v48 = vshll.u32 %v11845_v36, 16 }
 0x419   : > { %8163 = vrot.lane.b32.xlu1 %v12664_v29, %s13473_s26  ;;  %v3555_v52 = vrot.slane %v3553_v15, 4  ;;  %v3558_v38 = vrot.slane %v3556_v56, 5  ;;  %v3569_v31 = vrot.slane %v3567_v58, 4  ;;  %v3576_v27 = vshll.u32 %v11846_v32, 16  ;;  %v19445_v34 = vpop.permute.xlu1 %9032 }
 0x41a   : > { %8083 = vrot.lane.b32.xlu0 %v12648_v40, %s13472_s21  ;;  %v12680_v50 = vcombine.low %v18931_v12, %v18943_v13  ;;  %v8775_v54 = vsel %vm8763_vm1, %v8742_v37, %v19334_v6  ;;  %v3572_v33 = vrot.slane %v3570_v5, 5  ;;  %v11909_v7 = vrot.slane %v11877_v11, 9  ;;  %v11847_v11 = vld [vmem:[%s13560_s30 + $0x15c] sm:$0x1] }
 0x41b   : > { %v3559_v46 = vor.u32 %v3558_v38, %v3555_v52  ;;  %v3564_v1 = vrot.slane %v3562_v48, 5  ;;  %v3858_v41 = vrot.slane %v11845_v36, 5  ;;  %v11910_v53 = vrot.slane %v11878_v20, 9  ;;  %v19455_v36 = vpop.permute.xlu0 %7993  ;;  %v11848_v20 = vld [vmem:[%s13560_s30 + $0x164] sm:$0x1] }
 0x41c   : > { %v3573_v19 = vor.u32 %v3572_v33, %v3569_v31  ;;  %v3578_v10 = vrot.slane %v3576_v27, 5  ;;  %v3862_v47 = vrot.slane %v11846_v32, 5  ;;  %v10158_v12 = vsel %vm10141_vm0, %v8775_v54, %v19342_v21  ;;  %v11879_v52 = vld [vmem:[%s13560_s30 + $0x158] sm:$0xe]  ;;  %v13358_v27 = vld [vmem:[%s13560_s30 + $0x174] sm:$0x1] }
 0x41d   : > { %v9847_v13 = vsel %vm8367_vm8, %v9815_v49, %v19274_v35  ;;  %10131 = vrot.lane.b32.xlu1 %v10088_v0, %s20514_s27  ;;  %v12633_v6 = vcombine.low %v19378_v60, %v19387_v24  ;;  %v3560_v43 = vrot.slane %v3559_v46, 4  ;;  %10487 = vmatmul.mubr.bf16.gmra.mrb[20].mxu0 %v10158_v12  ;;  %v3581_v44 = vshrl.u32 %v19424_v14, 16  ;;  %v19443_v0 = vld [vmem:[%s13560_s30 + $0x170] sm:$0xf]  ;;  %v11880_v33 = vld [vmem:[%s13560_s30 + $0x160] sm:$0xe] }
 0x41e   : > { %8275 = vrot.lane.b32.xlu0 %v12680_v50, %s20511_s29  ;;  %v3574_v45 = vrot.slane %v3573_v19, 4  ;;  %v3859_v17 = vsel %vm13804_vm5, %v11909_v7, %v3858_v41  ;;  %10680 = vmatmul.mubr.bf16.gmra.mrb[20].mxu1 %v10158_v12  ;;  %v3584_v21 = vshll.u32 %v19424_v14, 16  ;;  %v3595_v35 = vshrl.u32 %v19427_v30, 16  ;;  %v13359_v12 = vld [vmem:[%s13560_s30 + $0x17c] sm:$0x1] }
 0x41f   : > { %v3565_v60 = vsel %vm13584_vm2, %v3560_v43, %v3564_v1  ;;  %v3863_v24 = vsel %vm13804_vm5, %v11910_v53, %v3862_v47  ;;  %v3583_v29 = vrot.slane %v3581_v44, 4  ;;  %v3598_v28 = vshll.u32 %v19427_v30, 16  ;;  %10496 = vmatprep.mubr.bf16.mxu0 %v13476_v25  ;;  %10689 = vmatprep.mubr.bf16.mxu1 %v13476_v25 }
 0x420   : > { %v10069_v49 = vsel %vm8598_vm15, %v10037_v39, %v19241_v23  ;;  %v9879_v26 = vsel %vm8400_vm9, %v9847_v13, %v19305_v51  ;;  %v3579_v16 = vsel %vm13584_vm2, %v3574_v45, %v3578_v10  ;;  %v3586_v32 = vrot.slane %v3584_v21, 5  ;;  %v20541_v45 = vld [vmem:[#allocation41_spill] sm:$0xff] }
 0x421   : > { %v12649_v4 = vcombine.low %v3565_v60, %v3579_v16  ;;  %v3597_v15 = vrot.slane %v3595_v35, 4  ;;  %v3600_v56 = vrot.slane %v3598_v28, 5  ;;  %v4348_v58 = vshrl.u32 %v19443_v0, 16 }
 0x422   : > { %vm20539_vm12 = vcmask 121856   ;;  %8005 = vrot.lane.b32.xlu0 %v12633_v6, %s20530_s28  ;;  %v12665_v23 = vcombine.low %v3859_v17, %v3863_v24  ;;  %v4351_v51 = vshll.u32 %v19443_v0, 16  ;;  %v4362_v39 = vshrl.u32 %v19453_v2, 16  ;;  %v9735_v1 = vpop.permute.xlu0 %9734  ;;  %v20542_v17 = vld [vmem:[#allocation122_spill] sm:$0xff] }
 0x423   : > { %v9911_v40 = vsel %vm20539_vm12, %v9879_v26, %v19322_v22  ;;  %8085 = vrot.lane.b32.xlu1 %v12649_v4, %s13472_s21  ;;  %v12681_v5 = vcombine.low %v19115_v3, %v19125_v18  ;;  %v4365_v48 = vshll.u32 %v19453_v2, 16  ;;  %v3587_v22 = vor.u32 %v3586_v32, %v3583_v29  ;;  %v19486_v7 = vpop.permute.xlu1 %8073  ;;  %v19500_v29 = vld [vmem:[%s13560_s30 + $0x168] sm:$0xf]  ;;  %v20544_v26 = vld [vmem:[#allocation91_spill] sm:$0xff] }
 0x424   : > { %v9943_v37 = vsel %vm8466_vm11, %v9911_v40, %v19360_v63  ;;  %vm20540_vm10 = vcmask 171008   ;;  %v12634_v31 = vcombine.low %v19424_v14, %v19427_v30  ;;  %v4357_v50 = vshll.u32 %v13358_v27, 16 }
 0x425   : > { %v9975_v38 = vsel %vm20540_vm10, %v9943_v37, %v19380_v59  ;;  %v3590_v54 = vshll.u32 %v11847_v11, 16  ;;  %v4350_v63 = vrot.slane %v4348_v58, 4  ;;  %v4353_v3 = vrot.slane %v4351_v51, 5  ;;  %v11849_v51 = vld [vmem:[%s13560_s30 + $0x16c] sm:$0x1] }
 0x426   : > { %v3588_v18 = vrot.slane %v3587_v22, 4  ;;  %v3601_v46 = vor.u32 %v3600_v56, %v3597_v15  ;;  %8165 = vrot.lane.b32.xlu0 %v12665_v23, %s13473_s26  ;;  %v4364_v41 = vrot.slane %v4362_v39, 4  ;;  %v3604_v59 = vshll.u32 %v11848_v20, 16  ;;  %v11818_v15 = vld [vmem:[%s13560_s30 + $0x170] sm:$0xf] }
 0x427   : > { %v3592_v53 = vrot.slane %v3590_v54, 5  ;;  %v11911_v19 = vrot.slane %v11879_v52, 9  ;;  %8277 = vrot.lane.b32.xlu1 %v12681_v5, %s20511_s29  ;;  %v4367_v14 = vrot.slane %v4365_v48, 5  ;;  %v3866_v10 = vrot.slane %v11847_v11, 5  ;;  %v19502_v28 = vpop.permute.xlu1 %8153  ;;  %v11850_v48 = vld [vmem:[%s13560_s30 + $0x174] sm:$0x1] }
 0x428   : > { %v3602_v30 = vrot.slane %v3601_v46, 4  ;;  %v11912_v47 = vrot.slane %v11880_v33, 9  ;;  %v4371_v13 = vshll.u32 %v13359_v12, 16  ;;  %v3606_v43 = vrot.slane %v3604_v59, 5  ;;  %v11881_v54 = vld [vmem:[%s13560_s30 + $0x168] sm:$0xe] }
 0x429   : > { %v3593_v6 = vsel %vm13584_vm2, %v3588_v18, %v3592_v53  ;;  %v3870_v44 = vrot.slane %v11848_v20, 5  ;;  %v8612_v21 = vsel %vm8598_vm15, %v20542_v17, %v20541_v45  ;;  %vm20543_vm12 = vcmask 269312  }
 0x42a   : > { %v10089_v35 = vsel %vm20543_vm12, %v10069_v49, 0  ;;  %v4354_v60 = vor.u32 %v4353_v3, %v4350_v63  ;;  %v3867_v24 = vsel %vm13804_vm5, %v11911_v19, %v3866_v10  ;;  %vm20545_vm10 = vmmov %vm20543_vm12  ;;  %v10007_v32 = vsel %vm8532_vm13, %v9975_v38, %v19369_v9  ;;  %v19517_v23 = vpop.permute.xlu0 %9112 }
 0x42b   : > { %v8645_v16 = vsel %vm20545_vm10, %v8612_v21, %v20544_v26  ;;  %10133 = vrot.lane.b32.xlu0 %v10089_v35, %s20514_s27  ;;  %v3607_v49 = vsel %vm13584_vm2, %v3602_v30, %v3606_v43  ;;  %v3871_v4 = vsel %vm13804_vm5, %v11912_v47, %v3870_v44  ;;  %8007 = vrot.lane.b32.xlu1 %v12634_v31, %s20530_s28  ;;  %v4359_v9 = vrot.slane %v4357_v50, 5  ;;  %v8266_v46 = vpop.permute.xlu1 %8265  ;;  %v11819_v21 = vld [vmem:[%s13560_s30 + $0x178] sm:$0xf] }
 0x42c   : > { %v10039_v56 = vsel %vm8565_vm14, %v10007_v32, %v19413_v61  ;;  %v4368_v58 = vor.u32 %v4367_v14, %v4364_v41  ;;  %v12650_v11 = vcombine.low %v3593_v6, %v3607_v49  ;;  %v12666_v40 = vcombine.low %v3867_v24, %v3871_v4  ;;  %v11882_v41 = vld [vmem:[%s13560_s30 + $0x170] sm:$0xe]  ;;  %v11820_v24 = vld [vmem:[%s13560_s30 + $0x180] sm:$0xf] }
 0x42d   : > { %v4373_v39 = vrot.slane %v4371_v13, 5  ;;  %v3609_v37 = vshrl.u32 %v19500_v29, 16  ;;  %v3612_v5 = vshll.u32 %v19500_v29, 16  ;;  %v4355_v20 = vrot.slane %v4354_v60, 4 }
 0x42e   : > { %v10071_v22 = vsel %vm8598_vm15, %v10039_v56, %v9735_v1  ;;  %v3623_v52 = vshrl.u32 %v11818_v15, 16  ;;  %v3626_v61 = vshll.u32 %v11818_v15, 16  ;;  %v12682_v38 = vcombine.low %v19289_v55, %v19295_v62  ;;  %v19530_v1 = vpop.permute.xlu0 %9192 }
 0x42f   : > { %8087 = vrot.lane.b32.xlu0 %v12650_v11, %s13472_s21  ;;  %v3611_v31 = vrot.slane %v3609_v37, 4  ;;  %v3614_v27 = vrot.slane %v3612_v5, 5  ;;  %v3618_v50 = vshll.u32 %v11849_v51, 16  ;;  %v4369_v33 = vrot.slane %v4368_v58, 4  ;;  %8167 = vrot.lane.b32.xlu1 %v12666_v40, %s13473_s26 }
 0x430   : > { %v3625_v63 = vrot.slane %v3623_v52, 4  ;;  %v3628_v3 = vrot.slane %v3626_v61, 5  ;;  %v3632_v18 = vshll.u32 %v11850_v48, 16  ;;  %vm20546_vm12 = vcmask 293888   ;;  %v11852_v52 = vld [vmem:[%s13560_s30 + $0x184] sm:$0x1] }
 0x431   : > { %v8678_v53 = vsel %vm20546_vm12, %v8645_v16, %v19455_v36  ;;  %v10090_v59 = vsel %vm20545_vm10, %v10071_v22, 0  ;;  %v3615_v55 = vor.u32 %v3614_v27, %v3611_v31  ;;  %v3620_v62 = vrot.slane %v3618_v50, 5  ;;  %v11851_v22 = vld [vmem:[%s13560_s30 + $0x17c] sm:$0x1]  ;;  %v11883_v61 = vld [vmem:[%s13560_s30 + $0x178] sm:$0xe] }
 0x432   : > { %v3629_v19 = vor.u32 %v3628_v3, %v3625_v63  ;;  %v3634_v14 = vrot.slane %v3632_v18, 5  ;;  %v11913_v30 = vrot.slane %v11881_v54, 9  ;;  %v3874_v10 = vrot.slane %v11849_v51, 5  ;;  %v9305_v17 = vpop.permute.xlu0 %9304 }
 0x433   : > { %8279 = vrot.lane.b32.xlu0 %v12682_v38, %s20511_s29  ;;  %v12635_v47 = vcombine.low %v19500_v29, %v11818_v15  ;;  %v3616_v12 = vrot.slane %v3615_v55, 4  ;;  %v11914_v13 = vrot.slane %v11882_v41, 9  ;;  %v3878_v6 = vrot.slane %v11850_v48, 5  ;;  %10135 = vrot.lane.b32.xlu1 %v10090_v59, %s20514_s27 }
 0x434   : > { %v4360_v36 = vsel %vm13584_vm2, %v4355_v20, %v4359_v9  ;;  %v4374_v43 = vsel %vm13584_vm2, %v4369_v33, %v4373_v39  ;;  %v3630_v44 = vrot.slane %v3629_v19, 4  ;;  %v3875_v45 = vsel %vm13804_vm5, %v11913_v30, %v3874_v10  ;;  %v9385_v49 = vpop.permute.xlu1 %9384 }
 0x435   : > { %v3621_v35 = vsel %vm13584_vm2, %v3616_v12, %v3620_v62  ;;  %v3879_v60 = vsel %vm13804_vm5, %v11914_v13, %v3878_v6  ;;  %v3637_v29 = vshrl.u32 %v11819_v21, 16  ;;  %v3640_v26 = vshll.u32 %v11819_v21, 16  ;;  %v13360_v6 = vld [vmem:[%s13560_s30 + $0x80] sm:$0xf] }
 0x436   : > { %v8711_v16 = vsel %vm8697_vm3, %v8678_v53, %v19486_v7  ;;  %v3635_v32 = vsel %vm13584_vm2, %v3630_v44, %v3634_v14  ;;  %v3651_v4 = vshrl.u32 %v11820_v24, 16  ;;  %v12667_v58 = vcombine.low %v3875_v45, %v3879_v60  ;;  %v10122_v7 = vpop.permute.xlu0 %10121 }
 0x437   : > { %8009 = vrot.lane.b32.xlu0 %v12635_v47, %s20530_s28  ;;  %v8744_v15 = vsel %vm8730_vm4, %v8711_v16, %v19502_v28  ;;  %v12651_v56 = vcombine.low %v3621_v35, %v3635_v32  ;;  %v3654_v11 = vshll.u32 %v11820_v24, 16  ;;  %v12699_v40 = vcombine.low %v4360_v36, %v4374_v43  ;;  %v13361_v36 = vld [vmem:[%s13560_s30 + $0x88] sm:$0xf] }
 0x438   : > { %v8777_v51 = vsel %vm8763_vm1, %v8744_v15, %v8266_v46  ;;  %v12683_v9 = vcombine.low %v19443_v0, %v19453_v2  ;;  %v3639_v39 = vrot.slane %v3637_v29, 4  ;;  %v3642_v37 = vrot.slane %v3640_v26, 5  ;;  %v9465_v20 = vpop.permute.xlu1 %9464  ;;  %v11884_v0 = vld [vmem:[%s13560_s30 + $0x180] sm:$0xe]  ;;  %v11948_v16 = vld [vmem:[%s13560_s30 + $0x188] sm:$0xf] }
 0x439   : > { %8089 = vrot.lane.b32.xlu1 %v12651_v56, %s13472_s21  ;;  %v10161_v28 = vsel %vm10141_vm0, %v8777_v51, %v10122_v7  ;;  %v3653_v5 = vrot.slane %v3651_v4, 4  ;;  %v3656_v48 = vrot.slane %v3654_v11, 5  ;;  %v9784_v38 = vsel %vm8285_vm6, %v12699_v40, %v19416_v57  ;;  %v20549_v15 = vld [vmem:[#allocation9_spill] sm:$0xff]  ;;  %v20551_v51 = vld [vmem:[#allocation27_spill] sm:$0xff] }
 0x43a   : > { %10497 = vmatmul.mubr.bf16.gmra.mrb[24].mxu0 %v10161_v28  ;;  %10690 = vmatmul.mubr.bf16.gmra.mrb[24].mxu1 %v10161_v28  ;;  %v9817_v2 = vsel %vm8334_vm7, %v9784_v38, %v19445_v34  ;;  %v12636_v31 = vcombine.low %v11819_v21, %v11820_v24  ;;  %v3643_v27 = vor.u32 %v3642_v37, %v3639_v39  ;;  %v3646_v50 = vshll.u32 %v11851_v22, 16  ;;  %v9577_v63 = vpop.permute.xlu0 %9576  ;;  %v20553_v38 = vld [vmem:[#allocation60_spill] sm:$0xff] }
 0x43b   : > { %8169 = vrot.lane.b32.xlu0 %v12667_v58, %s13473_s26  ;;  %10506 = vmatprep.mubr.bf16.mxu0 %v13476_v25  ;;  %v9849_v54 = vsel %vm8367_vm8, %v9817_v2, %v19517_v23  ;;  %v3657_v3 = vor.u32 %v3656_v48, %v3653_v5  ;;  %v3660_v18 = vshll.u32 %v11852_v52, 16  ;;  %v11915_v57 = vrot.slane %v11883_v61, 9 }
 0x43c   : > { %10699 = vmatprep.mubr.bf16.mxu1 %v13476_v25  ;;  %v19576_v33 = vpop.permute.xlu1 %8922  ;;  %v9881_v46 = vsel %vm8400_vm9, %v9849_v54, %v19530_v1  ;;  %v3882_v41 = vrot.slane %v11851_v22, 5  ;;  %v11916_v34 = vrot.slane %v11884_v0, 9  ;;  %vm20547_vm12 = vcmask 121856   ;;  %v20552_v22 = vld [vmem:[#allocation43_spill] sm:$0xff] }
 0x43d   : > { %8281 = vrot.lane.b32.xlu1 %v12683_v9, %s20511_s29  ;;  %v9913_v53 = vsel %vm20547_vm12, %v9881_v46, %v9305_v17  ;;  %v3886_v59 = vrot.slane %v11852_v52, 5  ;;  %v3644_v55 = vrot.slane %v3643_v27, 4  ;;  %v3648_v23 = vrot.slane %v3646_v50, 5 }
 0x43e   : > { %v3883_v62 = vsel %vm13804_vm5, %v11915_v57, %v3882_v41  ;;  %v10224_v19 = vlaneseq  ;;  %v3658_v30 = vrot.slane %v3657_v3, 4  ;;  %v3662_v1 = vrot.slane %v3660_v18, 5 }
 0x43f   : > { %v3887_v10 = vsel %vm13804_vm5, %v11916_v34, %v3886_v59  ;;  %v9945_v47 = vsel %vm8466_vm11, %v9913_v53, %v9385_v49  ;;  %v12436_v43 = vcombine.low %v13360_v6, %v13361_v36  ;;  %vm20548_vm10 = vcmask 171008   ;;  %v10222_v49 = vld [vmem:[%s20177_s2] sm:$0xf] }
 0x440   : > { %v19584_v14 = vpop.permute.xlu1 %7995  ;;  %v12668_v12 = vcombine.low %v3883_v62, %v3887_v10  ;;  %v10225_v13 = vshrl.u32 %v10224_v19, 7  ;;  %v9977_v44 = vsel %vm20548_vm10, %v9945_v47, %v9465_v20  ;;  %v3649_v21 = vsel %vm13584_vm2, %v3644_v55, %v3648_v23  ;;  %v20555_v55 = vld [vmem:[#allocation95_spill] sm:$0xff]  ;;  %v13362_v47 = vld [vmem:[%s13560_s30 + $0x184] sm:$0x1] }
 0x441   : > { %8011 = vrot.lane.b32.xlu1 %v12636_v31, %s20530_s28  ;;  %v10009_v17 = vsel %vm8532_vm13, %v9977_v44, %v9577_v63  ;;  %v3663_v24 = vsel %vm13584_vm2, %v3658_v30, %v3662_v1  ;;  %v8309_v56 = vsel %vm8285_vm6, %v12436_v43, %v20549_v15  ;;  %vm20550_vm5 = vcmask 269312   ;;  %v20554_v31 = vld [vmem:[#allocation76_spill] sm:$0xff]  ;;  %v20556_v1 = vld [vmem:[#allocation97_spill] sm:$0xff] }
 0x442   : > { %v9657_v45 = vpop.permute.xlu0 %9656  ;;  %v10226_v29 = vsub.s32 0, %v10225_v13  ;;  %v10234_v26 = vsub.s32 2, %v10225_v13  ;;  %v10230_v4 = vsub.s32 1, %v10225_v13  ;;  %v10238_v40 = vsub.s32 3, %v10225_v13  ;;  %v13363_v13 = vld [vmem:[%s13560_s30 + $0x18c] sm:$0x1] }
 0x443   : > { %v10041_v35 = vsel %vm8565_vm14, %v10009_v17, %v9657_v45  ;;  %v8350_v7 = vsel %vm8334_vm7, %v8309_v56, %v20551_v51  ;;  %v4376_v9 = vshrl.u32 %v11947_v8, 16  ;;  %v4379_v39 = vshll.u32 %v11947_v8, 16  ;;  %v20558_v56 = vld [vmem:[#allocation6_spill] sm:$0xff] }
 0x444   : > { %v9737_v60 = vpop.permute.xlu1 %9736  ;;  %v12652_v37 = vcombine.low %v3649_v21, %v3663_v24  ;;  %v4390_v28 = vshrl.u32 %v11948_v16, 16  ;;  %v4393_v5 = vshll.u32 %v11948_v16, 16  ;;  %v19613_v48 = vrot.slane %v10222_v49, %v10226_v29 }
 0x445   : > { %8171 = vrot.lane.b32.xlu1 %v12668_v12, %s13473_s26  ;;  %v10073_v32 = vsel %vm8598_vm15, %v10041_v35, %v9737_v60  ;;  %v19615_v20 = vrot.slane %v10222_v49, %v10234_v26  ;;  %v8383_v52 = vsel %vm8367_vm8, %v8350_v7, %v20552_v22  ;;  %v19620_v61 = vrot.slane %v10222_v49, %v10230_v4  ;;  %v20559_v7 = vld [vmem:[#allocation39_spill] sm:$0xff]  ;;  %v20560_v22 = vld [vmem:[#allocation86_spill] sm:$0xff]  ;;  %s13380_s26 = scalar_lea.vmem %s20121_s11, 8192 }
 0x446   : > { %v10091_v58 = vsel %vm20550_vm5, %v10073_v32, 0  ;;  %v19608_v11 = vpop.permute.xlu0 %9034  ;;  %v8416_v0 = vsel %vm8400_vm9, %v8383_v52, %v20553_v38  ;;  %v19624_v2 = vrot.slane %v10222_v49, %v10238_v40  ;;  %v4378_v50 = vrot.slane %v4376_v9, 4  ;;  %v20557_v32 = vld [vmem:[#allocation112_spill] sm:$0xff]  ;;  %p13381_p12 = scmp.ne.s32.totalorder %s20121_s11, %s13380_s26 }
 0x447   : > { %10137 = vrot.lane.b32.xlu0 %v10091_v58, %s20514_s27  ;;  %v8449_v27 = vsel %vm20547_vm12, %v8416_v0, %v20554_v31  ;;  %v4381_v54 = vrot.slane %v4379_v39, 5  ;;  %v12684_v63 = vcombine.low %v11947_v8, %v11948_v16  ;;  %v4392_v57 = vrot.slane %v4390_v28, 4 }
 0x448   : > { %v4395_v46 = vrot.slane %v4393_v5, 5  ;;  %v8482_v23 = vsel %vm8466_vm11, %v8449_v27, %v20555_v55  ;;  %v4385_v12 = vshll.u32 %v13362_v47, 16  ;;  %v4399_v6 = vshll.u32 %v13363_v13, 16  ;;  %v20563_v47 = vld [vmem:[#allocation32_spill] sm:$0xff]  ;;  %p13382_p13 = pnand %p13381_p12, %p13540_p4 }
 0x449   : > { %v8515_v10 = vsel %vm20548_vm10, %v8482_v23, %v20556_v1  ;;  %v4382_v45 = vor.u32 %v4381_v54, %v4378_v50  ;;  %vm20561_vm12 = vcmask 293888  }
 0x44a   : > { %v10438_v3 = vpop.f32.mrb[0].mxu0  ;;  %v4396_v24 = vor.u32 %v4395_v46, %v4392_v57  ;;  %v8548_v49 = vsel %vm8532_vm13, %v8515_v10, %v20557_v32  ;;  %v4401_v5 = vrot.slane %v4399_v6, 5  ;;  %v20564_v6 = vld [vmem:[#allocation48_spill] sm:$0xff]  ;;  %p13383_p0 = pneg %p13382_p13 }
 0x44b   : > { %8091 = vrot.lane.b32.xlu0 %v12652_v37, %s13472_s21  ;;  %v10631_v18 = vpop.f32.mrb[0].mxu1  ;;  %v10439_v34 = vadd.f32 %v10438_v3, %v19613_v48  ;;  %v10440_v59 = vpop.f32.mrb[1].mxu0  ;;  %v8581_v58 = vsel %vm8565_vm14, %v8548_v49, %v20558_v56  ;;  %v4383_v39 = vrot.slane %v4382_v45, 4  ;;  %v4387_v37 = vrot.slane %v4385_v12, 5  ;;  %v20573_v49 = vld [vmem:[#allocation23_spill] sm:$0xff]  ;;  %v20574_v56 = vld [vmem:[#allocation10_spill] sm:$0xff] }
 0x44c   : > { %v10632_v53 = vadd.f32 %v10631_v18, %v19615_v20  ;;  %v10441_v19 = vadd.f32 %v10440_v59, %v19620_v61  ;;  %v10633_v30 = vpop.f32.mrb[1].mxu1  ;;  %v10442_v43 = vpop.f32.mrb[2].mxu0  ;;  %v8614_v9 = vsel %vm8598_vm15, %v8581_v58, %v20559_v7  ;;  %v4397_v28 = vrot.slane %v4396_v24, 4  ;;  %v20570_v24 = vld [vmem:[#allocation103_spill] sm:$0xff]  ;;  %s20129_s21 = scalar_lea.sflag [#allocation3], %s175_s6 }
 0x44d   : > { %v8076_v41 = vpop.permute.xlu0 %8075  ;;  %v19637_v62 = vpop.permute.xlu1 %9114  ;;  %v10634_v36 = vadd.f32 %v10633_v30, %v19624_v2  ;;  %v10443_v21 = vadd.f32 %v10442_v43, %v19613_v48  ;;  %v8647_v52 = vsel %vm20550_vm5, %v8614_v9, %v20560_v22  ;;  %v4388_v50 = vsel %vm13584_vm2, %v4383_v39, %v4387_v37  ;;  %v20566_v43 = vld [vmem:[#allocation63_spill] sm:$0xff]  ;;  %v20576_v39 = vld [vmem:[#allocation56_spill] sm:$0xff] }
 0x44e   : > { %v10635_v44 = vpop.f32.mrb[2].mxu1  ;;  %v12962_v17 = vpack.c.bf16 %v10441_v19, %v10439_v34  ;;  %v10444_v35 = vpop.f32.mrb[3].mxu0  ;;  %v8680_v31 = vsel %vm20561_vm12, %v8647_v52, %v19584_v14  ;;  %v4402_v54 = vsel %vm13584_vm2, %v4397_v28, %v4401_v5  ;;  %v20562_v19 = vld [vmem:[#allocation12_spill] sm:$0xff]  ;;  %vm20565_vm2 = vcmask 121856   ;;  %v20575_v7 = vld [vmem:[#allocation11_spill] sm:$0xff]  ;;  %v20577_v5 = vld [vmem:[#allocation29_spill] sm:$0xff] }
 0x44f   : > { %8283 = vrot.lane.b32.xlu0 %v12684_v63, %s20511_s29  ;;  %v10636_v8 = vadd.f32 %v10635_v44, %v19615_v20  ;;  %v10637_v60 = vpop.f32.mrb[3].mxu1  ;;  %v12963_v29 = vpack.c.bf16 %v10634_v36, %v10632_v53  ;;  %v10445_v26 = vadd.f32 %v10444_v35, %v19620_v61  ;;  %v8713_v27 = vsel %vm8697_vm3, %v8680_v31, %v8076_v41  ;;  %v13364_v41 = vld [vmem:[%s13560_s30 + $0xa0] sm:$0xf]  ;;  %v13365_v53 = vld [vmem:[%s13560_s30 + $0xa8] sm:$0xf]  ;;  %vm20568_vm10 = vmmov %vm20565_vm2  ;;  %s13384_s29 = sshll.u32 %s13477_s9, 4  ;;  %s13385_s29 = int_to_ptr.vmem [resolvable:$false] %s13384_s29 }
 0x450   : > { %v10638_v16 = vadd.f32 %v10637_v60, %v19624_v2  ;;  %11174 = vst [vmem:[%s19653_s10] sm:$0xff] %v12962_v17  ;;  %v12700_v34 = vcombine.low %v4388_v50, %v4402_v54  ;;  %v12437_v42 = vcombine.low %v13364_v41, %v13365_v53  ;;  %v20567_v17 = vld [vmem:[#allocation79_spill] sm:$0xff]  ;;  %vm20569_vm5 = vcmask 171008   ;;  %v13367_v35 = vld [vmem:[%s13560_s30 + $0xb8] sm:$0xf]  ;;  %v20578_v52 = vld [vmem:[#allocation93_spill] sm:$0xff]  ;;  %s13386_s23 = scalar_lea.vmem %s13385_s29, 16384  ;;  %p13387_p1 = scmp.lt.s32.totalorder %s20121_s11, %s13385_s29 }
 0x451   : > { %v9195_v4 = vpop.permute.xlu1 %9194  ;;  %11175 = vst [vmem:[%s19653_s10 + $0x8] sm:$0xff] %v12963_v29  ;;  %v12964_v40 = vpack.c.bf16 %v10445_v26, %v10443_v21  ;;  %v20571_v26 = vld [vmem:[#allocation99_spill] sm:$0xff]  ;;  %vm20572_vm12 = vmmov %vm20569_vm5  ;;  %v20581_v50 = vld [vmem:[#allocation45_spill] sm:$0xff]  ;;  %p13388_p2 = scmp.lt.s32.totalorder %s13386_s23, %s13380_s26 }
 0x452   : > { %v8156_v15 = vpop.permute.xlu0 %8155  ;;  %v12965_v51 = vpack.c.bf16 %v10638_v16, %v10636_v8  ;;  %v9787_v59 = vsel %vm8285_vm6, %v12700_v34, %v19576_v33  ;;  %v8312_v30 = vsel %vm8285_vm6, %v12437_v42, %v20562_v19  ;;  %v13366_v8 = vld [vmem:[%s13560_s30 + $0xb0] sm:$0xf] }
 0x453   : > { %11176 = vst [vmem:[%s19653_s10 + $0x10] sm:$0xff] %v12964_v40  ;;  %v8746_v63 = vsel %vm8730_vm4, %v8713_v27, %v8156_v15  ;;  %v9819_v23 = vsel %vm8334_vm7, %v9787_v59, %v19608_v11  ;;  %v8352_v12 = vsel %vm8334_vm7, %v8312_v30, %v20563_v47  ;;  %v12438_v60 = vcombine.low %v13366_v8, %v13367_v35  ;;  %v20584_v30 = vld [vmem:[#allocation78_spill] sm:$0xff]  ;;  %p13389_p3 = por %p13388_p2, %p13387_p1 }
 0x454   : > { %11177 = vst [vmem:[%s19653_s10 + $0x18] sm:$0xff] %v12965_v51  ;;  %v9851_v1 = vsel %vm8367_vm8, %v9819_v23, %v19637_v62  ;;  %v8385_v33 = vsel %vm8367_vm8, %v8352_v12, %v20564_v6  ;;  %v13369_v23 = vld [vmem:[%s13560_s30 + $0xc8] sm:$0xf]  ;;  %v20586_v6 = vld [vmem:[#allocation101_spill] sm:$0xff] }
 0x455   : > { %v9307_v38 = vpop.permute.xlu1 %9306  ;;  %v9883_v13 = vsel %vm8400_vm9, %v9851_v1, %v9195_v4  ;;  %v8418_v11 = vsel %vm8400_vm9, %v8385_v33, %v20566_v43  ;;  %v8315_v9 = vsel %vm8285_vm6, %v12438_v60, %v20575_v7  ;;  %v20589_v60 = vld [vmem:[#allocation114_spill] sm:$0xff]  ;;  %p13390_p5 = pnand %p13389_p3, %p13383_p0 }
 0x456   : > { %v8268_v0 = vpop.permute.xlu0 %8267  ;;  %v9915_v36 = vsel %vm20565_vm2, %v9883_v13, %v9307_v38  ;;  %v8451_v62 = vsel %vm20568_vm10, %v8418_v11, %v20567_v17  ;;  %v8354_v22 = vsel %vm8334_vm7, %v8315_v9, %v20577_v5  ;;  %vm20579_vm2 = vcmask 269312   ;;  %v20587_v17 = vld [vmem:[#allocation98_spill] sm:$0xff] }
 0x457   : > { %v8779_v3 = vsel %vm8763_vm1, %v8746_v63, %v8268_v0  ;;  %v8484_v29 = vsel %vm8466_vm11, %v8451_v62, %v20570_v24  ;;  %vm20580_vm10 = vmmov %vm20579_vm2  ;;  %v8387_v54 = vsel %vm8367_vm8, %v8354_v22, %v20581_v50  ;;  %v20595_v22 = vld [vmem:[#allocation50_spill] sm:$0xff] }
 0x458   : > { %v8517_v16 = vsel %vm20572_vm12, %v8484_v29, %v20571_v26  ;;  %vm20585_vm12 = vcmask 121856  }
 0x459   : > { %v10124_v18 = vpop.permute.xlu1 %10123  ;;  %v8550_v4 = vsel %vm8532_vm13, %v8517_v16, %v20573_v49 }
 0x45a   : > { %v9387_v57 = vpop.permute.xlu0 %9386  ;;  %v10164_v46 = vsel %vm10141_vm0, %v8779_v3, %v10124_v18  ;;  %v8583_v58 = vsel %vm8565_vm14, %v8550_v4, %v20574_v56  ;;  %v20591_v56 = vld [vmem:[#allocation14_spill] sm:$0xff] }
 0x45b   : > { %10507 = vmatmul.mubr.bf16.gmra.mrb[28].mxu0 %v10164_v46  ;;  %10700 = vmatmul.mubr.bf16.gmra.mrb[28].mxu1 %v10164_v46  ;;  %v9947_v44 = vsel %vm8466_vm11, %v9915_v36, %v9387_v57  ;;  %v8616_v37 = vsel %vm8598_vm15, %v8583_v58, %v20576_v39  ;;  %v20583_v46 = vld [vmem:[#allocation62_spill] sm:$0xff] }
 0x45c   : > { %10516 = vmatprep.mubr.bf16.mxu0 %v13476_v25  ;;  %10709 = vmatprep.mubr.bf16.mxu1 %v13476_v25  ;;  %v8649_v38 = vsel %vm20579_vm2, %v8616_v37, %v20578_v52  ;;  %v8420_v34 = vsel %vm8400_vm9, %v8387_v54, %v20583_v46  ;;  %vm20588_vm2 = vcmask 171008   ;;  %v20593_v39 = vld [vmem:[#allocation34_spill] sm:$0xff]  ;;  %v20597_v54 = vld [vmem:[#allocation81_spill] sm:$0xff] }
 0x45d   : > { %v9579_v14 = vpop.permute.xlu1 %9578  ;;  %v8453_v1 = vsel %vm20585_vm12, %v8420_v34, %v20584_v30  ;;  %v20599_v46 = vld [vmem:[#allocation102_spill] sm:$0xff]  ;;  %v20601_v30 = vld [vmem:[#allocation20_spill] sm:$0xff] }
 0x45e   : > { %v9467_v55 = vpop.permute.xlu0 %9466  ;;  %v8486_v33 = vsel %vm8466_vm11, %v8453_v1, %v20586_v6  ;;  %v20603_v6 = vld [vmem:[#allocation96_spill] sm:$0xff] }
 0x45f   : > { %v9979_v21 = vsel %vm20569_vm5, %v9947_v44, %v9467_v55  ;;  %vm20582_vm5 = vcmask 293888   ;;  %v13368_v55 = vld [vmem:[%s13560_s30 + $0xc0] sm:$0xf]  ;;  %v8519_v62 = vsel %vm20588_vm2, %v8486_v33, %v20587_v17 }
 0x460   : > { %v10011_v15 = vsel %vm8532_vm13, %v9979_v21, %v9579_v14  ;;  %v12439_v19 = vcombine.low %v13368_v55, %v13369_v23  ;;  %v8552_v24 = vsel %vm8532_vm13, %v8519_v62, %v20589_v60  ;;  %v20600_v55 = vld [vmem:[#allocation88_spill] sm:$0xff]  ;;  %v20606_v62 = vld [vmem:[#allocation47_spill] sm:$0xff] }
 0x461   : > { %v7998_v10 = vpop.permute.xlu1 %7997 }
 0x462   : > { %v8682_v63 = vsel %vm20582_vm5, %v8649_v38, %v7998_v10  ;;  %v8318_v58 = vsel %vm8285_vm6, %v12439_v19, %v20591_v56  ;;  %v20609_v56 = vld [vmem:[#allocation108_spill] sm:$0xff] }
 0x463   : > { %v8356_v37 = vsel %vm8334_vm7, %v8318_v58, %v20593_v39 }
 0x464   : > { %v8389_v52 = vsel %vm8367_vm8, %v8356_v37, %v20595_v22 }
 0x467   : > { %v9659_v45 = vpop.permute.xlu0 %9658 }
 0x468   : > { %v10043_v40 = vsel %vm8565_vm14, %v10011_v15, %v9659_v45 }
 0x46a   : > { %v8078_v32 = vpop.permute.xlu1 %8077 }
 0x46b   : > { %v8715_v14 = vsel %vm8697_vm3, %v8682_v63, %v8078_v32  ;;  %v20590_v32 = vld [vmem:[#allocation7_spill] sm:$0xff] }
 0x46c   : > { %v9739_v51 = vpop.permute.xlu0 %9738  ;;  %v10448_v27 = vpop.f32.mrb[4].mxu0  ;;  %v8585_v49 = vsel %vm8565_vm14, %v8552_v24, %v20590_v32 }
 0x46d   : > { %v10075_v28 = vsel %vm8598_vm15, %v10043_v40, %v9739_v51  ;;  %v10449_v3 = vadd.f32 %v10448_v27, %v19613_v48  ;;  %v10641_v18 = vpop.f32.mrb[4].mxu1  ;;  %v10450_v57 = vpop.f32.mrb[5].mxu0  ;;  %v20592_v40 = vld [vmem:[#allocation46_spill] sm:$0xff] }
 0x46e   : > { %v10092_v0 = vsel %vm20580_vm10, %v10075_v28, 0  ;;  %v8270_v31 = vpop.permute.xlu1 %8269  ;;  %v10642_v53 = vadd.f32 %v10641_v18, %v19615_v20  ;;  %v10451_v42 = vadd.f32 %v10450_v57, %v19620_v61  ;;  %v10643_v59 = vpop.f32.mrb[5].mxu1  ;;  %v8618_v51 = vsel %vm8598_vm15, %v8585_v49, %v20592_v40  ;;  %v20594_v28 = vld [vmem:[#allocation92_spill] sm:$0xff]  ;;  %v20598_v18 = vld [vmem:[#allocation115_spill] sm:$0xff] }
 0x46f   : > { %10139 = vrot.lane.b32.xlu1 %v10092_v0, %s20514_s27  ;;  %v10644_v47 = vadd.f32 %v10643_v59, %v19624_v2  ;;  %v10452_v12 = vpop.f32.mrb[6].mxu0  ;;  %v10645_v13 = vpop.f32.mrb[6].mxu1  ;;  %v8651_v5 = vsel %vm20580_vm10, %v8618_v51, %v20594_v28  ;;  %v20608_v49 = vld [vmem:[#allocation80_spill] sm:$0xff] }
 0x470   : > { %v8158_v41 = vpop.permute.xlu0 %8157  ;;  %v12966_v43 = vpack.c.bf16 %v10451_v42, %v10449_v3  ;;  %v10453_v11 = vadd.f32 %v10452_v12, %v19613_v48  ;;  %v10646_v44 = vadd.f32 %v10645_v13, %v19615_v20  ;;  %v10454_v45 = vpop.f32.mrb[7].mxu0  ;;  %v13371_v42 = vld [vmem:[%s13560_s30 + $0xd8] sm:$0xf] }
 0x471   : > { %v8748_v10 = vsel %vm8730_vm4, %v8715_v14, %v8158_v41  ;;  %v12967_v21 = vpack.c.bf16 %v10644_v47, %v10642_v53  ;;  %v10455_v8 = vadd.f32 %v10454_v45, %v19620_v61  ;;  %v10647_v35 = vpop.f32.mrb[7].mxu1  ;;  %v13370_v53 = vld [vmem:[%s13560_s30 + $0xd0] sm:$0xf]  ;;  %v20602_v47 = vld [vmem:[#allocation58_spill] sm:$0xff]  ;;  %v20610_v40 = vld [vmem:[#allocation100_spill] sm:$0xff] }
 0x472   : > { %v8000_v36 = vpop.permute.xlu1 %7999  ;;  %v8781_v26 = vsel %vm8763_vm1, %v8748_v10, %v8270_v31  ;;  %11178 = vst [vmem:[%s19653_s10 + $0x20] sm:$0xff] %v12966_v43  ;;  %v10648_v16 = vadd.f32 %v10647_v35, %v19624_v2  ;;  %v20596_v31 = vld [vmem:[#allocation65_spill] sm:$0xff]  ;;  %v12440_v59 = vcombine.low %v13370_v53, %v13371_v42  ;;  %v20605_v45 = vld [vmem:[#allocation31_spill] sm:$0xff]  ;;  %v20607_v35 = vld [vmem:[#allocation64_spill] sm:$0xff] }
 0x473   : > { %11179 = vst [vmem:[%s19653_s10 + $0x28] sm:$0xff] %v12967_v21  ;;  %v12968_v15 = vpack.c.bf16 %v10455_v8, %v10453_v11  ;;  %v8684_v38 = vsel %vm20582_vm5, %v8651_v5, %v8000_v36  ;;  %v8422_v27 = vsel %vm8400_vm9, %v8389_v52, %v20596_v31  ;;  %v20604_v43 = vld [vmem:[#allocation13_spill] sm:$0xff]  ;;  %v20612_v5 = vld [vmem:[#allocation16_spill] sm:$0xff]  ;;  %v20613_v52 = vld [vmem:[#allocation18_spill] sm:$0xff] }
 0x474   : > { %v10126_v29 = vpop.permute.xlu0 %10125  ;;  %v12969_v9 = vpack.c.bf16 %v10648_v16, %v10646_v44  ;;  %v8455_v63 = vsel %vm20585_vm12, %v8422_v27, %v20597_v54  ;;  %v8321_v11 = vsel %vm8285_vm6, %v12440_v59, %v20604_v43  ;;  %v13373_v16 = vld [vmem:[%s13560_s30 + $0xf8] sm:$0xf]  ;;  %v20619_v42 = vld [vmem:[#allocation83_spill] sm:$0xff]  ;;  %v13375_v43 = vld [vmem:[%s13560_s30 + $0x108] sm:$0xf] }
 0x475   : > { %v10167_v4 = vsel %vm10141_vm0, %v8781_v26, %v10126_v29  ;;  %11180 = vst [vmem:[%s19653_s10 + $0x30] sm:$0xff] %v12968_v15  ;;  %v8488_v57 = vsel %vm8466_vm11, %v8455_v63, %v20598_v18  ;;  %v8358_v17 = vsel %vm8334_vm7, %v8321_v11, %v20605_v45  ;;  %v13372_v26 = vld [vmem:[%s13560_s30 + $0xf0] sm:$0xf]  ;;  %v20614_v31 = vld [vmem:[#allocation36_spill] sm:$0xff]  ;;  %v20617_v18 = vld [vmem:[#allocation94_spill] sm:$0xff] }
 0x476   : > { %10517 = vmatmul.mubr.bf16.gmra.mrb[32].mxu0 %v10167_v4  ;;  %10710 = vmatmul.mubr.bf16.gmra.mrb[32].mxu1 %v10167_v4  ;;  %v8160_v7 = vpop.permute.xlu1 %8159  ;;  %11181 = vst [vmem:[%s19653_s10 + $0x38] sm:$0xff] %v12969_v9  ;;  %v8521_v34 = vsel %vm20588_vm2, %v8488_v57, %v20599_v46  ;;  %v8391_v21 = vsel %vm8367_vm8, %v8358_v17, %v20606_v62  ;;  %v20611_v9 = vld [vmem:[#allocation87_spill] sm:$0xff]  ;;  %v20616_v63 = vld [vmem:[#allocation52_spill] sm:$0xff] }
 0x477   : > { %10526 = vmatprep.mubr.bf16.mxu0 %v13476_v25  ;;  %10719 = vmatprep.mubr.bf16.mxu1 %v13476_v25  ;;  %v8554_v23 = vsel %vm8532_vm13, %v8521_v34, %v20600_v55  ;;  %v8424_v60 = vsel %vm8400_vm9, %v8391_v21, %v20607_v35  ;;  %v12441_v32 = vcombine.low %v13372_v26, %v13373_v16  ;;  %v20618_v34 = vld [vmem:[#allocation67_spill] sm:$0xff]  ;;  %v20624_v35 = vld [vmem:[#allocation61_spill] sm:$0xff] }
 0x478   : > { %v8080_v0 = vpop.permute.xlu0 %8079  ;;  %v8587_v1 = vsel %vm8565_vm14, %v8554_v23, %v20601_v30  ;;  %v8457_v4 = vsel %vm20585_vm12, %v8424_v60, %v20608_v49  ;;  %v20620_v23 = vld [vmem:[#allocation117_spill] sm:$0xff] }
 0x479   : > { %v8717_v50 = vsel %vm8697_vm3, %v8684_v38, %v8080_v0  ;;  %v8620_v12 = vsel %vm8598_vm15, %v8587_v1, %v20602_v47  ;;  %v8490_v58 = vsel %vm8466_vm11, %v8457_v4, %v20609_v56  ;;  %v8324_v22 = vsel %vm8285_vm6, %v12441_v32, %v20612_v5  ;;  %v20621_v30 = vld [vmem:[#allocation105_spill] sm:$0xff]  ;;  %v20622_v47 = vld [vmem:[#allocation107_spill] sm:$0xff] }
 0x47a   : > { %v10128_v3 = vpop.permute.xlu1 %10127  ;;  %v8750_v14 = vsel %vm8730_vm4, %v8717_v50, %v8160_v7  ;;  %v8653_v33 = vsel %vm20580_vm10, %v8620_v12, %v20603_v6  ;;  %v8523_v51 = vsel %vm20588_vm2, %v8490_v58, %v20610_v40  ;;  %v8360_v27 = vsel %vm8334_vm7, %v8324_v22, %v20614_v31  ;;  %v20615_v50 = vld [vmem:[#allocation57_spill] sm:$0xff] }
 0x47b   : > { %v8556_v39 = vsel %vm8532_vm13, %v8523_v51, %v20611_v9  ;;  %v20625_v49 = vld [vmem:[#allocation5_spill] sm:$0xff] }
 0x47c   : > { %v8272_v41 = vpop.permute.xlu0 %8271  ;;  %v8589_v38 = vsel %vm8565_vm14, %v8556_v39, %v20613_v52  ;;  %v20627_v31 = vld [vmem:[#allocation33_spill] sm:$0xff] }
 0x47d   : > { %v8783_v19 = vsel %vm8763_vm1, %v8750_v14, %v8272_v41  ;;  %v8622_v54 = vsel %vm8598_vm15, %v8589_v38, %v20615_v50 }
 0x47e   : > { %v10170_v10 = vsel %vm10141_vm0, %v8783_v19, %v10128_v3  ;;  %v8393_v3 = vsel %vm8367_vm8, %v8360_v27, %v20616_v63  ;;  %v8655_v57 = vsel %vm20580_vm10, %v8622_v54, %v20617_v18  ;;  %v20628_v54 = vld [vmem:[#allocation49_spill] sm:$0xff]  ;;  %v20629_v18 = vld [vmem:[#allocation66_spill] sm:$0xff] }
 0x47f   : > { %10527 = vmatmul.mubr.bf16.gmra.mrb[36].mxu0 %v10170_v10  ;;  %10720 = vmatmul.mubr.bf16.gmra.mrb[36].mxu1 %v10170_v10  ;;  %v8082_v13 = vpop.permute.xlu1 %8081  ;;  %v8426_v14 = vsel %vm8400_vm9, %v8393_v3, %v20618_v34 }
 0x480   : > { %v8002_v36 = vpop.permute.xlu0 %8001  ;;  %10536 = vmatprep.mubr.bf16.mxu0 %v13476_v25  ;;  %10729 = vmatprep.mubr.bf16.mxu1 %v13476_v25  ;;  %v8459_v59 = vsel %vm20585_vm12, %v8426_v14, %v20619_v42  ;;  %v20630_v14 = vld [vmem:[#allocation82_spill] sm:$0xff] }
 0x481   : > { %v8686_v44 = vsel %vm20582_vm5, %v8653_v33, %v8002_v36  ;;  %v8492_v19 = vsel %vm8466_vm11, %v8459_v59, %v20620_v23  ;;  %v13374_v36 = vld [vmem:[%s13560_s30 + $0x100] sm:$0xf]  ;;  %v20631_v59 = vld [vmem:[#allocation116_spill] sm:$0xff] }
 0x482   : > { %v8719_v24 = vsel %vm8697_vm3, %v8686_v44, %v8082_v13  ;;  %v8525_v1 = vsel %vm20588_vm2, %v8492_v19, %v20621_v30  ;;  %v12442_v11 = vcombine.low %v13374_v36, %v13375_v43  ;;  %v20623_v44 = vld [vmem:[#allocation26_spill] sm:$0xff]  ;;  %v20632_v23 = vld [vmem:[#allocation104_spill] sm:$0xff]  ;;  %v20635_v36 = vld [vmem:[#allocation59_spill] sm:$0xff] }
 0x483   : > { %v8274_v8 = vpop.permute.xlu1 %8273  ;;  %v8558_v12 = vsel %vm8532_vm13, %v8525_v1, %v20622_v47  ;;  %v20633_v30 = vld [vmem:[#allocation24_spill] sm:$0xff] }
 0x484   : > { %v8162_v29 = vpop.permute.xlu0 %8161  ;;  %v8591_v45 = vsel %vm8565_vm14, %v8558_v12, %v20623_v44  ;;  %v20634_v12 = vld [vmem:[#allocation19_spill] sm:$0xff] }
 0x485   : > { %v8752_v15 = vsel %vm8730_vm4, %v8719_v24, %v8162_v29  ;;  %v8624_v60 = vsel %vm8598_vm15, %v8591_v45, %v20624_v35 }
 0x486   : > { %v8785_v28 = vsel %vm8763_vm1, %v8752_v15, %v8274_v8  ;;  %v8657_v4 = vsel %vm20580_vm10, %v8624_v60, %v20625_v49  ;;  %v20637_v49 = vld [vmem:[#allocation21_spill] sm:$0xff] }
 0x487   : > { %v8004_v7 = vpop.permute.xlu1 %8003 }
 0x488   : > { %v10130_v37 = vpop.permute.xlu0 %10129  ;;  %v8688_v41 = vsel %vm20582_vm5, %v8655_v57, %v8004_v7 }
 0x489   : > { %v10173_v0 = vsel %vm10141_vm0, %v8785_v28, %v10130_v37  ;;  %v20626_v28 = vld [vmem:[#allocation15_spill] sm:$0xff] }
 0x48a   : > { %10537 = vmatmul.mubr.bf16.gmra.mrb[40].mxu0 %v10173_v0  ;;  %10730 = vmatmul.mubr.bf16.gmra.mrb[40].mxu1 %v10173_v0  ;;  %v8327_v5 = vsel %vm8285_vm6, %v12442_v11, %v20626_v28  ;;  %v20636_v11 = vld [vmem:[#allocation111_spill] sm:$0xff] }
 0x48b   : > { %v8164_v46 = vpop.permute.xlu1 %8163  ;;  %10546 = vmatprep.mubr.bf16.mxu0 %v13476_v25  ;;  %10739 = vmatprep.mubr.bf16.mxu1 %v13476_v25  ;;  %v8362_v27 = vsel %vm8334_vm7, %v8327_v5, %v20627_v31  ;;  %v20642_v28 = vld [vmem:[#allocation119_spill] sm:$0xff] }
 0x48c   : > { %v8084_v53 = vpop.permute.xlu0 %8083  ;;  %v8395_v63 = vsel %vm8367_vm8, %v8362_v27, %v20628_v54  ;;  %v20645_v27 = vld [vmem:[#allocation22_spill] sm:$0xff]  ;;  %v20646_v54 = vld [vmem:[#allocation72_spill] sm:$0xff] }
 0x48d   : > { %v8721_v55 = vsel %vm8697_vm3, %v8688_v41, %v8084_v53  ;;  %v8428_v57 = vsel %vm8400_vm9, %v8395_v63, %v20629_v18 }
 0x48e   : > { %v8754_v13 = vsel %vm8730_vm4, %v8721_v55, %v8164_v46  ;;  %v8461_v41 = vsel %vm20585_vm12, %v8428_v57, %v20630_v14  ;;  %v20647_v57 = vld [vmem:[#allocation121_spill] sm:$0xff] }
 0x48f   : > { %v10132_v10 = vpop.permute.xlu1 %10131  ;;  %v10458_v33 = vpop.f32.mrb[8].mxu0  ;;  %v8494_v55 = vsel %vm8466_vm11, %v8461_v41, %v20631_v59 }
 0x490   : > { %v8276_v6 = vpop.permute.xlu0 %8275  ;;  %v10459_v62 = vadd.f32 %v10458_v33, %v19613_v48  ;;  %v10651_v21 = vpop.f32.mrb[8].mxu1  ;;  %v8527_v19 = vsel %vm20588_vm2, %v8494_v55, %v20632_v23 }
 0x491   : > { %v8787_v17 = vsel %vm8763_vm1, %v8754_v13, %v8276_v6  ;;  %v10460_v8 = vpop.f32.mrb[9].mxu0  ;;  %v10652_v29 = vadd.f32 %v10651_v21, %v19615_v20  ;;  %v10653_v16 = vpop.f32.mrb[9].mxu1  ;;  %v8560_v1 = vsel %vm8532_vm13, %v8527_v19, %v20633_v30 }
 0x492   : > { %v10176_v24 = vsel %vm10141_vm0, %v8787_v17, %v10132_v10  ;;  %v10461_v26 = vadd.f32 %v10460_v8, %v19620_v61  ;;  %v10462_v32 = vpop.f32.mrb[10].mxu0  ;;  %v10654_v15 = vadd.f32 %v10653_v16, %v19624_v2  ;;  %v10655_v58 = vpop.f32.mrb[10].mxu1  ;;  %v8593_v13 = vsel %vm8565_vm14, %v8560_v1, %v20634_v12 }
 0x493   : > { %10547 = vmatmul.mubr.bf16.gmra.mrb[44].mxu0 %v10176_v24  ;;  %10740 = vmatmul.mubr.bf16.gmra.mrb[44].mxu1 %v10176_v24  ;;  %v10463_v56 = vadd.f32 %v10462_v32, %v19613_v48  ;;  %v10464_v40 = vpop.f32.mrb[11].mxu0  ;;  %v10656_v9 = vadd.f32 %v10655_v58, %v19615_v20  ;;  %v10657_v37 = vpop.f32.mrb[11].mxu1  ;;  %v8626_v43 = vsel %vm8598_vm15, %v8593_v13, %v20635_v36  ;;  %v20639_v58 = vld [vmem:[#allocation53_spill] sm:$0xff] }
 0x494   : > { %v8006_v51 = vpop.permute.xlu0 %8005  ;;  %10556 = vmatprep.mubr.bf16.mxu0 %v13476_v25  ;;  %10749 = vmatprep.mubr.bf16.mxu1 %v13476_v25  ;;  %v12970_v7 = vpack.c.bf16 %v10461_v26, %v10459_v62  ;;  %v10465_v39 = vadd.f32 %v10464_v40, %v19620_v61  ;;  %v12971_v38 = vpack.c.bf16 %v10654_v15, %v10652_v29  ;;  %v13376_v29 = vld [vmem:[%s13560_s30 + $0x110] sm:$0xf]  ;;  %v13377_v26 = vld [vmem:[%s13560_s30 + $0x118] sm:$0xf]  ;;  %v20638_v15 = vld [vmem:[#allocation38_spill] sm:$0xff] }
 0x495   : > { %v8086_v22 = vpop.permute.xlu1 %8085  ;;  %v8690_v52 = vsel %vm20582_vm5, %v8657_v4, %v8006_v51  ;;  %v10658_v0 = vadd.f32 %v10657_v37, %v19624_v2  ;;  %v8659_v44 = vsel %vm20580_vm10, %v8626_v43, %v20636_v11  ;;  %v12443_v16 = vcombine.low %v13376_v29, %v13377_v26  ;;  %v20640_v51 = vld [vmem:[#allocation69_spill] sm:$0xff] }
 0x496   : > { %11182 = vst [vmem:[%s19653_s10 + $0x40] sm:$0xff] %v12970_v7  ;;  %v12972_v50 = vpack.c.bf16 %v10465_v39, %v10463_v56  ;;  %11183 = vst [vmem:[%s19653_s10 + $0x48] sm:$0xff] %v12971_v38  ;;  %v8723_v46 = vsel %vm8697_vm3, %v8690_v52, %v8086_v22  ;;  %v20641_v39 = vld [vmem:[#allocation85_spill] sm:$0xff]  ;;  %v20643_v52 = vld [vmem:[#allocation110_spill] sm:$0xff] }
 0x497   : > { %v12973_v3 = vpack.c.bf16 %v10658_v0, %v10656_v9  ;;  %v8330_v4 = vsel %vm8285_vm6, %v12443_v16, %v20637_v49  ;;  %v20644_v0 = vld [vmem:[#allocation113_spill] sm:$0xff]  ;;  %v20649_v16 = vld [vmem:[#allocation35_spill] sm:$0xff] }
 0x498   : > { %v8166_v34 = vpop.permute.xlu0 %8165  ;;  %11184 = vst [vmem:[%s19653_s10 + $0x50] sm:$0xff] %v12972_v50  ;;  %v8364_v56 = vsel %vm8334_vm7, %v8330_v4, %v20638_v15  ;;  %v20648_v29 = vld [vmem:[#allocation17_spill] sm:$0xff]  ;;  %v20650_v49 = vld [vmem:[#allocation51_spill] sm:$0xff]  ;;  %v20651_v15 = vld [vmem:[#allocation68_spill] sm:$0xff] }
 0x499   : > { %v8278_v53 = vpop.permute.xlu1 %8277  ;;  %v8756_v42 = vsel %vm8730_vm4, %v8723_v46, %v8166_v34  ;;  %11185 = vst [vmem:[%s19653_s10 + $0x58] sm:$0xff] %v12973_v3  ;;  %v8397_v40 = vsel %vm8367_vm8, %v8364_v56, %v20639_v58  ;;  %v20652_v58 = vld [vmem:[#allocation84_spill] sm:$0xff] }
 0x49a   : > { %v8789_v47 = vsel %vm8763_vm1, %v8756_v42, %v8278_v53  ;;  %v8430_v7 = vsel %vm8400_vm9, %v8397_v40, %v20640_v51 }
 0x49b   : > { %v8463_v37 = vsel %vm20585_vm12, %v8430_v7, %v20641_v39  ;;  %v20653_v7 = vld [vmem:[#allocation118_spill] sm:$0xff] }
 0x49c   : > { %v8496_v5 = vsel %vm8466_vm11, %v8463_v37, %v20642_v28 }
 0x49d   : > { %v10134_v10 = vpop.permute.xlu0 %10133  ;;  %v8008_v6 = vpop.permute.xlu1 %8007  ;;  %v8529_v38 = vsel %vm20588_vm2, %v8496_v5, %v20643_v52 }
 0x49e   : > { %v10179_v33 = vsel %vm10141_vm0, %v8789_v47, %v10134_v10  ;;  %v8692_v45 = vsel %vm20582_vm5, %v8659_v44, %v8008_v6  ;;  %v8562_v31 = vsel %vm8532_vm13, %v8529_v38, %v20644_v0 }
 0x49f   : > { %10557 = vmatmul.mubr.bf16.gmra.mrb[48].mxu0 %v10179_v33  ;;  %10750 = vmatmul.mubr.bf16.gmra.mrb[48].mxu1 %v10179_v33  ;;  %v8595_v50 = vsel %vm8565_vm14, %v8562_v31, %v20645_v27 }
 0x4a0   : > { %10566 = vmatprep.mubr.bf16.mxu0 %v13476_v25  ;;  %10759 = vmatprep.mubr.bf16.mxu1 %v13476_v25  ;;  %v8628_v63 = vsel %vm8598_vm15, %v8595_v50, %v20646_v54  ;;  %v20656_v50 = vld [vmem:[#allocation109_spill] sm:$0xff] }
 0x4a1   : > { %v8088_v17 = vpop.permute.xlu0 %8087  ;;  %v8168_v21 = vpop.permute.xlu1 %8167  ;;  %v8661_v46 = vsel %vm20580_vm10, %v8628_v63, %v20647_v57 }
 0x4a2   : > { %v8725_v62 = vsel %vm8697_vm3, %v8692_v45, %v8088_v17 }
 0x4a3   : > { %v8758_v8 = vsel %vm8730_vm4, %v8725_v62, %v8168_v21 }
 0x4a5   : > { %v8280_v35 = vpop.permute.xlu0 %8279  ;;  %v10136_v24 = vpop.permute.xlu1 %10135 }
 0x4a6   : > { %v8791_v60 = vsel %vm8763_vm1, %v8758_v8, %v8280_v35  ;;  %v13378_v35 = vld [vmem:[%s13560_s30 + $0x120] sm:$0xf] }
 0x4a7   : > { %v10182_v32 = vsel %vm10141_vm0, %v8791_v60, %v10136_v24  ;;  %v13379_v60 = vld [vmem:[%s13560_s30 + $0x128] sm:$0xf]  ;;  %s13026_s30 = sshll.u32 %s13450_s15, 13 }
 0x4a8   : > { %10567 = vmatmul.mubr.bf16.gmra.mrb[52].mxu0 %v10182_v32  ;;  %10760 = vmatmul.mubr.bf16.gmra.mrb[52].mxu1 %v10182_v32  ;;  %v12444_v24 = vcombine.low %v13378_v35, %v13379_v60  ;;  %s20119_s15 = scalar_lea.hbm %s20178_s3, %s13026_s30 }
 0x4a9   : > { %10576 = vmatprep.mubr.bf16.mxu0 %v13476_v25  ;;  %10769 = vmatprep.mubr.bf16.mxu1 %v13476_v25  ;;  %v8010_v22 = vpop.permute.xlu0 %8009 }
 0x4aa   : > { %v8694_v41 = vsel %vm20582_vm5, %v8661_v46, %v8010_v22  ;;  %v8333_v26 = vsel %vm8285_vm6, %v12444_v24, %v20648_v29  ;;  %v20654_v22 = vld [vmem:[#allocation106_spill] sm:$0xff]  ;;  %vm20655_vm6 = vmmov %vm20588_vm2 }
 0x4ab   : > { %v8090_v9 = vpop.permute.xlu1 %8089  ;;  %v8366_v32 = vsel %vm8334_vm7, %v8333_v26, %v20649_v16  ;;  %vm20660_vm7 = vmmov %vm20580_vm10 }
 0x4ac   : > { %v8727_v23 = vsel %vm8697_vm3, %v8694_v41, %v8090_v9  ;;  %v8399_v4 = vsel %vm8367_vm8, %v8366_v32, %v20650_v49  ;;  %vm20661_vm8 = vmmov %vm20582_vm5 }
 0x4ad   : > { %v8170_v3 = vpop.permute.xlu0 %8169  ;;  %v8432_v56 = vsel %vm8400_vm9, %v8399_v4, %v20651_v15 }
 0x4ae   : > { %v8760_v44 = vsel %vm8730_vm4, %v8727_v23, %v8170_v3  ;;  %v8465_v40 = vsel %vm20585_vm12, %v8432_v56, %v20652_v58  ;;  %v20658_v23 = vld [vmem:[#allocation71_spill] sm:$0xff] }
 0x4af   : > { %v8282_v18 = vpop.permute.xlu1 %8281  ;;  %v8498_v9 = vsel %vm8466_vm11, %v8465_v40, %v20653_v7 }
 0x4b0   : > { %v8793_v45 = vsel %vm8763_vm1, %v8760_v44, %v8282_v18  ;;  %v8531_v52 = vsel %vm20655_vm6, %v8498_v9, %v20654_v22 }
 0x4b1   : > { %v8564_v54 = vsel %vm8532_vm13, %v8531_v52, %v20656_v50 }
 0x4b3   : > { %v10468_v34 = vpop.f32.mrb[12].mxu0 }
 0x4b4   : > { %v10661_v14 = vpop.f32.mrb[12].mxu1  ;;  %v10469_v53 = vadd.f32 %v10468_v34, %v19613_v48  ;;  %v10470_v59 = vpop.f32.mrb[13].mxu0 }
 0x4b5   : > { %v10662_v42 = vadd.f32 %v10661_v14, %v19615_v20  ;;  %v10663_v55 = vpop.f32.mrb[13].mxu1  ;;  %v10471_v19 = vadd.f32 %v10470_v59, %v19620_v61  ;;  %v10472_v1 = vpop.f32.mrb[14].mxu0 }
 0x4b6   : > { %v10664_v30 = vadd.f32 %v10663_v55, %v19624_v2  ;;  %v10665_v10 = vpop.f32.mrb[14].mxu1  ;;  %v10473_v47 = vadd.f32 %v10472_v1, %v19613_v48  ;;  %v10474_v13 = vpop.f32.mrb[15].mxu0 }
 0x4b7   : > { %v10666_v12 = vadd.f32 %v10665_v10, %v19615_v20  ;;  %v10667_v6 = vpop.f32.mrb[15].mxu1  ;;  %v12974_v33 = vpack.c.bf16 %v10471_v19, %v10469_v53  ;;  %v10475_v43 = vadd.f32 %v10474_v13, %v19620_v61  ;;  %v8012_v55 = vpop.permute.xlu1 %8011  ;;  %v20659_v10 = vld [vmem:[#allocation120_spill] sm:$0xff] }
 0x4b8   : > { %v12975_v36 = vpack.c.bf16 %v10664_v30, %v10662_v42  ;;  %v10668_v11 = vadd.f32 %v10667_v6, %v19624_v2  ;;  %v20657_v42 = vld [vmem:[#allocation90_spill] sm:$0xff] }
 0x4b9   : > { %11186 = vst [vmem:[%s19653_s10 + $0x60] sm:$0xff] %v12974_v33  ;;  %v12976_v17 = vpack.c.bf16 %v10475_v43, %v10473_v47  ;;  %v10138_v21 = vpop.permute.xlu0 %10137  ;;  %v8597_v59 = vsel %vm8565_vm14, %v8564_v54, %v20657_v42 }
 0x4ba   : > { %11187 = vst [vmem:[%s19653_s10 + $0x68] sm:$0xff] %v12975_v36  ;;  %v12977_v62 = vpack.c.bf16 %v10668_v11, %v10666_v12  ;;  %v10185_v8 = vsel %vm10141_vm0, %v8793_v45, %v10138_v21  ;;  %v8630_v19 = vsel %vm8598_vm15, %v8597_v59, %v20658_v23 }
 0x4bb   : > { %11188 = vst [vmem:[%s19653_s10 + $0x70] sm:$0xff] %v12976_v17  ;;  %10577 = vmatmul.mubr.bf16.gmra.mrb[56].mxu0 %v10185_v8  ;;  %10770 = vmatmul.mubr.bf16.gmra.mrb[56].mxu1 %v10185_v8  ;;  %v8663_v47 = vsel %vm20660_vm7, %v8630_v19, %v20659_v10  ;;  %v8172_v6 = vpop.permute.xlu1 %8171 }
 0x4bc   : > { %11189 = vst [vmem:[%s19653_s10 + $0x78] sm:$0xff] %v12977_v62  ;;  %10586 = vmatprep.mubr.bf16.mxu0 %v13476_v25  ;;  %10779 = vmatprep.mubr.bf16.mxu1 %v13476_v25  ;;  %v8696_v12 = vsel %vm20661_vm8, %v8663_v47, %v8012_v55 }
 0x4bd   : > { %v8092_v46 = vpop.permute.xlu0 %8091 }
 0x4be   : > { %v8729_v13 = vsel %vm8697_vm3, %v8696_v12, %v8092_v46 }
 0x4bf   : > { %v8762_v36 = vsel %vm8730_vm4, %v8729_v13, %v8172_v6 }
 0x4c1   : > { %v8284_v33 = vpop.permute.xlu0 %8283 }
 0x4c2   : > { %v8795_v43 = vsel %vm8763_vm1, %v8762_v36, %v8284_v33 }
 0x4d4   : > { %v10478_v51 = vpop.f32.mrb[16].mxu0  ;;  %v10671_v25 = vpop.f32.mrb[16].mxu1 }
 0x4d5   : > { %v10479_v39 = vadd.f32 %v10478_v51, %v19613_v48  ;;  %v10672_v37 = vadd.f32 %v10671_v25, %v19615_v20  ;;  %v10480_v28 = vpop.f32.mrb[17].mxu0  ;;  %v10673_v5 = vpop.f32.mrb[17].mxu1 }
 0x4d6   : > { %v10481_v38 = vadd.f32 %v10480_v28, %v19620_v61  ;;  %v10674_v0 = vadd.f32 %v10673_v5, %v19624_v2  ;;  %v10482_v31 = vpop.f32.mrb[18].mxu0  ;;  %v10675_v27 = vpop.f32.mrb[18].mxu1 }
 0x4d7   : > { %v10483_v63 = vadd.f32 %v10482_v31, %v19613_v48  ;;  %v10676_v3 = vadd.f32 %v10675_v27, %v19615_v20  ;;  %v10484_v18 = vpop.f32.mrb[19].mxu0  ;;  %v10677_v57 = vpop.f32.mrb[19].mxu1 }
 0x4d8   : > { %v12978_v34 = vpack.c.bf16 %v10481_v38, %v10479_v39  ;;  %v12979_v14 = vpack.c.bf16 %v10674_v0, %v10672_v37  ;;  %v10485_v41 = vadd.f32 %v10484_v18, %v19620_v61  ;;  %v10678_v53 = vadd.f32 %v10677_v57, %v19624_v2 }
 0x4da   : > { %11190 = vst [vmem:[%s19653_s10 + $0x80] sm:$0xff] %v12978_v34  ;;  %11191 = vst [vmem:[%s19653_s10 + $0x88] sm:$0xff] %v12979_v14  ;;  %v12980_v30 = vpack.c.bf16 %v10485_v41, %v10483_v63  ;;  %v12981_v1 = vpack.c.bf16 %v10678_v53, %v10676_v3 }
 0x4dc   : > { %11192 = vst [vmem:[%s19653_s10 + $0x90] sm:$0xff] %v12980_v30  ;;  %11193 = vst [vmem:[%s19653_s10 + $0x98] sm:$0xff] %v12981_v1 }
 0x4e1   : > { %v10140_v11 = vpop.permute.xlu1 %10139 }
 0x4e2   : > { %v10188_v44 = vsel %vm10141_vm0, %v8795_v43, %v10140_v11 }
 0x4e3   : > { %10587 = vmatmul.mubr.bf16.gmra.mrb[60].mxu0 %v10188_v44  ;;  %10780 = vmatmul.mubr.bf16.gmra.mrb[60].mxu1 %v10188_v44 }
 0x4f0   : > { %v10488_v45 = vpop.f32.mrb[20].mxu0 }
 0x4f1   : > { %v10489_v17 = vadd.f32 %v10488_v45, %v19613_v48  ;;  %v10681_v62 = vpop.f32.mrb[20].mxu1  ;;  %v10490_v21 = vpop.f32.mrb[21].mxu0 }
 0x4f2   : > { %v10682_v8 = vadd.f32 %v10681_v62, %v19615_v20  ;;  %v10491_v35 = vadd.f32 %v10490_v21, %v19620_v61  ;;  %v10683_v60 = vpop.f32.mrb[21].mxu1  ;;  %v10492_v24 = vpop.f32.mrb[22].mxu0 }
 0x4f3   : > { %v10684_v29 = vadd.f32 %v10683_v60, %v19624_v2  ;;  %v10493_v26 = vadd.f32 %v10492_v24, %v19613_v48  ;;  %v10685_v16 = vpop.f32.mrb[22].mxu1  ;;  %v10494_v32 = vpop.f32.mrb[23].mxu0 }
 0x4f4   : > { %v12982_v49 = vpack.c.bf16 %v10491_v35, %v10489_v17  ;;  %v10686_v4 = vadd.f32 %v10685_v16, %v19615_v20  ;;  %v10495_v15 = vadd.f32 %v10494_v32, %v19620_v61  ;;  %v10687_v56 = vpop.f32.mrb[23].mxu1 }
 0x4f5   : > { %v12983_v58 = vpack.c.bf16 %v10684_v29, %v10682_v8  ;;  %v10688_v40 = vadd.f32 %v10687_v56, %v19624_v2 }
 0x4f6   : > { %11194 = vst [vmem:[%s19653_s10 + $0xa0] sm:$0xff] %v12982_v49  ;;  %v12984_v51 = vpack.c.bf16 %v10495_v15, %v10493_v26 }
 0x4f7   : > { %11195 = vst [vmem:[%s19653_s10 + $0xa8] sm:$0xff] %v12983_v58  ;;  %v12985_v25 = vpack.c.bf16 %v10688_v40, %v10686_v4 }
 0x4f8   : > { %11196 = vst [vmem:[%s19653_s10 + $0xb0] sm:$0xff] %v12984_v51 }
 0x4f9   : > { %11197 = vst [vmem:[%s19653_s10 + $0xb8] sm:$0xff] %v12985_v25 }
 0x50d   : > { %v10498_v7 = vpop.f32.mrb[24].mxu0  ;;  %v10691_v9 = vpop.f32.mrb[24].mxu1 }
 0x50e   : > { %v10499_v39 = vadd.f32 %v10498_v7, %v19613_v48  ;;  %v10692_v37 = vadd.f32 %v10691_v9, %v19615_v20  ;;  %v10500_v28 = vpop.f32.mrb[25].mxu0  ;;  %v10693_v5 = vpop.f32.mrb[25].mxu1 }
 0x50f   : > { %v10501_v22 = vadd.f32 %v10500_v28, %v19620_v61  ;;  %v10694_v52 = vadd.f32 %v10693_v5, %v19624_v2  ;;  %v10502_v38 = vpop.f32.mrb[26].mxu0  ;;  %v10695_v0 = vpop.f32.mrb[26].mxu1 }
 0x510   : > { %v10503_v31 = vadd.f32 %v10502_v38, %v19613_v48  ;;  %v10696_v27 = vadd.f32 %v10695_v0, %v19615_v20  ;;  %v10504_v50 = vpop.f32.mrb[27].mxu0  ;;  %v10697_v54 = vpop.f32.mrb[27].mxu1 }
 0x511   : > { %v12986_v63 = vpack.c.bf16 %v10501_v22, %v10499_v39  ;;  %v12987_v3 = vpack.c.bf16 %v10694_v52, %v10692_v37  ;;  %v10505_v18 = vadd.f32 %v10504_v50, %v19620_v61  ;;  %v10698_v57 = vadd.f32 %v10697_v54, %v19624_v2 }
 0x513   : > { %11198 = vst [vmem:[%s19653_s10 + $0xc0] sm:$0xff] %v12986_v63  ;;  %11199 = vst [vmem:[%s19653_s10 + $0xc8] sm:$0xff] %v12987_v3  ;;  %v12988_v46 = vpack.c.bf16 %v10505_v18, %v10503_v31  ;;  %v12989_v34 = vpack.c.bf16 %v10698_v57, %v10696_v27 }
 0x515   : > { %11200 = vst [vmem:[%s19653_s10 + $0xd0] sm:$0xff] %v12988_v46  ;;  %11201 = vst [vmem:[%s19653_s10 + $0xd8] sm:$0xff] %v12989_v34 }
 0x52e   : > { %v10508_v14 = vpop.f32.mrb[28].mxu0  ;;  %v10701_v41 = vpop.f32.mrb[28].mxu1 }
 0x52f   : > { %v10509_v53 = vadd.f32 %v10508_v14, %v19613_v48  ;;  %v10702_v42 = vadd.f32 %v10701_v41, %v19615_v20  ;;  %v10510_v59 = vpop.f32.mrb[29].mxu0  ;;  %v10703_v55 = vpop.f32.mrb[29].mxu1 }
 0x530   : > { %v10511_v23 = vadd.f32 %v10510_v59, %v19620_v61  ;;  %v10704_v19 = vadd.f32 %v10703_v55, %v19624_v2  ;;  %v10512_v30 = vpop.f32.mrb[30].mxu0  ;;  %v10705_v1 = vpop.f32.mrb[30].mxu1 }
 0x531   : > { %v10513_v10 = vadd.f32 %v10512_v30, %v19613_v48  ;;  %v10706_v47 = vadd.f32 %v10705_v1, %v19615_v20  ;;  %v10514_v12 = vpop.f32.mrb[31].mxu0  ;;  %v10707_v13 = vpop.f32.mrb[31].mxu1 }
 0x532   : > { %v12990_v6 = vpack.c.bf16 %v10511_v23, %v10509_v53  ;;  %v12991_v33 = vpack.c.bf16 %v10704_v19, %v10702_v42  ;;  %v10515_v36 = vadd.f32 %v10514_v12, %v19620_v61  ;;  %v10708_v43 = vadd.f32 %v10707_v13, %v19624_v2 }
 0x534   : > { %11202 = vst [vmem:[%s19653_s10 + $0xe0] sm:$0xff] %v12990_v6  ;;  %11203 = vst [vmem:[%s19653_s10 + $0xe8] sm:$0xff] %v12991_v33  ;;  %v12992_v11 = vpack.c.bf16 %v10515_v36, %v10513_v10  ;;  %v12993_v44 = vpack.c.bf16 %v10708_v43, %v10706_v47 }
 0x536   : > { %11204 = vst [vmem:[%s19653_s10 + $0xf0] sm:$0xff] %v12992_v11  ;;  %11205 = vst [vmem:[%s19653_s10 + $0xf8] sm:$0xff] %v12993_v44 }
 0x549   : > { %v10518_v45 = vpop.f32.mrb[32].mxu0  ;;  %v10711_v17 = vpop.f32.mrb[32].mxu1 }
 0x54a   : > { %v10519_v62 = vadd.f32 %v10518_v45, %v19613_v48  ;;  %v10712_v21 = vadd.f32 %v10711_v17, %v19615_v20  ;;  %v10520_v8 = vpop.f32.mrb[33].mxu0  ;;  %v10713_v35 = vpop.f32.mrb[33].mxu1 }
 0x54b   : > { %v10521_v60 = vadd.f32 %v10520_v8, %v19620_v61  ;;  %v10714_v24 = vadd.f32 %v10713_v35, %v19624_v2  ;;  %v10522_v29 = vpop.f32.mrb[34].mxu0  ;;  %v10715_v26 = vpop.f32.mrb[34].mxu1 }
 0x54c   : > { %v10523_v16 = vadd.f32 %v10522_v29, %v19613_v48  ;;  %v10716_v32 = vadd.f32 %v10715_v26, %v19615_v20  ;;  %v10524_v49 = vpop.f32.mrb[35].mxu0  ;;  %v10717_v4 = vpop.f32.mrb[35].mxu1 }
 0x54d   : > { %v12994_v15 = vpack.c.bf16 %v10521_v60, %v10519_v62  ;;  %v12995_v56 = vpack.c.bf16 %v10714_v24, %v10712_v21  ;;  %v10525_v58 = vadd.f32 %v10524_v49, %v19620_v61  ;;  %v10718_v40 = vadd.f32 %v10717_v4, %v19624_v2 }
 0x54f   : > { %11206 = vst [vmem:[%s19653_s10 + $0x100] sm:$0xff] %v12994_v15  ;;  %11207 = vst [vmem:[%s19653_s10 + $0x108] sm:$0xff] %v12995_v56  ;;  %v12996_v51 = vpack.c.bf16 %v10525_v58, %v10523_v16  ;;  %v12997_v25 = vpack.c.bf16 %v10718_v40, %v10716_v32 }
 0x551   : > { %11208 = vst [vmem:[%s19653_s10 + $0x110] sm:$0xff] %v12996_v51  ;;  %11209 = vst [vmem:[%s19653_s10 + $0x118] sm:$0xff] %v12997_v25 }
 0x552   : > { %v10528_v7 = vpop.f32.mrb[36].mxu0  ;;  %v10721_v9 = vpop.f32.mrb[36].mxu1 }
 0x553   : > { %v10529_v39 = vadd.f32 %v10528_v7, %v19613_v48  ;;  %v10722_v37 = vadd.f32 %v10721_v9, %v19615_v20  ;;  %v10530_v28 = vpop.f32.mrb[37].mxu0  ;;  %v10723_v5 = vpop.f32.mrb[37].mxu1 }
 0x554   : > { %v10531_v22 = vadd.f32 %v10530_v28, %v19620_v61  ;;  %v10724_v52 = vadd.f32 %v10723_v5, %v19624_v2  ;;  %v10532_v38 = vpop.f32.mrb[38].mxu0  ;;  %v10725_v0 = vpop.f32.mrb[38].mxu1 }
 0x555   : > { %v10533_v31 = vadd.f32 %v10532_v38, %v19613_v48  ;;  %v10726_v27 = vadd.f32 %v10725_v0, %v19615_v20  ;;  %v10534_v50 = vpop.f32.mrb[39].mxu0  ;;  %v10727_v54 = vpop.f32.mrb[39].mxu1 }
 0x556   : > { %v12998_v63 = vpack.c.bf16 %v10531_v22, %v10529_v39  ;;  %v12999_v3 = vpack.c.bf16 %v10724_v52, %v10722_v37  ;;  %v10535_v18 = vadd.f32 %v10534_v50, %v19620_v61  ;;  %v10728_v57 = vadd.f32 %v10727_v54, %v19624_v2 }
 0x558   : > { %11210 = vst [vmem:[%s19653_s10 + $0x120] sm:$0xff] %v12998_v63  ;;  %11211 = vst [vmem:[%s19653_s10 + $0x128] sm:$0xff] %v12999_v3  ;;  %v13000_v46 = vpack.c.bf16 %v10535_v18, %v10533_v31  ;;  %v13001_v34 = vpack.c.bf16 %v10728_v57, %v10726_v27 }
 0x55a   : > { %11212 = vst [vmem:[%s19653_s10 + $0x130] sm:$0xff] %v13000_v46  ;;  %11213 = vst [vmem:[%s19653_s10 + $0x138] sm:$0xff] %v13001_v34 }
 0x55d   : > { %v10538_v14 = vpop.f32.mrb[40].mxu0  ;;  %v10731_v41 = vpop.f32.mrb[40].mxu1 }
 0x55e   : > { %v10539_v53 = vadd.f32 %v10538_v14, %v19613_v48  ;;  %v10732_v42 = vadd.f32 %v10731_v41, %v19615_v20  ;;  %v10540_v59 = vpop.f32.mrb[41].mxu0  ;;  %v10733_v55 = vpop.f32.mrb[41].mxu1 }
 0x55f   : > { %v10541_v23 = vadd.f32 %v10540_v59, %v19620_v61  ;;  %v10734_v19 = vadd.f32 %v10733_v55, %v19624_v2  ;;  %v10542_v30 = vpop.f32.mrb[42].mxu0  ;;  %v10735_v1 = vpop.f32.mrb[42].mxu1 }
 0x560   : > { %v10543_v10 = vadd.f32 %v10542_v30, %v19613_v48  ;;  %v10736_v47 = vadd.f32 %v10735_v1, %v19615_v20  ;;  %v10544_v12 = vpop.f32.mrb[43].mxu0  ;;  %v10737_v13 = vpop.f32.mrb[43].mxu1 }
 0x561   : > { %v13002_v6 = vpack.c.bf16 %v10541_v23, %v10539_v53  ;;  %v13003_v33 = vpack.c.bf16 %v10734_v19, %v10732_v42  ;;  %v10545_v36 = vadd.f32 %v10544_v12, %v19620_v61  ;;  %v10738_v43 = vadd.f32 %v10737_v13, %v19624_v2 }
 0x563   : > { %11214 = vst [vmem:[%s19653_s10 + $0x140] sm:$0xff] %v13002_v6  ;;  %11215 = vst [vmem:[%s19653_s10 + $0x148] sm:$0xff] %v13003_v33  ;;  %v13004_v11 = vpack.c.bf16 %v10545_v36, %v10543_v10  ;;  %v13005_v44 = vpack.c.bf16 %v10738_v43, %v10736_v47 }
 0x565   : > { %11216 = vst [vmem:[%s19653_s10 + $0x150] sm:$0xff] %v13004_v11  ;;  %11217 = vst [vmem:[%s19653_s10 + $0x158] sm:$0xff] %v13005_v44 }
 0x566   : > { %v10548_v45 = vpop.f32.mrb[44].mxu0  ;;  %v10741_v17 = vpop.f32.mrb[44].mxu1 }
 0x567   : > { %v10549_v62 = vadd.f32 %v10548_v45, %v19613_v48  ;;  %v10742_v21 = vadd.f32 %v10741_v17, %v19615_v20  ;;  %v10550_v8 = vpop.f32.mrb[45].mxu0  ;;  %v10743_v35 = vpop.f32.mrb[45].mxu1 }
 0x568   : > { %v10551_v60 = vadd.f32 %v10550_v8, %v19620_v61  ;;  %v10744_v24 = vadd.f32 %v10743_v35, %v19624_v2  ;;  %v10552_v29 = vpop.f32.mrb[46].mxu0  ;;  %v10745_v26 = vpop.f32.mrb[46].mxu1 }
 0x569   : > { %v10553_v16 = vadd.f32 %v10552_v29, %v19613_v48  ;;  %v10746_v32 = vadd.f32 %v10745_v26, %v19615_v20  ;;  %v10554_v49 = vpop.f32.mrb[47].mxu0  ;;  %v10747_v4 = vpop.f32.mrb[47].mxu1 }
 0x56a   : > { %v13006_v15 = vpack.c.bf16 %v10551_v60, %v10549_v62  ;;  %v13007_v56 = vpack.c.bf16 %v10744_v24, %v10742_v21  ;;  %v10555_v58 = vadd.f32 %v10554_v49, %v19620_v61  ;;  %v10748_v40 = vadd.f32 %v10747_v4, %v19624_v2 }
 0x56c   : > { %11218 = vst [vmem:[%s19653_s10 + $0x160] sm:$0xff] %v13006_v15  ;;  %11219 = vst [vmem:[%s19653_s10 + $0x168] sm:$0xff] %v13007_v56  ;;  %v13008_v51 = vpack.c.bf16 %v10555_v58, %v10553_v16  ;;  %v13009_v25 = vpack.c.bf16 %v10748_v40, %v10746_v32 }
 0x56e   : > { %11220 = vst [vmem:[%s19653_s10 + $0x170] sm:$0xff] %v13008_v51  ;;  %11221 = vst [vmem:[%s19653_s10 + $0x178] sm:$0xff] %v13009_v25 }
 0x572   : > { %v10558_v7 = vpop.f32.mrb[48].mxu0  ;;  %v10751_v9 = vpop.f32.mrb[48].mxu1 }
 0x573   : > { %v10559_v39 = vadd.f32 %v10558_v7, %v19613_v48  ;;  %v10752_v37 = vadd.f32 %v10751_v9, %v19615_v20  ;;  %v10560_v28 = vpop.f32.mrb[49].mxu0  ;;  %v10753_v5 = vpop.f32.mrb[49].mxu1 }
 0x574   : > { %v10561_v22 = vadd.f32 %v10560_v28, %v19620_v61  ;;  %v10754_v52 = vadd.f32 %v10753_v5, %v19624_v2  ;;  %v10562_v38 = vpop.f32.mrb[50].mxu0  ;;  %v10755_v0 = vpop.f32.mrb[50].mxu1 }
 0x575   : > { %v10563_v31 = vadd.f32 %v10562_v38, %v19613_v48  ;;  %v10756_v27 = vadd.f32 %v10755_v0, %v19615_v20  ;;  %v10564_v50 = vpop.f32.mrb[51].mxu0  ;;  %v10757_v54 = vpop.f32.mrb[51].mxu1 }
 0x576   : > { %v13010_v63 = vpack.c.bf16 %v10561_v22, %v10559_v39  ;;  %v13011_v3 = vpack.c.bf16 %v10754_v52, %v10752_v37  ;;  %v10565_v18 = vadd.f32 %v10564_v50, %v19620_v61  ;;  %v10758_v57 = vadd.f32 %v10757_v54, %v19624_v2 }
 0x578   : > { %11222 = vst [vmem:[%s19653_s10 + $0x180] sm:$0xff] %v13010_v63  ;;  %11223 = vst [vmem:[%s19653_s10 + $0x188] sm:$0xff] %v13011_v3  ;;  %v13012_v46 = vpack.c.bf16 %v10565_v18, %v10563_v31  ;;  %v13013_v34 = vpack.c.bf16 %v10758_v57, %v10756_v27 }
 0x57a   : > { %11224 = vst [vmem:[%s19653_s10 + $0x190] sm:$0xff] %v13012_v46  ;;  %11225 = vst [vmem:[%s19653_s10 + $0x198] sm:$0xff] %v13013_v34 }
 0x57b   : > { %v10568_v14 = vpop.f32.mrb[52].mxu0  ;;  %v10761_v41 = vpop.f32.mrb[52].mxu1 }
 0x57c   : > { %v10569_v53 = vadd.f32 %v10568_v14, %v19613_v48  ;;  %v10762_v42 = vadd.f32 %v10761_v41, %v19615_v20  ;;  %v10570_v59 = vpop.f32.mrb[53].mxu0  ;;  %v10763_v55 = vpop.f32.mrb[53].mxu1 }
 0x57d   : > { %v10571_v23 = vadd.f32 %v10570_v59, %v19620_v61  ;;  %v10764_v19 = vadd.f32 %v10763_v55, %v19624_v2  ;;  %v10572_v30 = vpop.f32.mrb[54].mxu0  ;;  %v10765_v1 = vpop.f32.mrb[54].mxu1 }
 0x57e   : > { %v10573_v10 = vadd.f32 %v10572_v30, %v19613_v48  ;;  %v10766_v47 = vadd.f32 %v10765_v1, %v19615_v20  ;;  %v10574_v12 = vpop.f32.mrb[55].mxu0  ;;  %v10767_v13 = vpop.f32.mrb[55].mxu1 }
 0x57f   : > { %v13014_v6 = vpack.c.bf16 %v10571_v23, %v10569_v53  ;;  %v13015_v33 = vpack.c.bf16 %v10764_v19, %v10762_v42  ;;  %v10575_v36 = vadd.f32 %v10574_v12, %v19620_v61  ;;  %v10768_v43 = vadd.f32 %v10767_v13, %v19624_v2 }
 0x581   : > { %11226 = vst [vmem:[%s19653_s10 + $0x1a0] sm:$0xff] %v13014_v6  ;;  %11227 = vst [vmem:[%s19653_s10 + $0x1a8] sm:$0xff] %v13015_v33  ;;  %v13016_v11 = vpack.c.bf16 %v10575_v36, %v10573_v10  ;;  %v13017_v44 = vpack.c.bf16 %v10768_v43, %v10766_v47 }
 0x583   : > { %11228 = vst [vmem:[%s19653_s10 + $0x1b0] sm:$0xff] %v13016_v11  ;;  %11229 = vst [vmem:[%s19653_s10 + $0x1b8] sm:$0xff] %v13017_v44 }
 0x58e   : > { %v10578_v45 = vpop.f32.mrb[56].mxu0  ;;  %v10771_v17 = vpop.f32.mrb[56].mxu1 }
 0x58f   : > { %v10579_v62 = vadd.f32 %v10578_v45, %v19613_v48  ;;  %v10772_v21 = vadd.f32 %v10771_v17, %v19615_v20  ;;  %v10580_v8 = vpop.f32.mrb[57].mxu0  ;;  %v10773_v35 = vpop.f32.mrb[57].mxu1 }
 0x590   : > { %v10581_v60 = vadd.f32 %v10580_v8, %v19620_v61  ;;  %v10774_v24 = vadd.f32 %v10773_v35, %v19624_v2  ;;  %v10582_v29 = vpop.f32.mrb[58].mxu0  ;;  %v10775_v26 = vpop.f32.mrb[58].mxu1 }
 0x591   : > { %v10583_v16 = vadd.f32 %v10582_v29, %v19613_v48  ;;  %v10776_v32 = vadd.f32 %v10775_v26, %v19615_v20  ;;  %v10584_v49 = vpop.f32.mrb[59].mxu0  ;;  %v10777_v4 = vpop.f32.mrb[59].mxu1 }
 0x592   : > { %v13018_v15 = vpack.c.bf16 %v10581_v60, %v10579_v62  ;;  %v13019_v56 = vpack.c.bf16 %v10774_v24, %v10772_v21  ;;  %v10585_v58 = vadd.f32 %v10584_v49, %v19620_v61  ;;  %v10778_v40 = vadd.f32 %v10777_v4, %v19624_v2 }
 0x594   : > { %11230 = vst [vmem:[%s19653_s10 + $0x1c0] sm:$0xff] %v13018_v15  ;;  %11231 = vst [vmem:[%s19653_s10 + $0x1c8] sm:$0xff] %v13019_v56  ;;  %v13020_v51 = vpack.c.bf16 %v10585_v58, %v10583_v16  ;;  %v13021_v25 = vpack.c.bf16 %v10778_v40, %v10776_v32 }
 0x596   : > { %11232 = vst [vmem:[%s19653_s10 + $0x1d0] sm:$0xff] %v13020_v51  ;;  %11233 = vst [vmem:[%s19653_s10 + $0x1d8] sm:$0xff] %v13021_v25 }
 0x5b6   : > { %v10588_v7 = vpop.f32.mrb[60].mxu0  ;;  %v10781_v9 = vpop.f32.mrb[60].mxu1 }
 0x5b7   : > { %v10589_v39 = vadd.f32 %v10588_v7, %v19613_v48  ;;  %v10782_v37 = vadd.f32 %v10781_v9, %v19615_v20  ;;  %v10590_v28 = vpop.f32.mrb[61].mxu0  ;;  %v10783_v5 = vpop.f32.mrb[61].mxu1 }
 0x5b8   : > { %v10591_v22 = vadd.f32 %v10590_v28, %v19620_v61  ;;  %v10784_v52 = vadd.f32 %v10783_v5, %v19624_v2  ;;  %v10592_v38 = vpop.f32.mrb[62].mxu0  ;;  %v10785_v0 = vpop.f32.mrb[62].mxu1 }
 0x5b9   : > { %v10593_v31 = vadd.f32 %v10592_v38, %v19613_v48  ;;  %v10786_v27 = vadd.f32 %v10785_v0, %v19615_v20  ;;  %v10594_v50 = vpop.f32.mrb[63].mxu0  ;;  %v10787_v54 = vpop.f32.mrb[63].mxu1 }
 0x5ba   : > { %v13022_v63 = vpack.c.bf16 %v10591_v22, %v10589_v39  ;;  %v13023_v3 = vpack.c.bf16 %v10784_v52, %v10782_v37  ;;  %v10595_v18 = vadd.f32 %v10594_v50, %v19620_v61  ;;  %v10788_v57 = vadd.f32 %v10787_v54, %v19624_v2 }
 0x5bc   : > { %11234 = vst [vmem:[%s19653_s10 + $0x1e0] sm:$0xff] %v13022_v63  ;;  %11235 = vst [vmem:[%s19653_s10 + $0x1e8] sm:$0xff] %v13023_v3  ;;  %v13024_v48 = vpack.c.bf16 %v10595_v18, %v10593_v31  ;;  %v13025_v20 = vpack.c.bf16 %v10788_v57, %v10786_v27 }
 0x5be   : > { %11236 = vst [vmem:[%s19653_s10 + $0x1f0] sm:$0xff] %v13024_v48  ;;  %11237 = vst [vmem:[%s19653_s10 + $0x1f8] sm:$0xff] %v13025_v20 }
 0x5bf   : > { %13393 = shalt.err (!%p13390_p5)
}
 0x5c0   : > { %s13394_s8 = scalar_lea.hbm %s20119_s15, 8192  ;;  %s13398_s4 = scalar_lea.hbm %s20178_s3, 16384 }
 0x5c1   : > { %p13395_p6 = scmp.ne.s32.totalorder %s20119_s15, %s13394_s8  ;;  %p13399_p10 = scmp.lt.u32.totalorder %s20119_s15, %s20178_s3 }
 0x5c2   : > { %p13400_p11 = scmp.lt.u32.totalorder %s13398_s4, %s13394_s8  ;;  %p13402_p13 = scmp.lt.u32.totalorder %s13394_s8, %s20119_s15 }
 0x5c3   : > { %p13396_p7 = pnand %p13395_p6, %p13540_p4 }
 0x5c4   : > { %p13401_p12 = por %p13400_p11, %p13399_p10 }
 0x5c5   : > { %p13397_p9 = pneg %p13396_p7 }
 0x5c6   : > { %p13403_p0 = por %p13402_p13, %p13401_p12 }
 0x5c8   : > { %p13404_p1 = pnand %p13403_p0, %p13397_p9 }
 0x5ca   : > { %13407 = shalt.err (!%p13404_p1)
}
 0x5cb   : > { %s13478_s7 = smov 256   ;;  %s13479_s10 = smov 16  }
 0x5cc   : > { %13028 = dma.vmem_to_hbm [thread:$0]  (%p13540_p4), %s20121_s11, 8192, %s20119_s15, %s20129_s21, %s13478_s7, %s13478_s7, %s13479_s10  }
 0x5cd PF: > { %p13034_p2 = scmp.ge.s32.totalorder %s13458_s17, 2  ;;  %s11270_s30 = sand.u32 1, %s13438_s12  }
 0x5ce   : > { %s11271_s18 = scalar_lea.sflag [#allocation3], %s11270_s30 }
 0x5cf   : > { %p13031_p3 = pnand %p13034_p2, %p13547_p8 }
 0x5d1   : > { %13433 = dma.done.wait (!%p13031_p3), %s11271_s18, 8192  }
 0x5d2   : > { %13435 = vsyncadd (!%p13031_p3), %s11271_s18, 4294959104  ;;  %s16_s17 = sadd.s32 1, %s13458_s17   ;;  %s20662_s12 = smov %s13442_s13 }
 0x5d3   : > { %p13_p5 = scmp.ge.s32.totalorder %s16_s17, 4   ;;  %s20663_s13 = smov %s13446_s14 }
 0x5d4   : > { %s20664_s14 = smov %s13553_s25  ;;  %s20665_s15 = smov %s13454_s16 }
 0x5d5   : > { %s20666_s16 = smov %s20668_s20  ;;  %15 = sbr.rel (!%p13_p5) target bundleno = 4 (0x4), region = 76 }
 0x5dc   :  { %11276 = vsyncpa [#allocation3], 1 }
 0x5dd   :  { %11278 = vsyncpa [#allocation3 + $0x1], 1 }

</bundles_post_ra>
